<compile_context>
chip_gen: v5e
topology: v5e:2x2
jax: 0.10.0
libtpu: 0.0.40
codegen_flags: <defaults>
</compile_context>

<pallas_src>
import functools

import jax
import jax.numpy as jnp
from jax import lax
from jax.experimental import pallas as pl
from jax.experimental.pallas import tpu as pltpu


# ----------------------------------------------------------------------------
# Kernel
# ----------------------------------------------------------------------------
def _lstm_kernel(num_layers, hidden_pad, chunk_len, unroll, compute_dtype, *refs):
    """refs = [pregates0 (Tc, Bt, 4Hp) compute_dtype,
               w_hh0     (Hp, 4Hp)     compute_dtype,
               w_ih_1..w_ih_{L-1} (Hp, 4Hp) compute_dtype,
               w_hh_1..w_hh_{L-1} (Hp, 4Hp) compute_dtype,
               b_1..b_{L-1}       (1, 4Hp)  f32,
               out_ref   (Bt, Hp) f32,
               h_scr     (L, Bt, Hp) f32  (VMEM scratch),
               c_scr     (L, Bt, Hp) f32  (VMEM scratch)]"""
    L, Hp, Tc = num_layers, hidden_pad, chunk_len
    n_extra = L - 1
    pg0_ref = refs[0]
    whh0_ref = refs[1]
    wih_refs = refs[2:2 + n_extra]
    whh_refs = refs[2 + n_extra:2 + 2 * n_extra]
    b_refs = refs[2 + 2 * n_extra:2 + 3 * n_extra]
    out_ref = refs[2 + 3 * n_extra]
    h_scr = refs[3 + 3 * n_extra]
    c_scr = refs[4 + 3 * n_extra]

    tc = pl.program_id(1)

    # h/c live in VMEM scratch (persist across time chunks, no vreg spills).
    @pl.when(tc == 0)
    def _init():
        h_scr[...] = jnp.zeros_like(h_scr)
        c_scr[...] = jnp.zeros_like(c_scr)

    # Hoisted out of the time loop: bias loads (tiny, f32).
    b_consts = [r[...] for r in b_refs]

    def gate_update(gates, c_prev):
        # Hp is a multiple of 128, so every slice below is lane aligned.
        i_g = jax.nn.sigmoid(gates[:, 0 * Hp:1 * Hp])
        f_g = jax.nn.sigmoid(gates[:, 1 * Hp:2 * Hp])
        g_g = jnp.tanh(gates[:, 2 * Hp:3 * Hp])
        o_g = jax.nn.sigmoid(gates[:, 3 * Hp:4 * Hp])
        c_new = f_g * c_prev + i_g * g_g
        h_new = o_g * jnp.tanh(c_new)
        return h_new, c_new

    def step(t, carry):
        # Layer 0: input projection (x @ W_ih0 + b0) is pre-computed outside
        # the kernel; only h_prev @ W_hh0 stays on the serial critical path.
        gates0 = jnp.dot(h_scr[0].astype(compute_dtype), whh0_ref[...],
                         preferred_element_type=jnp.float32)
        gates0 = gates0 + pg0_ref[t].astype(jnp.float32)
        h_new, c_new = gate_update(gates0, c_scr[0])
        h_scr[0] = h_new
        c_scr[0] = c_new
        inp = h_new.astype(compute_dtype)

        # Layers >= 1: two accumulated dots (no concat / extra VMEM copy).
        for l in range(1, L):
            gates = (jnp.dot(inp, wih_refs[l - 1][...],
                             preferred_element_type=jnp.float32)
                     + jnp.dot(h_scr[l].astype(compute_dtype),
                               whh_refs[l - 1][...],
                               preferred_element_type=jnp.float32)
                     + b_consts[l - 1])
            h_new, c_new = gate_update(gates, c_scr[l])
            h_scr[l] = h_new
            c_scr[l] = c_new
            inp = h_new.astype(compute_dtype)
        return carry

    lax.fori_loop(0, Tc, step, 0, unroll=unroll)

    # Lane-dense (Bt, Hp) last hidden state of the top layer, written once.
    @pl.when(tc == pl.num_programs(1) - 1)
    def _finalize():
        out_ref[...] = h_scr[L - 1]


# ----------------------------------------------------------------------------
# Helpers
# ----------------------------------------------------------------------------
def _round_up(x, m):
    return (x + m - 1) // m * m


def _pad_gate_cols(w, H, Hp):
    """Pad the trailing 4*H axis to 4*Hp, per-gate ([i,f,g,o] blocks)."""
    lead = w.shape[:-1]
    w = w.reshape(lead + (4, H))
    pad = [(0, 0)] * len(lead) + [(0, 0), (0, Hp - H)]
    return jnp.pad(w, pad).reshape(lead + (4 * Hp,))


def _tpu_defaults():
    """(vmem_capacity_bytes, mxu_rows) with safe fallbacks."""
    vmem_cap = 128 * 2 ** 20
    mxu_rows = 256          # v6e / v7x: 256-row MXU
    try:
        vmem_cap = int(pltpu.get_tpu_info().vmem_capacity_bytes)
    except Exception:
        pass
    try:
        kind = jax.devices()[0].device_kind.lower()
        if any(v in kind for v in ("v2", "v3", "v4", "v5")):
            mxu_rows = 128  # 128-row MXU parts
    except Exception:
        pass
    return vmem_cap, mxu_rows


def _largest_divisor_leq(n, cap):
    d = max(1, min(n, cap))
    while n % d != 0:
        d -= 1
    return d


# ----------------------------------------------------------------------------
# Wrapper
# ----------------------------------------------------------------------------
def lstm_model_forward(x, params, compute_dtype=jnp.bfloat16):
    """x: (B, T, D_in) float32 (batch_first, like the PyTorch module).

    compute_dtype controls the dtype of the recurrent matmul operands and of
    the stored pre-gates tensor; accumulation and all element-wise gate math
    stay in f32.  compute_dtype=float32 gives the exact PyTorch-semantics path.
    """
    w_ih_list, w_hh_list, b_list, w_fc, b_fc = params
    B, T, D_in = x.shape
    L = len(w_ih_list)
    H = w_hh_list[0].shape[0]
    n_extra = L - 1

    LANE = 128
    vmem_cap, mxu_rows = _tpu_defaults()

    Hp = _round_up(H, LANE)                       # lane-aligned gate slices

    # ---- batch tile: fill the MXU M dimension (128 / 256 rows) --------------
    B_TILE = min(_round_up(B, 8), mxu_rows)
    if _round_up(B, B_TILE) == B_TILE and B_TILE >= 128:
        # Only one grid point with a big tile: halve it so both v7x TCs
        # (parallel axis) get work.  For tiny batches keep single-TC.
        B_TILE = _round_up(B_TILE // 2, 8)
    Bp = _round_up(B, B_TILE)

    store_dtype = compute_dtype                   # pre-gates storage dtype
    itemsz = jnp.dtype(store_dtype).itemsize

    # ---- time chunk: bounded VMEM, auto double-buffered DMA along T ---------
    bytes_per_step = B_TILE * 4 * Hp * itemsz
    tc_target = max(1, min(T, (4 * 2 ** 20) // max(1, bytes_per_step)))
    tc_target = max(tc_target, min(T, 8))
    Tc = _largest_divisor_leq(T, tc_target)
    n_tc = T // Tc

    # ---- hoisted layer-0 input projection: one big, well-shaped matmul ------
    # TODO(synk): on bandwidth-limited v5e with D_in << 4Hp, computing
    # x_chunk @ W_ih0 inside the kernel would avoid the pre-gates HBM round-trip.
    x_tb = jnp.transpose(x, (1, 0, 2))                    # (T, B, D_in) time-major
    x_tb = jnp.pad(x_tb, ((0, 0), (0, Bp - B), (0, 0)))   # (T, Bp, D_in)
    w_ih0_p = _pad_gate_cols(w_ih_list[0], H, Hp)         # (D_in, 4Hp)
    b0_p = _pad_gate_cols(b_list[0], H, Hp)               # (1, 4Hp)
    pregates0 = (jnp.einsum("tbd,dg->tbg", x_tb, w_ih0_p) + b0_p
                 ).astype(store_dtype)                    # (T, Bp, 4Hp)

    # ---- recurrent weights: lane-padded, pre-split W_ih / W_hh per layer ----
    whh0_p = _pad_gate_cols(
        jnp.pad(w_hh_list[0], ((0, Hp - H), (0, 0))), H, Hp
    ).astype(compute_dtype)                               # (Hp, 4Hp)

    wih_p, whh_p, b_p = [], [], []
    for l in range(1, L):
        wih_p.append(_pad_gate_cols(
            jnp.pad(w_ih_list[l], ((0, Hp - H), (0, 0))), H, Hp
        ).astype(compute_dtype))
        whh_p.append(_pad_gate_cols(
            jnp.pad(w_hh_list[l], ((0, Hp - H), (0, 0))), H, Hp
        ).astype(compute_dtype))
        b_p.append(_pad_gate_cols(b_list[l], H, Hp).astype(jnp.float32))

    operands = [pregates0, whh0_p] + wih_p + whh_p + b_p

    in_specs = [
        pl.BlockSpec((Tc, B_TILE, 4 * Hp), lambda b, t: (t, b, 0)),   # pre-gates
        pl.BlockSpec((Hp, 4 * Hp), lambda b, t: (0, 0)),              # w_hh layer 0
    ]
    in_specs += [pl.BlockSpec((Hp, 4 * Hp), lambda b, t: (0, 0))
                 for _ in range(2 * n_extra)]                         # w_ih/w_hh l>=1
    in_specs += [pl.BlockSpec((1, 4 * Hp), lambda b, t: (0, 0))
                 for _ in range(n_extra)]                             # biases l>=1

    # ---- VMEM budget: clamp to ~0.75x this generation's capacity ------------
    wbytes = jnp.dtype(compute_dtype).itemsize
    resident = (2 * Tc * B_TILE * 4 * Hp * itemsz            # pre-gates (dbl buf)
                + 2 * (1 + 2 * n_extra) * Hp * 4 * Hp * wbytes
                + 2 * n_extra * 4 * Hp * 4
                + 2 * B_TILE * Hp * 4                        # output
                + 2 * L * B_TILE * Hp * 4)                   # h/c scratch
    vmem_limit = int(min(int(0.75 * vmem_cap),
                         max(32 * 2 ** 20, 2 * resident + 8 * 2 ** 20)))

    flops = 2 * T * Bp * 4 * Hp * (Hp + n_extra * 2 * Hp)
    bytes_accessed = (sum(int(a.size) * a.dtype.itemsize for a in operands)
                      + Bp * Hp * 4)
    cost = pl.CostEstimate(flops=int(flops),
                           transcendentals=int(5 * T * L * Bp * Hp),
                           bytes_accessed=int(bytes_accessed))

    # Partial unroll for long chunks (wavefront overlap), full for short ones.
    if Tc <= 8:
        unroll = Tc
    elif Tc % 4 == 0:
        unroll = 4
    elif Tc % 2 == 0:
        unroll = 2
    else:
        unroll = 1

    kernel = functools.partial(_lstm_kernel, L, Hp, Tc, unroll, compute_dtype)

    h_last = pl.pallas_call(
        kernel,
        out_shape=jax.ShapeDtypeStruct((Bp, Hp), jnp.float32),
        grid_spec=pltpu.PrefetchScalarGridSpec(
            num_scalar_prefetch=0,
            grid=(Bp // B_TILE, n_tc),         # (parallel batch tiles, time chunks)
            in_specs=in_specs,
            out_specs=pl.BlockSpec((B_TILE, Hp), lambda b, t: (b, 0)),
            scratch_shapes=[pltpu.VMEM((L, B_TILE, Hp), jnp.float32),   # h
                            pltpu.VMEM((L, B_TILE, Hp), jnp.float32)],  # c
        ),
        compiler_params=pltpu.CompilerParams(
            dimension_semantics=("parallel", "arbitrary"),
            vmem_limit_bytes=vmem_limit,
        ),
        cost_estimate=cost,
    )(*operands)

    # Final Linear (H -> O, O=1) in plain XLA: kernel output stays lane-dense.
    return h_last[:B, :H] @ w_fc + b_fc


# ----------------------------------------------------------------------------
# Pure-JAX reference (mirrors the kernel's operand-dtype choices)
# ----------------------------------------------------------------------------
def ref_forward(x, params, compute_dtype=jnp.float32):
    """compute_dtype=float32 reproduces exact PyTorch nn.LSTM + nn.Linear math;
    compute_dtype=bfloat16 mimics the kernel's operand / pre-gates quantization."""
    w_ih_list, w_hh_list, b_list, w_fc, b_fc = params
    B, T, _ = x.shape
    L = len(w_ih_list)
    H = w_hh_list[0].shape[0]
    cd = compute_dtype
    h = [jnp.zeros((B, H), jnp.float32) for _ in range(L)]
    c = [jnp.zeros((B, H), jnp.float32) for _ in range(L)]
    for t in range(T):
        inp = x[:, t, :]
        # hoisted layer-0 projection, stored in cd (bf16 path) like the kernel
        pg0 = (inp @ w_ih_list[0] + b_list[0]).astype(cd).astype(jnp.float32)
        for l in range(L):
            if l == 0:
                gates = pg0 + jnp.dot(h[0].astype(cd), w_hh_list[0].astype(cd),
                                      preferred_element_type=jnp.float32)
            else:
                gates = (jnp.dot(inp.astype(cd), w_ih_list[l].astype(cd),
                                 preferred_element_type=jnp.float32)
                         + jnp.dot(h[l].astype(cd), w_hh_list[l].astype(cd),
                                   preferred_element_type=jnp.float32)
                         + b_list[l])
            i_g = jax.nn.sigmoid(gates[:, 0 * H:1 * H])
            f_g = jax.nn.sigmoid(gates[:, 1 * H:2 * H])
            g_g = jnp.tanh(gates[:, 2 * H:3 * H])
            o_g = jax.nn.sigmoid(gates[:, 3 * H:4 * H])
            c[l] = f_g * c[l] + i_g * g_g
            h[l] = o_g * jnp.tanh(c[l])
            inp = h[l]
    return h[L - 1] @ w_fc + b_fc


def make_params(key, input_size, hidden_size, num_layers, output_size):
    """Deterministic uniform(-1/sqrt(H), 1/sqrt(H)) init, like PyTorch defaults.
    Weights are stored pre-transposed: (in_features, 4H) and (H, out)."""
    H = hidden_size
    bound = 1.0 / jnp.sqrt(jnp.float32(H))
    w_ih_list, w_hh_list, b_list = [], [], []
    for l in range(num_layers):
        d_in = input_size if l == 0 else H
        key, k1, k2, k3, k4 = jax.random.split(key, 5)
        w_ih_list.append(jax.random.uniform(k1, (d_in, 4 * H), jnp.float32,
                                            -bound, bound))
        w_hh_list.append(jax.random.uniform(k2, (H, 4 * H), jnp.float32,
                                            -bound, bound))
        b_ih = jax.random.uniform(k3, (1, 4 * H), jnp.float32, -bound, bound)
        b_hh = jax.random.uniform(k4, (1, 4 * H), jnp.float32, -bound, bound)
        b_list.append(b_ih + b_hh)
    key, k5, k6 = jax.random.split(key, 3)
    w_fc = jax.random.uniform(k5, (H, output_size), jnp.float32, -bound, bound)
    b_fc = jax.random.uniform(k6, (1, output_size), jnp.float32, -bound, bound)
    return (w_ih_list, w_hh_list, b_list, w_fc, b_fc)


if __name__ == "__main__":
    B, T, D_IN, H, L, O = 2, 8, 4, 32, 2, 1

    key = jax.random.PRNGKey(0)
    kx, kp = jax.random.split(key)
    x = jax.random.normal(kx, (B, T, D_IN), jnp.float32)
    params = make_params(kp, D_IN, H, L, O)

    # 1) f32 MXU operands: must match exact PyTorch-semantics reference.
    out_f32 = jax.block_until_ready(
        lstm_model_forward(x, params, compute_dtype=jnp.float32))
    ref_f32 = ref_forward(x, params, compute_dtype=jnp.float32)
    assert out_f32.shape == (B, O)
    assert jnp.allclose(out_f32, ref_f32, atol=1e-4, rtol=1e-4), (out_f32, ref_f32)

    # 2) bf16 MXU operands + bf16-stored pre-gates (recommended on v6e/v7x):
    #    compare against a reference applying the same quantization.  Slightly
    #    looser tolerance than the f32 path because kernel and reference round
    #    the pre-gates to bf16 independently.
    out_bf16 = jax.block_until_ready(
        lstm_model_forward(x, params, compute_dtype=jnp.bfloat16))
    ref_bf16 = ref_forward(x, params, compute_dtype=jnp.bfloat16)
    assert jnp.allclose(out_bf16, ref_bf16, atol=3e-3, rtol=3e-3), (out_bf16, ref_bf16)

    print("KERNEL_OK")
</pallas_src>

<mosaic_0001>
module attributes {stable_mosaic.version = 11 : i64} {
  func.func @_lstm_kernel(%arg0: i32, %arg1: i32, %arg2: memref<8x8x512xf32, #tpu.memory_space<vmem>>, %arg3: memref<128x512xf32, #tpu.memory_space<vmem>>, %arg4: memref<128x512xf32, #tpu.memory_space<vmem>>, %arg5: memref<128x512xf32, #tpu.memory_space<vmem>>, %arg6: memref<1x512xf32, #tpu.memory_space<vmem>>, %arg7: memref<8x128xf32, #tpu.memory_space<vmem>>, %arg8: memref<2x8x128xf32, #tpu.memory_space<vmem>>, %arg9: memref<2x8x128xf32, #tpu.memory_space<vmem>>) attributes {dimension_semantics = [#tpu.dimension_semantics<parallel>, #tpu.dimension_semantics<arbitrary>], iteration_bounds = array<i64: 1, 1>, scalar_prefetch = 0 : i64, scratch_operands = 2 : i64, tpu.core_type = #tpu.core_type<tc>, window_params = [{transform_indices = @transform_0, window_bounds = array<i64: 8, 8, 512>}, {pipeline_mode = #tpu.pipeline_mode<synchronous>, transform_indices = @transform_1, window_bounds = array<i64: 128, 512>}, {pipeline_mode = #tpu.pipeline_mode<synchronous>, transform_indices = @transform_2, window_bounds = array<i64: 128, 512>}, {pipeline_mode = #tpu.pipeline_mode<synchronous>, transform_indices = @transform_3, window_bounds = array<i64: 128, 512>}, {pipeline_mode = #tpu.pipeline_mode<synchronous>, transform_indices = @transform_4, window_bounds = array<i64: 1, 512>}, {transform_indices = @transform_5, window_bounds = array<i64: 8, 128>}]} {
    %c0_i32 = arith.constant 0 : i32
    %0 = arith.cmpi eq, %arg1, %c0_i32 : i32
    %1 = arith.extui %0 : i1 to i32
    %c0_i32_0 = arith.constant 0 : i32
    %2 = arith.cmpi ne, %1, %c0_i32_0 : i32
    scf.if %2 {
      %cst_331 = arith.constant 0.000000e+00 : f32
      %671 = vector.broadcast %cst_331 : f32 to vector<2x8x128xf32>
      %c0_332 = arith.constant 0 : index
      %c0_333 = arith.constant 0 : index
      %c0_334 = arith.constant 0 : index
      %672 = vector.load %arg8[%c0_332, %c0_333, %c0_334] : memref<2x8x128xf32, #tpu.memory_space<vmem>>, vector<2x8x128xf32>
      tpu.vector_store %arg8[%c0_332, %c0_333, %c0_334], %671 {strides = array<i32>} : memref<2x8x128xf32, #tpu.memory_space<vmem>>, vector<2x8x128xf32>,
      %cst_335 = arith.constant 0.000000e+00 : f32
      %673 = vector.broadcast %cst_335 : f32 to vector<2x8x128xf32>
      %c0_336 = arith.constant 0 : index
      %c0_337 = arith.constant 0 : index
      %c0_338 = arith.constant 0 : index
      %674 = vector.load %arg9[%c0_336, %c0_337, %c0_338] : memref<2x8x128xf32, #tpu.memory_space<vmem>>, vector<2x8x128xf32>
      tpu.vector_store %arg9[%c0_336, %c0_337, %c0_338], %673 {strides = array<i32>} : memref<2x8x128xf32, #tpu.memory_space<vmem>>, vector<2x8x128xf32>,
    } else {
    }
    %c0 = arith.constant 0 : index
    %c0_1 = arith.constant 0 : index
    %3 = vector.load %arg6[%c0, %c0_1] : memref<1x512xf32, #tpu.memory_space<vmem>>, vector<1x512xf32>
    %c0_i32_2 = arith.constant 0 : i32
    %c0_3 = arith.constant 0 : index
    %c0_4 = arith.constant 0 : index
    %c0_5 = arith.constant 0 : index
    %4 = vector.load %arg8[%c0_3, %c0_4, %c0_5] : memref<2x8x128xf32, #tpu.memory_space<vmem>>, vector<1x8x128xf32>
    %5 = vector.shape_cast %4 : vector<1x8x128xf32> to vector<8x128xf32>
    %c0_6 = arith.constant 0 : index
    %c0_7 = arith.constant 0 : index
    %6 = vector.load %arg3[%c0_6, %c0_7] : memref<128x512xf32, #tpu.memory_space<vmem>>, vector<128x512xf32>
    %cst = arith.constant dense<0.000000e+00> : vector<8x512xf32>
    %7 = tpu.matmul %5, %6, %cst {dimension_numbers = #tpu.dot_dimension_numbers<[1], [0], [0], [1], [0, 0, 1, 1], [], []>} : vector<8x128xf32>, vector<128x512xf32>, vector<8x512xf32> -> vector<8x512xf32>
    %8 = arith.index_cast %c0_i32_2 : i32 to index
    %c0_8 = arith.constant 0 : index
    %c0_9 = arith.constant 0 : index
    %9 = vector.load %arg2[%8, %c0_8, %c0_9] : memref<8x8x512xf32, #tpu.memory_space<vmem>>, vector<1x8x512xf32>
    %10 = vector.shape_cast %9 : vector<1x8x512xf32> to vector<8x512xf32>
    %11 = arith.addf %7, %10 : vector<8x512xf32>
    %c0_10 = arith.constant 0 : index
    %c0_11 = arith.constant 0 : index
    %c0_12 = arith.constant 0 : index
    %12 = vector.load %arg9[%c0_10, %c0_11, %c0_12] : memref<2x8x128xf32, #tpu.memory_space<vmem>>, vector<1x8x128xf32>
    %13 = vector.shape_cast %12 : vector<1x8x128xf32> to vector<8x128xf32>
    %14 = vector.extract_strided_slice %11 {offsets = [0, 0], sizes = [8, 128], strides = [1, 1]} : vector<8x512xf32> to vector<8x128xf32>
    %15 = arith.negf %14 : vector<8x128xf32>
    %16 = math.exp %15 : vector<8x128xf32>
    %cst_13 = arith.constant 1.000000e+00 : f32
    %17 = vector.broadcast %cst_13 : f32 to vector<8x128xf32>
    %18 = arith.addf %17, %16 : vector<8x128xf32>
    %19 = arith.divf %17, %18 : vector<8x128xf32>
    %20 = vector.extract_strided_slice %11 {offsets = [0, 128], sizes = [8, 128], strides = [1, 1]} : vector<8x512xf32> to vector<8x128xf32>
    %21 = arith.negf %20 : vector<8x128xf32>
    %22 = math.exp %21 : vector<8x128xf32>
    %cst_14 = arith.constant 1.000000e+00 : f32
    %23 = vector.broadcast %cst_14 : f32 to vector<8x128xf32>
    %24 = arith.addf %23, %22 : vector<8x128xf32>
    %25 = arith.divf %23, %24 : vector<8x128xf32>
    %26 = vector.extract_strided_slice %11 {offsets = [0, 256], sizes = [8, 128], strides = [1, 1]} : vector<8x512xf32> to vector<8x128xf32>
    %27 = math.tanh %26 : vector<8x128xf32>
    %28 = vector.extract_strided_slice %11 {offsets = [0, 384], sizes = [8, 128], strides = [1, 1]} : vector<8x512xf32> to vector<8x128xf32>
    %29 = arith.negf %28 : vector<8x128xf32>
    %30 = math.exp %29 : vector<8x128xf32>
    %cst_15 = arith.constant 1.000000e+00 : f32
    %31 = vector.broadcast %cst_15 : f32 to vector<8x128xf32>
    %32 = arith.addf %31, %30 : vector<8x128xf32>
    %33 = arith.divf %31, %32 : vector<8x128xf32>
    %34 = arith.mulf %25, %13 : vector<8x128xf32>
    %35 = arith.mulf %19, %27 : vector<8x128xf32>
    %36 = arith.addf %34, %35 : vector<8x128xf32>
    %37 = math.tanh %36 : vector<8x128xf32>
    %38 = arith.mulf %33, %37 : vector<8x128xf32>
    %c0_16 = arith.constant 0 : index
    %c0_17 = arith.constant 0 : index
    %c0_18 = arith.constant 0 : index
    %39 = vector.load %arg8[%c0_16, %c0_17, %c0_18] : memref<2x8x128xf32, #tpu.memory_space<vmem>>, vector<1x8x128xf32>
    %40 = vector.shape_cast %39 : vector<1x8x128xf32> to vector<8x128xf32>
    %41 = vector.shape_cast %38 : vector<8x128xf32> to vector<1x8x128xf32>
    tpu.vector_store %arg8[%c0_16, %c0_17, %c0_18], %41 {strides = array<i32>} : memref<2x8x128xf32, #tpu.memory_space<vmem>>, vector<1x8x128xf32>,
    %c0_19 = arith.constant 0 : index
    %c0_20 = arith.constant 0 : index
    %c0_21 = arith.constant 0 : index
    %42 = vector.load %arg9[%c0_19, %c0_20, %c0_21] : memref<2x8x128xf32, #tpu.memory_space<vmem>>, vector<1x8x128xf32>
    %43 = vector.shape_cast %42 : vector<1x8x128xf32> to vector<8x128xf32>
    %44 = vector.shape_cast %36 : vector<8x128xf32> to vector<1x8x128xf32>
    tpu.vector_store %arg9[%c0_19, %c0_20, %c0_21], %44 {strides = array<i32>} : memref<2x8x128xf32, #tpu.memory_space<vmem>>, vector<1x8x128xf32>,
    %c0_22 = arith.constant 0 : index
    %c0_23 = arith.constant 0 : index
    %45 = vector.load %arg4[%c0_22, %c0_23] : memref<128x512xf32, #tpu.memory_space<vmem>>, vector<128x512xf32>
    %cst_24 = arith.constant dense<0.000000e+00> : vector<8x512xf32>
    %46 = tpu.matmul %38, %45, %cst_24 {dimension_numbers = #tpu.dot_dimension_numbers<[1], [0], [0], [1], [0, 0, 1, 1], [], []>} : vector<8x128xf32>, vector<128x512xf32>, vector<8x512xf32> -> vector<8x512xf32>
    %c1 = arith.constant 1 : index
    %c0_25 = arith.constant 0 : index
    %c0_26 = arith.constant 0 : index
    %47 = vector.load %arg8[%c1, %c0_25, %c0_26] : memref<2x8x128xf32, #tpu.memory_space<vmem>>, vector<1x8x128xf32>
    %48 = vector.shape_cast %47 : vector<1x8x128xf32> to vector<8x128xf32>
    %c0_27 = arith.constant 0 : index
    %c0_28 = arith.constant 0 : index
    %49 = vector.load %arg5[%c0_27, %c0_28] : memref<128x512xf32, #tpu.memory_space<vmem>>, vector<128x512xf32>
    %cst_29 = arith.constant dense<0.000000e+00> : vector<8x512xf32>
    %50 = tpu.matmul %48, %49, %cst_29 {dimension_numbers = #tpu.dot_dimension_numbers<[1], [0], [0], [1], [0, 0, 1, 1], [], []>} : vector<8x128xf32>, vector<128x512xf32>, vector<8x512xf32> -> vector<8x512xf32>
    %51 = arith.addf %46, %50 : vector<8x512xf32>
    %52 = vector.broadcast %3 : vector<1x512xf32> to vector<8x512xf32>
    %53 = arith.addf %51, %52 : vector<8x512xf32>
    %c1_30 = arith.constant 1 : index
    %c0_31 = arith.constant 0 : index
    %c0_32 = arith.constant 0 : index
    %54 = vector.load %arg9[%c1_30, %c0_31, %c0_32] : memref<2x8x128xf32, #tpu.memory_space<vmem>>, vector<1x8x128xf32>
    %55 = vector.shape_cast %54 : vector<1x8x128xf32> to vector<8x128xf32>
    %56 = vector.extract_strided_slice %53 {offsets = [0, 0], sizes = [8, 128], strides = [1, 1]} : vector<8x512xf32> to vector<8x128xf32>
    %57 = arith.negf %56 : vector<8x128xf32>
    %58 = math.exp %57 : vector<8x128xf32>
    %cst_33 = arith.constant 1.000000e+00 : f32
    %59 = vector.broadcast %cst_33 : f32 to vector<8x128xf32>
    %60 = arith.addf %59, %58 : vector<8x128xf32>
    %61 = arith.divf %59, %60 : vector<8x128xf32>
    %62 = vector.extract_strided_slice %53 {offsets = [0, 128], sizes = [8, 128], strides = [1, 1]} : vector<8x512xf32> to vector<8x128xf32>
    %63 = arith.negf %62 : vector<8x128xf32>
    %64 = math.exp %63 : vector<8x128xf32>
    %cst_34 = arith.constant 1.000000e+00 : f32
    %65 = vector.broadcast %cst_34 : f32 to vector<8x128xf32>
    %66 = arith.addf %65, %64 : vector<8x128xf32>
    %67 = arith.divf %65, %66 : vector<8x128xf32>
    %68 = vector.extract_strided_slice %53 {offsets = [0, 256], sizes = [8, 128], strides = [1, 1]} : vector<8x512xf32> to vector<8x128xf32>
    %69 = math.tanh %68 : vector<8x128xf32>
    %70 = vector.extract_strided_slice %53 {offsets = [0, 384], sizes = [8, 128], strides = [1, 1]} : vector<8x512xf32> to vector<8x128xf32>
    %71 = arith.negf %70 : vector<8x128xf32>
    %72 = math.exp %71 : vector<8x128xf32>
    %cst_35 = arith.constant 1.000000e+00 : f32
    %73 = vector.broadcast %cst_35 : f32 to vector<8x128xf32>
    %74 = arith.addf %73, %72 : vector<8x128xf32>
    %75 = arith.divf %73, %74 : vector<8x128xf32>
    %76 = arith.mulf %67, %55 : vector<8x128xf32>
    %77 = arith.mulf %61, %69 : vector<8x128xf32>
    %78 = arith.addf %76, %77 : vector<8x128xf32>
    %79 = math.tanh %78 : vector<8x128xf32>
    %80 = arith.mulf %75, %79 : vector<8x128xf32>
    %c1_36 = arith.constant 1 : index
    %c0_37 = arith.constant 0 : index
    %c0_38 = arith.constant 0 : index
    %81 = vector.load %arg8[%c1_36, %c0_37, %c0_38] : memref<2x8x128xf32, #tpu.memory_space<vmem>>, vector<1x8x128xf32>
    %82 = vector.shape_cast %81 : vector<1x8x128xf32> to vector<8x128xf32>
    %83 = vector.shape_cast %80 : vector<8x128xf32> to vector<1x8x128xf32>
    tpu.vector_store %arg8[%c1_36, %c0_37, %c0_38], %83 {strides = array<i32>} : memref<2x8x128xf32, #tpu.memory_space<vmem>>, vector<1x8x128xf32>,
    %c1_39 = arith.constant 1 : index
    %c0_40 = arith.constant 0 : index
    %c0_41 = arith.constant 0 : index
    %84 = vector.load %arg9[%c1_39, %c0_40, %c0_41] : memref<2x8x128xf32, #tpu.memory_space<vmem>>, vector<1x8x128xf32>
    %85 = vector.shape_cast %84 : vector<1x8x128xf32> to vector<8x128xf32>
    %86 = vector.shape_cast %78 : vector<8x128xf32> to vector<1x8x128xf32>
    tpu.vector_store %arg9[%c1_39, %c0_40, %c0_41], %86 {strides = array<i32>} : memref<2x8x128xf32, #tpu.memory_space<vmem>>, vector<1x8x128xf32>,
    %c1_i32 = arith.constant 1 : i32
    %c0_42 = arith.constant 0 : index
    %c0_43 = arith.constant 0 : index
    %c0_44 = arith.constant 0 : index
    %87 = vector.load %arg8[%c0_42, %c0_43, %c0_44] : memref<2x8x128xf32, #tpu.memory_space<vmem>>, vector<1x8x128xf32>
    %88 = vector.shape_cast %87 : vector<1x8x128xf32> to vector<8x128xf32>
    %c0_45 = arith.constant 0 : index
    %c0_46 = arith.constant 0 : index
    %89 = vector.load %arg3[%c0_45, %c0_46] : memref<128x512xf32, #tpu.memory_space<vmem>>, vector<128x512xf32>
    %cst_47 = arith.constant dense<0.000000e+00> : vector<8x512xf32>
    %90 = tpu.matmul %88, %89, %cst_47 {dimension_numbers = #tpu.dot_dimension_numbers<[1], [0], [0], [1], [0, 0, 1, 1], [], []>} : vector<8x128xf32>, vector<128x512xf32>, vector<8x512xf32> -> vector<8x512xf32>
    %91 = arith.index_cast %c1_i32 : i32 to index
    %c0_48 = arith.constant 0 : index
    %c0_49 = arith.constant 0 : index
    %92 = vector.load %arg2[%91, %c0_48, %c0_49] : memref<8x8x512xf32, #tpu.memory_space<vmem>>, vector<1x8x512xf32>
    %93 = vector.shape_cast %92 : vector<1x8x512xf32> to vector<8x512xf32>
    %94 = arith.addf %90, %93 : vector<8x512xf32>
    %c0_50 = arith.constant 0 : index
    %c0_51 = arith.constant 0 : index
    %c0_52 = arith.constant 0 : index
    %95 = vector.load %arg9[%c0_50, %c0_51, %c0_52] : memref<2x8x128xf32, #tpu.memory_space<vmem>>, vector<1x8x128xf32>
    %96 = vector.shape_cast %95 : vector<1x8x128xf32> to vector<8x128xf32>
    %97 = vector.extract_strided_slice %94 {offsets = [0, 0], sizes = [8, 128], strides = [1, 1]} : vector<8x512xf32> to vector<8x128xf32>
    %98 = arith.negf %97 : vector<8x128xf32>
    %99 = math.exp %98 : vector<8x128xf32>
    %cst_53 = arith.constant 1.000000e+00 : f32
    %100 = vector.broadcast %cst_53 : f32 to vector<8x128xf32>
    %101 = arith.addf %100, %99 : vector<8x128xf32>
    %102 = arith.divf %100, %101 : vector<8x128xf32>
    %103 = vector.extract_strided_slice %94 {offsets = [0, 128], sizes = [8, 128], strides = [1, 1]} : vector<8x512xf32> to vector<8x128xf32>
    %104 = arith.negf %103 : vector<8x128xf32>
    %105 = math.exp %104 : vector<8x128xf32>
    %cst_54 = arith.constant 1.000000e+00 : f32
    %106 = vector.broadcast %cst_54 : f32 to vector<8x128xf32>
    %107 = arith.addf %106, %105 : vector<8x128xf32>
    %108 = arith.divf %106, %107 : vector<8x128xf32>
    %109 = vector.extract_strided_slice %94 {offsets = [0, 256], sizes = [8, 128], strides = [1, 1]} : vector<8x512xf32> to vector<8x128xf32>
    %110 = math.tanh %109 : vector<8x128xf32>
    %111 = vector.extract_strided_slice %94 {offsets = [0, 384], sizes = [8, 128], strides = [1, 1]} : vector<8x512xf32> to vector<8x128xf32>
    %112 = arith.negf %111 : vector<8x128xf32>
    %113 = math.exp %112 : vector<8x128xf32>
    %cst_55 = arith.constant 1.000000e+00 : f32
    %114 = vector.broadcast %cst_55 : f32 to vector<8x128xf32>
    %115 = arith.addf %114, %113 : vector<8x128xf32>
    %116 = arith.divf %114, %115 : vector<8x128xf32>
    %117 = arith.mulf %108, %96 : vector<8x128xf32>
    %118 = arith.mulf %102, %110 : vector<8x128xf32>
    %119 = arith.addf %117, %118 : vector<8x128xf32>
    %120 = math.tanh %119 : vector<8x128xf32>
    %121 = arith.mulf %116, %120 : vector<8x128xf32>
    %c0_56 = arith.constant 0 : index
    %c0_57 = arith.constant 0 : index
    %c0_58 = arith.constant 0 : index
    %122 = vector.load %arg8[%c0_56, %c0_57, %c0_58] : memref<2x8x128xf32, #tpu.memory_space<vmem>>, vector<1x8x128xf32>
    %123 = vector.shape_cast %122 : vector<1x8x128xf32> to vector<8x128xf32>
    %124 = vector.shape_cast %121 : vector<8x128xf32> to vector<1x8x128xf32>
    tpu.vector_store %arg8[%c0_56, %c0_57, %c0_58], %124 {strides = array<i32>} : memref<2x8x128xf32, #tpu.memory_space<vmem>>, vector<1x8x128xf32>,
    %c0_59 = arith.constant 0 : index
    %c0_60 = arith.constant 0 : index
    %c0_61 = arith.constant 0 : index
    %125 = vector.load %arg9[%c0_59, %c0_60, %c0_61] : memref<2x8x128xf32, #tpu.memory_space<vmem>>, vector<1x8x128xf32>
    %126 = vector.shape_cast %125 : vector<1x8x128xf32> to vector<8x128xf32>
    %127 = vector.shape_cast %119 : vector<8x128xf32> to vector<1x8x128xf32>
    tpu.vector_store %arg9[%c0_59, %c0_60, %c0_61], %127 {strides = array<i32>} : memref<2x8x128xf32, #tpu.memory_space<vmem>>, vector<1x8x128xf32>,
    %c0_62 = arith.constant 0 : index
    %c0_63 = arith.constant 0 : index
    %128 = vector.load %arg4[%c0_62, %c0_63] : memref<128x512xf32, #tpu.memory_space<vmem>>, vector<128x512xf32>
    %cst_64 = arith.constant dense<0.000000e+00> : vector<8x512xf32>
    %129 = tpu.matmul %121, %128, %cst_64 {dimension_numbers = #tpu.dot_dimension_numbers<[1], [0], [0], [1], [0, 0, 1, 1], [], []>} : vector<8x128xf32>, vector<128x512xf32>, vector<8x512xf32> -> vector<8x512xf32>
    %c1_65 = arith.constant 1 : index
    %c0_66 = arith.constant 0 : index
    %c0_67 = arith.constant 0 : index
    %130 = vector.load %arg8[%c1_65, %c0_66, %c0_67] : memref<2x8x128xf32, #tpu.memory_space<vmem>>, vector<1x8x128xf32>
    %131 = vector.shape_cast %130 : vector<1x8x128xf32> to vector<8x128xf32>
    %c0_68 = arith.constant 0 : index
    %c0_69 = arith.constant 0 : index
    %132 = vector.load %arg5[%c0_68, %c0_69] : memref<128x512xf32, #tpu.memory_space<vmem>>, vector<128x512xf32>
    %cst_70 = arith.constant dense<0.000000e+00> : vector<8x512xf32>
    %133 = tpu.matmul %131, %132, %cst_70 {dimension_numbers = #tpu.dot_dimension_numbers<[1], [0], [0], [1], [0, 0, 1, 1], [], []>} : vector<8x128xf32>, vector<128x512xf32>, vector<8x512xf32> -> vector<8x512xf32>
    %134 = arith.addf %129, %133 : vector<8x512xf32>
    %135 = vector.broadcast %3 : vector<1x512xf32> to vector<8x512xf32>
    %136 = arith.addf %134, %135 : vector<8x512xf32>
    %c1_71 = arith.constant 1 : index
    %c0_72 = arith.constant 0 : index
    %c0_73 = arith.constant 0 : index
    %137 = vector.load %arg9[%c1_71, %c0_72, %c0_73] : memref<2x8x128xf32, #tpu.memory_space<vmem>>, vector<1x8x128xf32>
    %138 = vector.shape_cast %137 : vector<1x8x128xf32> to vector<8x128xf32>
    %139 = vector.extract_strided_slice %136 {offsets = [0, 0], sizes = [8, 128], strides = [1, 1]} : vector<8x512xf32> to vector<8x128xf32>
    %140 = arith.negf %139 : vector<8x128xf32>
    %141 = math.exp %140 : vector<8x128xf32>
    %cst_74 = arith.constant 1.000000e+00 : f32
    %142 = vector.broadcast %cst_74 : f32 to vector<8x128xf32>
    %143 = arith.addf %142, %141 : vector<8x128xf32>
    %144 = arith.divf %142, %143 : vector<8x128xf32>
    %145 = vector.extract_strided_slice %136 {offsets = [0, 128], sizes = [8, 128], strides = [1, 1]} : vector<8x512xf32> to vector<8x128xf32>
    %146 = arith.negf %145 : vector<8x128xf32>
    %147 = math.exp %146 : vector<8x128xf32>
    %cst_75 = arith.constant 1.000000e+00 : f32
    %148 = vector.broadcast %cst_75 : f32 to vector<8x128xf32>
    %149 = arith.addf %148, %147 : vector<8x128xf32>
    %150 = arith.divf %148, %149 : vector<8x128xf32>
    %151 = vector.extract_strided_slice %136 {offsets = [0, 256], sizes = [8, 128], strides = [1, 1]} : vector<8x512xf32> to vector<8x128xf32>
    %152 = math.tanh %151 : vector<8x128xf32>
    %153 = vector.extract_strided_slice %136 {offsets = [0, 384], sizes = [8, 128], strides = [1, 1]} : vector<8x512xf32> to vector<8x128xf32>
    %154 = arith.negf %153 : vector<8x128xf32>
    %155 = math.exp %154 : vector<8x128xf32>
    %cst_76 = arith.constant 1.000000e+00 : f32
    %156 = vector.broadcast %cst_76 : f32 to vector<8x128xf32>
    %157 = arith.addf %156, %155 : vector<8x128xf32>
    %158 = arith.divf %156, %157 : vector<8x128xf32>
    %159 = arith.mulf %150, %138 : vector<8x128xf32>
    %160 = arith.mulf %144, %152 : vector<8x128xf32>
    %161 = arith.addf %159, %160 : vector<8x128xf32>
    %162 = math.tanh %161 : vector<8x128xf32>
    %163 = arith.mulf %158, %162 : vector<8x128xf32>
    %c1_77 = arith.constant 1 : index
    %c0_78 = arith.constant 0 : index
    %c0_79 = arith.constant 0 : index
    %164 = vector.load %arg8[%c1_77, %c0_78, %c0_79] : memref<2x8x128xf32, #tpu.memory_space<vmem>>, vector<1x8x128xf32>
    %165 = vector.shape_cast %164 : vector<1x8x128xf32> to vector<8x128xf32>
    %166 = vector.shape_cast %163 : vector<8x128xf32> to vector<1x8x128xf32>
    tpu.vector_store %arg8[%c1_77, %c0_78, %c0_79], %166 {strides = array<i32>} : memref<2x8x128xf32, #tpu.memory_space<vmem>>, vector<1x8x128xf32>,
    %c1_80 = arith.constant 1 : index
    %c0_81 = arith.constant 0 : index
    %c0_82 = arith.constant 0 : index
    %167 = vector.load %arg9[%c1_80, %c0_81, %c0_82] : memref<2x8x128xf32, #tpu.memory_space<vmem>>, vector<1x8x128xf32>
    %168 = vector.shape_cast %167 : vector<1x8x128xf32> to vector<8x128xf32>
    %169 = vector.shape_cast %161 : vector<8x128xf32> to vector<1x8x128xf32>
    tpu.vector_store %arg9[%c1_80, %c0_81, %c0_82], %169 {strides = array<i32>} : memref<2x8x128xf32, #tpu.memory_space<vmem>>, vector<1x8x128xf32>,
    %c2_i32 = arith.constant 2 : i32
    %c0_83 = arith.constant 0 : index
    %c0_84 = arith.constant 0 : index
    %c0_85 = arith.constant 0 : index
    %170 = vector.load %arg8[%c0_83, %c0_84, %c0_85] : memref<2x8x128xf32, #tpu.memory_space<vmem>>, vector<1x8x128xf32>
    %171 = vector.shape_cast %170 : vector<1x8x128xf32> to vector<8x128xf32>
    %c0_86 = arith.constant 0 : index
    %c0_87 = arith.constant 0 : index
    %172 = vector.load %arg3[%c0_86, %c0_87] : memref<128x512xf32, #tpu.memory_space<vmem>>, vector<128x512xf32>
    %cst_88 = arith.constant dense<0.000000e+00> : vector<8x512xf32>
    %173 = tpu.matmul %171, %172, %cst_88 {dimension_numbers = #tpu.dot_dimension_numbers<[1], [0], [0], [1], [0, 0, 1, 1], [], []>} : vector<8x128xf32>, vector<128x512xf32>, vector<8x512xf32> -> vector<8x512xf32>
    %174 = arith.index_cast %c2_i32 : i32 to index
    %c0_89 = arith.constant 0 : index
    %c0_90 = arith.constant 0 : index
    %175 = vector.load %arg2[%174, %c0_89, %c0_90] : memref<8x8x512xf32, #tpu.memory_space<vmem>>, vector<1x8x512xf32>
    %176 = vector.shape_cast %175 : vector<1x8x512xf32> to vector<8x512xf32>
    %177 = arith.addf %173, %176 : vector<8x512xf32>
    %c0_91 = arith.constant 0 : index
    %c0_92 = arith.constant 0 : index
    %c0_93 = arith.constant 0 : index
    %178 = vector.load %arg9[%c0_91, %c0_92, %c0_93] : memref<2x8x128xf32, #tpu.memory_space<vmem>>, vector<1x8x128xf32>
    %179 = vector.shape_cast %178 : vector<1x8x128xf32> to vector<8x128xf32>
    %180 = vector.extract_strided_slice %177 {offsets = [0, 0], sizes = [8, 128], strides = [1, 1]} : vector<8x512xf32> to vector<8x128xf32>
    %181 = arith.negf %180 : vector<8x128xf32>
    %182 = math.exp %181 : vector<8x128xf32>
    %cst_94 = arith.constant 1.000000e+00 : f32
    %183 = vector.broadcast %cst_94 : f32 to vector<8x128xf32>
    %184 = arith.addf %183, %182 : vector<8x128xf32>
    %185 = arith.divf %183, %184 : vector<8x128xf32>
    %186 = vector.extract_strided_slice %177 {offsets = [0, 128], sizes = [8, 128], strides = [1, 1]} : vector<8x512xf32> to vector<8x128xf32>
    %187 = arith.negf %186 : vector<8x128xf32>
    %188 = math.exp %187 : vector<8x128xf32>
    %cst_95 = arith.constant 1.000000e+00 : f32
    %189 = vector.broadcast %cst_95 : f32 to vector<8x128xf32>
    %190 = arith.addf %189, %188 : vector<8x128xf32>
    %191 = arith.divf %189, %190 : vector<8x128xf32>
    %192 = vector.extract_strided_slice %177 {offsets = [0, 256], sizes = [8, 128], strides = [1, 1]} : vector<8x512xf32> to vector<8x128xf32>
    %193 = math.tanh %192 : vector<8x128xf32>
    %194 = vector.extract_strided_slice %177 {offsets = [0, 384], sizes = [8, 128], strides = [1, 1]} : vector<8x512xf32> to vector<8x128xf32>
    %195 = arith.negf %194 : vector<8x128xf32>
    %196 = math.exp %195 : vector<8x128xf32>
    %cst_96 = arith.constant 1.000000e+00 : f32
    %197 = vector.broadcast %cst_96 : f32 to vector<8x128xf32>
    %198 = arith.addf %197, %196 : vector<8x128xf32>
    %199 = arith.divf %197, %198 : vector<8x128xf32>
    %200 = arith.mulf %191, %179 : vector<8x128xf32>
    %201 = arith.mulf %185, %193 : vector<8x128xf32>
    %202 = arith.addf %200, %201 : vector<8x128xf32>
    %203 = math.tanh %202 : vector<8x128xf32>
    %204 = arith.mulf %199, %203 : vector<8x128xf32>
    %c0_97 = arith.constant 0 : index
    %c0_98 = arith.constant 0 : index
    %c0_99 = arith.constant 0 : index
    %205 = vector.load %arg8[%c0_97, %c0_98, %c0_99] : memref<2x8x128xf32, #tpu.memory_space<vmem>>, vector<1x8x128xf32>
    %206 = vector.shape_cast %205 : vector<1x8x128xf32> to vector<8x128xf32>
    %207 = vector.shape_cast %204 : vector<8x128xf32> to vector<1x8x128xf32>
    tpu.vector_store %arg8[%c0_97, %c0_98, %c0_99], %207 {strides = array<i32>} : memref<2x8x128xf32, #tpu.memory_space<vmem>>, vector<1x8x128xf32>,
    %c0_100 = arith.constant 0 : index
    %c0_101 = arith.constant 0 : index
    %c0_102 = arith.constant 0 : index
    %208 = vector.load %arg9[%c0_100, %c0_101, %c0_102] : memref<2x8x128xf32, #tpu.memory_space<vmem>>, vector<1x8x128xf32>
    %209 = vector.shape_cast %208 : vector<1x8x128xf32> to vector<8x128xf32>
    %210 = vector.shape_cast %202 : vector<8x128xf32> to vector<1x8x128xf32>
    tpu.vector_store %arg9[%c0_100, %c0_101, %c0_102], %210 {strides = array<i32>} : memref<2x8x128xf32, #tpu.memory_space<vmem>>, vector<1x8x128xf32>,
    %c0_103 = arith.constant 0 : index
    %c0_104 = arith.constant 0 : index
    %211 = vector.load %arg4[%c0_103, %c0_104] : memref<128x512xf32, #tpu.memory_space<vmem>>, vector<128x512xf32>
    %cst_105 = arith.constant dense<0.000000e+00> : vector<8x512xf32>
    %212 = tpu.matmul %204, %211, %cst_105 {dimension_numbers = #tpu.dot_dimension_numbers<[1], [0], [0], [1], [0, 0, 1, 1], [], []>} : vector<8x128xf32>, vector<128x512xf32>, vector<8x512xf32> -> vector<8x512xf32>
    %c1_106 = arith.constant 1 : index
    %c0_107 = arith.constant 0 : index
    %c0_108 = arith.constant 0 : index
    %213 = vector.load %arg8[%c1_106, %c0_107, %c0_108] : memref<2x8x128xf32, #tpu.memory_space<vmem>>, vector<1x8x128xf32>
    %214 = vector.shape_cast %213 : vector<1x8x128xf32> to vector<8x128xf32>
    %c0_109 = arith.constant 0 : index
    %c0_110 = arith.constant 0 : index
    %215 = vector.load %arg5[%c0_109, %c0_110] : memref<128x512xf32, #tpu.memory_space<vmem>>, vector<128x512xf32>
    %cst_111 = arith.constant dense<0.000000e+00> : vector<8x512xf32>
    %216 = tpu.matmul %214, %215, %cst_111 {dimension_numbers = #tpu.dot_dimension_numbers<[1], [0], [0], [1], [0, 0, 1, 1], [], []>} : vector<8x128xf32>, vector<128x512xf32>, vector<8x512xf32> -> vector<8x512xf32>
    %217 = arith.addf %212, %216 : vector<8x512xf32>
    %218 = vector.broadcast %3 : vector<1x512xf32> to vector<8x512xf32>
    %219 = arith.addf %217, %218 : vector<8x512xf32>
    %c1_112 = arith.constant 1 : index
    %c0_113 = arith.constant 0 : index
    %c0_114 = arith.constant 0 : index
    %220 = vector.load %arg9[%c1_112, %c0_113, %c0_114] : memref<2x8x128xf32, #tpu.memory_space<vmem>>, vector<1x8x128xf32>
    %221 = vector.shape_cast %220 : vector<1x8x128xf32> to vector<8x128xf32>
    %222 = vector.extract_strided_slice %219 {offsets = [0, 0], sizes = [8, 128], strides = [1, 1]} : vector<8x512xf32> to vector<8x128xf32>
    %223 = arith.negf %222 : vector<8x128xf32>
    %224 = math.exp %223 : vector<8x128xf32>
    %cst_115 = arith.constant 1.000000e+00 : f32
    %225 = vector.broadcast %cst_115 : f32 to vector<8x128xf32>
    %226 = arith.addf %225, %224 : vector<8x128xf32>
    %227 = arith.divf %225, %226 : vector<8x128xf32>
    %228 = vector.extract_strided_slice %219 {offsets = [0, 128], sizes = [8, 128], strides = [1, 1]} : vector<8x512xf32> to vector<8x128xf32>
    %229 = arith.negf %228 : vector<8x128xf32>
    %230 = math.exp %229 : vector<8x128xf32>
    %cst_116 = arith.constant 1.000000e+00 : f32
    %231 = vector.broadcast %cst_116 : f32 to vector<8x128xf32>
    %232 = arith.addf %231, %230 : vector<8x128xf32>
    %233 = arith.divf %231, %232 : vector<8x128xf32>
    %234 = vector.extract_strided_slice %219 {offsets = [0, 256], sizes = [8, 128], strides = [1, 1]} : vector<8x512xf32> to vector<8x128xf32>
    %235 = math.tanh %234 : vector<8x128xf32>
    %236 = vector.extract_strided_slice %219 {offsets = [0, 384], sizes = [8, 128], strides = [1, 1]} : vector<8x512xf32> to vector<8x128xf32>
    %237 = arith.negf %236 : vector<8x128xf32>
    %238 = math.exp %237 : vector<8x128xf32>
    %cst_117 = arith.constant 1.000000e+00 : f32
    %239 = vector.broadcast %cst_117 : f32 to vector<8x128xf32>
    %240 = arith.addf %239, %238 : vector<8x128xf32>
    %241 = arith.divf %239, %240 : vector<8x128xf32>
    %242 = arith.mulf %233, %221 : vector<8x128xf32>
    %243 = arith.mulf %227, %235 : vector<8x128xf32>
    %244 = arith.addf %242, %243 : vector<8x128xf32>
    %245 = math.tanh %244 : vector<8x128xf32>
    %246 = arith.mulf %241, %245 : vector<8x128xf32>
    %c1_118 = arith.constant 1 : index
    %c0_119 = arith.constant 0 : index
    %c0_120 = arith.constant 0 : index
    %247 = vector.load %arg8[%c1_118, %c0_119, %c0_120] : memref<2x8x128xf32, #tpu.memory_space<vmem>>, vector<1x8x128xf32>
    %248 = vector.shape_cast %247 : vector<1x8x128xf32> to vector<8x128xf32>
    %249 = vector.shape_cast %246 : vector<8x128xf32> to vector<1x8x128xf32>
    tpu.vector_store %arg8[%c1_118, %c0_119, %c0_120], %249 {strides = array<i32>} : memref<2x8x128xf32, #tpu.memory_space<vmem>>, vector<1x8x128xf32>,
    %c1_121 = arith.constant 1 : index
    %c0_122 = arith.constant 0 : index
    %c0_123 = arith.constant 0 : index
    %250 = vector.load %arg9[%c1_121, %c0_122, %c0_123] : memref<2x8x128xf32, #tpu.memory_space<vmem>>, vector<1x8x128xf32>
    %251 = vector.shape_cast %250 : vector<1x8x128xf32> to vector<8x128xf32>
    %252 = vector.shape_cast %244 : vector<8x128xf32> to vector<1x8x128xf32>
    tpu.vector_store %arg9[%c1_121, %c0_122, %c0_123], %252 {strides = array<i32>} : memref<2x8x128xf32, #tpu.memory_space<vmem>>, vector<1x8x128xf32>,
    %c3_i32 = arith.constant 3 : i32
    %c0_124 = arith.constant 0 : index
    %c0_125 = arith.constant 0 : index
    %c0_126 = arith.constant 0 : index
    %253 = vector.load %arg8[%c0_124, %c0_125, %c0_126] : memref<2x8x128xf32, #tpu.memory_space<vmem>>, vector<1x8x128xf32>
    %254 = vector.shape_cast %253 : vector<1x8x128xf32> to vector<8x128xf32>
    %c0_127 = arith.constant 0 : index
    %c0_128 = arith.constant 0 : index
    %255 = vector.load %arg3[%c0_127, %c0_128] : memref<128x512xf32, #tpu.memory_space<vmem>>, vector<128x512xf32>
    %cst_129 = arith.constant dense<0.000000e+00> : vector<8x512xf32>
    %256 = tpu.matmul %254, %255, %cst_129 {dimension_numbers = #tpu.dot_dimension_numbers<[1], [0], [0], [1], [0, 0, 1, 1], [], []>} : vector<8x128xf32>, vector<128x512xf32>, vector<8x512xf32> -> vector<8x512xf32>
    %257 = arith.index_cast %c3_i32 : i32 to index
    %c0_130 = arith.constant 0 : index
    %c0_131 = arith.constant 0 : index
    %258 = vector.load %arg2[%257, %c0_130, %c0_131] : memref<8x8x512xf32, #tpu.memory_space<vmem>>, vector<1x8x512xf32>
    %259 = vector.shape_cast %258 : vector<1x8x512xf32> to vector<8x512xf32>
    %260 = arith.addf %256, %259 : vector<8x512xf32>
    %c0_132 = arith.constant 0 : index
    %c0_133 = arith.constant 0 : index
    %c0_134 = arith.constant 0 : index
    %261 = vector.load %arg9[%c0_132, %c0_133, %c0_134] : memref<2x8x128xf32, #tpu.memory_space<vmem>>, vector<1x8x128xf32>
    %262 = vector.shape_cast %261 : vector<1x8x128xf32> to vector<8x128xf32>
    %263 = vector.extract_strided_slice %260 {offsets = [0, 0], sizes = [8, 128], strides = [1, 1]} : vector<8x512xf32> to vector<8x128xf32>
    %264 = arith.negf %263 : vector<8x128xf32>
    %265 = math.exp %264 : vector<8x128xf32>
    %cst_135 = arith.constant 1.000000e+00 : f32
    %266 = vector.broadcast %cst_135 : f32 to vector<8x128xf32>
    %267 = arith.addf %266, %265 : vector<8x128xf32>
    %268 = arith.divf %266, %267 : vector<8x128xf32>
    %269 = vector.extract_strided_slice %260 {offsets = [0, 128], sizes = [8, 128], strides = [1, 1]} : vector<8x512xf32> to vector<8x128xf32>
    %270 = arith.negf %269 : vector<8x128xf32>
    %271 = math.exp %270 : vector<8x128xf32>
    %cst_136 = arith.constant 1.000000e+00 : f32
    %272 = vector.broadcast %cst_136 : f32 to vector<8x128xf32>
    %273 = arith.addf %272, %271 : vector<8x128xf32>
    %274 = arith.divf %272, %273 : vector<8x128xf32>
    %275 = vector.extract_strided_slice %260 {offsets = [0, 256], sizes = [8, 128], strides = [1, 1]} : vector<8x512xf32> to vector<8x128xf32>
    %276 = math.tanh %275 : vector<8x128xf32>
    %277 = vector.extract_strided_slice %260 {offsets = [0, 384], sizes = [8, 128], strides = [1, 1]} : vector<8x512xf32> to vector<8x128xf32>
    %278 = arith.negf %277 : vector<8x128xf32>
    %279 = math.exp %278 : vector<8x128xf32>
    %cst_137 = arith.constant 1.000000e+00 : f32
    %280 = vector.broadcast %cst_137 : f32 to vector<8x128xf32>
    %281 = arith.addf %280, %279 : vector<8x128xf32>
    %282 = arith.divf %280, %281 : vector<8x128xf32>
    %283 = arith.mulf %274, %262 : vector<8x128xf32>
    %284 = arith.mulf %268, %276 : vector<8x128xf32>
    %285 = arith.addf %283, %284 : vector<8x128xf32>
    %286 = math.tanh %285 : vector<8x128xf32>
    %287 = arith.mulf %282, %286 : vector<8x128xf32>
    %c0_138 = arith.constant 0 : index
    %c0_139 = arith.constant 0 : index
    %c0_140 = arith.constant 0 : index
    %288 = vector.load %arg8[%c0_138, %c0_139, %c0_140] : memref<2x8x128xf32, #tpu.memory_space<vmem>>, vector<1x8x128xf32>
    %289 = vector.shape_cast %288 : vector<1x8x128xf32> to vector<8x128xf32>
    %290 = vector.shape_cast %287 : vector<8x128xf32> to vector<1x8x128xf32>
    tpu.vector_store %arg8[%c0_138, %c0_139, %c0_140], %290 {strides = array<i32>} : memref<2x8x128xf32, #tpu.memory_space<vmem>>, vector<1x8x128xf32>,
    %c0_141 = arith.constant 0 : index
    %c0_142 = arith.constant 0 : index
    %c0_143 = arith.constant 0 : index
    %291 = vector.load %arg9[%c0_141, %c0_142, %c0_143] : memref<2x8x128xf32, #tpu.memory_space<vmem>>, vector<1x8x128xf32>
    %292 = vector.shape_cast %291 : vector<1x8x128xf32> to vector<8x128xf32>
    %293 = vector.shape_cast %285 : vector<8x128xf32> to vector<1x8x128xf32>
    tpu.vector_store %arg9[%c0_141, %c0_142, %c0_143], %293 {strides = array<i32>} : memref<2x8x128xf32, #tpu.memory_space<vmem>>, vector<1x8x128xf32>,
    %c0_144 = arith.constant 0 : index
    %c0_145 = arith.constant 0 : index
    %294 = vector.load %arg4[%c0_144, %c0_145] : memref<128x512xf32, #tpu.memory_space<vmem>>, vector<128x512xf32>
    %cst_146 = arith.constant dense<0.000000e+00> : vector<8x512xf32>
    %295 = tpu.matmul %287, %294, %cst_146 {dimension_numbers = #tpu.dot_dimension_numbers<[1], [0], [0], [1], [0, 0, 1, 1], [], []>} : vector<8x128xf32>, vector<128x512xf32>, vector<8x512xf32> -> vector<8x512xf32>
    %c1_147 = arith.constant 1 : index
    %c0_148 = arith.constant 0 : index
    %c0_149 = arith.constant 0 : index
    %296 = vector.load %arg8[%c1_147, %c0_148, %c0_149] : memref<2x8x128xf32, #tpu.memory_space<vmem>>, vector<1x8x128xf32>
    %297 = vector.shape_cast %296 : vector<1x8x128xf32> to vector<8x128xf32>
    %c0_150 = arith.constant 0 : index
    %c0_151 = arith.constant 0 : index
    %298 = vector.load %arg5[%c0_150, %c0_151] : memref<128x512xf32, #tpu.memory_space<vmem>>, vector<128x512xf32>
    %cst_152 = arith.constant dense<0.000000e+00> : vector<8x512xf32>
    %299 = tpu.matmul %297, %298, %cst_152 {dimension_numbers = #tpu.dot_dimension_numbers<[1], [0], [0], [1], [0, 0, 1, 1], [], []>} : vector<8x128xf32>, vector<128x512xf32>, vector<8x512xf32> -> vector<8x512xf32>
    %300 = arith.addf %295, %299 : vector<8x512xf32>
    %301 = vector.broadcast %3 : vector<1x512xf32> to vector<8x512xf32>
    %302 = arith.addf %300, %301 : vector<8x512xf32>
    %c1_153 = arith.constant 1 : index
    %c0_154 = arith.constant 0 : index
    %c0_155 = arith.constant 0 : index
    %303 = vector.load %arg9[%c1_153, %c0_154, %c0_155] : memref<2x8x128xf32, #tpu.memory_space<vmem>>, vector<1x8x128xf32>
    %304 = vector.shape_cast %303 : vector<1x8x128xf32> to vector<8x128xf32>
    %305 = vector.extract_strided_slice %302 {offsets = [0, 0], sizes = [8, 128], strides = [1, 1]} : vector<8x512xf32> to vector<8x128xf32>
    %306 = arith.negf %305 : vector<8x128xf32>
    %307 = math.exp %306 : vector<8x128xf32>
    %cst_156 = arith.constant 1.000000e+00 : f32
    %308 = vector.broadcast %cst_156 : f32 to vector<8x128xf32>
    %309 = arith.addf %308, %307 : vector<8x128xf32>
    %310 = arith.divf %308, %309 : vector<8x128xf32>
    %311 = vector.extract_strided_slice %302 {offsets = [0, 128], sizes = [8, 128], strides = [1, 1]} : vector<8x512xf32> to vector<8x128xf32>
    %312 = arith.negf %311 : vector<8x128xf32>
    %313 = math.exp %312 : vector<8x128xf32>
    %cst_157 = arith.constant 1.000000e+00 : f32
    %314 = vector.broadcast %cst_157 : f32 to vector<8x128xf32>
    %315 = arith.addf %314, %313 : vector<8x128xf32>
    %316 = arith.divf %314, %315 : vector<8x128xf32>
    %317 = vector.extract_strided_slice %302 {offsets = [0, 256], sizes = [8, 128], strides = [1, 1]} : vector<8x512xf32> to vector<8x128xf32>
    %318 = math.tanh %317 : vector<8x128xf32>
    %319 = vector.extract_strided_slice %302 {offsets = [0, 384], sizes = [8, 128], strides = [1, 1]} : vector<8x512xf32> to vector<8x128xf32>
    %320 = arith.negf %319 : vector<8x128xf32>
    %321 = math.exp %320 : vector<8x128xf32>
    %cst_158 = arith.constant 1.000000e+00 : f32
    %322 = vector.broadcast %cst_158 : f32 to vector<8x128xf32>
    %323 = arith.addf %322, %321 : vector<8x128xf32>
    %324 = arith.divf %322, %323 : vector<8x128xf32>
    %325 = arith.mulf %316, %304 : vector<8x128xf32>
    %326 = arith.mulf %310, %318 : vector<8x128xf32>
    %327 = arith.addf %325, %326 : vector<8x128xf32>
    %328 = math.tanh %327 : vector<8x128xf32>
    %329 = arith.mulf %324, %328 : vector<8x128xf32>
    %c1_159 = arith.constant 1 : index
    %c0_160 = arith.constant 0 : index
    %c0_161 = arith.constant 0 : index
    %330 = vector.load %arg8[%c1_159, %c0_160, %c0_161] : memref<2x8x128xf32, #tpu.memory_space<vmem>>, vector<1x8x128xf32>
    %331 = vector.shape_cast %330 : vector<1x8x128xf32> to vector<8x128xf32>
    %332 = vector.shape_cast %329 : vector<8x128xf32> to vector<1x8x128xf32>
    tpu.vector_store %arg8[%c1_159, %c0_160, %c0_161], %332 {strides = array<i32>} : memref<2x8x128xf32, #tpu.memory_space<vmem>>, vector<1x8x128xf32>,
    %c1_162 = arith.constant 1 : index
    %c0_163 = arith.constant 0 : index
    %c0_164 = arith.constant 0 : index
    %333 = vector.load %arg9[%c1_162, %c0_163, %c0_164] : memref<2x8x128xf32, #tpu.memory_space<vmem>>, vector<1x8x128xf32>
    %334 = vector.shape_cast %333 : vector<1x8x128xf32> to vector<8x128xf32>
    %335 = vector.shape_cast %327 : vector<8x128xf32> to vector<1x8x128xf32>
    tpu.vector_store %arg9[%c1_162, %c0_163, %c0_164], %335 {strides = array<i32>} : memref<2x8x128xf32, #tpu.memory_space<vmem>>, vector<1x8x128xf32>,
    %c4_i32 = arith.constant 4 : i32
    %c0_165 = arith.constant 0 : index
    %c0_166 = arith.constant 0 : index
    %c0_167 = arith.constant 0 : index
    %336 = vector.load %arg8[%c0_165, %c0_166, %c0_167] : memref<2x8x128xf32, #tpu.memory_space<vmem>>, vector<1x8x128xf32>
    %337 = vector.shape_cast %336 : vector<1x8x128xf32> to vector<8x128xf32>
    %c0_168 = arith.constant 0 : index
    %c0_169 = arith.constant 0 : index
    %338 = vector.load %arg3[%c0_168, %c0_169] : memref<128x512xf32, #tpu.memory_space<vmem>>, vector<128x512xf32>
    %cst_170 = arith.constant dense<0.000000e+00> : vector<8x512xf32>
    %339 = tpu.matmul %337, %338, %cst_170 {dimension_numbers = #tpu.dot_dimension_numbers<[1], [0], [0], [1], [0, 0, 1, 1], [], []>} : vector<8x128xf32>, vector<128x512xf32>, vector<8x512xf32> -> vector<8x512xf32>
    %340 = arith.index_cast %c4_i32 : i32 to index
    %c0_171 = arith.constant 0 : index
    %c0_172 = arith.constant 0 : index
    %341 = vector.load %arg2[%340, %c0_171, %c0_172] : memref<8x8x512xf32, #tpu.memory_space<vmem>>, vector<1x8x512xf32>
    %342 = vector.shape_cast %341 : vector<1x8x512xf32> to vector<8x512xf32>
    %343 = arith.addf %339, %342 : vector<8x512xf32>
    %c0_173 = arith.constant 0 : index
    %c0_174 = arith.constant 0 : index
    %c0_175 = arith.constant 0 : index
    %344 = vector.load %arg9[%c0_173, %c0_174, %c0_175] : memref<2x8x128xf32, #tpu.memory_space<vmem>>, vector<1x8x128xf32>
    %345 = vector.shape_cast %344 : vector<1x8x128xf32> to vector<8x128xf32>
    %346 = vector.extract_strided_slice %343 {offsets = [0, 0], sizes = [8, 128], strides = [1, 1]} : vector<8x512xf32> to vector<8x128xf32>
    %347 = arith.negf %346 : vector<8x128xf32>
    %348 = math.exp %347 : vector<8x128xf32>
    %cst_176 = arith.constant 1.000000e+00 : f32
    %349 = vector.broadcast %cst_176 : f32 to vector<8x128xf32>
    %350 = arith.addf %349, %348 : vector<8x128xf32>
    %351 = arith.divf %349, %350 : vector<8x128xf32>
    %352 = vector.extract_strided_slice %343 {offsets = [0, 128], sizes = [8, 128], strides = [1, 1]} : vector<8x512xf32> to vector<8x128xf32>
    %353 = arith.negf %352 : vector<8x128xf32>
    %354 = math.exp %353 : vector<8x128xf32>
    %cst_177 = arith.constant 1.000000e+00 : f32
    %355 = vector.broadcast %cst_177 : f32 to vector<8x128xf32>
    %356 = arith.addf %355, %354 : vector<8x128xf32>
    %357 = arith.divf %355, %356 : vector<8x128xf32>
    %358 = vector.extract_strided_slice %343 {offsets = [0, 256], sizes = [8, 128], strides = [1, 1]} : vector<8x512xf32> to vector<8x128xf32>
    %359 = math.tanh %358 : vector<8x128xf32>
    %360 = vector.extract_strided_slice %343 {offsets = [0, 384], sizes = [8, 128], strides = [1, 1]} : vector<8x512xf32> to vector<8x128xf32>
    %361 = arith.negf %360 : vector<8x128xf32>
    %362 = math.exp %361 : vector<8x128xf32>
    %cst_178 = arith.constant 1.000000e+00 : f32
    %363 = vector.broadcast %cst_178 : f32 to vector<8x128xf32>
    %364 = arith.addf %363, %362 : vector<8x128xf32>
    %365 = arith.divf %363, %364 : vector<8x128xf32>
    %366 = arith.mulf %357, %345 : vector<8x128xf32>
    %367 = arith.mulf %351, %359 : vector<8x128xf32>
    %368 = arith.addf %366, %367 : vector<8x128xf32>
    %369 = math.tanh %368 : vector<8x128xf32>
    %370 = arith.mulf %365, %369 : vector<8x128xf32>
    %c0_179 = arith.constant 0 : index
    %c0_180 = arith.constant 0 : index
    %c0_181 = arith.constant 0 : index
    %371 = vector.load %arg8[%c0_179, %c0_180, %c0_181] : memref<2x8x128xf32, #tpu.memory_space<vmem>>, vector<1x8x128xf32>
    %372 = vector.shape_cast %371 : vector<1x8x128xf32> to vector<8x128xf32>
    %373 = vector.shape_cast %370 : vector<8x128xf32> to vector<1x8x128xf32>
    tpu.vector_store %arg8[%c0_179, %c0_180, %c0_181], %373 {strides = array<i32>} : memref<2x8x128xf32, #tpu.memory_space<vmem>>, vector<1x8x128xf32>,
    %c0_182 = arith.constant 0 : index
    %c0_183 = arith.constant 0 : index
    %c0_184 = arith.constant 0 : index
    %374 = vector.load %arg9[%c0_182, %c0_183, %c0_184] : memref<2x8x128xf32, #tpu.memory_space<vmem>>, vector<1x8x128xf32>
    %375 = vector.shape_cast %374 : vector<1x8x128xf32> to vector<8x128xf32>
    %376 = vector.shape_cast %368 : vector<8x128xf32> to vector<1x8x128xf32>
    tpu.vector_store %arg9[%c0_182, %c0_183, %c0_184], %376 {strides = array<i32>} : memref<2x8x128xf32, #tpu.memory_space<vmem>>, vector<1x8x128xf32>,
    %c0_185 = arith.constant 0 : index
    %c0_186 = arith.constant 0 : index
    %377 = vector.load %arg4[%c0_185, %c0_186] : memref<128x512xf32, #tpu.memory_space<vmem>>, vector<128x512xf32>
    %cst_187 = arith.constant dense<0.000000e+00> : vector<8x512xf32>
    %378 = tpu.matmul %370, %377, %cst_187 {dimension_numbers = #tpu.dot_dimension_numbers<[1], [0], [0], [1], [0, 0, 1, 1], [], []>} : vector<8x128xf32>, vector<128x512xf32>, vector<8x512xf32> -> vector<8x512xf32>
    %c1_188 = arith.constant 1 : index
    %c0_189 = arith.constant 0 : index
    %c0_190 = arith.constant 0 : index
    %379 = vector.load %arg8[%c1_188, %c0_189, %c0_190] : memref<2x8x128xf32, #tpu.memory_space<vmem>>, vector<1x8x128xf32>
    %380 = vector.shape_cast %379 : vector<1x8x128xf32> to vector<8x128xf32>
    %c0_191 = arith.constant 0 : index
    %c0_192 = arith.constant 0 : index
    %381 = vector.load %arg5[%c0_191, %c0_192] : memref<128x512xf32, #tpu.memory_space<vmem>>, vector<128x512xf32>
    %cst_193 = arith.constant dense<0.000000e+00> : vector<8x512xf32>
    %382 = tpu.matmul %380, %381, %cst_193 {dimension_numbers = #tpu.dot_dimension_numbers<[1], [0], [0], [1], [0, 0, 1, 1], [], []>} : vector<8x128xf32>, vector<128x512xf32>, vector<8x512xf32> -> vector<8x512xf32>
    %383 = arith.addf %378, %382 : vector<8x512xf32>
    %384 = vector.broadcast %3 : vector<1x512xf32> to vector<8x512xf32>
    %385 = arith.addf %383, %384 : vector<8x512xf32>
    %c1_194 = arith.constant 1 : index
    %c0_195 = arith.constant 0 : index
    %c0_196 = arith.constant 0 : index
    %386 = vector.load %arg9[%c1_194, %c0_195, %c0_196] : memref<2x8x128xf32, #tpu.memory_space<vmem>>, vector<1x8x128xf32>
    %387 = vector.shape_cast %386 : vector<1x8x128xf32> to vector<8x128xf32>
    %388 = vector.extract_strided_slice %385 {offsets = [0, 0], sizes = [8, 128], strides = [1, 1]} : vector<8x512xf32> to vector<8x128xf32>
    %389 = arith.negf %388 : vector<8x128xf32>
    %390 = math.exp %389 : vector<8x128xf32>
    %cst_197 = arith.constant 1.000000e+00 : f32
    %391 = vector.broadcast %cst_197 : f32 to vector<8x128xf32>
    %392 = arith.addf %391, %390 : vector<8x128xf32>
    %393 = arith.divf %391, %392 : vector<8x128xf32>
    %394 = vector.extract_strided_slice %385 {offsets = [0, 128], sizes = [8, 128], strides = [1, 1]} : vector<8x512xf32> to vector<8x128xf32>
    %395 = arith.negf %394 : vector<8x128xf32>
    %396 = math.exp %395 : vector<8x128xf32>
    %cst_198 = arith.constant 1.000000e+00 : f32
    %397 = vector.broadcast %cst_198 : f32 to vector<8x128xf32>
    %398 = arith.addf %397, %396 : vector<8x128xf32>
    %399 = arith.divf %397, %398 : vector<8x128xf32>
    %400 = vector.extract_strided_slice %385 {offsets = [0, 256], sizes = [8, 128], strides = [1, 1]} : vector<8x512xf32> to vector<8x128xf32>
    %401 = math.tanh %400 : vector<8x128xf32>
    %402 = vector.extract_strided_slice %385 {offsets = [0, 384], sizes = [8, 128], strides = [1, 1]} : vector<8x512xf32> to vector<8x128xf32>
    %403 = arith.negf %402 : vector<8x128xf32>
    %404 = math.exp %403 : vector<8x128xf32>
    %cst_199 = arith.constant 1.000000e+00 : f32
    %405 = vector.broadcast %cst_199 : f32 to vector<8x128xf32>
    %406 = arith.addf %405, %404 : vector<8x128xf32>
    %407 = arith.divf %405, %406 : vector<8x128xf32>
    %408 = arith.mulf %399, %387 : vector<8x128xf32>
    %409 = arith.mulf %393, %401 : vector<8x128xf32>
    %410 = arith.addf %408, %409 : vector<8x128xf32>
    %411 = math.tanh %410 : vector<8x128xf32>
    %412 = arith.mulf %407, %411 : vector<8x128xf32>
    %c1_200 = arith.constant 1 : index
    %c0_201 = arith.constant 0 : index
    %c0_202 = arith.constant 0 : index
    %413 = vector.load %arg8[%c1_200, %c0_201, %c0_202] : memref<2x8x128xf32, #tpu.memory_space<vmem>>, vector<1x8x128xf32>
    %414 = vector.shape_cast %413 : vector<1x8x128xf32> to vector<8x128xf32>
    %415 = vector.shape_cast %412 : vector<8x128xf32> to vector<1x8x128xf32>
    tpu.vector_store %arg8[%c1_200, %c0_201, %c0_202], %415 {strides = array<i32>} : memref<2x8x128xf32, #tpu.memory_space<vmem>>, vector<1x8x128xf32>,
    %c1_203 = arith.constant 1 : index
    %c0_204 = arith.constant 0 : index
    %c0_205 = arith.constant 0 : index
    %416 = vector.load %arg9[%c1_203, %c0_204, %c0_205] : memref<2x8x128xf32, #tpu.memory_space<vmem>>, vector<1x8x128xf32>
    %417 = vector.shape_cast %416 : vector<1x8x128xf32> to vector<8x128xf32>
    %418 = vector.shape_cast %410 : vector<8x128xf32> to vector<1x8x128xf32>
    tpu.vector_store %arg9[%c1_203, %c0_204, %c0_205], %418 {strides = array<i32>} : memref<2x8x128xf32, #tpu.memory_space<vmem>>, vector<1x8x128xf32>,
    %c5_i32 = arith.constant 5 : i32
    %c0_206 = arith.constant 0 : index
    %c0_207 = arith.constant 0 : index
    %c0_208 = arith.constant 0 : index
    %419 = vector.load %arg8[%c0_206, %c0_207, %c0_208] : memref<2x8x128xf32, #tpu.memory_space<vmem>>, vector<1x8x128xf32>
    %420 = vector.shape_cast %419 : vector<1x8x128xf32> to vector<8x128xf32>
    %c0_209 = arith.constant 0 : index
    %c0_210 = arith.constant 0 : index
    %421 = vector.load %arg3[%c0_209, %c0_210] : memref<128x512xf32, #tpu.memory_space<vmem>>, vector<128x512xf32>
    %cst_211 = arith.constant dense<0.000000e+00> : vector<8x512xf32>
    %422 = tpu.matmul %420, %421, %cst_211 {dimension_numbers = #tpu.dot_dimension_numbers<[1], [0], [0], [1], [0, 0, 1, 1], [], []>} : vector<8x128xf32>, vector<128x512xf32>, vector<8x512xf32> -> vector<8x512xf32>
    %423 = arith.index_cast %c5_i32 : i32 to index
    %c0_212 = arith.constant 0 : index
    %c0_213 = arith.constant 0 : index
    %424 = vector.load %arg2[%423, %c0_212, %c0_213] : memref<8x8x512xf32, #tpu.memory_space<vmem>>, vector<1x8x512xf32>
    %425 = vector.shape_cast %424 : vector<1x8x512xf32> to vector<8x512xf32>
    %426 = arith.addf %422, %425 : vector<8x512xf32>
    %c0_214 = arith.constant 0 : index
    %c0_215 = arith.constant 0 : index
    %c0_216 = arith.constant 0 : index
    %427 = vector.load %arg9[%c0_214, %c0_215, %c0_216] : memref<2x8x128xf32, #tpu.memory_space<vmem>>, vector<1x8x128xf32>
    %428 = vector.shape_cast %427 : vector<1x8x128xf32> to vector<8x128xf32>
    %429 = vector.extract_strided_slice %426 {offsets = [0, 0], sizes = [8, 128], strides = [1, 1]} : vector<8x512xf32> to vector<8x128xf32>
    %430 = arith.negf %429 : vector<8x128xf32>
    %431 = math.exp %430 : vector<8x128xf32>
    %cst_217 = arith.constant 1.000000e+00 : f32
    %432 = vector.broadcast %cst_217 : f32 to vector<8x128xf32>
    %433 = arith.addf %432, %431 : vector<8x128xf32>
    %434 = arith.divf %432, %433 : vector<8x128xf32>
    %435 = vector.extract_strided_slice %426 {offsets = [0, 128], sizes = [8, 128], strides = [1, 1]} : vector<8x512xf32> to vector<8x128xf32>
    %436 = arith.negf %435 : vector<8x128xf32>
    %437 = math.exp %436 : vector<8x128xf32>
    %cst_218 = arith.constant 1.000000e+00 : f32
    %438 = vector.broadcast %cst_218 : f32 to vector<8x128xf32>
    %439 = arith.addf %438, %437 : vector<8x128xf32>
    %440 = arith.divf %438, %439 : vector<8x128xf32>
    %441 = vector.extract_strided_slice %426 {offsets = [0, 256], sizes = [8, 128], strides = [1, 1]} : vector<8x512xf32> to vector<8x128xf32>
    %442 = math.tanh %441 : vector<8x128xf32>
    %443 = vector.extract_strided_slice %426 {offsets = [0, 384], sizes = [8, 128], strides = [1, 1]} : vector<8x512xf32> to vector<8x128xf32>
    %444 = arith.negf %443 : vector<8x128xf32>
    %445 = math.exp %444 : vector<8x128xf32>
    %cst_219 = arith.constant 1.000000e+00 : f32
    %446 = vector.broadcast %cst_219 : f32 to vector<8x128xf32>
    %447 = arith.addf %446, %445 : vector<8x128xf32>
    %448 = arith.divf %446, %447 : vector<8x128xf32>
    %449 = arith.mulf %440, %428 : vector<8x128xf32>
    %450 = arith.mulf %434, %442 : vector<8x128xf32>
    %451 = arith.addf %449, %450 : vector<8x128xf32>
    %452 = math.tanh %451 : vector<8x128xf32>
    %453 = arith.mulf %448, %452 : vector<8x128xf32>
    %c0_220 = arith.constant 0 : index
    %c0_221 = arith.constant 0 : index
    %c0_222 = arith.constant 0 : index
    %454 = vector.load %arg8[%c0_220, %c0_221, %c0_222] : memref<2x8x128xf32, #tpu.memory_space<vmem>>, vector<1x8x128xf32>
    %455 = vector.shape_cast %454 : vector<1x8x128xf32> to vector<8x128xf32>
    %456 = vector.shape_cast %453 : vector<8x128xf32> to vector<1x8x128xf32>
    tpu.vector_store %arg8[%c0_220, %c0_221, %c0_222], %456 {strides = array<i32>} : memref<2x8x128xf32, #tpu.memory_space<vmem>>, vector<1x8x128xf32>,
    %c0_223 = arith.constant 0 : index
    %c0_224 = arith.constant 0 : index
    %c0_225 = arith.constant 0 : index
    %457 = vector.load %arg9[%c0_223, %c0_224, %c0_225] : memref<2x8x128xf32, #tpu.memory_space<vmem>>, vector<1x8x128xf32>
    %458 = vector.shape_cast %457 : vector<1x8x128xf32> to vector<8x128xf32>
    %459 = vector.shape_cast %451 : vector<8x128xf32> to vector<1x8x128xf32>
    tpu.vector_store %arg9[%c0_223, %c0_224, %c0_225], %459 {strides = array<i32>} : memref<2x8x128xf32, #tpu.memory_space<vmem>>, vector<1x8x128xf32>,
    %c0_226 = arith.constant 0 : index
    %c0_227 = arith.constant 0 : index
    %460 = vector.load %arg4[%c0_226, %c0_227] : memref<128x512xf32, #tpu.memory_space<vmem>>, vector<128x512xf32>
    %cst_228 = arith.constant dense<0.000000e+00> : vector<8x512xf32>
    %461 = tpu.matmul %453, %460, %cst_228 {dimension_numbers = #tpu.dot_dimension_numbers<[1], [0], [0], [1], [0, 0, 1, 1], [], []>} : vector<8x128xf32>, vector<128x512xf32>, vector<8x512xf32> -> vector<8x512xf32>
    %c1_229 = arith.constant 1 : index
    %c0_230 = arith.constant 0 : index
    %c0_231 = arith.constant 0 : index
    %462 = vector.load %arg8[%c1_229, %c0_230, %c0_231] : memref<2x8x128xf32, #tpu.memory_space<vmem>>, vector<1x8x128xf32>
    %463 = vector.shape_cast %462 : vector<1x8x128xf32> to vector<8x128xf32>
    %c0_232 = arith.constant 0 : index
    %c0_233 = arith.constant 0 : index
    %464 = vector.load %arg5[%c0_232, %c0_233] : memref<128x512xf32, #tpu.memory_space<vmem>>, vector<128x512xf32>
    %cst_234 = arith.constant dense<0.000000e+00> : vector<8x512xf32>
    %465 = tpu.matmul %463, %464, %cst_234 {dimension_numbers = #tpu.dot_dimension_numbers<[1], [0], [0], [1], [0, 0, 1, 1], [], []>} : vector<8x128xf32>, vector<128x512xf32>, vector<8x512xf32> -> vector<8x512xf32>
    %466 = arith.addf %461, %465 : vector<8x512xf32>
    %467 = vector.broadcast %3 : vector<1x512xf32> to vector<8x512xf32>
    %468 = arith.addf %466, %467 : vector<8x512xf32>
    %c1_235 = arith.constant 1 : index
    %c0_236 = arith.constant 0 : index
    %c0_237 = arith.constant 0 : index
    %469 = vector.load %arg9[%c1_235, %c0_236, %c0_237] : memref<2x8x128xf32, #tpu.memory_space<vmem>>, vector<1x8x128xf32>
    %470 = vector.shape_cast %469 : vector<1x8x128xf32> to vector<8x128xf32>
    %471 = vector.extract_strided_slice %468 {offsets = [0, 0], sizes = [8, 128], strides = [1, 1]} : vector<8x512xf32> to vector<8x128xf32>
    %472 = arith.negf %471 : vector<8x128xf32>
    %473 = math.exp %472 : vector<8x128xf32>
    %cst_238 = arith.constant 1.000000e+00 : f32
    %474 = vector.broadcast %cst_238 : f32 to vector<8x128xf32>
    %475 = arith.addf %474, %473 : vector<8x128xf32>
    %476 = arith.divf %474, %475 : vector<8x128xf32>
    %477 = vector.extract_strided_slice %468 {offsets = [0, 128], sizes = [8, 128], strides = [1, 1]} : vector<8x512xf32> to vector<8x128xf32>
    %478 = arith.negf %477 : vector<8x128xf32>
    %479 = math.exp %478 : vector<8x128xf32>
    %cst_239 = arith.constant 1.000000e+00 : f32
    %480 = vector.broadcast %cst_239 : f32 to vector<8x128xf32>
    %481 = arith.addf %480, %479 : vector<8x128xf32>
    %482 = arith.divf %480, %481 : vector<8x128xf32>
    %483 = vector.extract_strided_slice %468 {offsets = [0, 256], sizes = [8, 128], strides = [1, 1]} : vector<8x512xf32> to vector<8x128xf32>
    %484 = math.tanh %483 : vector<8x128xf32>
    %485 = vector.extract_strided_slice %468 {offsets = [0, 384], sizes = [8, 128], strides = [1, 1]} : vector<8x512xf32> to vector<8x128xf32>
    %486 = arith.negf %485 : vector<8x128xf32>
    %487 = math.exp %486 : vector<8x128xf32>
    %cst_240 = arith.constant 1.000000e+00 : f32
    %488 = vector.broadcast %cst_240 : f32 to vector<8x128xf32>
    %489 = arith.addf %488, %487 : vector<8x128xf32>
    %490 = arith.divf %488, %489 : vector<8x128xf32>
    %491 = arith.mulf %482, %470 : vector<8x128xf32>
    %492 = arith.mulf %476, %484 : vector<8x128xf32>
    %493 = arith.addf %491, %492 : vector<8x128xf32>
    %494 = math.tanh %493 : vector<8x128xf32>
    %495 = arith.mulf %490, %494 : vector<8x128xf32>
    %c1_241 = arith.constant 1 : index
    %c0_242 = arith.constant 0 : index
    %c0_243 = arith.constant 0 : index
    %496 = vector.load %arg8[%c1_241, %c0_242, %c0_243] : memref<2x8x128xf32, #tpu.memory_space<vmem>>, vector<1x8x128xf32>
    %497 = vector.shape_cast %496 : vector<1x8x128xf32> to vector<8x128xf32>
    %498 = vector.shape_cast %495 : vector<8x128xf32> to vector<1x8x128xf32>
    tpu.vector_store %arg8[%c1_241, %c0_242, %c0_243], %498 {strides = array<i32>} : memref<2x8x128xf32, #tpu.memory_space<vmem>>, vector<1x8x128xf32>,
    %c1_244 = arith.constant 1 : index
    %c0_245 = arith.constant 0 : index
    %c0_246 = arith.constant 0 : index
    %499 = vector.load %arg9[%c1_244, %c0_245, %c0_246] : memref<2x8x128xf32, #tpu.memory_space<vmem>>, vector<1x8x128xf32>
    %500 = vector.shape_cast %499 : vector<1x8x128xf32> to vector<8x128xf32>
    %501 = vector.shape_cast %493 : vector<8x128xf32> to vector<1x8x128xf32>
    tpu.vector_store %arg9[%c1_244, %c0_245, %c0_246], %501 {strides = array<i32>} : memref<2x8x128xf32, #tpu.memory_space<vmem>>, vector<1x8x128xf32>,
    %c6_i32 = arith.constant 6 : i32
    %c0_247 = arith.constant 0 : index
    %c0_248 = arith.constant 0 : index
    %c0_249 = arith.constant 0 : index
    %502 = vector.load %arg8[%c0_247, %c0_248, %c0_249] : memref<2x8x128xf32, #tpu.memory_space<vmem>>, vector<1x8x128xf32>
    %503 = vector.shape_cast %502 : vector<1x8x128xf32> to vector<8x128xf32>
    %c0_250 = arith.constant 0 : index
    %c0_251 = arith.constant 0 : index
    %504 = vector.load %arg3[%c0_250, %c0_251] : memref<128x512xf32, #tpu.memory_space<vmem>>, vector<128x512xf32>
    %cst_252 = arith.constant dense<0.000000e+00> : vector<8x512xf32>
    %505 = tpu.matmul %503, %504, %cst_252 {dimension_numbers = #tpu.dot_dimension_numbers<[1], [0], [0], [1], [0, 0, 1, 1], [], []>} : vector<8x128xf32>, vector<128x512xf32>, vector<8x512xf32> -> vector<8x512xf32>
    %506 = arith.index_cast %c6_i32 : i32 to index
    %c0_253 = arith.constant 0 : index
    %c0_254 = arith.constant 0 : index
    %507 = vector.load %arg2[%506, %c0_253, %c0_254] : memref<8x8x512xf32, #tpu.memory_space<vmem>>, vector<1x8x512xf32>
    %508 = vector.shape_cast %507 : vector<1x8x512xf32> to vector<8x512xf32>
    %509 = arith.addf %505, %508 : vector<8x512xf32>
    %c0_255 = arith.constant 0 : index
    %c0_256 = arith.constant 0 : index
    %c0_257 = arith.constant 0 : index
    %510 = vector.load %arg9[%c0_255, %c0_256, %c0_257] : memref<2x8x128xf32, #tpu.memory_space<vmem>>, vector<1x8x128xf32>
    %511 = vector.shape_cast %510 : vector<1x8x128xf32> to vector<8x128xf32>
    %512 = vector.extract_strided_slice %509 {offsets = [0, 0], sizes = [8, 128], strides = [1, 1]} : vector<8x512xf32> to vector<8x128xf32>
    %513 = arith.negf %512 : vector<8x128xf32>
    %514 = math.exp %513 : vector<8x128xf32>
    %cst_258 = arith.constant 1.000000e+00 : f32
    %515 = vector.broadcast %cst_258 : f32 to vector<8x128xf32>
    %516 = arith.addf %515, %514 : vector<8x128xf32>
    %517 = arith.divf %515, %516 : vector<8x128xf32>
    %518 = vector.extract_strided_slice %509 {offsets = [0, 128], sizes = [8, 128], strides = [1, 1]} : vector<8x512xf32> to vector<8x128xf32>
    %519 = arith.negf %518 : vector<8x128xf32>
    %520 = math.exp %519 : vector<8x128xf32>
    %cst_259 = arith.constant 1.000000e+00 : f32
    %521 = vector.broadcast %cst_259 : f32 to vector<8x128xf32>
    %522 = arith.addf %521, %520 : vector<8x128xf32>
    %523 = arith.divf %521, %522 : vector<8x128xf32>
    %524 = vector.extract_strided_slice %509 {offsets = [0, 256], sizes = [8, 128], strides = [1, 1]} : vector<8x512xf32> to vector<8x128xf32>
    %525 = math.tanh %524 : vector<8x128xf32>
    %526 = vector.extract_strided_slice %509 {offsets = [0, 384], sizes = [8, 128], strides = [1, 1]} : vector<8x512xf32> to vector<8x128xf32>
    %527 = arith.negf %526 : vector<8x128xf32>
    %528 = math.exp %527 : vector<8x128xf32>
    %cst_260 = arith.constant 1.000000e+00 : f32
    %529 = vector.broadcast %cst_260 : f32 to vector<8x128xf32>
    %530 = arith.addf %529, %528 : vector<8x128xf32>
    %531 = arith.divf %529, %530 : vector<8x128xf32>
    %532 = arith.mulf %523, %511 : vector<8x128xf32>
    %533 = arith.mulf %517, %525 : vector<8x128xf32>
    %534 = arith.addf %532, %533 : vector<8x128xf32>
    %535 = math.tanh %534 : vector<8x128xf32>
    %536 = arith.mulf %531, %535 : vector<8x128xf32>
    %c0_261 = arith.constant 0 : index
    %c0_262 = arith.constant 0 : index
    %c0_263 = arith.constant 0 : index
    %537 = vector.load %arg8[%c0_261, %c0_262, %c0_263] : memref<2x8x128xf32, #tpu.memory_space<vmem>>, vector<1x8x128xf32>
    %538 = vector.shape_cast %537 : vector<1x8x128xf32> to vector<8x128xf32>
    %539 = vector.shape_cast %536 : vector<8x128xf32> to vector<1x8x128xf32>
    tpu.vector_store %arg8[%c0_261, %c0_262, %c0_263], %539 {strides = array<i32>} : memref<2x8x128xf32, #tpu.memory_space<vmem>>, vector<1x8x128xf32>,
    %c0_264 = arith.constant 0 : index
    %c0_265 = arith.constant 0 : index
    %c0_266 = arith.constant 0 : index
    %540 = vector.load %arg9[%c0_264, %c0_265, %c0_266] : memref<2x8x128xf32, #tpu.memory_space<vmem>>, vector<1x8x128xf32>
    %541 = vector.shape_cast %540 : vector<1x8x128xf32> to vector<8x128xf32>
    %542 = vector.shape_cast %534 : vector<8x128xf32> to vector<1x8x128xf32>
    tpu.vector_store %arg9[%c0_264, %c0_265, %c0_266], %542 {strides = array<i32>} : memref<2x8x128xf32, #tpu.memory_space<vmem>>, vector<1x8x128xf32>,
    %c0_267 = arith.constant 0 : index
    %c0_268 = arith.constant 0 : index
    %543 = vector.load %arg4[%c0_267, %c0_268] : memref<128x512xf32, #tpu.memory_space<vmem>>, vector<128x512xf32>
    %cst_269 = arith.constant dense<0.000000e+00> : vector<8x512xf32>
    %544 = tpu.matmul %536, %543, %cst_269 {dimension_numbers = #tpu.dot_dimension_numbers<[1], [0], [0], [1], [0, 0, 1, 1], [], []>} : vector<8x128xf32>, vector<128x512xf32>, vector<8x512xf32> -> vector<8x512xf32>
    %c1_270 = arith.constant 1 : index
    %c0_271 = arith.constant 0 : index
    %c0_272 = arith.constant 0 : index
    %545 = vector.load %arg8[%c1_270, %c0_271, %c0_272] : memref<2x8x128xf32, #tpu.memory_space<vmem>>, vector<1x8x128xf32>
    %546 = vector.shape_cast %545 : vector<1x8x128xf32> to vector<8x128xf32>
    %c0_273 = arith.constant 0 : index
    %c0_274 = arith.constant 0 : index
    %547 = vector.load %arg5[%c0_273, %c0_274] : memref<128x512xf32, #tpu.memory_space<vmem>>, vector<128x512xf32>
    %cst_275 = arith.constant dense<0.000000e+00> : vector<8x512xf32>
    %548 = tpu.matmul %546, %547, %cst_275 {dimension_numbers = #tpu.dot_dimension_numbers<[1], [0], [0], [1], [0, 0, 1, 1], [], []>} : vector<8x128xf32>, vector<128x512xf32>, vector<8x512xf32> -> vector<8x512xf32>
    %549 = arith.addf %544, %548 : vector<8x512xf32>
    %550 = vector.broadcast %3 : vector<1x512xf32> to vector<8x512xf32>
    %551 = arith.addf %549, %550 : vector<8x512xf32>
    %c1_276 = arith.constant 1 : index
    %c0_277 = arith.constant 0 : index
    %c0_278 = arith.constant 0 : index
    %552 = vector.load %arg9[%c1_276, %c0_277, %c0_278] : memref<2x8x128xf32, #tpu.memory_space<vmem>>, vector<1x8x128xf32>
    %553 = vector.shape_cast %552 : vector<1x8x128xf32> to vector<8x128xf32>
    %554 = vector.extract_strided_slice %551 {offsets = [0, 0], sizes = [8, 128], strides = [1, 1]} : vector<8x512xf32> to vector<8x128xf32>
    %555 = arith.negf %554 : vector<8x128xf32>
    %556 = math.exp %555 : vector<8x128xf32>
    %cst_279 = arith.constant 1.000000e+00 : f32
    %557 = vector.broadcast %cst_279 : f32 to vector<8x128xf32>
    %558 = arith.addf %557, %556 : vector<8x128xf32>
    %559 = arith.divf %557, %558 : vector<8x128xf32>
    %560 = vector.extract_strided_slice %551 {offsets = [0, 128], sizes = [8, 128], strides = [1, 1]} : vector<8x512xf32> to vector<8x128xf32>
    %561 = arith.negf %560 : vector<8x128xf32>
    %562 = math.exp %561 : vector<8x128xf32>
    %cst_280 = arith.constant 1.000000e+00 : f32
    %563 = vector.broadcast %cst_280 : f32 to vector<8x128xf32>
    %564 = arith.addf %563, %562 : vector<8x128xf32>
    %565 = arith.divf %563, %564 : vector<8x128xf32>
    %566 = vector.extract_strided_slice %551 {offsets = [0, 256], sizes = [8, 128], strides = [1, 1]} : vector<8x512xf32> to vector<8x128xf32>
    %567 = math.tanh %566 : vector<8x128xf32>
    %568 = vector.extract_strided_slice %551 {offsets = [0, 384], sizes = [8, 128], strides = [1, 1]} : vector<8x512xf32> to vector<8x128xf32>
    %569 = arith.negf %568 : vector<8x128xf32>
    %570 = math.exp %569 : vector<8x128xf32>
    %cst_281 = arith.constant 1.000000e+00 : f32
    %571 = vector.broadcast %cst_281 : f32 to vector<8x128xf32>
    %572 = arith.addf %571, %570 : vector<8x128xf32>
    %573 = arith.divf %571, %572 : vector<8x128xf32>
    %574 = arith.mulf %565, %553 : vector<8x128xf32>
    %575 = arith.mulf %559, %567 : vector<8x128xf32>
    %576 = arith.addf %574, %575 : vector<8x128xf32>
    %577 = math.tanh %576 : vector<8x128xf32>
    %578 = arith.mulf %573, %577 : vector<8x128xf32>
    %c1_282 = arith.constant 1 : index
    %c0_283 = arith.constant 0 : index
    %c0_284 = arith.constant 0 : index
    %579 = vector.load %arg8[%c1_282, %c0_283, %c0_284] : memref<2x8x128xf32, #tpu.memory_space<vmem>>, vector<1x8x128xf32>
    %580 = vector.shape_cast %579 : vector<1x8x128xf32> to vector<8x128xf32>
    %581 = vector.shape_cast %578 : vector<8x128xf32> to vector<1x8x128xf32>
    tpu.vector_store %arg8[%c1_282, %c0_283, %c0_284], %581 {strides = array<i32>} : memref<2x8x128xf32, #tpu.memory_space<vmem>>, vector<1x8x128xf32>,
    %c1_285 = arith.constant 1 : index
    %c0_286 = arith.constant 0 : index
    %c0_287 = arith.constant 0 : index
    %582 = vector.load %arg9[%c1_285, %c0_286, %c0_287] : memref<2x8x128xf32, #tpu.memory_space<vmem>>, vector<1x8x128xf32>
    %583 = vector.shape_cast %582 : vector<1x8x128xf32> to vector<8x128xf32>
    %584 = vector.shape_cast %576 : vector<8x128xf32> to vector<1x8x128xf32>
    tpu.vector_store %arg9[%c1_285, %c0_286, %c0_287], %584 {strides = array<i32>} : memref<2x8x128xf32, #tpu.memory_space<vmem>>, vector<1x8x128xf32>,
    %c7_i32 = arith.constant 7 : i32
    %c0_288 = arith.constant 0 : index
    %c0_289 = arith.constant 0 : index
    %c0_290 = arith.constant 0 : index
    %585 = vector.load %arg8[%c0_288, %c0_289, %c0_290] : memref<2x8x128xf32, #tpu.memory_space<vmem>>, vector<1x8x128xf32>
    %586 = vector.shape_cast %585 : vector<1x8x128xf32> to vector<8x128xf32>
    %c0_291 = arith.constant 0 : index
    %c0_292 = arith.constant 0 : index
    %587 = vector.load %arg3[%c0_291, %c0_292] : memref<128x512xf32, #tpu.memory_space<vmem>>, vector<128x512xf32>
    %cst_293 = arith.constant dense<0.000000e+00> : vector<8x512xf32>
    %588 = tpu.matmul %586, %587, %cst_293 {dimension_numbers = #tpu.dot_dimension_numbers<[1], [0], [0], [1], [0, 0, 1, 1], [], []>} : vector<8x128xf32>, vector<128x512xf32>, vector<8x512xf32> -> vector<8x512xf32>
    %589 = arith.index_cast %c7_i32 : i32 to index
    %c0_294 = arith.constant 0 : index
    %c0_295 = arith.constant 0 : index
    %590 = vector.load %arg2[%589, %c0_294, %c0_295] : memref<8x8x512xf32, #tpu.memory_space<vmem>>, vector<1x8x512xf32>
    %591 = vector.shape_cast %590 : vector<1x8x512xf32> to vector<8x512xf32>
    %592 = arith.addf %588, %591 : vector<8x512xf32>
    %c0_296 = arith.constant 0 : index
    %c0_297 = arith.constant 0 : index
    %c0_298 = arith.constant 0 : index
    %593 = vector.load %arg9[%c0_296, %c0_297, %c0_298] : memref<2x8x128xf32, #tpu.memory_space<vmem>>, vector<1x8x128xf32>
    %594 = vector.shape_cast %593 : vector<1x8x128xf32> to vector<8x128xf32>
    %595 = vector.extract_strided_slice %592 {offsets = [0, 0], sizes = [8, 128], strides = [1, 1]} : vector<8x512xf32> to vector<8x128xf32>
    %596 = arith.negf %595 : vector<8x128xf32>
    %597 = math.exp %596 : vector<8x128xf32>
    %cst_299 = arith.constant 1.000000e+00 : f32
    %598 = vector.broadcast %cst_299 : f32 to vector<8x128xf32>
    %599 = arith.addf %598, %597 : vector<8x128xf32>
    %600 = arith.divf %598, %599 : vector<8x128xf32>
    %601 = vector.extract_strided_slice %592 {offsets = [0, 128], sizes = [8, 128], strides = [1, 1]} : vector<8x512xf32> to vector<8x128xf32>
    %602 = arith.negf %601 : vector<8x128xf32>
    %603 = math.exp %602 : vector<8x128xf32>
    %cst_300 = arith.constant 1.000000e+00 : f32
    %604 = vector.broadcast %cst_300 : f32 to vector<8x128xf32>
    %605 = arith.addf %604, %603 : vector<8x128xf32>
    %606 = arith.divf %604, %605 : vector<8x128xf32>
    %607 = vector.extract_strided_slice %592 {offsets = [0, 256], sizes = [8, 128], strides = [1, 1]} : vector<8x512xf32> to vector<8x128xf32>
    %608 = math.tanh %607 : vector<8x128xf32>
    %609 = vector.extract_strided_slice %592 {offsets = [0, 384], sizes = [8, 128], strides = [1, 1]} : vector<8x512xf32> to vector<8x128xf32>
    %610 = arith.negf %609 : vector<8x128xf32>
    %611 = math.exp %610 : vector<8x128xf32>
    %cst_301 = arith.constant 1.000000e+00 : f32
    %612 = vector.broadcast %cst_301 : f32 to vector<8x128xf32>
    %613 = arith.addf %612, %611 : vector<8x128xf32>
    %614 = arith.divf %612, %613 : vector<8x128xf32>
    %615 = arith.mulf %606, %594 : vector<8x128xf32>
    %616 = arith.mulf %600, %608 : vector<8x128xf32>
    %617 = arith.addf %615, %616 : vector<8x128xf32>
    %618 = math.tanh %617 : vector<8x128xf32>
    %619 = arith.mulf %614, %618 : vector<8x128xf32>
    %c0_302 = arith.constant 0 : index
    %c0_303 = arith.constant 0 : index
    %c0_304 = arith.constant 0 : index
    %620 = vector.load %arg8[%c0_302, %c0_303, %c0_304] : memref<2x8x128xf32, #tpu.memory_space<vmem>>, vector<1x8x128xf32>
    %621 = vector.shape_cast %620 : vector<1x8x128xf32> to vector<8x128xf32>
    %622 = vector.shape_cast %619 : vector<8x128xf32> to vector<1x8x128xf32>
    tpu.vector_store %arg8[%c0_302, %c0_303, %c0_304], %622 {strides = array<i32>} : memref<2x8x128xf32, #tpu.memory_space<vmem>>, vector<1x8x128xf32>,
    %c0_305 = arith.constant 0 : index
    %c0_306 = arith.constant 0 : index
    %c0_307 = arith.constant 0 : index
    %623 = vector.load %arg9[%c0_305, %c0_306, %c0_307] : memref<2x8x128xf32, #tpu.memory_space<vmem>>, vector<1x8x128xf32>
    %624 = vector.shape_cast %623 : vector<1x8x128xf32> to vector<8x128xf32>
    %625 = vector.shape_cast %617 : vector<8x128xf32> to vector<1x8x128xf32>
    tpu.vector_store %arg9[%c0_305, %c0_306, %c0_307], %625 {strides = array<i32>} : memref<2x8x128xf32, #tpu.memory_space<vmem>>, vector<1x8x128xf32>,
    %c0_308 = arith.constant 0 : index
    %c0_309 = arith.constant 0 : index
    %626 = vector.load %arg4[%c0_308, %c0_309] : memref<128x512xf32, #tpu.memory_space<vmem>>, vector<128x512xf32>
    %cst_310 = arith.constant dense<0.000000e+00> : vector<8x512xf32>
    %627 = tpu.matmul %619, %626, %cst_310 {dimension_numbers = #tpu.dot_dimension_numbers<[1], [0], [0], [1], [0, 0, 1, 1], [], []>} : vector<8x128xf32>, vector<128x512xf32>, vector<8x512xf32> -> vector<8x512xf32>
    %c1_311 = arith.constant 1 : index
    %c0_312 = arith.constant 0 : index
    %c0_313 = arith.constant 0 : index
    %628 = vector.load %arg8[%c1_311, %c0_312, %c0_313] : memref<2x8x128xf32, #tpu.memory_space<vmem>>, vector<1x8x128xf32>
    %629 = vector.shape_cast %628 : vector<1x8x128xf32> to vector<8x128xf32>
    %c0_314 = arith.constant 0 : index
    %c0_315 = arith.constant 0 : index
    %630 = vector.load %arg5[%c0_314, %c0_315] : memref<128x512xf32, #tpu.memory_space<vmem>>, vector<128x512xf32>
    %cst_316 = arith.constant dense<0.000000e+00> : vector<8x512xf32>
    %631 = tpu.matmul %629, %630, %cst_316 {dimension_numbers = #tpu.dot_dimension_numbers<[1], [0], [0], [1], [0, 0, 1, 1], [], []>} : vector<8x128xf32>, vector<128x512xf32>, vector<8x512xf32> -> vector<8x512xf32>
    %632 = arith.addf %627, %631 : vector<8x512xf32>
    %633 = vector.broadcast %3 : vector<1x512xf32> to vector<8x512xf32>
    %634 = arith.addf %632, %633 : vector<8x512xf32>
    %c1_317 = arith.constant 1 : index
    %c0_318 = arith.constant 0 : index
    %c0_319 = arith.constant 0 : index
    %635 = vector.load %arg9[%c1_317, %c0_318, %c0_319] : memref<2x8x128xf32, #tpu.memory_space<vmem>>, vector<1x8x128xf32>
    %636 = vector.shape_cast %635 : vector<1x8x128xf32> to vector<8x128xf32>
    %637 = vector.extract_strided_slice %634 {offsets = [0, 0], sizes = [8, 128], strides = [1, 1]} : vector<8x512xf32> to vector<8x128xf32>
    %638 = arith.negf %637 : vector<8x128xf32>
    %639 = math.exp %638 : vector<8x128xf32>
    %cst_320 = arith.constant 1.000000e+00 : f32
    %640 = vector.broadcast %cst_320 : f32 to vector<8x128xf32>
    %641 = arith.addf %640, %639 : vector<8x128xf32>
    %642 = arith.divf %640, %641 : vector<8x128xf32>
    %643 = vector.extract_strided_slice %634 {offsets = [0, 128], sizes = [8, 128], strides = [1, 1]} : vector<8x512xf32> to vector<8x128xf32>
    %644 = arith.negf %643 : vector<8x128xf32>
    %645 = math.exp %644 : vector<8x128xf32>
    %cst_321 = arith.constant 1.000000e+00 : f32
    %646 = vector.broadcast %cst_321 : f32 to vector<8x128xf32>
    %647 = arith.addf %646, %645 : vector<8x128xf32>
    %648 = arith.divf %646, %647 : vector<8x128xf32>
    %649 = vector.extract_strided_slice %634 {offsets = [0, 256], sizes = [8, 128], strides = [1, 1]} : vector<8x512xf32> to vector<8x128xf32>
    %650 = math.tanh %649 : vector<8x128xf32>
    %651 = vector.extract_strided_slice %634 {offsets = [0, 384], sizes = [8, 128], strides = [1, 1]} : vector<8x512xf32> to vector<8x128xf32>
    %652 = arith.negf %651 : vector<8x128xf32>
    %653 = math.exp %652 : vector<8x128xf32>
    %cst_322 = arith.constant 1.000000e+00 : f32
    %654 = vector.broadcast %cst_322 : f32 to vector<8x128xf32>
    %655 = arith.addf %654, %653 : vector<8x128xf32>
    %656 = arith.divf %654, %655 : vector<8x128xf32>
    %657 = arith.mulf %648, %636 : vector<8x128xf32>
    %658 = arith.mulf %642, %650 : vector<8x128xf32>
    %659 = arith.addf %657, %658 : vector<8x128xf32>
    %660 = math.tanh %659 : vector<8x128xf32>
    %661 = arith.mulf %656, %660 : vector<8x128xf32>
    %c1_323 = arith.constant 1 : index
    %c0_324 = arith.constant 0 : index
    %c0_325 = arith.constant 0 : index
    %662 = vector.load %arg8[%c1_323, %c0_324, %c0_325] : memref<2x8x128xf32, #tpu.memory_space<vmem>>, vector<1x8x128xf32>
    %663 = vector.shape_cast %662 : vector<1x8x128xf32> to vector<8x128xf32>
    %664 = vector.shape_cast %661 : vector<8x128xf32> to vector<1x8x128xf32>
    tpu.vector_store %arg8[%c1_323, %c0_324, %c0_325], %664 {strides = array<i32>} : memref<2x8x128xf32, #tpu.memory_space<vmem>>, vector<1x8x128xf32>,
    %c1_326 = arith.constant 1 : index
    %c0_327 = arith.constant 0 : index
    %c0_328 = arith.constant 0 : index
    %665 = vector.load %arg9[%c1_326, %c0_327, %c0_328] : memref<2x8x128xf32, #tpu.memory_space<vmem>>, vector<1x8x128xf32>
    %666 = vector.shape_cast %665 : vector<1x8x128xf32> to vector<8x128xf32>
    %667 = vector.shape_cast %659 : vector<8x128xf32> to vector<1x8x128xf32>
    tpu.vector_store %arg9[%c1_326, %c0_327, %c0_328], %667 {strides = array<i32>} : memref<2x8x128xf32, #tpu.memory_space<vmem>>, vector<1x8x128xf32>,
    %c8_i32 = arith.constant 8 : i32
    %c0_i32_329 = arith.constant 0 : i32
    %668 = arith.cmpi eq, %arg1, %c0_i32_329 : i32
    %669 = arith.extui %668 : i1 to i32
    %c0_i32_330 = arith.constant 0 : i32
    %670 = arith.cmpi ne, %669, %c0_i32_330 : i32
    scf.if %670 {
      %c1_331 = arith.constant 1 : index
      %c0_332 = arith.constant 0 : index
      %c0_333 = arith.constant 0 : index
      %671 = vector.load %arg8[%c1_331, %c0_332, %c0_333] : memref<2x8x128xf32, #tpu.memory_space<vmem>>, vector<1x8x128xf32>
      %672 = vector.shape_cast %671 : vector<1x8x128xf32> to vector<8x128xf32>
      %c0_334 = arith.constant 0 : index
      %c0_335 = arith.constant 0 : index
      %673 = vector.load %arg7[%c0_334, %c0_335] : memref<8x128xf32, #tpu.memory_space<vmem>>, vector<8x128xf32>
      tpu.vector_store %arg7[%c0_334, %c0_335], %672 {strides = array<i32>} : memref<8x128xf32, #tpu.memory_space<vmem>>, vector<8x128xf32>,
    } else {
    }
    return
  }
  func.func @transform_0(%arg0: i32, %arg1: i32) -> (i32, i32, i32) {
    %c0_i32 = arith.constant 0 : i32
    %c0_i32_0 = arith.constant 0 : i32
    return %arg1, %arg0, %c0_i32 : i32, i32, i32
  }
  func.func @transform_1(%arg0: i32, %arg1: i32) -> (i32, i32) {
    %c0_i32 = arith.constant 0 : i32
    %c0_i32_0 = arith.constant 0 : i32
    %c0_i32_1 = arith.constant 0 : i32
    return %c0_i32, %c0_i32_0 : i32, i32
  }
  func.func @transform_2(%arg0: i32, %arg1: i32) -> (i32, i32) {
    %c0_i32 = arith.constant 0 : i32
    %c0_i32_0 = arith.constant 0 : i32
    %c0_i32_1 = arith.constant 0 : i32
    return %c0_i32, %c0_i32_0 : i32, i32
  }
  func.func @transform_3(%arg0: i32, %arg1: i32) -> (i32, i32) {
    %c0_i32 = arith.constant 0 : i32
    %c0_i32_0 = arith.constant 0 : i32
    %c0_i32_1 = arith.constant 0 : i32
    return %c0_i32, %c0_i32_0 : i32, i32
  }
  func.func @transform_4(%arg0: i32, %arg1: i32) -> (i32, i32) {
    %c0_i32 = arith.constant 0 : i32
    %c0_i32_0 = arith.constant 0 : i32
    %c0_i32_1 = arith.constant 0 : i32
    return %c0_i32, %c0_i32_0 : i32, i32
  }
  func.func @transform_5(%arg0: i32, %arg1: i32) -> (i32, i32) {
    %c0_i32 = arith.constant 0 : i32
    %c0_i32_0 = arith.constant 0 : i32
    return %arg0, %c0_i32 : i32, i32
  }
}

</mosaic_0001>

<bundles_post_ra>
// kernel: tpu_custom_call.1
= control target key start
LH: loop header
LB: loop body
LE: loop exit
PB: predicated region body
PF: predicated region fallthrough
CT: control target
= control target key end

     0   :  { %10 = vsyncpa [#allocation5], 0  ;;  %s6503_s0 = inlined_call_operand.hbm [shape: f32[8,8,512], index: 0, kind: input, shape index: {}]   ;;  %s6504_s1 = inlined_call_operand.hbm [shape: f32[128,512], index: 1, kind: input, shape index: {}]   ;;  %s6505_s2 = inlined_call_operand.hbm [shape: f32[128,512], index: 2, kind: input, shape index: {}]   ;;  %s6506_s3 = inlined_call_operand.hbm [shape: f32[128,512], index: 3, kind: input, shape index: {}]   ;;  %s6507_s4 = inlined_call_operand.hbm [shape: f32[1,512], index: 4, kind: input, shape index: {}]   ;;  %s6508_s5 = inlined_call_operand.hbm [shape: f32[8,128], index: 5, kind: output, shape index: {}]  }
   0x1   :  { %11 = vsyncpa [#allocation8], 0 }
   0x2   :  { %12 = vsyncpa [#allocation11], 0 }
   0x3   :  { %13 = vsyncpa [#allocation6], 0  ;;  %s31_s20 = sshll.u32 %s6504_s1, 4  ;;  %s5285_s21 = smov [#allocation7]   ;;  %s32_s20 = int_to_ptr.hbm [resolvable:$true] %s31_s20 }
   0x4   :  { %s33_s22 = sshll.u32 %s5285_s21, 4  ;;  %s57_s25 = sshll.u32 %s6506_s3, 4  ;;  %s34_s22 = int_to_ptr.vmem [resolvable:$true] %s33_s22  ;;  %s58_s25 = int_to_ptr.hbm [resolvable:$true] %s57_s25 }
   0x5   :  { %s5286_s26 = smov 512   ;;  %s5287_s27 = smov 32  }
   0x6   :  { %39 = dma.hbm_to_vmem [thread:$0]  %s32_s20, 8192, %s34_s22, [#allocation8], %s5286_s26, %s5286_s26, %s5287_s27  }
   0x7   :  { %s5288_s28 = smov [#allocation10]   ;;  %s18_s7 = sshll.u32 %s6503_s0, 4  ;;  %s19_s7 = int_to_ptr.hbm [resolvable:$true] %s18_s7 }
   0x8   :  { %s59_s29 = sshll.u32 %s5288_s28, 4  ;;  %s44_s9 = sshll.u32 %s6505_s2, 4  ;;  %s60_s29 = int_to_ptr.vmem [resolvable:$true] %s59_s29  ;;  %s45_s9 = int_to_ptr.hbm [resolvable:$true] %s44_s9 }
   0x9   :  { %65 = dma.hbm_to_vmem [thread:$0]  %s58_s25, 8192, %s60_s29, [#allocation11], %s5286_s26, %s5286_s26, %s5287_s27  }
   0xa   :  { %s5289_s10 = smov [#allocation4]   ;;  %s5290_s3 = smov [#allocation9]  }
   0xb   :  { %s20_s11 = sshll.u32 %s5289_s10, 4  ;;  %s46_s12 = sshll.u32 %s5290_s3, 4  ;;  %s21_s11 = int_to_ptr.vmem [resolvable:$true] %s20_s11  ;;  %s47_s12 = int_to_ptr.vmem [resolvable:$true] %s46_s12 }
   0xc   :  { %26 = dma.hbm_to_vmem [thread:$0]  %s19_s7, 4096, %s21_s11, [#allocation5], %s5286_s26, %s5286_s26, %s5287_s27  }
   0xd   :  { %s71_s15 = sshll.u32 %s6507_s4, 4  ;;  %s5291_s0 = smov [#allocation12]   ;;  %s72_s15 = int_to_ptr.hbm [resolvable:$true] %s71_s15 }
   0xe   :  { %52 = dma.hbm_to_vmem [thread:$0]  %s45_s9, 8192, %s47_s12, [#allocation8], %s5286_s26, %s5286_s26, %s5287_s27  }
   0xf   :  { %s73_s16 = sshll.u32 %s5291_s0, 4  ;;  %s74_s16 = int_to_ptr.vmem [resolvable:$true] %s73_s16 }
  0x10   :  { %76 = dma.hbm_to_vmem [thread:$0]  %s72_s15, 64, %s74_s16, [#allocation11]  }
  0x11   :  { %5277 = dma.done.wait [#allocation5], 4096  }
  0x12   :  { %5278 = vsyncadd [#allocation5], 4294963200 }
  0x13   :  { %5279 = dma.done.wait [#allocation8], 16384  }
  0x14   :  { %5280 = vsyncadd [#allocation8], 4294950912 }
  0x15   :  { %5281 = dma.done.wait [#allocation11], 8256  }
  0x16   :  { %5282 = vsyncadd [#allocation11], 4294959040  ;;  %v5339_v0 = vld [vmem:[#allocation7 + $0x1e0] sm:$0xff]  ;;  %v5341_v1 = vld [vmem:[#allocation7 + $0x1e8] sm:$0xff]  ;;  %v6515_v61 = vmov 0.0   ;;  %s5293_s2 = smov [#allocation13]  }
  0x17   :  { %v5343_v2 = vld [vmem:[#allocation7 + $0x1f8] sm:$0xff]  ;;  %175 = vmatpush.msra.mxu0 %v5339_v0  ;;  %195 = vmatpush.msra.mxu1 %v5341_v1  ;;  %v5347_v3 = vld [vmem:[#allocation7 + $0x1c0] sm:$0xff]  ;;  %v5349_v4 = vld [vmem:[#allocation7 + $0x1c8] sm:$0xff]  ;;  %s4726_s4 = sshll.u32 %s5293_s2, 4  ;;  %s4728_s19 = sshll.u32 %s6508_s5, 4  ;;  %s4727_s4 = int_to_ptr.vmem [resolvable:$true] %s4726_s4  ;;  %s4729_s19 = int_to_ptr.hbm [resolvable:$true] %s4728_s19 }
  0x18   :  { %v5351_v5 = vld [vmem:[#allocation7 + $0x1d8] sm:$0xff]  ;;  %235 = vmatpush.msra.mxu3 %v5343_v2  ;;  %v5354_v6 = vld [vmem:[#allocation7 + $0x1a0] sm:$0xff]  ;;  %v5356_v7 = vld [vmem:[#allocation7 + $0x1a8] sm:$0xff] }
  0x19   :  { %176 = vmatpush.msra.mxu0 %v5347_v3  ;;  %196 = vmatpush.msra.mxu1 %v5349_v4  ;;  %v5360_v8 = vld [vmem:[#allocation7 + $0x1b8] sm:$0xff]  ;;  %v5363_v9 = vld [vmem:[#allocation7 + $0x180] sm:$0xff]  ;;  %v5365_v10 = vld [vmem:[#allocation7 + $0x188] sm:$0xff] }
  0x1a   :  { %236 = vmatpush.msra.mxu3 %v5351_v5  ;;  %v5369_v11 = vld [vmem:[#allocation7 + $0x198] sm:$0xff]  ;;  %v5372_v12 = vld [vmem:[#allocation7 + $0x160] sm:$0xff]  ;;  %v5374_v13 = vld [vmem:[#allocation7 + $0x168] sm:$0xff] }
  0x1b   :  { %177 = vmatpush.msra.mxu0 %v5354_v6  ;;  %197 = vmatpush.msra.mxu1 %v5356_v7  ;;  %v5378_v14 = vld [vmem:[#allocation7 + $0x178] sm:$0xff]  ;;  %v5381_v15 = vld [vmem:[#allocation7 + $0x140] sm:$0xff]  ;;  %v5383_v16 = vld [vmem:[#allocation7 + $0x148] sm:$0xff] }
  0x1c   :  { %237 = vmatpush.msra.mxu3 %v5360_v8  ;;  %v5385_v17 = vld [vmem:[#allocation7 + $0x1f0] sm:$0xff]  ;;  %v5389_v18 = vld [vmem:[#allocation7 + $0x158] sm:$0xff]  ;;  %v5394_v20 = vld [vmem:[#allocation7 + $0x120] sm:$0xff] }
  0x1d   :  { %178 = vmatpush.msra.mxu0 %v5363_v9  ;;  %198 = vmatpush.msra.mxu1 %v5365_v10  ;;  %v5391_v19 = vld [vmem:[#allocation7 + $0x1d0] sm:$0xff]  ;;  %v5396_v21 = vld [vmem:[#allocation7 + $0x128] sm:$0xff]  ;;  %v5401_v22 = vld [vmem:[#allocation7 + $0x138] sm:$0xff] }
  0x1e   :  { %238 = vmatpush.msra.mxu3 %v5369_v11  ;;  %215 = vmatpush.msra.mxu2 %v5385_v17  ;;  %v5403_v23 = vld [vmem:[#allocation7 + $0x1b0] sm:$0xff]  ;;  %v5406_v24 = vld [vmem:[#allocation7 + $0x100] sm:$0xff]  ;;  %v5408_v25 = vld [vmem:[#allocation7 + $0x108] sm:$0xff] }
  0x1f   :  { %179 = vmatpush.msra.mxu0 %v5372_v12  ;;  %199 = vmatpush.msra.mxu1 %v5374_v13  ;;  %v5413_v26 = vld [vmem:[#allocation7 + $0x118] sm:$0xff]  ;;  %v5415_v27 = vld [vmem:[#allocation7 + $0x190] sm:$0xff]  ;;  %v5418_v28 = vld [vmem:[#allocation7 + $0xe0] sm:$0xff] }
  0x20   :  { %239 = vmatpush.msra.mxu3 %v5378_v14  ;;  %216 = vmatpush.msra.mxu2 %v5391_v19  ;;  %v5420_v29 = vld [vmem:[#allocation7 + $0xe8] sm:$0xff]  ;;  %v5425_v30 = vld [vmem:[#allocation7 + $0xf8] sm:$0xff]  ;;  %v5427_v31 = vld [vmem:[#allocation7 + $0x170] sm:$0xff] }
  0x21   :  { %180 = vmatpush.msra.mxu0 %v5381_v15  ;;  %200 = vmatpush.msra.mxu1 %v5383_v16  ;;  %v5430_v32 = vld [vmem:[#allocation7 + $0xc0] sm:$0xff]  ;;  %v5432_v33 = vld [vmem:[#allocation7 + $0xc8] sm:$0xff]  ;;  %v5437_v34 = vld [vmem:[#allocation7 + $0xd8] sm:$0xff] }
  0x22   :  { %240 = vmatpush.msra.mxu3 %v5389_v18  ;;  %217 = vmatpush.msra.mxu2 %v5403_v23  ;;  %v5439_v35 = vld [vmem:[#allocation7 + $0x150] sm:$0xff]  ;;  %v5442_v36 = vld [vmem:[#allocation7 + $0xa0] sm:$0xff]  ;;  %v5444_v37 = vld [vmem:[#allocation7 + $0xa8] sm:$0xff] }
  0x23   :  { %181 = vmatpush.msra.mxu0 %v5394_v20  ;;  %201 = vmatpush.msra.mxu1 %v5396_v21  ;;  %v5449_v38 = vld [vmem:[#allocation7 + $0xb8] sm:$0xff]  ;;  %v5451_v39 = vld [vmem:[#allocation7 + $0x130] sm:$0xff]  ;;  %v5454_v40 = vld [vmem:[#allocation7 + $0x80] sm:$0xff] }
  0x24   :  { %241 = vmatpush.msra.mxu3 %v5401_v22  ;;  %218 = vmatpush.msra.mxu2 %v5415_v27  ;;  %v5456_v41 = vld [vmem:[#allocation7 + $0x88] sm:$0xff]  ;;  %v5461_v42 = vld [vmem:[#allocation7 + $0x98] sm:$0xff]  ;;  %v5463_v43 = vld [vmem:[#allocation7 + $0x110] sm:$0xff] }
  0x25   :  { %182 = vmatpush.msra.mxu0 %v5406_v24  ;;  %202 = vmatpush.msra.mxu1 %v5408_v25  ;;  %6572 = vst [vmem:[#allocation18_spill] sm:$0xff] %v5461_v42  ;;  %v5466_v44 = vld [vmem:[#allocation7 + $0x60] sm:$0xff]  ;;  %v5468_v45 = vld [vmem:[#allocation7 + $0x68] sm:$0xff]  ;;  %v5473_v46 = vld [vmem:[#allocation7 + $0x78] sm:$0xff] }
  0x26   :  { %242 = vmatpush.msra.mxu3 %v5413_v26  ;;  %219 = vmatpush.msra.mxu2 %v5427_v31  ;;  %6573 = vst [vmem:[#allocation19_spill] sm:$0xff] %v5466_v44  ;;  %v5475_v47 = vld [vmem:[#allocation7 + $0xf0] sm:$0xff]  ;;  %v5478_v48 = vld [vmem:[#allocation7 + $0x40] sm:$0xff]  ;;  %v5480_v49 = vld [vmem:[#allocation7 + $0x48] sm:$0xff] }
  0x27   :  { %183 = vmatpush.msra.mxu0 %v5418_v28  ;;  %203 = vmatpush.msra.mxu1 %v5420_v29  ;;  %6574 = vst [vmem:[#allocation20_spill] sm:$0xff] %v5468_v45  ;;  %v5485_v50 = vld [vmem:[#allocation7 + $0x58] sm:$0xff]  ;;  %v5487_v51 = vld [vmem:[#allocation7 + $0xd0] sm:$0xff]  ;;  %v5490_v52 = vld [vmem:[#allocation7 + $0x20] sm:$0xff] }
  0x28   :  { %243 = vmatpush.msra.mxu3 %v5425_v30  ;;  %220 = vmatpush.msra.mxu2 %v5439_v35  ;;  %6575 = vst [vmem:[#allocation21_spill] sm:$0xff] %v5473_v46  ;;  %v5492_v53 = vld [vmem:[#allocation7 + $0x28] sm:$0xff]  ;;  %v5497_v54 = vld [vmem:[#allocation7 + $0x38] sm:$0xff]  ;;  %v5499_v55 = vld [vmem:[#allocation7 + $0xb0] sm:$0xff] }
  0x29   :  { %184 = vmatpush.msra.mxu0 %v5430_v32  ;;  %204 = vmatpush.msra.mxu1 %v5432_v33  ;;  %6576 = vst [vmem:[#allocation22_spill] sm:$0xff] %v5478_v48  ;;  %v5502_v56 = vld [vmem:[#allocation7] sm:$0xff]  ;;  %v5504_v57 = vld [vmem:[#allocation7 + $0x8] sm:$0xff]  ;;  %v5509_v58 = vld [vmem:[#allocation7 + $0x18] sm:$0xff] }
  0x2a   :  { %244 = vmatpush.msra.mxu3 %v5437_v34  ;;  %221 = vmatpush.msra.mxu2 %v5451_v39  ;;  %6577 = vst [vmem:[#allocation23_spill] sm:$0xff] %v5480_v49  ;;  %v5515_v59 = vld [vmem:[#allocation7 + $0x90] sm:$0xff]  ;;  %v5517_v60 = vld [vmem:[#allocation10 + $0x1e0] sm:$0xff]  ;;  %v5521_v62 = vld [vmem:[#allocation10 + $0x1e8] sm:$0xff] }
  0x2b   :  { %185 = vmatpush.msra.mxu0 %v5442_v36  ;;  %205 = vmatpush.msra.mxu1 %v5444_v37  ;;  %6578 = vst [vmem:[#allocation24_spill] sm:$0xff] %v5485_v50  ;;  %v5523_v63 = vld [vmem:[#allocation10 + $0x1f8] sm:$0xff] }
  0x2c   :  { %245 = vmatpush.msra.mxu3 %v5449_v38  ;;  %222 = vmatpush.msra.mxu2 %v5463_v43  ;;  %6579 = vst [vmem:[#allocation25_spill] sm:$0xff] %v5490_v52 }
  0x2d   :  { %186 = vmatpush.msra.mxu0 %v5454_v40  ;;  %206 = vmatpush.msra.mxu1 %v5456_v41  ;;  %6580 = vst [vmem:[#allocation26_spill] sm:$0xff] %v5492_v53 }
  0x2e   :  { %246 = vmatpush.msra.mxu3 %v5461_v42  ;;  %223 = vmatpush.msra.mxu2 %v5475_v47  ;;  %6581 = vst [vmem:[#allocation27_spill] sm:$0xff] %v5497_v54  ;;  %v380_v42 = vld [vmem:[#allocation9 + $0x1d8] sm:$0xff] }
  0x2f   :  { %187 = vmatpush.msra.mxu0 %v5466_v44  ;;  %207 = vmatpush.msra.mxu1 %v5468_v45  ;;  %6582 = vst [vmem:[#allocation28_spill] sm:$0xff] %v5502_v56  ;;  %v396_v45 = vld [vmem:[#allocation10 + $0x48] sm:$0xff]  ;;  %v5663_v44 = vld [vmem:[#allocation10 + $0xb0] sm:$0xff] }
  0x30   :  { %247 = vmatpush.msra.mxu3 %v5473_v46  ;;  %6583 = vst [vmem:[#allocation29_spill] sm:$0xff] %v5504_v57  ;;  %224 = vmatpush.msra.mxu2 %v5487_v51  ;;  %v5611_v46 = vld [vmem:[#allocation10 + $0x118] sm:$0xff] }
  0x31   :  { %188 = vmatpush.msra.mxu0 %v5478_v48  ;;  %208 = vmatpush.msra.mxu1 %v5480_v49  ;;  %6584 = vst [vmem:[#allocation30_spill] sm:$0xff] %v5509_v58  ;;  %v5553_v49 = vld [vmem:[#allocation10 + $0x180] sm:$0xff] }
  0x32   :  { %248 = vmatpush.msra.mxu3 %v5485_v50  ;;  %225 = vmatpush.msra.mxu2 %v5499_v55  ;;  %6585 = vst [vmem:[#allocation31_spill] sm:$0xff] %v5517_v60  ;;  %v5547_v50 = vld [vmem:[#allocation10 + $0x1b8] sm:$0xff]  ;;  %v5565_v48 = vld [vmem:[#allocation10 + $0x160] sm:$0xff] }
  0x33   :  { %189 = vmatpush.msra.mxu0 %v5490_v52  ;;  %209 = vmatpush.msra.mxu1 %v5492_v53  ;;  %6586 = vst [vmem:[#allocation32_spill] sm:$0xff] %v5521_v62  ;;  %v5537_v53 = vld [vmem:[#allocation7 + $0x50] sm:$0xff]  ;;  %v5541_v52 = vld [vmem:[#allocation10 + $0x1a0] sm:$0xff] }
  0x34   :  { %249 = vmatpush.msra.mxu3 %v5497_v54  ;;  %6587 = vst [vmem:[#allocation33_spill] sm:$0xff] %v5523_v63  ;;  %226 = vmatpush.msra.mxu2 %v5515_v59  ;;  %v5535_v54 = vld [vmem:[#allocation10 + $0x1d8] sm:$0xff] }
  0x35   :  { %190 = vmatpush.msra.mxu0 %v5502_v56  ;;  %210 = vmatpush.msra.mxu1 %v5504_v57  ;;  %v5527_v56 = vld [vmem:[#allocation7 + $0x70] sm:$0xff]  ;;  %v5529_v57 = vld [vmem:[#allocation10 + $0x1c0] sm:$0xff]  ;;  %6591 = vst [vmem:[#allocation37_spill] sm:$0xff] %v5535_v54 }
  0x36   :  { %250 = vmatpush.msra.mxu3 %v5509_v58  ;;  %191 = vmatmul.f32.vlgmr.msra.gmra.mxu0 %v6515_v61  ;;  %6588 = vst [vmem:[#allocation34_spill] sm:$0xff] %v5527_v56  ;;  %v5533_v58 = vld [vmem:[#allocation10 + $0x1c8] sm:$0xff] }
  0x37   :  { %211 = vmatmul.f32.vlgmr.msra.gmra.mxu1 %v6515_v61  ;;  %251 = vmatmul.f32.vlgmr.msra.gmra.mxu3 %v6515_v61  ;;  %6589 = vst [vmem:[#allocation35_spill] sm:$0xff] %v5529_v57  ;;  %v5545_v61 = vld [vmem:[#allocation10 + $0x1a8] sm:$0xff] }
  0x38   :  { %451 = vmatpush.msrb.mxu0 %v5517_v60  ;;  %6590 = vst [vmem:[#allocation36_spill] sm:$0xff] %v5533_v58  ;;  %471 = vmatpush.msrb.mxu1 %v5521_v62  ;;  %v5549_v60 = vld [vmem:[#allocation7 + $0x30] sm:$0xff]  ;;  %v5559_v62 = vld [vmem:[#allocation10 + $0x198] sm:$0xff] }
  0x39   :  { %6592 = vst [vmem:[#allocation38_spill] sm:$0xff] %v5537_v53  ;;  %511 = vmatpush.msrb.mxu3 %v5523_v63  ;;  %227 = vmatpush.msra.mxu2 %v5527_v56  ;;  %v5557_v63 = vld [vmem:[#allocation10 + $0x188] sm:$0xff]  ;;  %v5657_v56 = vld [vmem:[#allocation10 + $0xf0] sm:$0xff] }
  0x3a   :  { %6593 = vst [vmem:[#allocation39_spill] sm:$0xff] %v5541_v52  ;;  %452 = vmatpush.msrb.mxu0 %v5529_v57  ;;  %472 = vmatpush.msrb.mxu1 %v5533_v58  ;;  %v5561_v57 = vld [vmem:[#allocation7 + $0x10] sm:$0xff] }
  0x3b   :  { %6594 = vst [vmem:[#allocation40_spill] sm:$0xff] %v5545_v61  ;;  %512 = vmatpush.msrb.mxu3 %v5535_v54  ;;  %228 = vmatpush.msra.mxu2 %v5537_v53  ;;  %v5569_v54 = vld [vmem:[#allocation10 + $0x168] sm:$0xff]  ;;  %v5571_v58 = vld [vmem:[#allocation10 + $0x1f0] sm:$0xff]  ;;  %v5587_v53 = vld [vmem:[#allocation10 + $0x158] sm:$0xff] }
  0x3c   :  { %6595 = vst [vmem:[#allocation41_spill] sm:$0xff] %v5547_v50  ;;  %453 = vmatpush.msrb.mxu0 %v5541_v52  ;;  %473 = vmatpush.msrb.mxu1 %v5545_v61  ;;  %v5575_v52 = vld [vmem:[#allocation10 + $0x178] sm:$0xff]  ;;  %v5581_v61 = vld [vmem:[#allocation10 + $0x148] sm:$0xff] }
  0x3d   :  { %6596 = vst [vmem:[#allocation42_spill] sm:$0xff] %v5549_v60  ;;  %513 = vmatpush.msrb.mxu3 %v5547_v50  ;;  %229 = vmatpush.msra.mxu2 %v5549_v60  ;;  %v5579_v50 = vld [vmem:[#allocation10 + $0x140] sm:$0xff]  ;;  %v6607_v60 = vmov 0.0  }
  0x3e   :  { %6597 = vst [vmem:[#allocation43_spill] sm:$0xff] %v5553_v49  ;;  %454 = vmatpush.msrb.mxu0 %v5553_v49  ;;  %474 = vmatpush.msrb.mxu1 %v5557_v63  ;;  %v5584_v49 = vld [vmem:[#allocation10 + $0x1d0] sm:$0xff] }
  0x3f   :  { %6598 = vst [vmem:[#allocation44_spill] sm:$0xff] %v5557_v63  ;;  %514 = vmatpush.msrb.mxu3 %v5559_v62  ;;  %230 = vmatpush.msra.mxu2 %v5561_v57  ;;  %v5593_v63 = vld [vmem:[#allocation10 + $0x128] sm:$0xff] }
  0x40   :  { %6599 = vst [vmem:[#allocation45_spill] sm:$0xff] %v5559_v62  ;;  %455 = vmatpush.msrb.mxu0 %v5565_v48  ;;  %231 = vmatmul.f32.vlgmr.msra.gmra.mxu2 %v6607_v60  ;;  %v5591_v62 = vld [vmem:[#allocation10 + $0x120] sm:$0xff] }
  0x41   :  { %6600 = vst [vmem:[#allocation46_spill] sm:$0xff] %v5561_v57  ;;  %475 = vmatpush.msrb.mxu1 %v5569_v54  ;;  %491 = vmatpush.msrb.mxu2 %v5571_v58  ;;  %v5599_v57 = vld [vmem:[#allocation10 + $0x138] sm:$0xff] }
  0x42   :  { %6601 = vst [vmem:[#allocation47_spill] sm:$0xff] %v5565_v48  ;;  %515 = vmatpush.msrb.mxu3 %v5575_v52  ;;  %v5595_v48 = vld [vmem:[#allocation10 + $0x1b0] sm:$0xff]  ;;  %456 = vmatpush.msrb.mxu0 %v5579_v50 }
  0x43   :  { %6602 = vst [vmem:[#allocation48_spill] sm:$0xff] %v5569_v54  ;;  %476 = vmatpush.msrb.mxu1 %v5581_v61  ;;  %492 = vmatpush.msrb.mxu2 %v5584_v49  ;;  %v5603_v54 = vld [vmem:[#allocation10 + $0x100] sm:$0xff] }
  0x44   :  { %6603 = vst [vmem:[#allocation49_spill] sm:$0xff] %v5571_v58  ;;  %516 = vmatpush.msrb.mxu3 %v5587_v53  ;;  %v5605_v58 = vld [vmem:[#allocation10 + $0x108] sm:$0xff]  ;;  %457 = vmatpush.msrb.mxu0 %v5591_v62 }
  0x45   :  { %6604 = vst [vmem:[#allocation50_spill] sm:$0xff] %v5575_v52  ;;  %v5607_v52 = vld [vmem:[#allocation10 + $0x190] sm:$0xff]  ;;  %477 = vmatpush.msrb.mxu1 %v5593_v63  ;;  %493 = vmatpush.msrb.mxu2 %v5595_v48 }
  0x46   :  { %6605 = vst [vmem:[#allocation51_spill] sm:$0xff] %v5579_v50  ;;  %517 = vmatpush.msrb.mxu3 %v5599_v57  ;;  %v5617_v50 = vld [vmem:[#allocation10 + $0xe8] sm:$0xff]  ;;  %458 = vmatpush.msrb.mxu0 %v5603_v54 }
  0x47   :  { %6606 = vst [vmem:[#allocation52_spill] sm:$0xff] %v5581_v61  ;;  %v5615_v61 = vld [vmem:[#allocation10 + $0xe0] sm:$0xff]  ;;  %478 = vmatpush.msrb.mxu1 %v5605_v58  ;;  %494 = vmatpush.msrb.mxu2 %v5607_v52 }
  0x48   :  { %6608 = vst [vmem:[#allocation53_spill] sm:$0xff] %v5584_v49  ;;  %v5623_v49 = vld [vmem:[#allocation10 + $0xf8] sm:$0xff]  ;;  %518 = vmatpush.msrb.mxu3 %v5611_v46  ;;  %459 = vmatpush.msrb.mxu0 %v5615_v61 }
  0x49   :  { %6609 = vst [vmem:[#allocation54_spill] sm:$0xff] %v5587_v53  ;;  %v5619_v53 = vld [vmem:[#allocation10 + $0x170] sm:$0xff]  ;;  %479 = vmatpush.msrb.mxu1 %v5617_v50 }
  0x4a   :  { %6610 = vst [vmem:[#allocation55_spill] sm:$0xff] %v5591_v62  ;;  %v5629_v62 = vld [vmem:[#allocation10 + $0xc8] sm:$0xff]  ;;  %495 = vmatpush.msrb.mxu2 %v5619_v53  ;;  %519 = vmatpush.msrb.mxu3 %v5623_v49 }
  0x4b   :  { %6611 = vst [vmem:[#allocation56_spill] sm:$0xff] %v5593_v63  ;;  %v5627_v63 = vld [vmem:[#allocation10 + $0xc0] sm:$0xff]  ;;  %480 = vmatpush.msrb.mxu1 %v5629_v62 }
  0x4c   :  { %6612 = vst [vmem:[#allocation57_spill] sm:$0xff] %v5595_v48  ;;  %v5635_v48 = vld [vmem:[#allocation10 + $0xd8] sm:$0xff]  ;;  %460 = vmatpush.msrb.mxu0 %v5627_v63 }
  0x4d   :  { %6613 = vst [vmem:[#allocation58_spill] sm:$0xff] %v5599_v57  ;;  %v5631_v57 = vld [vmem:[#allocation10 + $0x150] sm:$0xff]  ;;  %520 = vmatpush.msrb.mxu3 %v5635_v48 }
  0x4e   :  { %6614 = vst [vmem:[#allocation59_spill] sm:$0xff] %v5603_v54  ;;  %v5641_v54 = vld [vmem:[#allocation10 + $0xa8] sm:$0xff]  ;;  %496 = vmatpush.msrb.mxu2 %v5631_v57 }
  0x4f   :  { %6615 = vst [vmem:[#allocation60_spill] sm:$0xff] %v5605_v58  ;;  %v5639_v58 = vld [vmem:[#allocation10 + $0xa0] sm:$0xff]  ;;  %481 = vmatpush.msrb.mxu1 %v5641_v54 }
  0x50   :  { %6616 = vst [vmem:[#allocation61_spill] sm:$0xff] %v5607_v52  ;;  %v5647_v52 = vld [vmem:[#allocation10 + $0xb8] sm:$0xff]  ;;  %461 = vmatpush.msrb.mxu0 %v5639_v58 }
  0x51   :  { %6617 = vst [vmem:[#allocation62_spill] sm:$0xff] %v5611_v46  ;;  %v5643_v46 = vld [vmem:[#allocation10 + $0x130] sm:$0xff]  ;;  %521 = vmatpush.msrb.mxu3 %v5647_v52 }
  0x52   :  { %6618 = vst [vmem:[#allocation63_spill] sm:$0xff] %v5615_v61  ;;  %v404_v61 = vld [vmem:[#allocation10 + $0x88] sm:$0xff]  ;;  %497 = vmatpush.msrb.mxu2 %v5643_v46 }
  0x53   :  { %6619 = vst [vmem:[#allocation64_spill] sm:$0xff] %v5617_v50  ;;  %v403_v50 = vld [vmem:[#allocation10 + $0x80] sm:$0xff]  ;;  %482 = vmatpush.msrb.mxu1 %v404_v61  ;;  %v388_v61 = vld [vmem:[#allocation10 + $0x8] sm:$0xff] }
  0x54   :  { %6620 = vst [vmem:[#allocation65_spill] sm:$0xff] %v5619_v53  ;;  %v5651_v53 = vld [vmem:[#allocation10 + $0x110] sm:$0xff]  ;;  %462 = vmatpush.msrb.mxu0 %v403_v50  ;;  %v394_v50 = vld [vmem:[#allocation10 + $0x38] sm:$0xff] }
  0x55   :  { %6621 = vst [vmem:[#allocation66_spill] sm:$0xff] %v5623_v49  ;;  %v406_v49 = vld [vmem:[#allocation10 + $0x98] sm:$0xff]  ;;  %498 = vmatpush.msrb.mxu2 %v5651_v53 }
  0x56   :  { %6622 = vst [vmem:[#allocation67_spill] sm:$0xff] %v5627_v63  ;;  %v400_v63 = vld [vmem:[#allocation10 + $0x68] sm:$0xff]  ;;  %522 = vmatpush.msrb.mxu3 %v406_v49  ;;  %v387_v49 = vld [vmem:[#allocation10] sm:$0xff] }
  0x57   :  { %6623 = vst [vmem:[#allocation68_spill] sm:$0xff] %v5629_v62  ;;  %v399_v62 = vld [vmem:[#allocation10 + $0x60] sm:$0xff]  ;;  %483 = vmatpush.msrb.mxu1 %v400_v63  ;;  %499 = vmatpush.msrb.mxu2 %v5657_v56  ;;  %v382_v63 = vld [vmem:[#allocation9 + $0x1e8] sm:$0xff] }
  0x58   :  { %6624 = vst [vmem:[#allocation69_spill] sm:$0xff] %v5631_v57  ;;  %v395_v57 = vld [vmem:[#allocation10 + $0x40] sm:$0xff]  ;;  %463 = vmatpush.msrb.mxu0 %v399_v62  ;;  %v390_v62 = vld [vmem:[#allocation10 + $0x18] sm:$0xff] }
  0x59   :  { %6625 = vst [vmem:[#allocation70_spill] sm:$0xff] %v5635_v48  ;;  %v402_v48 = vld [vmem:[#allocation10 + $0x78] sm:$0xff]  ;;  %484 = vmatpush.msrb.mxu1 %v396_v45  ;;  %v377_v45 = vld [vmem:[#allocation9 + $0x1c0] sm:$0xff] }
  0x5a   :  { %6626 = vst [vmem:[#allocation71_spill] sm:$0xff] %v5639_v58  ;;  %v5660_v58 = vld [vmem:[#allocation10 + $0xd0] sm:$0xff]  ;;  %523 = vmatpush.msrb.mxu3 %v402_v48  ;;  %464 = vmatpush.msrb.mxu0 %v395_v57  ;;  %v381_v48 = vld [vmem:[#allocation9 + $0x1e0] sm:$0xff]  ;;  %v384_v57 = vld [vmem:[#allocation9 + $0x1f8] sm:$0xff] }
  0x5b   :  { %6627 = vst [vmem:[#allocation72_spill] sm:$0xff] %v5641_v54  ;;  %v398_v54 = vld [vmem:[#allocation10 + $0x58] sm:$0xff]  ;;  %500 = vmatpush.msrb.mxu2 %v5660_v58 }
  0x5c   :  { %6628 = vst [vmem:[#allocation73_spill] sm:$0xff] %v5643_v46  ;;  %v392_v46 = vld [vmem:[#allocation10 + $0x28] sm:$0xff]  ;;  %524 = vmatpush.msrb.mxu3 %v398_v54  ;;  %v397_v54 = vld [vmem:[#allocation10 + $0x50] sm:$0xff] }
  0x5d   :  { %6629 = vst [vmem:[#allocation74_spill] sm:$0xff] %v5647_v52  ;;  %v391_v52 = vld [vmem:[#allocation10 + $0x20] sm:$0xff]  ;;  %485 = vmatpush.msrb.mxu1 %v392_v46  ;;  %501 = vmatpush.msrb.mxu2 %v5663_v44 }
  0x5e   :  { %6630 = vst [vmem:[#allocation75_spill] sm:$0xff] %v5651_v53  ;;  %v405_v53 = vld [vmem:[#allocation10 + $0x90] sm:$0xff]  ;;  %465 = vmatpush.msrb.mxu0 %v391_v52  ;;  %525 = vmatpush.msrb.mxu3 %v394_v50  ;;  %v373_v46 = vld [vmem:[#allocation9 + $0x1a0] sm:$0xff]  ;;  %v374_v52 = vld [vmem:[#allocation9 + $0x1a8] sm:$0xff] }
  0x5f   :  { %6631 = vst [vmem:[#allocation76_spill] sm:$0xff] %v5657_v56  ;;  %v401_v56 = vld [vmem:[#allocation10 + $0x70] sm:$0xff]  ;;  %486 = vmatpush.msrb.mxu1 %v388_v61  ;;  %502 = vmatpush.msrb.mxu2 %v405_v53  ;;  %v376_v50 = vld [vmem:[#allocation9 + $0x1b8] sm:$0xff]  ;;  %v370_v61 = vld [vmem:[#allocation9 + $0x188] sm:$0xff] }
  0x60   :  { %6632 = vst [vmem:[#allocation77_spill] sm:$0xff] %v5660_v58  ;;  %466 = vmatpush.msrb.mxu0 %v387_v49  ;;  %526 = vmatpush.msrb.mxu3 %v390_v62  ;;  %v378_v58 = vld [vmem:[#allocation9 + $0x1c8] sm:$0xff]  ;;  %v369_v49 = vld [vmem:[#allocation9 + $0x180] sm:$0xff]  ;;  %v389_v53 = vld [vmem:[#allocation10 + $0x10] sm:$0xff] }
  0x61   :  { %6633 = vst [vmem:[#allocation78_spill] sm:$0xff] %v5663_v44  ;;  %551 = vmatpush.msra.mxu1 %v382_v63  ;;  %503 = vmatpush.msrb.mxu2 %v401_v56  ;;  %v393_v44 = vld [vmem:[#allocation10 + $0x30] sm:$0xff]  ;;  %v372_v62 = vld [vmem:[#allocation9 + $0x198] sm:$0xff]  ;;  %v365_v63 = vld [vmem:[#allocation9 + $0x160] sm:$0xff] }
  0x62   :  { %531 = vmatpush.msra.mxu0 %v381_v48  ;;  %591 = vmatpush.msra.mxu3 %v384_v57  ;;  %v383_v48 = vld [vmem:[#allocation9 + $0x1f0] sm:$0xff]  ;;  %v366_v56 = vld [vmem:[#allocation9 + $0x168] sm:$0xff]  ;;  %v368_v57 = vld [vmem:[#allocation9 + $0x178] sm:$0xff] }
  0x63   :  { %552 = vmatpush.msra.mxu1 %v378_v58  ;;  %504 = vmatpush.msrb.mxu2 %v397_v54  ;;  %v371_v58 = vld [vmem:[#allocation9 + $0x190] sm:$0xff]  ;;  %v361_v54 = vld [vmem:[#allocation9 + $0x140] sm:$0xff] }
  0x64   :  { %532 = vmatpush.msra.mxu0 %v377_v45  ;;  %592 = vmatpush.msra.mxu3 %v380_v42  ;;  %v379_v45 = vld [vmem:[#allocation9 + $0x1d0] sm:$0xff] }
  0x65   :  { %553 = vmatpush.msra.mxu1 %v374_v52  ;;  %505 = vmatpush.msrb.mxu2 %v393_v44  ;;  %v375_v42 = vld [vmem:[#allocation9 + $0x1b0] sm:$0xff] }
  0x66   :  { %533 = vmatpush.msra.mxu0 %v373_v46  ;;  %593 = vmatpush.msra.mxu3 %v376_v50  ;;  %v367_v44 = vld [vmem:[#allocation9 + $0x170] sm:$0xff]  ;;  %v362_v46 = vld [vmem:[#allocation9 + $0x148] sm:$0xff]  ;;  %v364_v50 = vld [vmem:[#allocation9 + $0x158] sm:$0xff] }
  0x67   :  { %554 = vmatpush.msra.mxu1 %v370_v61  ;;  %506 = vmatpush.msrb.mxu2 %v389_v53  ;;  %v363_v52 = vld [vmem:[#allocation9 + $0x150] sm:$0xff]  ;;  %v358_v61 = vld [vmem:[#allocation9 + $0x128] sm:$0xff] }
  0x68   :  { %534 = vmatpush.msra.mxu0 %v369_v49  ;;  %594 = vmatpush.msra.mxu3 %v372_v62  ;;  %v357_v49 = vld [vmem:[#allocation9 + $0x120] sm:$0xff]  ;;  %v359_v53 = vld [vmem:[#allocation9 + $0x130] sm:$0xff]  ;;  %v360_v62 = vld [vmem:[#allocation9 + $0x138] sm:$0xff] }
  0x69   :  { %571 = vmatpush.msra.mxu2 %v383_v48  ;;  %555 = vmatpush.msra.mxu1 %v366_v56  ;;  %v354_v48 = vld [vmem:[#allocation9 + $0x108] sm:$0xff]  ;;  %v356_v56 = vld [vmem:[#allocation9 + $0x118] sm:$0xff] }
  0x6a   :  { %535 = vmatpush.msra.mxu0 %v365_v63  ;;  %595 = vmatpush.msra.mxu3 %v368_v57  ;;  %v355_v63 = vld [vmem:[#allocation9 + $0x110] sm:$0xff]  ;;  %v349_v57 = vld [vmem:[#allocation9 + $0xe0] sm:$0xff] }
  0x6b   :  { %572 = vmatpush.msra.mxu2 %v379_v45  ;;  %467 = vmatmul.f32.vlgmr.msrb.gmra.mxu0 %v6607_v60  ;;  %v350_v45 = vld [vmem:[#allocation9 + $0xe8] sm:$0xff] }
  0x6c   :  { %487 = vmatmul.f32.vlgmr.msrb.gmra.mxu1 %v6607_v60  ;;  %507 = vmatmul.f32.vlgmr.msrb.gmra.mxu2 %v6607_v60 }
  0x6d   :  { %573 = vmatpush.msra.mxu2 %v375_v42  ;;  %527 = vmatmul.f32.vlgmr.msrb.gmra.mxu3 %v6607_v60  ;;  %v353_v60 = vld [vmem:[#allocation9 + $0x100] sm:$0xff]  ;;  %v351_v42 = vld [vmem:[#allocation9 + $0xf0] sm:$0xff] }
  0x6e   :  { %536 = vmatpush.msra.mxu0 %v361_v54  ;;  %556 = vmatpush.msra.mxu1 %v362_v46  ;;  %v346_v54 = vld [vmem:[#allocation9 + $0xc8] sm:$0xff]  ;;  %v347_v46 = vld [vmem:[#allocation9 + $0xd0] sm:$0xff] }
  0x6f   :  { %574 = vmatpush.msra.mxu2 %v371_v58  ;;  %596 = vmatpush.msra.mxu3 %v364_v50  ;;  %v352_v58 = vld [vmem:[#allocation9 + $0xf8] sm:$0xff]  ;;  %v341_v50 = vld [vmem:[#allocation9 + $0xa0] sm:$0xff] }
  0x70   :  { %537 = vmatpush.msra.mxu0 %v357_v49  ;;  %557 = vmatpush.msra.mxu1 %v358_v61  ;;  %v342_v49 = vld [vmem:[#allocation9 + $0xa8] sm:$0xff]  ;;  %v343_v61 = vld [vmem:[#allocation9 + $0xb0] sm:$0xff] }
  0x71   :  { %575 = vmatpush.msra.mxu2 %v367_v44  ;;  %597 = vmatpush.msra.mxu3 %v360_v62  ;;  %v345_v44 = vld [vmem:[#allocation9 + $0xc0] sm:$0xff] }
  0x72   :  { %538 = vmatpush.msra.mxu0 %v353_v60  ;;  %558 = vmatpush.msra.mxu1 %v354_v48  ;;  %v337_v62 = vld [vmem:[#allocation9 + $0x80] sm:$0xff]  ;;  %v338_v60 = vld [vmem:[#allocation9 + $0x88] sm:$0xff]  ;;  %v339_v48 = vld [vmem:[#allocation9 + $0x90] sm:$0xff] }
  0x73   :  { %576 = vmatpush.msra.mxu2 %v363_v52  ;;  %598 = vmatpush.msra.mxu3 %v356_v56  ;;  %v348_v52 = vld [vmem:[#allocation9 + $0xd8] sm:$0xff]  ;;  %v333_v56 = vld [vmem:[#allocation9 + $0x60] sm:$0xff] }
  0x74   :  { %539 = vmatpush.msra.mxu0 %v349_v57  ;;  %559 = vmatpush.msra.mxu1 %v350_v45  ;;  %v334_v57 = vld [vmem:[#allocation9 + $0x68] sm:$0xff]  ;;  %v335_v45 = vld [vmem:[#allocation9 + $0x70] sm:$0xff] }
  0x75   :  { %577 = vmatpush.msra.mxu2 %v359_v53  ;;  %599 = vmatpush.msra.mxu3 %v352_v58  ;;  %v344_v53 = vld [vmem:[#allocation9 + $0xb8] sm:$0xff]  ;;  %v329_v58 = vld [vmem:[#allocation9 + $0x40] sm:$0xff] }
  0x76   :  { %540 = vmatpush.msra.mxu0 %v345_v44  ;;  %560 = vmatpush.msra.mxu1 %v346_v54  ;;  %v330_v44 = vld [vmem:[#allocation9 + $0x48] sm:$0xff]  ;;  %v331_v54 = vld [vmem:[#allocation9 + $0x50] sm:$0xff] }
  0x77   :  { %578 = vmatpush.msra.mxu2 %v355_v63  ;;  %600 = vmatpush.msra.mxu3 %v348_v52  ;;  %v340_v63 = vld [vmem:[#allocation9 + $0x98] sm:$0xff]  ;;  %v325_v52 = vld [vmem:[#allocation9 + $0x20] sm:$0xff] }
  0x78   :  { %541 = vmatpush.msra.mxu0 %v341_v50  ;;  %561 = vmatpush.msra.mxu1 %v342_v49  ;;  %v326_v50 = vld [vmem:[#allocation9 + $0x28] sm:$0xff]  ;;  %v327_v49 = vld [vmem:[#allocation9 + $0x30] sm:$0xff] }
  0x79   :  { %579 = vmatpush.msra.mxu2 %v351_v42  ;;  %601 = vmatpush.msra.mxu3 %v344_v53  ;;  %v336_v42 = vld [vmem:[#allocation9 + $0x78] sm:$0xff]  ;;  %v321_v53 = vld [vmem:[#allocation9] sm:$0xff] }
  0x7a   :  { %542 = vmatpush.msra.mxu0 %v337_v62  ;;  %562 = vmatpush.msra.mxu1 %v338_v60  ;;  %v322_v62 = vld [vmem:[#allocation9 + $0x8] sm:$0xff]  ;;  %v323_v60 = vld [vmem:[#allocation9 + $0x10] sm:$0xff] }
  0x7b   :  { %580 = vmatpush.msra.mxu2 %v347_v46  ;;  %602 = vmatpush.msra.mxu3 %v340_v63  ;;  %v332_v46 = vld [vmem:[#allocation9 + $0x58] sm:$0xff] }
  0x7c   :  { %543 = vmatpush.msra.mxu0 %v333_v56  ;;  %563 = vmatpush.msra.mxu1 %v334_v57 }
  0x7d   :  { %581 = vmatpush.msra.mxu2 %v343_v61  ;;  %603 = vmatpush.msra.mxu3 %v336_v42  ;;  %v328_v61 = vld [vmem:[#allocation9 + $0x38] sm:$0xff] }
  0x7e   :  { %544 = vmatpush.msra.mxu0 %v329_v58  ;;  %564 = vmatpush.msra.mxu1 %v330_v44 }
  0x7f   :  { %582 = vmatpush.msra.mxu2 %v339_v48  ;;  %604 = vmatpush.msra.mxu3 %v332_v46  ;;  %v324_v48 = vld [vmem:[#allocation9 + $0x18] sm:$0xff] }
  0x80   :  { %545 = vmatpush.msra.mxu0 %v325_v52  ;;  %565 = vmatpush.msra.mxu1 %v326_v50 }
  0x81   :  { %583 = vmatpush.msra.mxu2 %v335_v45  ;;  %605 = vmatpush.msra.mxu3 %v328_v61 }
  0x82   :  { %546 = vmatpush.msra.mxu0 %v321_v53  ;;  %566 = vmatpush.msra.mxu1 %v322_v62 }
  0x83   :  { %584 = vmatpush.msra.mxu2 %v331_v54  ;;  %606 = vmatpush.msra.mxu3 %v324_v48 }
  0x84   :  { %761 = vmatpush.msrb.mxu0 %v5339_v0  ;;  %781 = vmatpush.msrb.mxu1 %v5341_v1  ;;  %v171_v0 = vld [vmem:[#allocation4] sm:$0xff]  ;;  %v172_v1 = vld [vmem:[#allocation4 + $0x8] sm:$0xff] }
  0x85   :  { %585 = vmatpush.msra.mxu2 %v327_v49  ;;  %821 = vmatpush.msrb.mxu3 %v5343_v2 }
  0x86   :  { %762 = vmatpush.msrb.mxu0 %v5347_v3  ;;  %782 = vmatpush.msrb.mxu1 %v5349_v4 }
  0x87   :  { %586 = vmatpush.msra.mxu2 %v323_v60  ;;  %822 = vmatpush.msrb.mxu3 %v5351_v5 }
  0x88   :  { %763 = vmatpush.msrb.mxu0 %v5354_v6  ;;  %783 = vmatpush.msrb.mxu1 %v5356_v7 }
  0x89   :  { %801 = vmatpush.msrb.mxu2 %v5385_v17  ;;  %823 = vmatpush.msrb.mxu3 %v5360_v8  ;;  %v174_v8 = vld [vmem:[#allocation4 + $0x18] sm:$0xff]  ;;  %v173_v17 = vld [vmem:[#allocation4 + $0x10] sm:$0xff] }
  0x8a   :  { %764 = vmatpush.msrb.mxu0 %v5363_v9  ;;  %784 = vmatpush.msrb.mxu1 %v5365_v10 }
  0x8b   :  { %802 = vmatpush.msrb.mxu2 %v5391_v19  ;;  %824 = vmatpush.msrb.mxu3 %v5369_v11  ;;  %v6636_v19 = vld [vmem:[#allocation20_spill] sm:$0xff] }
  0x8c   :  { %765 = vmatpush.msrb.mxu0 %v5372_v12  ;;  %785 = vmatpush.msrb.mxu1 %v5374_v13 }
  0x8d   :  { %803 = vmatpush.msrb.mxu2 %v5403_v23  ;;  %825 = vmatpush.msrb.mxu3 %v5378_v14  ;;  %v6639_v23 = vld [vmem:[#allocation22_spill] sm:$0xff] }
  0x8e   :  { %766 = vmatpush.msrb.mxu0 %v5381_v15  ;;  %786 = vmatpush.msrb.mxu1 %v5383_v16  ;;  %v6634_v16 = vld [vmem:[#allocation18_spill] sm:$0xff] }
  0x8f   :  { %804 = vmatpush.msrb.mxu2 %v5415_v27  ;;  %826 = vmatpush.msrb.mxu3 %v5389_v18  ;;  %v6635_v18 = vld [vmem:[#allocation19_spill] sm:$0xff]  ;;  %v6641_v27 = vld [vmem:[#allocation38_spill] sm:$0xff] }
  0x90   :  { %767 = vmatpush.msrb.mxu0 %v5394_v20  ;;  %787 = vmatpush.msrb.mxu1 %v5396_v21  ;;  %v6637_v20 = vld [vmem:[#allocation34_spill] sm:$0xff]  ;;  %v6638_v21 = vld [vmem:[#allocation21_spill] sm:$0xff] }
  0x91   :  { %805 = vmatpush.msrb.mxu2 %v5427_v31  ;;  %827 = vmatpush.msrb.mxu3 %v5401_v22  ;;  %v6644_v31 = vld [vmem:[#allocation26_spill] sm:$0xff] }
  0x92   :  { %768 = vmatpush.msrb.mxu0 %v5406_v24  ;;  %788 = vmatpush.msrb.mxu1 %v5408_v25  ;;  %v6640_v24 = vld [vmem:[#allocation23_spill] sm:$0xff] }
  0x93   :  { %806 = vmatpush.msrb.mxu2 %v5439_v35  ;;  %828 = vmatpush.msrb.mxu3 %v5413_v26 }
  0x94   :  { %769 = vmatpush.msrb.mxu0 %v5418_v28  ;;  %789 = vmatpush.msrb.mxu1 %v5420_v29  ;;  %v6642_v28 = vld [vmem:[#allocation24_spill] sm:$0xff] }
  0x95   :  { %807 = vmatpush.msrb.mxu2 %v5451_v39  ;;  %829 = vmatpush.msrb.mxu3 %v5425_v30  ;;  %v6643_v30 = vld [vmem:[#allocation25_spill] sm:$0xff] }
  0x96   :  { %770 = vmatpush.msrb.mxu0 %v5430_v32  ;;  %790 = vmatpush.msrb.mxu1 %v5432_v33  ;;  %v6645_v33 = vld [vmem:[#allocation42_spill] sm:$0xff] }
  0x97   :  { %808 = vmatpush.msrb.mxu2 %v5463_v43  ;;  %830 = vmatpush.msrb.mxu3 %v5437_v34  ;;  %v6646_v34 = vld [vmem:[#allocation27_spill] sm:$0xff] }
  0x98   :  { %771 = vmatpush.msrb.mxu0 %v5442_v36  ;;  %791 = vmatpush.msrb.mxu1 %v5444_v37  ;;  %v6647_v37 = vld [vmem:[#allocation28_spill] sm:$0xff] }
  0x99   :  { %809 = vmatpush.msrb.mxu2 %v5475_v47  ;;  %831 = vmatpush.msrb.mxu3 %v5449_v38  ;;  %v6648_v38 = vld [vmem:[#allocation29_spill] sm:$0xff] }
  0x9a   :  { %772 = vmatpush.msrb.mxu0 %v5454_v40  ;;  %792 = vmatpush.msrb.mxu1 %v5456_v41  ;;  %v6649_v40 = vld [vmem:[#allocation46_spill] sm:$0xff] }
  0x9b   :  { %810 = vmatpush.msrb.mxu2 %v5487_v51  ;;  %832 = vmatpush.msrb.mxu3 %v6634_v16  ;;  %v6650_v41 = vld [vmem:[#allocation30_spill] sm:$0xff]  ;;  %v6657_v16 = vld [vmem:[#allocation53_spill] sm:$0xff] }
  0x9c   :  { %773 = vmatpush.msrb.mxu0 %v6635_v18  ;;  %793 = vmatpush.msrb.mxu1 %v6636_v19  ;;  %v6659_v18 = vld [vmem:[#allocation39_spill] sm:$0xff]  ;;  %v6660_v19 = vld [vmem:[#allocation40_spill] sm:$0xff] }
  0x9d   :  { %811 = vmatpush.msrb.mxu2 %v5499_v55  ;;  %833 = vmatpush.msrb.mxu3 %v6638_v21  ;;  %v6662_v21 = vld [vmem:[#allocation41_spill] sm:$0xff] }
  0x9e   :  { %774 = vmatpush.msrb.mxu0 %v6639_v23  ;;  %794 = vmatpush.msrb.mxu1 %v6640_v24  ;;  %v6664_v23 = vld [vmem:[#allocation44_spill] sm:$0xff]  ;;  %v6665_v24 = vld [vmem:[#allocation61_spill] sm:$0xff] }
  0x9f   :  { %812 = vmatpush.msrb.mxu2 %v5515_v59  ;;  %834 = vmatpush.msrb.mxu3 %v6642_v28  ;;  %v6669_v28 = vld [vmem:[#allocation65_spill] sm:$0xff] }
  0xa0   :  { %775 = vmatpush.msrb.mxu0 %v6643_v30  ;;  %795 = vmatpush.msrb.mxu1 %v6644_v31  ;;  %v6671_v30 = vld [vmem:[#allocation51_spill] sm:$0xff]  ;;  %v6672_v31 = vld [vmem:[#allocation52_spill] sm:$0xff] }
  0xa1   :  { %813 = vmatpush.msrb.mxu2 %v6637_v20  ;;  %835 = vmatpush.msrb.mxu3 %v6646_v34  ;;  %v6661_v20 = vld [vmem:[#allocation57_spill] sm:$0xff]  ;;  %v6675_v34 = vld [vmem:[#allocation55_spill] sm:$0xff] }
  0xa2   :  { %776 = vmatpush.msrb.mxu0 %v6647_v37  ;;  %796 = vmatpush.msrb.mxu1 %v6648_v38  ;;  %v6678_v37 = vld [vmem:[#allocation58_spill] sm:$0xff]  ;;  %v6679_v38 = vld [vmem:[#allocation59_spill] sm:$0xff] }
  0xa3   :  { %814 = vmatpush.msrb.mxu2 %v6641_v27  ;;  %836 = vmatpush.msrb.mxu3 %v6650_v41  ;;  %v6668_v27 = vld [vmem:[#allocation48_spill] sm:$0xff]  ;;  %v6682_v41 = vld [vmem:[#allocation62_spill] sm:$0xff] }
  0xa5   :  { %815 = vmatpush.msrb.mxu2 %v6645_v33  ;;  %v6674_v33 = vld [vmem:[#allocation54_spill] sm:$0xff] }
  0xa7   :  { %816 = vmatpush.msrb.mxu2 %v6649_v40  ;;  %v6681_v40 = vld [vmem:[#allocation75_spill] sm:$0xff] }
  0xb3   :  { %v192_v2 = vpop.f32.mrf.mxu0 }
  0xb4   :  { %v193_v3 = vadd.f32 %v192_v2, %v171_v0  ;;  %v212_v4 = vpop.f32.mrf.mxu1 }
  0xb5   :  { %v213_v5 = vadd.f32 %v212_v4, %v172_v1 }
  0xb6   :  { %v4740_v6 = vmul.f32 -1.442695, %v193_v3 }
  0xb7   :  { %v4741_v7 = vmul.f32 -1.442695, %v213_v5 }
  0xb8   :  { %4797 = vpow2.f32 %v4740_v6 }
  0xb9   :  { %4799 = vpow2.f32 %v4741_v7 }
  0xba   :  { %v252_v9 = vpop.f32.mrf.mxu3 }
  0xbb   :  { %v253_v10 = vadd.f32 %v252_v9, %v174_v8 }
  0xbd   :  { %v4742_v11 = vmul.f32 -1.442695, %v253_v10  ;;  %v6651_v10 = vld [vmem:[#allocation31_spill] sm:$0xff] }
  0xbe   :  { %v4798_v12 = vpop.eup %4797 }
  0xbf   :  { %v4800_v13 = vpop.eup %4799  ;;  %v259_v14 = vadd.f32 1.0, %v4798_v12  ;;  %4801 = vpow2.f32 %v4742_v11  ;;  %v6652_v11 = vld [vmem:[#allocation32_spill] sm:$0xff]  ;;  %v6653_v12 = vld [vmem:[#allocation49_spill] sm:$0xff] }
  0xc0   :  { %v278_v15 = vadd.f32 1.0, %v4800_v13  ;;  %v6654_v13 = vld [vmem:[#allocation33_spill] sm:$0xff] }
  0xc1   :  { %4803 = vrcp.f32 %v259_v14  ;;  %v271_v51 = vand.u32 2147483648, %v259_v14  ;;  %v269_v63 = vand.u32 2147483647, %v259_v14  ;;  %vm265_vm2 = vweird.f32 %v259_v14 }
  0xc2   :  { %4805 = vrcp.f32 %v278_v15  ;;  %v290_v55 = vand.u32 2147483648, %v278_v15  ;;  %v288_v57 = vand.u32 2147483647, %v278_v15  ;;  %vm284_vm3 = vweird.f32 %v278_v15 }
  0xc3   :  { %v232_v22 = vpop.f32.mrf.mxu2  ;;  %v272_v54 = vor.u32 1.1754944e-38, %v271_v51  ;;  %vm270_vm5 = vcmp.eq.f32.partialorder %v269_v63, 8.507059e+37  ;;  %v6685_v51 = vld [vmem:[#allocation76_spill] sm:$0xff] }
  0xc4   :  { %v233_v26 = vadd.f32 %v232_v22, %v173_v17  ;;  %v291_v52 = vor.u32 1.1754944e-38, %v290_v55  ;;  %vm289_vm7 = vcmp.eq.f32.partialorder %v288_v57, 8.507059e+37  ;;  %v6658_v17 = vld [vmem:[#allocation37_spill] sm:$0xff]  ;;  %v6663_v22 = vld [vmem:[#allocation43_spill] sm:$0xff]  ;;  %v6686_v55 = vld [vmem:[#allocation66_spill] sm:$0xff] }
  0xc5   :  { %v4802_v25 = vpop.eup %4801  ;;  %v6688_v63 = vld [vmem:[#allocation68_spill] sm:$0xff]  ;;  %v6690_v57 = vld [vmem:[#allocation70_spill] sm:$0xff] }
  0xc6   :  { %v298_v29 = vadd.f32 1.0, %v4802_v25  ;;  %v6666_v25 = vld [vmem:[#allocation45_spill] sm:$0xff] }
  0xc7   :  { %v4804_v32 = vpop.eup %4803 }
  0xc8   :  { %v4806_v35 = vpop.eup %4805  ;;  %v261_v36 = vmul.f32 %v4804_v32, %v259_v14  ;;  %4807 = vrcp.f32 %v298_v29  ;;  %vm266_vm0 = vweird.f32 %v4804_v32  ;;  %v310_v3 = vand.u32 2147483648, %v298_v29  ;;  %v6655_v14 = vld [vmem:[#allocation35_spill] sm:$0xff] }
  0xc9   :  { %v280_v39 = vmul.f32 %v4806_v35, %v278_v15  ;;  %4809 = vtanh.f32 %v233_v26  ;;  %vm285_vm1 = vweird.f32 %v4806_v35  ;;  %vm267_vm4 = vmor %vm265_vm2, %vm266_vm0  ;;  %vm304_vm9 = vweird.f32 %v298_v29  ;;  %v6656_v15 = vld [vmem:[#allocation36_spill] sm:$0xff]  ;;  %v6667_v26 = vld [vmem:[#allocation47_spill] sm:$0xff] }
  0xca   :  { %v262_v43 = vsub.f32 1.0, %v261_v36  ;;  %vm286_vm6 = vmor %vm284_vm3, %vm285_vm1  ;;  %v308_v4 = vand.u32 2147483647, %v298_v29  ;;  %v311_v6 = vor.u32 1.1754944e-38, %v310_v3  ;;  %v6677_v36 = vld [vmem:[#allocation73_spill] sm:$0xff] }
  0xcb   :  { %v281_v47 = vsub.f32 1.0, %v280_v39  ;;  %v6680_v39 = vld [vmem:[#allocation60_spill] sm:$0xff] }
  0xcc   :  { %v263_v59 = vmul.f32 %v4804_v32, %v262_v43  ;;  %vm309_vm11 = vcmp.eq.f32.partialorder %v308_v4, 8.507059e+37  ;;  %v6683_v43 = vld [vmem:[#allocation63_spill] sm:$0xff]  ;;  %v976_v3 = vld [vmem:[#allocation10 + $0x20] sm:$0xff]  ;;  %v977_v4 = vld [vmem:[#allocation10 + $0x28] sm:$0xff] }
  0xcd   :  { %v282_v56 = vmul.f32 %v4806_v35, %v281_v47  ;;  %v6684_v47 = vld [vmem:[#allocation64_spill] sm:$0xff] }
  0xce   :  { %v4808_v45 = vpop.eup %4807  ;;  %v264_v42 = vadd.f32 %v4804_v32, %v263_v59  ;;  %v6687_v59 = vld [vmem:[#allocation67_spill] sm:$0xff] }
  0xcf   :  { %v4810_v58 = vpop.eup %4809  ;;  %v300_v44 = vmul.f32 %v4808_v45, %v298_v29  ;;  %v283_v46 = vadd.f32 %v4806_v35, %v282_v56  ;;  %vm305_vm8 = vweird.f32 %v4808_v45  ;;  %v6670_v29 = vld [vmem:[#allocation50_spill] sm:$0xff]  ;;  %v6689_v56 = vld [vmem:[#allocation77_spill] sm:$0xff] }
  0xd0   :  { %v268_v50 = vsel %vm267_vm4, %v4804_v32, %v264_v42  ;;  %vm306_vm10 = vmor %vm304_vm9, %vm305_vm8  ;;  %v6673_v32 = vld [vmem:[#allocation69_spill] sm:$0xff]  ;;  %v6692_v42 = vld [vmem:[#allocation72_spill] sm:$0xff] }
  0xd1   :  { %v301_v49 = vsub.f32 1.0, %v300_v44  ;;  %v273_v61 = vsel %vm270_vm5, %v272_v54, %v268_v50  ;;  %v287_v53 = vsel %vm286_vm6, %v4806_v35, %v283_v46  ;;  %v6676_v35 = vld [vmem:[#allocation56_spill] sm:$0xff]  ;;  %v6694_v44 = vld [vmem:[#allocation74_spill] sm:$0xff] }
  0xd2   :  { %v292_v62 = vsel %vm289_vm7, %v291_v52, %v287_v53  ;;  %v315_v60 = vmul.f32 %v4810_v58, %v273_v61  ;;  %v6693_v58 = vld [vmem:[#allocation78_spill] sm:$0xff]  ;;  %v988_v54 = vld [vmem:[#allocation10 + $0x80] sm:$0xff]  ;;  %v991_v50 = vld [vmem:[#allocation10 + $0x98] sm:$0xff] }
  0xd3   :  { %v302_v48 = vmul.f32 %v4808_v45, %v301_v49  ;;  %v314_v0 = vmul.f32 0.0, %v292_v62  ;;  %v989_v46 = vld [vmem:[#allocation10 + $0x88] sm:$0xff]  ;;  %v990_v52 = vld [vmem:[#allocation10 + $0x90] sm:$0xff]  ;;  %v984_v49 = vld [vmem:[#allocation10 + $0x60] sm:$0xff] }
  0xd4   :  { %v985_v61 = vld [vmem:[#allocation10 + $0x68] sm:$0xff]  ;;  %v986_v53 = vld [vmem:[#allocation10 + $0x70] sm:$0xff]  ;;  %v987_v62 = vld [vmem:[#allocation10 + $0x78] sm:$0xff] }
  0xd5   :  { %v5735_v1 = vadd.f32 %v315_v60, %v314_v0  ;;  %v303_v2 = vadd.f32 %v4808_v45, %v302_v48  ;;  %v980_v60 = vld [vmem:[#allocation10 + $0x40] sm:$0xff]  ;;  %v981_v48 = vld [vmem:[#allocation10 + $0x48] sm:$0xff]  ;;  %v982_v0 = vld [vmem:[#allocation10 + $0x50] sm:$0xff] }
  0xd7   :  { %4811 = vtanh.f32 %v5735_v1  ;;  %v307_v5 = vsel %vm306_vm10, %v4808_v45, %v303_v2  ;;  %v6691_v45 = vld [vmem:[#allocation71_spill] sm:$0xff] }
  0xd8   :  { %v312_v8 = vsel %vm309_vm11, %v311_v6, %v307_v5  ;;  %v983_v2 = vld [vmem:[#allocation10 + $0x58] sm:$0xff]  ;;  %v978_v5 = vld [vmem:[#allocation10 + $0x30] sm:$0xff] }
  0xd9   :  { %v979_v6 = vld [vmem:[#allocation10 + $0x38] sm:$0xff] }
  0xdd   :  { %v4812_v7 = vpop.eup %4811 }
  0xde   :  { %v318_v9 = vmul.f32 %v4812_v7, %v312_v8  ;;  %v972_v7 = vld [vmem:[#allocation10] sm:$0xff]  ;;  %v973_v8 = vld [vmem:[#allocation10 + $0x8] sm:$0xff] }
  0xe0   :  { %547 = vmatmul.f32.vlgmr.msra.gmra.mxu0 %v318_v9  ;;  %567 = vmatmul.f32.vlgmr.msra.gmra.mxu1 %v318_v9 }
  0xe1   :  { %587 = vmatmul.f32.vlgmr.msra.gmra.mxu2 %v318_v9  ;;  %607 = vmatmul.f32.vlgmr.msra.gmra.mxu3 %v318_v9 }
  0xe2   :  { %1036 = vmatpush.msra.mxu0 %v6651_v10  ;;  %1056 = vmatpush.msra.mxu1 %v6652_v11  ;;  %v975_v10 = vld [vmem:[#allocation10 + $0x18] sm:$0xff]  ;;  %v967_v11 = vld [vmem:[#allocation9 + $0x1e0] sm:$0xff] }
  0xe3   :  { %1076 = vmatpush.msra.mxu2 %v6653_v12  ;;  %1096 = vmatpush.msra.mxu3 %v6654_v13  ;;  %v968_v12 = vld [vmem:[#allocation9 + $0x1e8] sm:$0xff] }
  0xe4   :  { %1037 = vmatpush.msra.mxu0 %v6655_v14  ;;  %1057 = vmatpush.msra.mxu1 %v6656_v15  ;;  %v969_v15 = vld [vmem:[#allocation9 + $0x1f0] sm:$0xff] }
  0xe5   :  { %1077 = vmatpush.msra.mxu2 %v6657_v16  ;;  %1097 = vmatpush.msra.mxu3 %v6658_v17  ;;  %v970_v16 = vld [vmem:[#allocation9 + $0x1f8] sm:$0xff]  ;;  %v963_v17 = vld [vmem:[#allocation9 + $0x1c0] sm:$0xff] }
  0xe6   :  { %1038 = vmatpush.msra.mxu0 %v6659_v18  ;;  %1058 = vmatpush.msra.mxu1 %v6660_v19  ;;  %v964_v18 = vld [vmem:[#allocation9 + $0x1c8] sm:$0xff]  ;;  %v965_v19 = vld [vmem:[#allocation9 + $0x1d0] sm:$0xff] }
  0xe7   :  { %1078 = vmatpush.msra.mxu2 %v6661_v20  ;;  %1098 = vmatpush.msra.mxu3 %v6662_v21  ;;  %v966_v20 = vld [vmem:[#allocation9 + $0x1d8] sm:$0xff]  ;;  %v959_v21 = vld [vmem:[#allocation9 + $0x1a0] sm:$0xff] }
  0xe8   :  { %777 = vmatmul.f32.vlgmr.msrb.gmra.mxu0 %v318_v9  ;;  %797 = vmatmul.f32.vlgmr.msrb.gmra.mxu1 %v318_v9  ;;  %v468_v13 = vpop.f32.mrf.mxu0 }
  0xe9   :  { %817 = vmatmul.f32.vlgmr.msrb.gmra.mxu2 %v318_v9  ;;  %837 = vmatmul.f32.vlgmr.msrb.gmra.mxu3 %v318_v9  ;;  %v974_v9 = vld [vmem:[#allocation10 + $0x10] sm:$0xff]  ;;  %v488_v14 = vpop.f32.mrf.mxu1 }
  0xea   :  { %1039 = vmatpush.msra.mxu0 %v6663_v22  ;;  %1059 = vmatpush.msra.mxu1 %v6664_v23  ;;  %v960_v22 = vld [vmem:[#allocation9 + $0x1a8] sm:$0xff]  ;;  %v961_v23 = vld [vmem:[#allocation9 + $0x1b0] sm:$0xff] }
  0xeb   :  { %1079 = vmatpush.msra.mxu2 %v6665_v24  ;;  %1099 = vmatpush.msra.mxu3 %v6666_v25  ;;  %v5782_v24 = vld [vmem:[#allocation12] sm:$0xf]  ;;  %v962_v25 = vld [vmem:[#allocation9 + $0x1b8] sm:$0xff] }
  0xec   :  { %1040 = vmatpush.msra.mxu0 %v6667_v26  ;;  %1060 = vmatpush.msra.mxu1 %v6668_v27  ;;  %v955_v26 = vld [vmem:[#allocation9 + $0x180] sm:$0xff]  ;;  %v956_v27 = vld [vmem:[#allocation9 + $0x188] sm:$0xff] }
  0xed   :  { %1080 = vmatpush.msra.mxu2 %v6669_v28  ;;  %1100 = vmatpush.msra.mxu3 %v6670_v29  ;;  %v957_v28 = vld [vmem:[#allocation9 + $0x190] sm:$0xff]  ;;  %v958_v29 = vld [vmem:[#allocation9 + $0x198] sm:$0xff] }
  0xee   :  { %1041 = vmatpush.msra.mxu0 %v6671_v30  ;;  %1061 = vmatpush.msra.mxu1 %v6672_v31  ;;  %v5785_v31 = vperm.slane %v5782_v24, 0 }
  0xef   :  { %1081 = vmatpush.msra.mxu2 %v6673_v32  ;;  %1101 = vmatpush.msra.mxu3 %v6674_v33  ;;  %v5788_v32 = vperm.slane %v5782_v24, 1  ;;  %v951_v33 = vld [vmem:[#allocation9 + $0x160] sm:$0xff] }
  0xf0   :  { %1042 = vmatpush.msra.mxu0 %v6675_v34  ;;  %1062 = vmatpush.msra.mxu1 %v6676_v35  ;;  %v528_v30 = vpop.f32.mrf.mxu3  ;;  %v952_v34 = vld [vmem:[#allocation9 + $0x168] sm:$0xff]  ;;  %v953_v35 = vld [vmem:[#allocation9 + $0x170] sm:$0xff] }
  0xf1   :  { %1082 = vmatpush.msra.mxu2 %v6677_v36  ;;  %1102 = vmatpush.msra.mxu3 %v6678_v37 }
  0xf2   :  { %1043 = vmatpush.msra.mxu0 %v6679_v38  ;;  %1063 = vmatpush.msra.mxu1 %v6680_v39  ;;  %v954_v38 = vld [vmem:[#allocation9 + $0x178] sm:$0xff]  ;;  %v5790_v39 = vpop.f32.mrf.mxu2 }
  0xf3   :  { %1083 = vmatpush.msra.mxu2 %v6681_v40  ;;  %1103 = vmatpush.msra.mxu3 %v6682_v41 }
  0xf4   :  { %1044 = vmatpush.msra.mxu0 %v6683_v43  ;;  %1064 = vmatpush.msra.mxu1 %v6684_v47  ;;  %v947_v43 = vld [vmem:[#allocation9 + $0x140] sm:$0xff]  ;;  %v948_v47 = vld [vmem:[#allocation9 + $0x148] sm:$0xff] }
  0xf5   :  { %1084 = vmatpush.msra.mxu2 %v6685_v51  ;;  %1104 = vmatpush.msra.mxu3 %v6686_v55  ;;  %v949_v51 = vld [vmem:[#allocation9 + $0x150] sm:$0xff]  ;;  %v950_v55 = vld [vmem:[#allocation9 + $0x158] sm:$0xff] }
  0xf6   :  { %1045 = vmatpush.msra.mxu0 %v6687_v59  ;;  %1065 = vmatpush.msra.mxu1 %v6688_v63 }
  0xf7   :  { %1085 = vmatpush.msra.mxu2 %v6689_v56  ;;  %1105 = vmatpush.msra.mxu3 %v6690_v57  ;;  %v943_v56 = vld [vmem:[#allocation9 + $0x120] sm:$0xff]  ;;  %v944_v57 = vld [vmem:[#allocation9 + $0x128] sm:$0xff] }
  0xf8   :  { %1046 = vmatpush.msra.mxu0 %v6691_v45  ;;  %1066 = vmatpush.msra.mxu1 %v6692_v42  ;;  %v945_v45 = vld [vmem:[#allocation9 + $0x130] sm:$0xff]  ;;  %v757_v42 = vld [vmem:[#allocation4 + $0x20] sm:$0xff] }
  0xf9   :  { %1086 = vmatpush.msra.mxu2 %v6693_v58  ;;  %1106 = vmatpush.msra.mxu3 %v6694_v44  ;;  %v946_v58 = vld [vmem:[#allocation9 + $0x138] sm:$0xff] }
  0xfa   :  { %1047 = vmatpush.msra.mxu0 %v988_v54  ;;  %1067 = vmatpush.msra.mxu1 %v989_v46  ;;  %v939_v46 = vld [vmem:[#allocation9 + $0x100] sm:$0xff] }
  0xfb   :  { %1087 = vmatpush.msra.mxu2 %v990_v52  ;;  %1107 = vmatpush.msra.mxu3 %v991_v50  ;;  %v940_v52 = vld [vmem:[#allocation9 + $0x108] sm:$0xff]  ;;  %v5795_v50 = vperm.slane %v5782_v24, 3 }
  0xfc   :  { %1048 = vmatpush.msra.mxu0 %v984_v49  ;;  %1068 = vmatpush.msra.mxu1 %v985_v61  ;;  %v758_v49 = vld [vmem:[#allocation4 + $0x28] sm:$0xff]  ;;  %v941_v61 = vld [vmem:[#allocation9 + $0x110] sm:$0xff] }
  0xfd   :  { %1088 = vmatpush.msra.mxu2 %v986_v53  ;;  %1108 = vmatpush.msra.mxu3 %v987_v62  ;;  %v942_v53 = vld [vmem:[#allocation9 + $0x118] sm:$0xff] }
  0xfe   :  { %1049 = vmatpush.msra.mxu0 %v980_v60  ;;  %1069 = vmatpush.msra.mxu1 %v981_v48  ;;  %v935_v60 = vld [vmem:[#allocation9 + $0xe0] sm:$0xff]  ;;  %v936_v48 = vld [vmem:[#allocation9 + $0xe8] sm:$0xff] }
  0xff   :  { %1089 = vmatpush.msra.mxu2 %v982_v0  ;;  %1109 = vmatpush.msra.mxu3 %v983_v2  ;;  %v937_v0 = vld [vmem:[#allocation9 + $0xf0] sm:$0xff] }
 0x100   :  { %1050 = vmatpush.msra.mxu0 %v976_v3  ;;  %1070 = vmatpush.msra.mxu1 %v977_v4 }
 0x101   :  { %1090 = vmatpush.msra.mxu2 %v978_v5  ;;  %1110 = vmatpush.msra.mxu3 %v979_v6  ;;  %v938_v5 = vld [vmem:[#allocation9 + $0xf8] sm:$0xff] }
 0x102   :  { %1051 = vmatpush.msra.mxu0 %v972_v7  ;;  %1071 = vmatpush.msra.mxu1 %v973_v8  ;;  %v931_v8 = vld [vmem:[#allocation9 + $0xc0] sm:$0xff] }
 0x103   :  { %1091 = vmatpush.msra.mxu2 %v974_v9  ;;  %1111 = vmatpush.msra.mxu3 %v975_v10  ;;  %v932_v9 = vld [vmem:[#allocation9 + $0xc8] sm:$0xff]  ;;  %v933_v10 = vld [vmem:[#allocation9 + $0xd0] sm:$0xff] }
 0x104   :  { %1116 = vmatpush.msrb.mxu0 %v967_v11  ;;  %1136 = vmatpush.msrb.mxu1 %v968_v12  ;;  %v934_v12 = vld [vmem:[#allocation9 + $0xd8] sm:$0xff] }
 0x105   :  { %1156 = vmatpush.msrb.mxu2 %v969_v15  ;;  %1176 = vmatpush.msrb.mxu3 %v970_v16  ;;  %v927_v16 = vld [vmem:[#allocation9 + $0xa0] sm:$0xff] }
 0x106   :  { %1117 = vmatpush.msrb.mxu0 %v963_v17  ;;  %1137 = vmatpush.msrb.mxu1 %v964_v18  ;;  %v928_v17 = vld [vmem:[#allocation9 + $0xa8] sm:$0xff] }
 0x107   :  { %1157 = vmatpush.msrb.mxu2 %v965_v19  ;;  %1177 = vmatpush.msrb.mxu3 %v966_v20  ;;  %v929_v19 = vld [vmem:[#allocation9 + $0xb0] sm:$0xff]  ;;  %v930_v20 = vld [vmem:[#allocation9 + $0xb8] sm:$0xff] }
 0x108   :  { %1118 = vmatpush.msrb.mxu0 %v959_v21  ;;  %1138 = vmatpush.msrb.mxu1 %v960_v22  ;;  %v923_v22 = vld [vmem:[#allocation9 + $0x80] sm:$0xff] }
 0x109   :  { %1158 = vmatpush.msrb.mxu2 %v961_v23  ;;  %1178 = vmatpush.msrb.mxu3 %v962_v25  ;;  %v924_v23 = vld [vmem:[#allocation9 + $0x88] sm:$0xff]  ;;  %v925_v25 = vld [vmem:[#allocation9 + $0x90] sm:$0xff] }
 0x10a   :  { %1119 = vmatpush.msrb.mxu0 %v955_v26  ;;  %1139 = vmatpush.msrb.mxu1 %v956_v27 }
 0x10b   :  { %1159 = vmatpush.msrb.mxu2 %v957_v28  ;;  %1179 = vmatpush.msrb.mxu3 %v958_v29  ;;  %v760_v28 = vld [vmem:[#allocation4 + $0x38] sm:$0xff] }
 0x10c   :  { %1120 = vmatpush.msrb.mxu0 %v951_v33  ;;  %1140 = vmatpush.msrb.mxu1 %v952_v34  ;;  %v926_v29 = vld [vmem:[#allocation9 + $0x98] sm:$0xff]  ;;  %v919_v34 = vld [vmem:[#allocation9 + $0x60] sm:$0xff] }
 0x10d   :  { %1160 = vmatpush.msrb.mxu2 %v953_v35  ;;  %1180 = vmatpush.msrb.mxu3 %v954_v38  ;;  %v920_v35 = vld [vmem:[#allocation9 + $0x68] sm:$0xff] }
 0x10e   :  { %1121 = vmatpush.msrb.mxu0 %v947_v43  ;;  %1141 = vmatpush.msrb.mxu1 %v948_v47  ;;  %v916_v43 = vld [vmem:[#allocation9 + $0x48] sm:$0xff]  ;;  %v917_v47 = vld [vmem:[#allocation9 + $0x50] sm:$0xff] }
 0x10f   :  { %1161 = vmatpush.msrb.mxu2 %v949_v51  ;;  %1181 = vmatpush.msrb.mxu3 %v950_v55  ;;  %v918_v55 = vld [vmem:[#allocation9 + $0x58] sm:$0xff] }
 0x110   :  { %1122 = vmatpush.msrb.mxu0 %v943_v56  ;;  %1142 = vmatpush.msrb.mxu1 %v944_v57  ;;  %v912_v56 = vld [vmem:[#allocation9 + $0x28] sm:$0xff]  ;;  %v913_v57 = vld [vmem:[#allocation9 + $0x30] sm:$0xff] }
 0x111   :  { %1162 = vmatpush.msrb.mxu2 %v945_v45  ;;  %1182 = vmatpush.msrb.mxu3 %v946_v58 }
 0x112   :  { %1123 = vmatpush.msrb.mxu0 %v939_v46  ;;  %1143 = vmatpush.msrb.mxu1 %v940_v52  ;;  %v907_v52 = vld [vmem:[#allocation9] sm:$0xff] }
 0x113   :  { %1163 = vmatpush.msrb.mxu2 %v941_v61  ;;  %1183 = vmatpush.msrb.mxu3 %v942_v53  ;;  %v909_v61 = vld [vmem:[#allocation9 + $0x10] sm:$0xff] }
 0x114   :  { %1124 = vmatpush.msrb.mxu0 %v935_v60  ;;  %1144 = vmatpush.msrb.mxu1 %v936_v48 }
 0x115   :  { %1164 = vmatpush.msrb.mxu2 %v937_v0  ;;  %1184 = vmatpush.msrb.mxu3 %v938_v5  ;;  %v910_v0 = vld [vmem:[#allocation9 + $0x18] sm:$0xff] }
 0x116   :  { %1125 = vmatpush.msrb.mxu0 %v931_v8  ;;  %1145 = vmatpush.msrb.mxu1 %v932_v9 }
 0x117   :  { %1165 = vmatpush.msrb.mxu2 %v933_v10  ;;  %1185 = vmatpush.msrb.mxu3 %v934_v12 }
 0x118   :  { %1126 = vmatpush.msrb.mxu0 %v927_v16  ;;  %1146 = vmatpush.msrb.mxu1 %v928_v17 }
 0x119   :  { %1166 = vmatpush.msrb.mxu2 %v929_v19  ;;  %1186 = vmatpush.msrb.mxu3 %v930_v20 }
 0x11a   :  { %1127 = vmatpush.msrb.mxu0 %v923_v22  ;;  %1147 = vmatpush.msrb.mxu1 %v924_v23 }
 0x11b   :  { %1167 = vmatpush.msrb.mxu2 %v925_v25  ;;  %1187 = vmatpush.msrb.mxu3 %v926_v29 }
 0x11c   :  { %1128 = vmatpush.msrb.mxu0 %v919_v34  ;;  %1148 = vmatpush.msrb.mxu1 %v920_v35 }
 0x11e   :  { %1149 = vmatpush.msrb.mxu1 %v916_v43 }
 0x120   :  { %1150 = vmatpush.msrb.mxu1 %v912_v56 }
 0x15d   :  { %v548_v36 = vpop.f32.mrf.mxu0  ;;  %v568_v37 = vpop.f32.mrf.mxu1 }
 0x15e   :  { %v549_v40 = vadd.f32 %v548_v36, %v468_v13  ;;  %v569_v41 = vadd.f32 %v568_v37, %v488_v14  ;;  %v921_v36 = vld [vmem:[#allocation9 + $0x70] sm:$0xff]  ;;  %v922_v37 = vld [vmem:[#allocation9 + $0x78] sm:$0xff] }
 0x15f   :  { %1168 = vmatpush.msrb.mxu2 %v921_v36  ;;  %1188 = vmatpush.msrb.mxu3 %v922_v37 }
 0x160   :  { %v620_v59 = vadd.f32 %v5785_v31, %v549_v40  ;;  %v621_v63 = vadd.f32 %v5788_v32, %v569_v41  ;;  %v5806_v40 = vperm.slane %v5782_v24, 2  ;;  %v915_v41 = vld [vmem:[#allocation9 + $0x40] sm:$0xff]  ;;  %v759_v24 = vld [vmem:[#allocation4 + $0x30] sm:$0xff] }
 0x161   :  { %1129 = vmatpush.msrb.mxu0 %v915_v41  ;;  %1169 = vmatpush.msrb.mxu2 %v917_v47 }
 0x162   :  { %v4743_v44 = vmul.f32 -1.442695, %v620_v59  ;;  %v4744_v54 = vmul.f32 -1.442695, %v621_v63  ;;  %v911_v63 = vld [vmem:[#allocation9 + $0x20] sm:$0xff]  ;;  %1189 = vmatpush.msrb.mxu3 %v918_v55 }
 0x163   :  { %1130 = vmatpush.msrb.mxu0 %v911_v63  ;;  %1170 = vmatpush.msrb.mxu2 %v913_v57 }
 0x164   :  { %4813 = vpow2.f32 %v4743_v44  ;;  %v608_v62 = vpop.f32.mrf.mxu3  ;;  %v588_v13 = vpop.f32.mrf.mxu2 }
 0x165   :  { %4815 = vpow2.f32 %v4744_v54  ;;  %v609_v2 = vadd.f32 %v608_v62, %v528_v30  ;;  %v778_v3 = vpop.f32.mrf.mxu0  ;;  %v798_v4 = vpop.f32.mrf.mxu1  ;;  %v589_v38 = vadd.f32 %v588_v13, %v5790_v39  ;;  %1131 = vmatpush.msrb.mxu0 %v907_v52  ;;  %1171 = vmatpush.msrb.mxu2 %v909_v61 }
 0x166   :  { %v779_v6 = vadd.f32 %v778_v3, %v757_v42  ;;  %v799_v7 = vadd.f32 %v798_v4, %v758_v49  ;;  %v914_v42 = vld [vmem:[#allocation9 + $0x38] sm:$0xff]  ;;  %v908_v49 = vld [vmem:[#allocation9 + $0x8] sm:$0xff] }
 0x167   :  { %v623_v11 = vadd.f32 %v5795_v50, %v609_v2  ;;  %v622_v44 = vadd.f32 %v5806_v40, %v589_v38  ;;  %1190 = vmatpush.msrb.mxu3 %v914_v42  ;;  %1151 = vmatpush.msrb.mxu1 %v908_v49 }
 0x168   :  { %v4746_v14 = vmul.f32 -1.442695, %v779_v6  ;;  %v4747_v15 = vmul.f32 -1.442695, %v799_v7 }
 0x169   :  { %v4745_v18 = vmul.f32 -1.442695, %v623_v11  ;;  %1191 = vmatpush.msrb.mxu3 %v910_v0  ;;  %v1327_v11 = vld [vmem:[#allocation7 + $0x1e0] sm:$0xff] }
 0x16a   :  { %v4814_v21 = vpop.eup %4813  ;;  %4817 = vpow2.f32 %v4746_v14 }
 0x16b   :  { %v4816_v26 = vpop.eup %4815  ;;  %v5798_v27 = vadd.f32 1.0, %v4814_v21  ;;  %4819 = vpow2.f32 %v4745_v18 }
 0x16c   :  { %v5800_v30 = vadd.f32 1.0, %v4816_v26  ;;  %4821 = vpow2.f32 %v4747_v15  ;;  %v838_v33 = vpop.f32.mrf.mxu3  ;;  %v818_v46 = vpop.f32.mrf.mxu2 }
 0x16d   :  { %4823 = vrcp.f32 %v5798_v27  ;;  %v839_v51 = vadd.f32 %v838_v33, %v760_v28  ;;  %v639_v62 = vand.u32 2147483647, %v5798_v27  ;;  %v641_v5 = vand.u32 2147483648, %v5798_v27 }
 0x16e   :  { %4825 = vrcp.f32 %v5800_v30  ;;  %v660_v4 = vand.u32 2147483648, %v5800_v30  ;;  %v658_v7 = vand.u32 2147483647, %v5800_v30  ;;  %v819_v8 = vadd.f32 %v818_v46, %v759_v24 }
 0x16f   :  { %v4748_v48 = vmul.f32 -1.442695, %v839_v51  ;;  %vm635_vm12 = vweird.f32 %v5798_v27  ;;  %vm654_vm13 = vweird.f32 %v5800_v30  ;;  %vm5826_vm14 = vcmp.eq.f32.partialorder %v639_v62, 8.507059e+37 }
 0x170   :  { %v4818_v59 = vpop.eup %4817  ;;  %v661_v12 = vor.u32 1.1754944e-38, %v660_v4  ;;  %v642_v14 = vor.u32 1.1754944e-38, %v641_v5  ;;  %vm5830_vm1 = vcmp.eq.f32.partialorder %v658_v7, 8.507059e+37 }
 0x171   :  { %v4820_v45 = vpop.eup %4819  ;;  %v5808_v39 = vadd.f32 1.0, %v4818_v59  ;;  %v1309_v59 = vld [vmem:[#allocation7 + $0x150] sm:$0xff] }
 0x172   :  { %v4822_v58 = vpop.eup %4821  ;;  %v5811_v54 = vadd.f32 1.0, %v4820_v45 }
 0x173   :  { %v4824_v53 = vpop.eup %4823  ;;  %4827 = vrcp.f32 %v5808_v39  ;;  %v5815_v60 = vadd.f32 1.0, %v4822_v58  ;;  %vm851_vm2 = vweird.f32 %v5808_v39  ;;  %v855_v21 = vand.u32 2147483647, %v5808_v39 }
 0x174   :  { %v4826_v2 = vpop.eup %4825  ;;  %v631_v3 = vmul.f32 %v4824_v53, %v5798_v27  ;;  %4829 = vrcp.f32 %v5811_v54  ;;  %vm636_vm15 = vweird.f32 %v4824_v53  ;;  %v857_v26 = vand.u32 2147483648, %v5808_v39 }
 0x175   :  { %v650_v6 = vmul.f32 %v4826_v2, %v5800_v30  ;;  %4831 = vrcp.f32 %v5815_v60  ;;  %vm655_vm0 = vweird.f32 %v4826_v2  ;;  %vm637_vm3 = vmor %vm635_vm12, %vm636_vm15  ;;  %vm870_vm4 = vweird.f32 %v5815_v60 }
 0x176   :  { %v632_v9 = vsub.f32 1.0, %v631_v3  ;;  %4833 = vtanh.f32 %v622_v44  ;;  %vm656_vm5 = vmor %vm654_vm13, %vm655_vm0  ;;  %v876_v27 = vand.u32 2147483648, %v5815_v60  ;;  %vm5854_vm7 = vcmp.eq.f32.partialorder %v855_v21, 8.507059e+37  ;;  %v1267_v21 = vld [vmem:[#allocation7] sm:$0xff] }
 0x177   :  { %v651_v10 = vsub.f32 1.0, %v650_v6  ;;  %4835 = vpow2.f32 %v4748_v48  ;;  %v874_v24 = vand.u32 2147483647, %v5815_v60  ;;  %v858_v58 = vor.u32 1.1754944e-38, %v857_v26  ;;  %v1321_v26 = vld [vmem:[#allocation7 + $0x1b0] sm:$0xff] }
 0x178   :  { %v633_v13 = vmul.f32 %v4824_v53, %v632_v9  ;;  %4837 = vtanh.f32 %v819_v8  ;;  %vm674_vm10 = vweird.f32 %v5811_v54  ;;  %v877_v49 = vor.u32 1.1754944e-38, %v876_v27  ;;  %v1316_v27 = vld [vmem:[#allocation7 + $0x188] sm:$0xff] }
 0x179   :  { %v4828_v15 = vpop.eup %4827  ;;  %v652_v16 = vmul.f32 %v4826_v2, %v651_v10  ;;  %v680_v61 = vand.u32 2147483648, %v5811_v54  ;;  %vm875_vm13 = vcmp.eq.f32.partialorder %v874_v24, 8.507059e+37  ;;  %v678_v48 = vand.u32 2147483647, %v5811_v54  ;;  %v1306_v24 = vld [vmem:[#allocation7 + $0x138] sm:$0xff] }
 0x17a   :  { %v5834_v18 = vpop.eup %4829  ;;  %v634_v19 = vadd.f32 %v4824_v53, %v633_v13  ;;  %v847_v20 = vmul.f32 %v4828_v15, %v5808_v39  ;;  %vm852_vm6 = vweird.f32 %v4828_v15  ;;  %v1330_v13 = vld [vmem:[#allocation7 + $0x1f8] sm:$0xff] }
 0x17b   :  { %v4832_v22 = vpop.eup %4831  ;;  %v653_v23 = vadd.f32 %v4826_v2, %v652_v16  ;;  %v670_v25 = vmul.f32 %v5834_v18, %v5811_v54  ;;  %vm853_vm9 = vmor %vm851_vm2, %vm852_vm6  ;;  %vm675_vm11 = vweird.f32 %v5834_v18  ;;  %v681_v4 = vor.u32 1.1754944e-38, %v680_v61  ;;  %v1328_v54 = vld [vmem:[#allocation7 + $0x1e8] sm:$0xff]  ;;  %v1297_v61 = vld [vmem:[#allocation7 + $0xf0] sm:$0xff] }
 0x17c   :  { %v4834_v28 = vpop.eup %4833  ;;  %v638_v29 = vsel %vm637_vm3, %v4824_v53, %v634_v19  ;;  %v848_v33 = vsub.f32 1.0, %v847_v20  ;;  %v866_v34 = vmul.f32 %v4832_v22, %v5815_v60  ;;  %vm871_vm8 = vweird.f32 %v4832_v22  ;;  %v1324_v16 = vld [vmem:[#allocation7 + $0x1c8] sm:$0xff]  ;;  %v1325_v19 = vld [vmem:[#allocation7 + $0x1d0] sm:$0xff]  ;;  %v1326_v20 = vld [vmem:[#allocation7 + $0x1d8] sm:$0xff] }
 0x17d   :  { %v4836_v35 = vpop.eup %4835  ;;  %v643_v36 = vsel %vm5826_vm14, %v642_v14, %v638_v29  ;;  %v657_v37 = vsel %vm656_vm5, %v4826_v2, %v653_v23  ;;  %v671_v38 = vsub.f32 1.0, %v670_v25  ;;  %vm872_vm12 = vmor %vm870_vm4, %vm871_vm8  ;;  %vm679_vm15 = vcmp.eq.f32.partialorder %v678_v48, 8.507059e+37  ;;  %v1320_v23 = vld [vmem:[#allocation7 + $0x1a8] sm:$0xff] }
 0x17e   :  { %v662_v41 = vsel %vm5830_vm1, %v661_v12, %v657_v37  ;;  %v685_v43 = vmul.f32 %v4834_v28, %v643_v36  ;;  %v867_v47 = vsub.f32 1.0, %v866_v34  ;;  %v849_v51 = vmul.f32 %v4828_v15, %v848_v33  ;;  %v4838_v30 = vpop.eup %4837  ;;  %vm676_vm14 = vmor %vm674_vm10, %vm675_vm11  ;;  %v1322_v28 = vld [vmem:[#allocation7 + $0x1b8] sm:$0xff]  ;;  %v1315_v34 = vld [vmem:[#allocation7 + $0x180] sm:$0xff] }
 0x17f   :  { %v684_v55 = vmul.f32 0.0, %v662_v41  ;;  %v5858_v63 = vadd.f32 1.0, %v4836_v35  ;;  %v672_v56 = vmul.f32 %v5834_v18, %v671_v38  ;;  %v1317_v35 = vld [vmem:[#allocation7 + $0x190] sm:$0xff]  ;;  %v1318_v36 = vld [vmem:[#allocation7 + $0x198] sm:$0xff]  ;;  %v1311_v41 = vld [vmem:[#allocation7 + $0x160] sm:$0xff] }
 0x180   :  { %v868_v57 = vmul.f32 %v4832_v22, %v867_v47  ;;  %v850_v45 = vadd.f32 %v4828_v15, %v849_v51  ;;  %v1313_v47 = vld [vmem:[#allocation7 + $0x170] sm:$0xff]  ;;  %v1314_v51 = vld [vmem:[#allocation7 + $0x178] sm:$0xff]  ;;  %v1292_v48 = vld [vmem:[#allocation7 + $0xc8] sm:$0xff] }
 0x181   :  { %v5862_v42 = vadd.f32 %v685_v43, %v684_v55  ;;  %4839 = vrcp.f32 %v5858_v63  ;;  %v673_v52 = vadd.f32 %v5834_v18, %v672_v56  ;;  %v896_v14 = vand.u32 2147483648, %v5858_v63  ;;  %v1312_v43 = vld [vmem:[#allocation7 + $0x168] sm:$0xff]  ;;  %v1303_v56 = vld [vmem:[#allocation7 + $0x120] sm:$0xff] }
 0x182   :  { %v854_v44 = vsel %vm853_vm9, %v4828_v15, %v850_v45  ;;  %v869_v46 = vadd.f32 %v4832_v22, %v868_v57  ;;  %v1323_v15 = vld [vmem:[#allocation7 + $0x1c0] sm:$0xff]  ;;  %vm890_vm1 = vweird.f32 %v5858_v63  ;;  %v1308_v55 = vld [vmem:[#allocation7 + $0x148] sm:$0xff]  ;;  %v1305_v45 = vld [vmem:[#allocation7 + $0x130] sm:$0xff] }
 0x183   :  { %4841 = vtanh.f32 %v5862_v42  ;;  %v859_v39 = vsel %vm5854_vm7, %v858_v58, %v854_v44  ;;  %v677_v60 = vsel %vm676_vm14, %v5834_v18, %v673_v52  ;;  %v894_v18 = vand.u32 2147483647, %v5858_v63  ;;  %v1304_v57 = vld [vmem:[#allocation7 + $0x128] sm:$0xff]  ;;  %v1299_v58 = vld [vmem:[#allocation7 + $0x100] sm:$0xff]  ;;  %v1302_v52 = vld [vmem:[#allocation7 + $0x118] sm:$0xff] }
 0x184   :  { %v873_v53 = vsel %vm872_vm12, %v4832_v22, %v869_v46  ;;  %v901_v62 = vmul.f32 %v4838_v30, %v859_v39  ;;  %v682_v8 = vsel %vm679_vm15, %v681_v4, %v677_v60  ;;  %v1319_v22 = vld [vmem:[#allocation7 + $0x1a0] sm:$0xff]  ;;  %v897_v33 = vor.u32 1.1754944e-38, %v896_v14  ;;  %v1300_v44 = vld [vmem:[#allocation7 + $0x108] sm:$0xff]  ;;  %v1301_v46 = vld [vmem:[#allocation7 + $0x110] sm:$0xff] }
 0x185   :  { %v878_v0 = vsel %vm875_vm13, %v877_v49, %v873_v53  ;;  %vm895_vm3 = vcmp.eq.f32.partialorder %v894_v18, 8.507059e+37  ;;  %v1307_v30 = vld [vmem:[#allocation7 + $0x140] sm:$0xff]  ;;  %v1296_v39 = vld [vmem:[#allocation7 + $0xe8] sm:$0xff]  ;;  %v1298_v53 = vld [vmem:[#allocation7 + $0xf8] sm:$0xff] }
 0x186   :  { %v900_v2 = vmul.f32 %v878_v0, %v5735_v1  ;;  %v1329_v1 = vld [vmem:[#allocation7 + $0x1f0] sm:$0xff]  ;;  %v1295_v49 = vld [vmem:[#allocation7 + $0xe0] sm:$0xff]  ;;  %v1276_v14 = vld [vmem:[#allocation7 + $0x48] sm:$0xff] }
 0x187   :  { %v4840_v3 = vpop.eup %4839  ;;  %v1293_v0 = vld [vmem:[#allocation7 + $0xd0] sm:$0xff]  ;;  %v1287_v60 = vld [vmem:[#allocation7 + $0xa0] sm:$0xff]  ;;  %v1272_v18 = vld [vmem:[#allocation7 + $0x28] sm:$0xff] }
 0x188   :  { %v5882_v5 = vadd.f32 %v901_v62, %v900_v2  ;;  %v886_v6 = vmul.f32 %v4840_v3, %v5858_v63  ;;  %vm891_vm0 = vweird.f32 %v4840_v3  ;;  %v1310_v63 = vld [vmem:[#allocation7 + $0x158] sm:$0xff]  ;;  %v1291_v62 = vld [vmem:[#allocation7 + $0xc0] sm:$0xff]  ;;  %v1289_v4 = vld [vmem:[#allocation7 + $0xb0] sm:$0xff] }
 0x189   :  { %v4842_v7 = vpop.eup %4841  ;;  %vm5890_vm2 = vmor %vm890_vm1, %vm891_vm0  ;;  %v1294_v2 = vld [vmem:[#allocation7 + $0xd8] sm:$0xff] }
 0x18a   :  { %v887_v9 = vsub.f32 1.0, %v886_v6  ;;  %v688_v10 = vmul.f32 %v4842_v7, %v682_v8  ;;  %4843 = vtanh.f32 %v5882_v5  ;;  %v1290_v6 = vld [vmem:[#allocation7 + $0xb8] sm:$0xff]  ;;  %v1283_v7 = vld [vmem:[#allocation7 + $0x80] sm:$0xff]  ;;  %v1284_v8 = vld [vmem:[#allocation7 + $0x88] sm:$0xff] }
 0x18c   :  { %v888_v12 = vmul.f32 %v4840_v3, %v887_v9  ;;  %1052 = vmatmul.f32.vlgmr.msra.gmra.mxu0 %v688_v10  ;;  %1072 = vmatmul.f32.vlgmr.msra.gmra.mxu1 %v688_v10  ;;  %v1285_v9 = vld [vmem:[#allocation7 + $0x90] sm:$0xff] }
 0x18d   :  { %1092 = vmatmul.f32.vlgmr.msra.gmra.mxu2 %v688_v10  ;;  %1112 = vmatmul.f32.vlgmr.msra.gmra.mxu3 %v688_v10  ;;  %v1286_v10 = vld [vmem:[#allocation7 + $0x98] sm:$0xff] }
 0x18e   :  { %v889_v17 = vadd.f32 %v4840_v3, %v888_v12  ;;  %1336 = vmatpush.msra.mxu0 %v1327_v11  ;;  %1356 = vmatpush.msra.mxu1 %v1328_v54  ;;  %v1279_v11 = vld [vmem:[#allocation7 + $0x60] sm:$0xff]  ;;  %v1280_v54 = vld [vmem:[#allocation7 + $0x68] sm:$0xff]  ;;  %v1281_v12 = vld [vmem:[#allocation7 + $0x70] sm:$0xff] }
 0x18f   :  { %1376 = vmatpush.msra.mxu2 %v1329_v1  ;;  %1396 = vmatpush.msra.mxu3 %v1330_v13  ;;  %v1282_v1 = vld [vmem:[#allocation7 + $0x78] sm:$0xff]  ;;  %v1275_v13 = vld [vmem:[#allocation7 + $0x40] sm:$0xff] }
 0x190   :  { %v893_v25 = vsel %vm5890_vm2, %v4840_v3, %v889_v17  ;;  %1337 = vmatpush.msra.mxu0 %v1323_v15  ;;  %1357 = vmatpush.msra.mxu1 %v1324_v16  ;;  %v4844_v29 = vpop.eup %4843  ;;  %v1288_v3 = vld [vmem:[#allocation7 + $0xa8] sm:$0xff]  ;;  %v1277_v15 = vld [vmem:[#allocation7 + $0x50] sm:$0xff]  ;;  %v1278_v16 = vld [vmem:[#allocation7 + $0x58] sm:$0xff] }
 0x191   :  { %1377 = vmatpush.msra.mxu2 %v1325_v19  ;;  %1397 = vmatpush.msra.mxu3 %v1326_v20  ;;  %v898_v37 = vsel %vm895_vm3, %v897_v33, %v893_v25  ;;  %v1271_v17 = vld [vmem:[#allocation7 + $0x20] sm:$0xff]  ;;  %v1273_v19 = vld [vmem:[#allocation7 + $0x30] sm:$0xff]  ;;  %v1274_v20 = vld [vmem:[#allocation7 + $0x38] sm:$0xff] }
 0x192   :  { %1338 = vmatpush.msra.mxu0 %v1319_v22  ;;  %1358 = vmatpush.msra.mxu1 %v1320_v23  ;;  %v5896_v38 = vmul.f32 %v4844_v29, %v898_v37  ;;  %v1268_v22 = vld [vmem:[#allocation7 + $0x8] sm:$0xff]  ;;  %v1269_v23 = vld [vmem:[#allocation7 + $0x10] sm:$0xff]  ;;  %v1270_v25 = vld [vmem:[#allocation7 + $0x18] sm:$0xff] }
 0x193   :  { %1378 = vmatpush.msra.mxu2 %v1321_v26  ;;  %1398 = vmatpush.msra.mxu3 %v1322_v28  ;;  %v1607_v26 = vld [vmem:[#allocation10 + $0x1e0] sm:$0xff]  ;;  %v1608_v28 = vld [vmem:[#allocation10 + $0x1e8] sm:$0xff]  ;;  %v1609_v29 = vld [vmem:[#allocation10 + $0x1f0] sm:$0xff] }
 0x194   :  { %1339 = vmatpush.msra.mxu0 %v1315_v34  ;;  %1359 = vmatpush.msra.mxu1 %v1316_v27  ;;  %v1610_v33 = vld [vmem:[#allocation10 + $0x1f8] sm:$0xff]  ;;  %v1603_v34 = vld [vmem:[#allocation10 + $0x1c0] sm:$0xff]  ;;  %v1604_v27 = vld [vmem:[#allocation10 + $0x1c8] sm:$0xff] }
 0x195   :  { %1379 = vmatpush.msra.mxu2 %v1317_v35  ;;  %1399 = vmatpush.msra.mxu3 %v1318_v36  ;;  %v1605_v35 = vld [vmem:[#allocation10 + $0x1d0] sm:$0xff]  ;;  %v1606_v36 = vld [vmem:[#allocation10 + $0x1d8] sm:$0xff]  ;;  %v1599_v37 = vld [vmem:[#allocation10 + $0x1a0] sm:$0xff] }
 0x196   :  { %1132 = vmatmul.f32.vlgmr.msrb.gmra.mxu0 %v5896_v38  ;;  %1152 = vmatmul.f32.vlgmr.msrb.gmra.mxu1 %v5896_v38 }
 0x197   :  { %1172 = vmatmul.f32.vlgmr.msrb.gmra.mxu2 %v5896_v38  ;;  %1192 = vmatmul.f32.vlgmr.msrb.gmra.mxu3 %v5896_v38 }
 0x198   :  { %1340 = vmatpush.msra.mxu0 %v1311_v41  ;;  %1360 = vmatpush.msra.mxu1 %v1312_v43  ;;  %v1600_v41 = vld [vmem:[#allocation10 + $0x1a8] sm:$0xff]  ;;  %v1601_v43 = vld [vmem:[#allocation10 + $0x1b0] sm:$0xff] }
 0x199   :  { %1380 = vmatpush.msra.mxu2 %v1313_v47  ;;  %1400 = vmatpush.msra.mxu3 %v1314_v51  ;;  %v1602_v47 = vld [vmem:[#allocation10 + $0x1b8] sm:$0xff]  ;;  %v1595_v51 = vld [vmem:[#allocation10 + $0x180] sm:$0xff] }
 0x19a   :  { %1341 = vmatpush.msra.mxu0 %v1307_v30  ;;  %1361 = vmatpush.msra.mxu1 %v1308_v55  ;;  %v1596_v30 = vld [vmem:[#allocation10 + $0x188] sm:$0xff]  ;;  %v1598_v55 = vld [vmem:[#allocation10 + $0x198] sm:$0xff] }
 0x19b   :  { %1381 = vmatpush.msra.mxu2 %v1309_v59  ;;  %1401 = vmatpush.msra.mxu3 %v1310_v63  ;;  %v1591_v59 = vld [vmem:[#allocation10 + $0x160] sm:$0xff]  ;;  %v1592_v63 = vld [vmem:[#allocation10 + $0x168] sm:$0xff] }
 0x19c   :  { %1342 = vmatpush.msra.mxu0 %v1303_v56  ;;  %1362 = vmatpush.msra.mxu1 %v1304_v57  ;;  %v1593_v56 = vld [vmem:[#allocation10 + $0x170] sm:$0xff]  ;;  %v1594_v57 = vld [vmem:[#allocation10 + $0x178] sm:$0xff] }
 0x19d   :  { %1382 = vmatpush.msra.mxu2 %v1305_v45  ;;  %1402 = vmatpush.msra.mxu3 %v1306_v24  ;;  %v1587_v45 = vld [vmem:[#allocation10 + $0x140] sm:$0xff]  ;;  %v1588_v24 = vld [vmem:[#allocation10 + $0x148] sm:$0xff] }
 0x19e   :  { %1343 = vmatpush.msra.mxu0 %v1299_v58  ;;  %1363 = vmatpush.msra.mxu1 %v1300_v44  ;;  %v1589_v58 = vld [vmem:[#allocation10 + $0x150] sm:$0xff]  ;;  %v1590_v44 = vld [vmem:[#allocation10 + $0x158] sm:$0xff] }
 0x19f   :  { %1383 = vmatpush.msra.mxu2 %v1301_v46  ;;  %1403 = vmatpush.msra.mxu3 %v1302_v52  ;;  %v1583_v46 = vld [vmem:[#allocation10 + $0x120] sm:$0xff]  ;;  %v1584_v52 = vld [vmem:[#allocation10 + $0x128] sm:$0xff] }
 0x1a0   :  { %1344 = vmatpush.msra.mxu0 %v1295_v49  ;;  %1364 = vmatpush.msra.mxu1 %v1296_v39  ;;  %v1585_v49 = vld [vmem:[#allocation10 + $0x130] sm:$0xff]  ;;  %v1586_v39 = vld [vmem:[#allocation10 + $0x138] sm:$0xff] }
 0x1a1   :  { %1384 = vmatpush.msra.mxu2 %v1297_v61  ;;  %1404 = vmatpush.msra.mxu3 %v1298_v53  ;;  %v1579_v61 = vld [vmem:[#allocation10 + $0x100] sm:$0xff]  ;;  %v1580_v53 = vld [vmem:[#allocation10 + $0x108] sm:$0xff] }
 0x1a2   :  { %1345 = vmatpush.msra.mxu0 %v1291_v62  ;;  %1365 = vmatpush.msra.mxu1 %v1292_v48  ;;  %v1581_v62 = vld [vmem:[#allocation10 + $0x110] sm:$0xff]  ;;  %v1582_v48 = vld [vmem:[#allocation10 + $0x118] sm:$0xff] }
 0x1a3   :  { %1385 = vmatpush.msra.mxu2 %v1293_v0  ;;  %1405 = vmatpush.msra.mxu3 %v1294_v2  ;;  %v1575_v0 = vld [vmem:[#allocation10 + $0xe0] sm:$0xff]  ;;  %v1576_v2 = vld [vmem:[#allocation10 + $0xe8] sm:$0xff] }
 0x1a4   :  { %1346 = vmatpush.msra.mxu0 %v1287_v60  ;;  %1366 = vmatpush.msra.mxu1 %v1288_v3  ;;  %v1577_v60 = vld [vmem:[#allocation10 + $0xf0] sm:$0xff]  ;;  %v1578_v3 = vld [vmem:[#allocation10 + $0xf8] sm:$0xff] }
 0x1a5   :  { %1386 = vmatpush.msra.mxu2 %v1289_v4  ;;  %1406 = vmatpush.msra.mxu3 %v1290_v6  ;;  %v1571_v4 = vld [vmem:[#allocation10 + $0xc0] sm:$0xff]  ;;  %v1572_v6 = vld [vmem:[#allocation10 + $0xc8] sm:$0xff] }
 0x1a6   :  { %1347 = vmatpush.msra.mxu0 %v1283_v7  ;;  %1367 = vmatpush.msra.mxu1 %v1284_v8  ;;  %v1573_v7 = vld [vmem:[#allocation10 + $0xd0] sm:$0xff]  ;;  %v1574_v8 = vld [vmem:[#allocation10 + $0xd8] sm:$0xff] }
 0x1a7   :  { %1387 = vmatpush.msra.mxu2 %v1285_v9  ;;  %1407 = vmatpush.msra.mxu3 %v1286_v10  ;;  %v1567_v9 = vld [vmem:[#allocation10 + $0xa0] sm:$0xff]  ;;  %v1568_v10 = vld [vmem:[#allocation10 + $0xa8] sm:$0xff] }
 0x1a8   :  { %1348 = vmatpush.msra.mxu0 %v1279_v11  ;;  %1368 = vmatpush.msra.mxu1 %v1280_v54  ;;  %v1569_v11 = vld [vmem:[#allocation10 + $0xb0] sm:$0xff]  ;;  %v1570_v54 = vld [vmem:[#allocation10 + $0xb8] sm:$0xff] }
 0x1a9   :  { %1388 = vmatpush.msra.mxu2 %v1281_v12  ;;  %1408 = vmatpush.msra.mxu3 %v1282_v1  ;;  %v1563_v12 = vld [vmem:[#allocation10 + $0x80] sm:$0xff]  ;;  %v1564_v1 = vld [vmem:[#allocation10 + $0x88] sm:$0xff] }
 0x1aa   :  { %1349 = vmatpush.msra.mxu0 %v1275_v13  ;;  %1369 = vmatpush.msra.mxu1 %v1276_v14  ;;  %v1565_v13 = vld [vmem:[#allocation10 + $0x90] sm:$0xff]  ;;  %v1566_v14 = vld [vmem:[#allocation10 + $0x98] sm:$0xff] }
 0x1ab   :  { %1389 = vmatpush.msra.mxu2 %v1277_v15  ;;  %1409 = vmatpush.msra.mxu3 %v1278_v16  ;;  %v1559_v15 = vld [vmem:[#allocation10 + $0x60] sm:$0xff]  ;;  %v1560_v16 = vld [vmem:[#allocation10 + $0x68] sm:$0xff] }
 0x1ac   :  { %1350 = vmatpush.msra.mxu0 %v1271_v17  ;;  %1370 = vmatpush.msra.mxu1 %v1272_v18  ;;  %v1561_v17 = vld [vmem:[#allocation10 + $0x70] sm:$0xff]  ;;  %v1562_v18 = vld [vmem:[#allocation10 + $0x78] sm:$0xff] }
 0x1ad   :  { %1390 = vmatpush.msra.mxu2 %v1273_v19  ;;  %1410 = vmatpush.msra.mxu3 %v1274_v20  ;;  %v1555_v19 = vld [vmem:[#allocation10 + $0x40] sm:$0xff]  ;;  %v1556_v20 = vld [vmem:[#allocation10 + $0x48] sm:$0xff] }
 0x1ae   :  { %1351 = vmatpush.msra.mxu0 %v1267_v21  ;;  %1371 = vmatpush.msra.mxu1 %v1268_v22  ;;  %v1557_v21 = vld [vmem:[#allocation10 + $0x50] sm:$0xff]  ;;  %v1558_v22 = vld [vmem:[#allocation10 + $0x58] sm:$0xff] }
 0x1af   :  { %1391 = vmatpush.msra.mxu2 %v1269_v23  ;;  %1411 = vmatpush.msra.mxu3 %v1270_v25  ;;  %v1551_v23 = vld [vmem:[#allocation10 + $0x20] sm:$0xff]  ;;  %v1552_v25 = vld [vmem:[#allocation10 + $0x28] sm:$0xff] }
 0x1b0   :  { %1352 = vmatmul.f32.vlgmr.msra.gmra.mxu0 %v5896_v38  ;;  %1372 = vmatmul.f32.vlgmr.msra.gmra.mxu1 %v5896_v38 }
 0x1b1   :  { %1392 = vmatmul.f32.vlgmr.msra.gmra.mxu2 %v5896_v38  ;;  %1412 = vmatmul.f32.vlgmr.msra.gmra.mxu3 %v5896_v38  ;;  %v1597_v38 = vld [vmem:[#allocation10 + $0x190] sm:$0xff] }
 0x1b2   :  { %1611 = vmatpush.msrb.mxu0 %v1607_v26  ;;  %1631 = vmatpush.msrb.mxu1 %v1608_v28  ;;  %v1553_v26 = vld [vmem:[#allocation10 + $0x30] sm:$0xff]  ;;  %v1554_v28 = vld [vmem:[#allocation10 + $0x38] sm:$0xff] }
 0x1b3   :  { %1651 = vmatpush.msrb.mxu2 %v1609_v29  ;;  %1671 = vmatpush.msrb.mxu3 %v1610_v33  ;;  %v5053_v29 = vld [vmem:[#allocation10] sm:$0xff]  ;;  %v5054_v33 = vld [vmem:[#allocation10 + $0x8] sm:$0xff] }
 0x1b4   :  { %1612 = vmatpush.msrb.mxu0 %v1603_v34  ;;  %1632 = vmatpush.msrb.mxu1 %v1604_v27  ;;  %v5055_v34 = vld [vmem:[#allocation10 + $0x10] sm:$0xff]  ;;  %v5056_v27 = vld [vmem:[#allocation10 + $0x18] sm:$0xff] }
 0x1b5   :  { %1652 = vmatpush.msrb.mxu2 %v1605_v35  ;;  %1672 = vmatpush.msrb.mxu3 %v1606_v36 }
 0x1b6   :  { %1613 = vmatpush.msrb.mxu0 %v1599_v37  ;;  %1633 = vmatpush.msrb.mxu1 %v1600_v41  ;;  %v5057_v37 = vld [vmem:[#allocation9 + $0x1e0] sm:$0xff]  ;;  %v5058_v41 = vld [vmem:[#allocation9 + $0x1e8] sm:$0xff] }
 0x1b7   :  { %1653 = vmatpush.msrb.mxu2 %v1601_v43  ;;  %1673 = vmatpush.msrb.mxu3 %v1602_v47  ;;  %v5059_v43 = vld [vmem:[#allocation9 + $0x1f0] sm:$0xff]  ;;  %v5060_v47 = vld [vmem:[#allocation9 + $0x1f8] sm:$0xff] }
 0x1b8   :  { %1614 = vmatpush.msrb.mxu0 %v1595_v51  ;;  %1634 = vmatpush.msrb.mxu1 %v1596_v30  ;;  %v5061_v51 = vld [vmem:[#allocation9 + $0x1c0] sm:$0xff]  ;;  %v5062_v30 = vld [vmem:[#allocation9 + $0x1c8] sm:$0xff] }
 0x1b9   :  { %1654 = vmatpush.msrb.mxu2 %v1597_v38  ;;  %1674 = vmatpush.msrb.mxu3 %v1598_v55  ;;  %v5063_v38 = vld [vmem:[#allocation9 + $0x1d0] sm:$0xff]  ;;  %v5064_v55 = vld [vmem:[#allocation9 + $0x1d8] sm:$0xff] }
 0x1ba   :  { %1615 = vmatpush.msrb.mxu0 %v1591_v59  ;;  %1635 = vmatpush.msrb.mxu1 %v1592_v63  ;;  %v5065_v59 = vld [vmem:[#allocation9 + $0x1a0] sm:$0xff]  ;;  %v5066_v63 = vld [vmem:[#allocation9 + $0x1a8] sm:$0xff] }
 0x1bb   :  { %1655 = vmatpush.msrb.mxu2 %v1593_v56  ;;  %1675 = vmatpush.msrb.mxu3 %v1594_v57  ;;  %v5067_v56 = vld [vmem:[#allocation9 + $0x1b0] sm:$0xff]  ;;  %v5068_v57 = vld [vmem:[#allocation9 + $0x1b8] sm:$0xff] }
 0x1bc   :  { %1616 = vmatpush.msrb.mxu0 %v1587_v45  ;;  %1636 = vmatpush.msrb.mxu1 %v1588_v24  ;;  %v5069_v45 = vld [vmem:[#allocation9 + $0x180] sm:$0xff]  ;;  %v5070_v24 = vld [vmem:[#allocation9 + $0x188] sm:$0xff] }
 0x1bd   :  { %1656 = vmatpush.msrb.mxu2 %v1589_v58  ;;  %1676 = vmatpush.msrb.mxu3 %v1590_v44  ;;  %v5071_v44 = vld [vmem:[#allocation9 + $0x190] sm:$0xff] }
 0x1be   :  { %1617 = vmatpush.msrb.mxu0 %v1583_v46  ;;  %1637 = vmatpush.msrb.mxu1 %v1584_v52  ;;  %v5072_v46 = vld [vmem:[#allocation9 + $0x198] sm:$0xff]  ;;  %v5073_v52 = vld [vmem:[#allocation9 + $0x160] sm:$0xff] }
 0x1bf   :  { %1657 = vmatpush.msrb.mxu2 %v1585_v49  ;;  %1677 = vmatpush.msrb.mxu3 %v1586_v39  ;;  %v5074_v49 = vld [vmem:[#allocation9 + $0x168] sm:$0xff]  ;;  %v5075_v39 = vld [vmem:[#allocation9 + $0x170] sm:$0xff] }
 0x1c0   :  { %1618 = vmatpush.msrb.mxu0 %v1579_v61  ;;  %1638 = vmatpush.msrb.mxu1 %v1580_v53  ;;  %v5076_v61 = vld [vmem:[#allocation9 + $0x178] sm:$0xff] }
 0x1c1   :  { %1658 = vmatpush.msrb.mxu2 %v1581_v62  ;;  %1678 = vmatpush.msrb.mxu3 %v1582_v48  ;;  %v5077_v48 = vld [vmem:[#allocation9 + $0x140] sm:$0xff] }
 0x1c2   :  { %1619 = vmatpush.msrb.mxu0 %v1575_v0  ;;  %1639 = vmatpush.msrb.mxu1 %v1576_v2  ;;  %v5078_v0 = vld [vmem:[#allocation9 + $0x148] sm:$0xff] }
 0x1c3   :  { %1659 = vmatpush.msrb.mxu2 %v1577_v60  ;;  %1679 = vmatpush.msrb.mxu3 %v1578_v3  ;;  %v5079_v3 = vld [vmem:[#allocation9 + $0x150] sm:$0xff] }
 0x1c4   :  { %1620 = vmatpush.msrb.mxu0 %v1571_v4  ;;  %1640 = vmatpush.msrb.mxu1 %v1572_v6  ;;  %v5080_v4 = vld [vmem:[#allocation9 + $0x158] sm:$0xff]  ;;  %v5081_v6 = vld [vmem:[#allocation9 + $0x120] sm:$0xff] }
 0x1c5   :  { %1660 = vmatpush.msrb.mxu2 %v1573_v7  ;;  %1680 = vmatpush.msrb.mxu3 %v1574_v8  ;;  %v5082_v7 = vld [vmem:[#allocation9 + $0x128] sm:$0xff]  ;;  %v1514_v8 = vld [vmem:[#allocation9 + $0x100] sm:$0xff] }
 0x1c6   :  { %1621 = vmatpush.msrb.mxu0 %v1567_v9  ;;  %1641 = vmatpush.msrb.mxu1 %v1568_v10  ;;  %v1515_v9 = vld [vmem:[#allocation9 + $0x108] sm:$0xff]  ;;  %v1516_v10 = vld [vmem:[#allocation9 + $0x110] sm:$0xff] }
 0x1c7   :  { %1661 = vmatpush.msrb.mxu2 %v1569_v11  ;;  %1681 = vmatpush.msrb.mxu3 %v1570_v54 }
 0x1c8   :  { %1622 = vmatpush.msrb.mxu0 %v1563_v12  ;;  %1642 = vmatpush.msrb.mxu1 %v1564_v1  ;;  %v5083_v12 = vld [vmem:[#allocation9 + $0x130] sm:$0xff]  ;;  %v5084_v1 = vld [vmem:[#allocation9 + $0x138] sm:$0xff] }
 0x1c9   :  { %1662 = vmatpush.msrb.mxu2 %v1565_v13  ;;  %1682 = vmatpush.msrb.mxu3 %v1566_v14  ;;  %v1517_v13 = vld [vmem:[#allocation9 + $0x118] sm:$0xff] }
 0x1ca   :  { %1623 = vmatpush.msrb.mxu0 %v1559_v15  ;;  %1643 = vmatpush.msrb.mxu1 %v1560_v16  ;;  %v1510_v15 = vld [vmem:[#allocation9 + $0xe0] sm:$0xff]  ;;  %v1511_v16 = vld [vmem:[#allocation9 + $0xe8] sm:$0xff] }
 0x1cb   :  { %1663 = vmatpush.msrb.mxu2 %v1561_v17  ;;  %1683 = vmatpush.msrb.mxu3 %v1562_v18  ;;  %v1512_v17 = vld [vmem:[#allocation9 + $0xf0] sm:$0xff] }
 0x1cc   :  { %1624 = vmatpush.msrb.mxu0 %v1555_v19  ;;  %1644 = vmatpush.msrb.mxu1 %v1556_v20  ;;  %v1513_v20 = vld [vmem:[#allocation9 + $0xf8] sm:$0xff] }
 0x1cd   :  { %1664 = vmatpush.msrb.mxu2 %v1557_v21  ;;  %1684 = vmatpush.msrb.mxu3 %v1558_v22  ;;  %v1506_v21 = vld [vmem:[#allocation9 + $0xc0] sm:$0xff]  ;;  %v1507_v22 = vld [vmem:[#allocation9 + $0xc8] sm:$0xff] }
 0x1ce   :  { %1625 = vmatpush.msrb.mxu0 %v1551_v23  ;;  %1645 = vmatpush.msrb.mxu1 %v1552_v25  ;;  %v1508_v23 = vld [vmem:[#allocation9 + $0xd0] sm:$0xff] }
 0x1cf   :  { %1665 = vmatpush.msrb.mxu2 %v1553_v26  ;;  %1685 = vmatpush.msrb.mxu3 %v1554_v28  ;;  %v1509_v26 = vld [vmem:[#allocation9 + $0xd8] sm:$0xff] }
 0x1d0   :  { %1626 = vmatpush.msrb.mxu0 %v5053_v29  ;;  %1646 = vmatpush.msrb.mxu1 %v5054_v33  ;;  %v1502_v29 = vld [vmem:[#allocation9 + $0xa0] sm:$0xff]  ;;  %v1503_v33 = vld [vmem:[#allocation9 + $0xa8] sm:$0xff] }
 0x1d1   :  { %1666 = vmatpush.msrb.mxu2 %v5055_v34  ;;  %1686 = vmatpush.msrb.mxu3 %v5056_v27  ;;  %v1504_v34 = vld [vmem:[#allocation9 + $0xb0] sm:$0xff]  ;;  %v1505_v27 = vld [vmem:[#allocation9 + $0xb8] sm:$0xff] }
 0x1d2   :  { %1691 = vmatpush.msra.mxu0 %v5057_v37  ;;  %1711 = vmatpush.msra.mxu1 %v5058_v41  ;;  %v1499_v37 = vld [vmem:[#allocation9 + $0x88] sm:$0xff]  ;;  %v1500_v41 = vld [vmem:[#allocation9 + $0x90] sm:$0xff] }
 0x1d3   :  { %1731 = vmatpush.msra.mxu2 %v5059_v43  ;;  %1751 = vmatpush.msra.mxu3 %v5060_v47  ;;  %v1501_v43 = vld [vmem:[#allocation9 + $0x98] sm:$0xff] }
 0x1d4   :  { %1692 = vmatpush.msra.mxu0 %v5061_v51  ;;  %1712 = vmatpush.msra.mxu1 %v5062_v30  ;;  %v1494_v51 = vld [vmem:[#allocation9 + $0x60] sm:$0xff]  ;;  %v1495_v30 = vld [vmem:[#allocation9 + $0x68] sm:$0xff] }
 0x1d5   :  { %1732 = vmatpush.msra.mxu2 %v5063_v38  ;;  %1752 = vmatpush.msra.mxu3 %v5064_v55  ;;  %v1496_v38 = vld [vmem:[#allocation9 + $0x70] sm:$0xff] }
 0x1d6   :  { %1693 = vmatpush.msra.mxu0 %v5065_v59  ;;  %1713 = vmatpush.msra.mxu1 %v5066_v63  ;;  %v1497_v59 = vld [vmem:[#allocation9 + $0x78] sm:$0xff] }
 0x1d7   :  { %1733 = vmatpush.msra.mxu2 %v5067_v56  ;;  %1753 = vmatpush.msra.mxu3 %v5068_v57 }
 0x1d8   :  { %1694 = vmatpush.msra.mxu0 %v5069_v45  ;;  %1714 = vmatpush.msra.mxu1 %v5070_v24  ;;  %v1490_v45 = vld [vmem:[#allocation9 + $0x40] sm:$0xff]  ;;  %v1491_v24 = vld [vmem:[#allocation9 + $0x48] sm:$0xff] }
 0x1d9   :  { %1734 = vmatpush.msra.mxu2 %v5071_v44  ;;  %1754 = vmatpush.msra.mxu3 %v5072_v46  ;;  %v1493_v46 = vld [vmem:[#allocation9 + $0x58] sm:$0xff] }
 0x1da   :  { %1695 = vmatpush.msra.mxu0 %v5073_v52  ;;  %1715 = vmatpush.msra.mxu1 %v5074_v49  ;;  %v1486_v52 = vld [vmem:[#allocation9 + $0x20] sm:$0xff]  ;;  %v1487_v49 = vld [vmem:[#allocation9 + $0x28] sm:$0xff] }
 0x1db   :  { %1735 = vmatpush.msra.mxu2 %v5075_v39  ;;  %1755 = vmatpush.msra.mxu3 %v5076_v61  ;;  %v1488_v39 = vld [vmem:[#allocation9 + $0x30] sm:$0xff] }
 0x1dc   :  { %1696 = vmatpush.msra.mxu0 %v5077_v48  ;;  %1716 = vmatpush.msra.mxu1 %v5078_v0  ;;  %v1483_v48 = vld [vmem:[#allocation9 + $0x8] sm:$0xff]  ;;  %v1484_v0 = vld [vmem:[#allocation9 + $0x10] sm:$0xff] }
 0x1dd   :  { %1736 = vmatpush.msra.mxu2 %v5079_v3  ;;  %1756 = vmatpush.msra.mxu3 %v5080_v4 }
 0x1de   :  { %1697 = vmatpush.msra.mxu0 %v5081_v6  ;;  %1717 = vmatpush.msra.mxu1 %v5082_v7 }
 0x1df   :  { %1737 = vmatpush.msra.mxu2 %v5083_v12  ;;  %1757 = vmatpush.msra.mxu3 %v5084_v1 }
 0x1e0   :  { %1698 = vmatpush.msra.mxu0 %v1514_v8  ;;  %1718 = vmatpush.msra.mxu1 %v1515_v9 }
 0x1e1   :  { %1738 = vmatpush.msra.mxu2 %v1516_v10  ;;  %1758 = vmatpush.msra.mxu3 %v1517_v13  ;;  %v1332_v10 = vld [vmem:[#allocation4 + $0x40] sm:$0xff] }
 0x1e2   :  { %1699 = vmatpush.msra.mxu0 %v1510_v15  ;;  %1719 = vmatpush.msra.mxu1 %v1511_v16 }
 0x1e3   :  { %1739 = vmatpush.msra.mxu2 %v1512_v17  ;;  %1759 = vmatpush.msra.mxu3 %v1513_v20 }
 0x1e4   :  { %1700 = vmatpush.msra.mxu0 %v1506_v21  ;;  %1720 = vmatpush.msra.mxu1 %v1507_v22 }
 0x1e5   :  { %1740 = vmatpush.msra.mxu2 %v1508_v23  ;;  %1760 = vmatpush.msra.mxu3 %v1509_v26 }
 0x1e6   :  { %1701 = vmatpush.msra.mxu0 %v1502_v29  ;;  %1721 = vmatpush.msra.mxu1 %v1503_v33 }
 0x1e7   :  { %1741 = vmatpush.msra.mxu2 %v1504_v34  ;;  %1761 = vmatpush.msra.mxu3 %v1505_v27 }
 0x1e8   :  { %1722 = vmatpush.msra.mxu1 %v1499_v37 }
 0x1e9   :  { %1742 = vmatpush.msra.mxu2 %v1500_v41  ;;  %1762 = vmatpush.msra.mxu3 %v1501_v43 }
 0x1ea   :  { %1723 = vmatpush.msra.mxu1 %v1495_v30 }
 0x1eb   :  { %1743 = vmatpush.msra.mxu2 %v1496_v38  ;;  %1763 = vmatpush.msra.mxu3 %v1497_v59 }
 0x1ec   :  { %1724 = vmatpush.msra.mxu1 %v1491_v24 }
 0x1ed   :  { %1764 = vmatpush.msra.mxu3 %v1493_v46 }
 0x1ee   :  { %1725 = vmatpush.msra.mxu1 %v1487_v49 }
 0x1f0   :  { %1726 = vmatpush.msra.mxu1 %v1483_v48 }
 0x209   :  { %v1053_v35 = vpop.f32.mrf.mxu0  ;;  %v1073_v36 = vpop.f32.mrf.mxu1 }
 0x210   :  { %v1113_v58 = vpop.f32.mrf.mxu3  ;;  %v5908_v14 = vpop.f32.mrf.mxu2 }
 0x213   :  { %v1133_v53 = vpop.f32.mrf.mxu0  ;;  %v1153_v62 = vpop.f32.mrf.mxu1 }
 0x214   :  { %v1134_v2 = vadd.f32 %v1133_v53, %v1053_v35  ;;  %v1154_v60 = vadd.f32 %v1153_v62, %v1073_v36  ;;  %v1498_v36 = vld [vmem:[#allocation9 + $0x80] sm:$0xff]  ;;  %v1489_v53 = vld [vmem:[#allocation9 + $0x38] sm:$0xff] }
 0x215   :  { %1702 = vmatpush.msra.mxu0 %v1498_v36  ;;  %v1482_v62 = vld [vmem:[#allocation9] sm:$0xff]  ;;  %1765 = vmatpush.msra.mxu3 %v1489_v53  ;;  %v1335_v36 = vld [vmem:[#allocation4 + $0x58] sm:$0xff] }
 0x216   :  { %v1196_v11 = vadd.f32 %v1134_v2, %v5785_v31  ;;  %v1197_v54 = vadd.f32 %v1154_v60, %v5788_v32  ;;  %v1485_v2 = vld [vmem:[#allocation9 + $0x18] sm:$0xff] }
 0x217   :  { %1703 = vmatpush.msra.mxu0 %v1494_v51  ;;  %1766 = vmatpush.msra.mxu3 %v1485_v2 }
 0x218   :  { %v4749_v18 = vmul.f32 -1.442695, %v1196_v11  ;;  %v4750_v19 = vmul.f32 -1.442695, %v1197_v54  ;;  %v1333_v11 = vld [vmem:[#allocation4 + $0x48] sm:$0xff] }
 0x219   :  { %1704 = vmatpush.msra.mxu0 %v1490_v45 }
 0x21a   :  { %4845 = vpow2.f32 %v4749_v18  ;;  %v1193_v25 = vpop.f32.mrf.mxu3  ;;  %v1173_v57 = vpop.f32.mrf.mxu2 }
 0x21b   :  { %4847 = vpow2.f32 %v4750_v19  ;;  %v1194_v28 = vadd.f32 %v1193_v25, %v1113_v58  ;;  %v1492_v58 = vld [vmem:[#allocation9 + $0x50] sm:$0xff]  ;;  %v1174_v61 = vadd.f32 %v1173_v57, %v5908_v14  ;;  %1705 = vmatpush.msra.mxu0 %v1486_v52 }
 0x21c   :  { %1744 = vmatpush.msra.mxu2 %v1492_v58 }
 0x21d   :  { %v1199_v35 = vadd.f32 %v1194_v28, %v5795_v50  ;;  %1706 = vmatpush.msra.mxu0 %v1482_v62  ;;  %v1198_v3 = vadd.f32 %v1174_v61, %v5806_v40 }
 0x21e   :  { %1745 = vmatpush.msra.mxu2 %v1488_v39  ;;  %v1334_v39 = vld [vmem:[#allocation4 + $0x50] sm:$0xff] }
 0x21f   :  { %v4751_v47 = vmul.f32 -1.442695, %v1199_v35 }
 0x220   :  { %v4846_v55 = vpop.eup %4845  ;;  %1746 = vmatpush.msra.mxu2 %v1484_v0 }
 0x221   :  { %v4848_v63 = vpop.eup %4847  ;;  %v5911_v56 = vadd.f32 1.0, %v4846_v55  ;;  %4849 = vpow2.f32 %v4751_v47 }
 0x222   :  { %v5913_v44 = vadd.f32 1.0, %v4848_v63 }
 0x223   :  { %4851 = vrcp.f32 %v5911_v56  ;;  %v1214_v12 = vand.u32 2147483647, %v5911_v56  ;;  %v1216_v14 = vand.u32 2147483648, %v5911_v56  ;;  %vm1210_vm6 = vweird.f32 %v5911_v56 }
 0x224   :  { %4853 = vrcp.f32 %v5913_v44  ;;  %v1235_v13 = vand.u32 2147483648, %v5913_v44  ;;  %v1233_v15 = vand.u32 2147483647, %v5913_v44  ;;  %vm1229_vm7 = vweird.f32 %v5913_v44 }
 0x225   :  { %vm1215_vm9 = vcmp.eq.f32.partialorder %v1214_v12, 8.507059e+37  ;;  %v1217_v28 = vor.u32 1.1754944e-38, %v1216_v14  ;;  %v1899_v12 = vld [vmem:[#allocation7 + $0x1c8] sm:$0xff]  ;;  %v1901_v14 = vld [vmem:[#allocation7 + $0x1d8] sm:$0xff] }
 0x226   :  { %v1236_v27 = vor.u32 1.1754944e-38, %v1235_v13  ;;  %vm1234_vm11 = vcmp.eq.f32.partialorder %v1233_v15, 8.507059e+37  ;;  %v1900_v13 = vld [vmem:[#allocation7 + $0x1d0] sm:$0xff] }
 0x227   :  { %v4850_v60 = vpop.eup %4849 }
 0x228   :  { %v5919_v4 = vadd.f32 1.0, %v4850_v60 }
 0x229   :  { %v4852_v6 = vpop.eup %4851 }
 0x22a   :  { %v4854_v7 = vpop.eup %4853  ;;  %v1206_v8 = vmul.f32 %v4852_v6, %v5911_v56  ;;  %4855 = vrcp.f32 %v5919_v4  ;;  %vm1211_vm4 = vweird.f32 %v4852_v6  ;;  %vm1249_vm13 = vweird.f32 %v5919_v4 }
 0x22b   :  { %v1225_v9 = vmul.f32 %v4854_v7, %v5913_v44  ;;  %4857 = vtanh.f32 %v1198_v3  ;;  %vm1230_vm5 = vweird.f32 %v4854_v7  ;;  %vm1212_vm8 = vmor %vm1210_vm6, %vm1211_vm4  ;;  %v1255_v44 = vand.u32 2147483648, %v5919_v4 }
 0x22c   :  { %v1207_v54 = vsub.f32 1.0, %v1206_v8  ;;  %vm1231_vm10 = vmor %vm1229_vm7, %vm1230_vm5 }
 0x22d   :  { %v1226_v1 = vsub.f32 1.0, %v1225_v9  ;;  %v1353_v16 = vpop.f32.mrf.mxu0  ;;  %v1373_v17 = vpop.f32.mrf.mxu1  ;;  %v1256_v49 = vor.u32 1.1754944e-38, %v1255_v44  ;;  %v1904_v9 = vld [vmem:[#allocation7 + $0x1f0] sm:$0xff]  ;;  %v1883_v44 = vld [vmem:[#allocation7 + $0x148] sm:$0xff] }
 0x22e   :  { %v1208_v18 = vmul.f32 %v4852_v6, %v1207_v54  ;;  %v1354_v19 = vadd.f32 %v1353_v16, %v1332_v10  ;;  %v1374_v20 = vadd.f32 %v1373_v17, %v1333_v11  ;;  %v1905_v10 = vld [vmem:[#allocation7 + $0x1f8] sm:$0xff]  ;;  %v1898_v54 = vld [vmem:[#allocation7 + $0x1c0] sm:$0xff] }
 0x22f   :  { %v1227_v21 = vmul.f32 %v4854_v7, %v1226_v1  ;;  %v1894_v17 = vld [vmem:[#allocation7 + $0x1a0] sm:$0xff] }
 0x230   :  { %v4856_v22 = vpop.eup %4855  ;;  %v1209_v23 = vadd.f32 %v4852_v6, %v1208_v18  ;;  %v4752_v25 = vmul.f32 -1.442695, %v1354_v19  ;;  %v4753_v26 = vmul.f32 -1.442695, %v1374_v20  ;;  %v1895_v18 = vld [vmem:[#allocation7 + $0x1a8] sm:$0xff] }
 0x231   :  { %v1228_v29 = vadd.f32 %v4854_v7, %v1227_v21  ;;  %v1245_v33 = vmul.f32 %v4856_v22, %v5919_v4  ;;  %v4858_v34 = vpop.eup %4857  ;;  %vm1250_vm12 = vweird.f32 %v4856_v22 }
 0x232   :  { %v1213_v35 = vsel %vm1212_vm8, %v4852_v6, %v1209_v23  ;;  %4859 = vpow2.f32 %v4752_v25  ;;  %vm1251_vm14 = vmor %vm1249_vm13, %vm1250_vm12  ;;  %v1903_v6 = vld [vmem:[#allocation7 + $0x1e8] sm:$0xff]  ;;  %v1897_v23 = vld [vmem:[#allocation7 + $0x1b8] sm:$0xff] }
 0x233   :  { %v1218_v37 = vsel %vm1215_vm9, %v1217_v28, %v1213_v35  ;;  %v1232_v41 = vsel %vm1231_vm10, %v4854_v7, %v1228_v29  ;;  %v1246_v43 = vsub.f32 1.0, %v1245_v33  ;;  %4861 = vpow2.f32 %v4753_v26  ;;  %v1890_v28 = vld [vmem:[#allocation7 + $0x180] sm:$0xff]  ;;  %v1891_v29 = vld [vmem:[#allocation7 + $0x188] sm:$0xff] }
 0x234   :  { %v1237_v47 = vsel %vm1234_vm11, %v1236_v27, %v1232_v41  ;;  %v1260_v51 = vmul.f32 %v4858_v34, %v1218_v37  ;;  %v1413_v30 = vpop.f32.mrf.mxu3  ;;  %v1393_v61 = vpop.f32.mrf.mxu2  ;;  %v1892_v34 = vld [vmem:[#allocation7 + $0x190] sm:$0xff]  ;;  %v1893_v27 = vld [vmem:[#allocation7 + $0x198] sm:$0xff] }
 0x235   :  { %v1259_v38 = vmul.f32 %v1237_v47, %v5862_v42  ;;  %v1414_v55 = vadd.f32 %v1413_v30, %v1335_v36  ;;  %v1247_v59 = vmul.f32 %v4856_v22, %v1246_v43  ;;  %v1253_v42 = vand.u32 2147483647, %v5919_v4  ;;  %v1902_v4 = vld [vmem:[#allocation7 + $0x1e0] sm:$0xff]  ;;  %v1887_v47 = vld [vmem:[#allocation7 + $0x168] sm:$0xff]  ;;  %v1856_v36 = vld [vmem:[#allocation7 + $0x70] sm:$0xff] }
 0x236   :  { %v1394_v60 = vadd.f32 %v1393_v61, %v1334_v39  ;;  %v1886_v43 = vld [vmem:[#allocation7 + $0x160] sm:$0xff]  ;;  %v1885_v39 = vld [vmem:[#allocation7 + $0x158] sm:$0xff] }
 0x237   :  { %v5932_v63 = vadd.f32 %v1260_v51, %v1259_v38  ;;  %v4754_v56 = vmul.f32 -1.442695, %v1414_v55  ;;  %v1248_v45 = vadd.f32 %v4856_v22, %v1247_v59  ;;  %vm1254_vm15 = vcmp.eq.f32.partialorder %v1253_v42, 8.507059e+37  ;;  %v1888_v59 = vld [vmem:[#allocation7 + $0x170] sm:$0xff]  ;;  %v1853_v51 = vld [vmem:[#allocation7 + $0x58] sm:$0xff] }
 0x238   :  { %v4860_v57 = vpop.eup %4859 }
 0x239   :  { %v4862_v24 = vpop.eup %4861  ;;  %4863 = vtanh.f32 %v5932_v63  ;;  %v5935_v58 = vadd.f32 1.0, %v4860_v57  ;;  %v1252_v52 = vsel %vm1251_vm14, %v4856_v22, %v1248_v45  ;;  %v1896_v22 = vld [vmem:[#allocation7 + $0x1b0] sm:$0xff] }
 0x23a   :  { %v5938_v46 = vadd.f32 1.0, %v4862_v24  ;;  %4865 = vpow2.f32 %v4754_v56  ;;  %v1257_v62 = vsel %vm1254_vm15, %v1256_v49, %v1252_v52  ;;  %v1889_v56 = vld [vmem:[#allocation7 + $0x178] sm:$0xff]  ;;  %v1884_v49 = vld [vmem:[#allocation7 + $0x150] sm:$0xff] }
 0x23b   :  { %4867 = vrcp.f32 %v5935_v58  ;;  %v1432_v16 = vand.u32 2147483648, %v5935_v58  ;;  %v1430_v21 = vand.u32 2147483647, %v5935_v58  ;;  %vm1426_vm2 = vweird.f32 %v5935_v58 }
 0x23c   :  { %4869 = vrcp.f32 %v5938_v46  ;;  %v1451_v19 = vand.u32 2147483648, %v5938_v46  ;;  %v1449_v26 = vand.u32 2147483647, %v5938_v46  ;;  %vm1445_vm3 = vweird.f32 %v5938_v46 }
 0x23d   :  { %v1433_v37 = vor.u32 1.1754944e-38, %v1432_v16  ;;  %vm1431_vm6 = vcmp.eq.f32.partialorder %v1430_v21, 8.507059e+37  ;;  %v1864_v21 = vld [vmem:[#allocation7 + $0xb0] sm:$0xff] }
 0x23e   :  { %v1452_v30 = vor.u32 1.1754944e-38, %v1451_v19  ;;  %vm1450_vm7 = vcmp.eq.f32.partialorder %v1449_v26, 8.507059e+37  ;;  %v1862_v19 = vld [vmem:[#allocation7 + $0xa0] sm:$0xff] }
 0x23f   :  { %v4864_v53 = vpop.eup %4863 }
 0x240   :  { %v4866_v48 = vpop.eup %4865  ;;  %v1263_v0 = vmul.f32 %v4864_v53, %v1257_v62  ;;  %v1878_v53 = vld [vmem:[#allocation7 + $0x120] sm:$0xff]  ;;  %v1879_v62 = vld [vmem:[#allocation7 + $0x128] sm:$0xff] }
 0x241   :  { %v5944_v2 = vpop.eup %4867  ;;  %v5946_v3 = vadd.f32 1.0, %v4866_v48 }
 0x242   :  { %v5948_v7 = vpop.eup %4869  ;;  %v1422_v8 = vmul.f32 %v5944_v2, %v5935_v58  ;;  %1627 = vmatmul.f32.vlgmr.msrb.gmra.mxu0 %v1263_v0  ;;  %1647 = vmatmul.f32.vlgmr.msrb.gmra.mxu1 %v1263_v0  ;;  %vm1427_vm0 = vweird.f32 %v5944_v2  ;;  %v1882_v58 = vld [vmem:[#allocation7 + $0x140] sm:$0xff] }
 0x243   :  { %v1441_v11 = vmul.f32 %v5948_v7, %v5938_v46  ;;  %4871 = vrcp.f32 %v5946_v3  ;;  %1667 = vmatmul.f32.vlgmr.msrb.gmra.mxu2 %v1263_v0  ;;  %1687 = vmatmul.f32.vlgmr.msrb.gmra.mxu3 %v1263_v0  ;;  %vm1446_vm1 = vweird.f32 %v5948_v7  ;;  %vm5970_vm4 = vmor %vm1426_vm2, %vm1427_vm0  ;;  %v1880_v0 = vld [vmem:[#allocation7 + $0x130] sm:$0xff]  ;;  %vm1465_vm9 = vweird.f32 %v5946_v3 }
 0x244   :  { %v1423_v1 = vsub.f32 1.0, %v1422_v8  ;;  %1911 = vmatpush.msrb.mxu0 %v1902_v4  ;;  %1931 = vmatpush.msrb.mxu1 %v1903_v6  ;;  %4873 = vtanh.f32 %v1394_v60  ;;  %vm5977_vm5 = vmor %vm1445_vm3, %vm1446_vm1  ;;  %v1874_v4 = vld [vmem:[#allocation7 + $0x100] sm:$0xff]  ;;  %v1875_v6 = vld [vmem:[#allocation7 + $0x108] sm:$0xff] }
 0x245   :  { %v1442_v15 = vsub.f32 1.0, %v1441_v11  ;;  %1951 = vmatpush.msrb.mxu2 %v1904_v9  ;;  %1971 = vmatpush.msrb.mxu3 %v1905_v10  ;;  %v1877_v8 = vld [vmem:[#allocation7 + $0x118] sm:$0xff]  ;;  %v1471_v9 = vand.u32 2147483648, %v5946_v3  ;;  %v1870_v10 = vld [vmem:[#allocation7 + $0xe0] sm:$0xff]  ;;  %v1871_v11 = vld [vmem:[#allocation7 + $0xe8] sm:$0xff] }
 0x246   :  { %v1424_v20 = vmul.f32 %v5944_v2, %v1423_v1  ;;  %1912 = vmatpush.msrb.mxu0 %v1898_v54  ;;  %1932 = vmatpush.msrb.mxu1 %v1899_v12  ;;  %v1469_v54 = vand.u32 2147483647, %v5946_v3  ;;  %v1872_v12 = vld [vmem:[#allocation7 + $0xf0] sm:$0xff]  ;;  %v1873_v1 = vld [vmem:[#allocation7 + $0xf8] sm:$0xff] }
 0x247   :  { %v1443_v25 = vmul.f32 %v5948_v7, %v1442_v15  ;;  %1952 = vmatpush.msrb.mxu2 %v1900_v13  ;;  %1972 = vmatpush.msrb.mxu3 %v1901_v14  ;;  %v1866_v14 = vld [vmem:[#allocation7 + $0xc0] sm:$0xff]  ;;  %v1867_v15 = vld [vmem:[#allocation7 + $0xc8] sm:$0xff] }
 0x248   :  { %v1425_v33 = vadd.f32 %v5944_v2, %v1424_v20  ;;  %1913 = vmatpush.msrb.mxu0 %v1894_v17  ;;  %1933 = vmatpush.msrb.mxu1 %v1895_v18  ;;  %v1869_v17 = vld [vmem:[#allocation7 + $0xd8] sm:$0xff]  ;;  %v1472_v18 = vor.u32 1.1754944e-38, %v1471_v9  ;;  %v1863_v20 = vld [vmem:[#allocation7 + $0xa8] sm:$0xff]  ;;  %vm1470_vm11 = vcmp.eq.f32.partialorder %v1469_v54, 8.507059e+37  ;;  %v2168_v9 = vld [vmem:[#allocation10 + $0x170] sm:$0xff] }
 0x249   :  { %v5965_v35 = vpop.eup %4871  ;;  %v1444_v41 = vadd.f32 %v5948_v7, %v1443_v25  ;;  %1953 = vmatpush.msrb.mxu2 %v1896_v22  ;;  %1973 = vmatpush.msrb.mxu3 %v1897_v23  ;;  %v1865_v22 = vld [vmem:[#allocation7 + $0xb8] sm:$0xff]  ;;  %v2163_v54 = vld [vmem:[#allocation10 + $0x148] sm:$0xff]  ;;  %v2158_v13 = vld [vmem:[#allocation10 + $0x120] sm:$0xff] }
 0x24a   :  { %v1429_v38 = vsel %vm5970_vm4, %v5944_v2, %v1425_v33  ;;  %v1461_v55 = vmul.f32 %v5965_v35, %v5946_v3  ;;  %1914 = vmatpush.msrb.mxu0 %v1890_v28  ;;  %1934 = vmatpush.msrb.mxu1 %v1891_v29  ;;  %v4874_v57 = vpop.eup %4873  ;;  %v1881_v2 = vld [vmem:[#allocation7 + $0x138] sm:$0xff]  ;;  %vm1466_vm8 = vweird.f32 %v5965_v35  ;;  %v1868_v3 = vld [vmem:[#allocation7 + $0xd0] sm:$0xff]  ;;  %v1858_v28 = vld [vmem:[#allocation7 + $0x80] sm:$0xff] }
 0x24b   :  { %v1434_v45 = vsel %vm1431_vm6, %v1433_v37, %v1429_v38  ;;  %v1448_v24 = vsel %vm5977_vm5, %v5948_v7, %v1444_v41  ;;  %1954 = vmatpush.msrb.mxu2 %v1892_v34  ;;  %1974 = vmatpush.msrb.mxu3 %v1893_v27  ;;  %vm6001_vm10 = vmor %vm1465_vm9, %vm1466_vm8  ;;  %v1859_v29 = vld [vmem:[#allocation7 + $0x88] sm:$0xff]  ;;  %v1860_v33 = vld [vmem:[#allocation7 + $0x90] sm:$0xff] }
 0x24c   :  { %v1453_v46 = vsel %vm1450_vm7, %v1452_v30, %v1448_v24  ;;  %v1476_v42 = vmul.f32 %v4874_v57, %v1434_v45  ;;  %v1462_v52 = vsub.f32 1.0, %v1461_v55  ;;  %1915 = vmatpush.msrb.mxu0 %v1886_v43  ;;  %1935 = vmatpush.msrb.mxu1 %v1887_v47  ;;  %v1861_v34 = vld [vmem:[#allocation7 + $0x98] sm:$0xff]  ;;  %v1854_v27 = vld [vmem:[#allocation7 + $0x60] sm:$0xff]  ;;  %v1851_v43 = vld [vmem:[#allocation7 + $0x48] sm:$0xff] }
 0x24d   :  { %v1475_v61 = vmul.f32 %v1453_v46, %v5882_v5  ;;  %1955 = vmatpush.msrb.mxu2 %v1888_v59  ;;  %1975 = vmatpush.msrb.mxu3 %v1889_v56  ;;  %v1876_v5 = vld [vmem:[#allocation7 + $0x110] sm:$0xff]  ;;  %v1857_v37 = vld [vmem:[#allocation7 + $0x78] sm:$0xff]  ;;  %v1850_v41 = vld [vmem:[#allocation7 + $0x40] sm:$0xff] }
 0x24e   :  { %v1463_v48 = vmul.f32 %v5965_v35, %v1462_v52  ;;  %1916 = vmatpush.msrb.mxu0 %v1882_v58  ;;  %1936 = vmatpush.msrb.mxu1 %v1883_v44  ;;  %v1852_v47 = vld [vmem:[#allocation7 + $0x50] sm:$0xff]  ;;  %v1846_v30 = vld [vmem:[#allocation7 + $0x20] sm:$0xff]  ;;  %v1847_v38 = vld [vmem:[#allocation7 + $0x28] sm:$0xff] }
 0x24f   :  { %v5991_v60 = vadd.f32 %v1476_v42, %v1475_v61  ;;  %1956 = vmatpush.msrb.mxu2 %v1884_v49  ;;  %1976 = vmatpush.msrb.mxu3 %v1885_v39  ;;  %v1848_v55 = vld [vmem:[#allocation7 + $0x30] sm:$0xff]  ;;  %v1849_v59 = vld [vmem:[#allocation7 + $0x38] sm:$0xff]  ;;  %v1842_v56 = vld [vmem:[#allocation7] sm:$0xff] }
 0x250   :  { %v1464_v7 = vadd.f32 %v5965_v35, %v1463_v48  ;;  %1917 = vmatpush.msrb.mxu0 %v1878_v53  ;;  %1937 = vmatpush.msrb.mxu1 %v1879_v62  ;;  %v1843_v57 = vld [vmem:[#allocation7 + $0x8] sm:$0xff]  ;;  %v1844_v45 = vld [vmem:[#allocation7 + $0x10] sm:$0xff]  ;;  %v1845_v24 = vld [vmem:[#allocation7 + $0x18] sm:$0xff] }
 0x251   :  { %4875 = vtanh.f32 %v5991_v60  ;;  %1957 = vmatpush.msrb.mxu2 %v1880_v0  ;;  %1977 = vmatpush.msrb.mxu3 %v1881_v2  ;;  %v2182_v58 = vld [vmem:[#allocation10 + $0x1e0] sm:$0xff]  ;;  %v2183_v44 = vld [vmem:[#allocation10 + $0x1e8] sm:$0xff]  ;;  %v2184_v46 = vld [vmem:[#allocation10 + $0x1f0] sm:$0xff] }
 0x252   :  { %1918 = vmatpush.msrb.mxu0 %v1874_v4  ;;  %1938 = vmatpush.msrb.mxu1 %v1875_v6  ;;  %v1468_v16 = vsel %vm6001_vm10, %v5965_v35, %v1464_v7  ;;  %v1855_v35 = vld [vmem:[#allocation7 + $0x68] sm:$0xff]  ;;  %v2185_v42 = vld [vmem:[#allocation10 + $0x1f8] sm:$0xff]  ;;  %v2178_v52 = vld [vmem:[#allocation10 + $0x1c0] sm:$0xff] }
 0x253   :  { %1958 = vmatpush.msrb.mxu2 %v1876_v5  ;;  %1978 = vmatpush.msrb.mxu3 %v1877_v8  ;;  %v1473_v25 = vsel %vm1470_vm11, %v1472_v18, %v1468_v16  ;;  %v2179_v49 = vld [vmem:[#allocation10 + $0x1c8] sm:$0xff]  ;;  %v2180_v39 = vld [vmem:[#allocation10 + $0x1d0] sm:$0xff]  ;;  %v2181_v61 = vld [vmem:[#allocation10 + $0x1d8] sm:$0xff] }
 0x254   :  { %1919 = vmatpush.msrb.mxu0 %v1870_v10  ;;  %1939 = vmatpush.msrb.mxu1 %v1871_v11  ;;  %v2174_v53 = vld [vmem:[#allocation10 + $0x1a0] sm:$0xff]  ;;  %v2175_v62 = vld [vmem:[#allocation10 + $0x1a8] sm:$0xff]  ;;  %v2176_v48 = vld [vmem:[#allocation10 + $0x1b0] sm:$0xff] }
 0x255   :  { %1959 = vmatpush.msrb.mxu2 %v1872_v12  ;;  %1979 = vmatpush.msrb.mxu3 %v1873_v1  ;;  %v2177_v0 = vld [vmem:[#allocation10 + $0x1b8] sm:$0xff]  ;;  %v2170_v2 = vld [vmem:[#allocation10 + $0x180] sm:$0xff]  ;;  %v2171_v4 = vld [vmem:[#allocation10 + $0x188] sm:$0xff] }
 0x256   :  { %1920 = vmatpush.msrb.mxu0 %v1866_v14  ;;  %1940 = vmatpush.msrb.mxu1 %v1867_v15  ;;  %v2172_v6 = vld [vmem:[#allocation10 + $0x190] sm:$0xff]  ;;  %v2173_v7 = vld [vmem:[#allocation10 + $0x198] sm:$0xff]  ;;  %v2166_v5 = vld [vmem:[#allocation10 + $0x160] sm:$0xff] }
 0x257   :  { %v4876_v23 = vpop.eup %4875  ;;  %1960 = vmatpush.msrb.mxu2 %v1868_v3  ;;  %1980 = vmatpush.msrb.mxu3 %v1869_v17  ;;  %v2167_v8 = vld [vmem:[#allocation10 + $0x168] sm:$0xff]  ;;  %v2169_v10 = vld [vmem:[#allocation10 + $0x178] sm:$0xff]  ;;  %v2162_v11 = vld [vmem:[#allocation10 + $0x140] sm:$0xff] }
 0x258   :  { %v1479_v26 = vmul.f32 %v4876_v23, %v1473_v25  ;;  %1921 = vmatpush.msrb.mxu0 %v1862_v19  ;;  %1941 = vmatpush.msrb.mxu1 %v1863_v20  ;;  %v2164_v12 = vld [vmem:[#allocation10 + $0x150] sm:$0xff]  ;;  %v2165_v1 = vld [vmem:[#allocation10 + $0x158] sm:$0xff]  ;;  %v2159_v14 = vld [vmem:[#allocation10 + $0x128] sm:$0xff] }
 0x259   :  { %1961 = vmatpush.msrb.mxu2 %v1864_v21  ;;  %1981 = vmatpush.msrb.mxu3 %v1865_v22  ;;  %v2160_v15 = vld [vmem:[#allocation10 + $0x130] sm:$0xff]  ;;  %v2161_v16 = vld [vmem:[#allocation10 + $0x138] sm:$0xff]  ;;  %v2154_v3 = vld [vmem:[#allocation10 + $0x100] sm:$0xff] }
 0x25a   :  { %1707 = vmatmul.f32.vlgmr.msra.gmra.mxu0 %v1479_v26  ;;  %1727 = vmatmul.f32.vlgmr.msra.gmra.mxu1 %v1479_v26  ;;  %v2155_v17 = vld [vmem:[#allocation10 + $0x108] sm:$0xff]  ;;  %v2156_v18 = vld [vmem:[#allocation10 + $0x110] sm:$0xff]  ;;  %v2157_v19 = vld [vmem:[#allocation10 + $0x118] sm:$0xff] }
 0x25b   :  { %1747 = vmatmul.f32.vlgmr.msra.gmra.mxu2 %v1479_v26  ;;  %1767 = vmatmul.f32.vlgmr.msra.gmra.mxu3 %v1479_v26  ;;  %v2150_v20 = vld [vmem:[#allocation10 + $0xe0] sm:$0xff]  ;;  %v2151_v21 = vld [vmem:[#allocation10 + $0xe8] sm:$0xff]  ;;  %v2152_v22 = vld [vmem:[#allocation10 + $0xf0] sm:$0xff] }
 0x25c   :  { %1922 = vmatpush.msrb.mxu0 %v1858_v28  ;;  %1942 = vmatpush.msrb.mxu1 %v1859_v29  ;;  %v2153_v23 = vld [vmem:[#allocation10 + $0xf8] sm:$0xff]  ;;  %v2146_v25 = vld [vmem:[#allocation10 + $0xc0] sm:$0xff]  ;;  %v2148_v28 = vld [vmem:[#allocation10 + $0xd0] sm:$0xff] }
 0x25d   :  { %1962 = vmatpush.msrb.mxu2 %v1860_v33  ;;  %1982 = vmatpush.msrb.mxu3 %v1861_v34  ;;  %v2149_v29 = vld [vmem:[#allocation10 + $0xd8] sm:$0xff]  ;;  %v2142_v33 = vld [vmem:[#allocation10 + $0xa0] sm:$0xff]  ;;  %v2143_v34 = vld [vmem:[#allocation10 + $0xa8] sm:$0xff] }
 0x25e   :  { %1923 = vmatpush.msrb.mxu0 %v1854_v27  ;;  %1943 = vmatpush.msrb.mxu1 %v1855_v35  ;;  %v2144_v27 = vld [vmem:[#allocation10 + $0xb0] sm:$0xff]  ;;  %v2145_v35 = vld [vmem:[#allocation10 + $0xb8] sm:$0xff] }
 0x25f   :  { %1963 = vmatpush.msrb.mxu2 %v1856_v36  ;;  %1983 = vmatpush.msrb.mxu3 %v1857_v37  ;;  %v2138_v36 = vld [vmem:[#allocation10 + $0x80] sm:$0xff]  ;;  %v2139_v37 = vld [vmem:[#allocation10 + $0x88] sm:$0xff] }
 0x260   :  { %1924 = vmatpush.msrb.mxu0 %v1850_v41  ;;  %1944 = vmatpush.msrb.mxu1 %v1851_v43  ;;  %v2140_v41 = vld [vmem:[#allocation10 + $0x90] sm:$0xff]  ;;  %v2141_v43 = vld [vmem:[#allocation10 + $0x98] sm:$0xff] }
 0x261   :  { %1964 = vmatpush.msrb.mxu2 %v1852_v47  ;;  %1984 = vmatpush.msrb.mxu3 %v1853_v51  ;;  %v2134_v47 = vld [vmem:[#allocation10 + $0x60] sm:$0xff]  ;;  %v2135_v51 = vld [vmem:[#allocation10 + $0x68] sm:$0xff] }
 0x262   :  { %1925 = vmatpush.msrb.mxu0 %v1846_v30  ;;  %1945 = vmatpush.msrb.mxu1 %v1847_v38  ;;  %v2136_v30 = vld [vmem:[#allocation10 + $0x70] sm:$0xff]  ;;  %v2137_v38 = vld [vmem:[#allocation10 + $0x78] sm:$0xff] }
 0x263   :  { %1965 = vmatpush.msrb.mxu2 %v1848_v55  ;;  %1985 = vmatpush.msrb.mxu3 %v1849_v59  ;;  %v2130_v55 = vld [vmem:[#allocation10 + $0x40] sm:$0xff]  ;;  %v2131_v59 = vld [vmem:[#allocation10 + $0x48] sm:$0xff] }
 0x264   :  { %1926 = vmatpush.msrb.mxu0 %v1842_v56  ;;  %1946 = vmatpush.msrb.mxu1 %v1843_v57  ;;  %v2132_v56 = vld [vmem:[#allocation10 + $0x50] sm:$0xff]  ;;  %v2133_v57 = vld [vmem:[#allocation10 + $0x58] sm:$0xff] }
 0x265   :  { %1966 = vmatpush.msrb.mxu2 %v1844_v45  ;;  %1986 = vmatpush.msrb.mxu3 %v1845_v24  ;;  %v2126_v45 = vld [vmem:[#allocation10 + $0x20] sm:$0xff]  ;;  %v2127_v24 = vld [vmem:[#allocation10 + $0x28] sm:$0xff] }
 0x266   :  { %1927 = vmatmul.f32.vlgmr.msrb.gmra.mxu0 %v1479_v26  ;;  %1947 = vmatmul.f32.vlgmr.msrb.gmra.mxu1 %v1479_v26 }
 0x267   :  { %1967 = vmatmul.f32.vlgmr.msrb.gmra.mxu2 %v1479_v26  ;;  %1987 = vmatmul.f32.vlgmr.msrb.gmra.mxu3 %v1479_v26  ;;  %v2147_v26 = vld [vmem:[#allocation10 + $0xc8] sm:$0xff] }
 0x268   :  { %2186 = vmatpush.msra.mxu0 %v2182_v58  ;;  %2206 = vmatpush.msra.mxu1 %v2183_v44  ;;  %v2128_v58 = vld [vmem:[#allocation10 + $0x30] sm:$0xff]  ;;  %v2129_v44 = vld [vmem:[#allocation10 + $0x38] sm:$0xff] }
 0x269   :  { %2226 = vmatpush.msra.mxu2 %v2184_v46  ;;  %2246 = vmatpush.msra.mxu3 %v2185_v42  ;;  %v2122_v46 = vld [vmem:[#allocation10] sm:$0xff]  ;;  %v2123_v42 = vld [vmem:[#allocation10 + $0x8] sm:$0xff] }
 0x26a   :  { %2187 = vmatpush.msra.mxu0 %v2178_v52  ;;  %2207 = vmatpush.msra.mxu1 %v2179_v49  ;;  %v2124_v52 = vld [vmem:[#allocation10 + $0x10] sm:$0xff]  ;;  %v2125_v49 = vld [vmem:[#allocation10 + $0x18] sm:$0xff] }
 0x26b   :  { %2227 = vmatpush.msra.mxu2 %v2180_v39  ;;  %2247 = vmatpush.msra.mxu3 %v2181_v61  ;;  %v2117_v39 = vld [vmem:[#allocation9 + $0x1e0] sm:$0xff]  ;;  %v2118_v61 = vld [vmem:[#allocation9 + $0x1e8] sm:$0xff] }
 0x26c   :  { %2188 = vmatpush.msra.mxu0 %v2174_v53  ;;  %2208 = vmatpush.msra.mxu1 %v2175_v62  ;;  %v2119_v53 = vld [vmem:[#allocation9 + $0x1f0] sm:$0xff]  ;;  %v2120_v62 = vld [vmem:[#allocation9 + $0x1f8] sm:$0xff] }
 0x26d   :  { %2228 = vmatpush.msra.mxu2 %v2176_v48  ;;  %2248 = vmatpush.msra.mxu3 %v2177_v0  ;;  %v2113_v48 = vld [vmem:[#allocation9 + $0x1c0] sm:$0xff]  ;;  %v2114_v0 = vld [vmem:[#allocation9 + $0x1c8] sm:$0xff] }
 0x26e   :  { %2189 = vmatpush.msra.mxu0 %v2170_v2  ;;  %2209 = vmatpush.msra.mxu1 %v2171_v4  ;;  %v2115_v2 = vld [vmem:[#allocation9 + $0x1d0] sm:$0xff]  ;;  %v2116_v4 = vld [vmem:[#allocation9 + $0x1d8] sm:$0xff] }
 0x26f   :  { %2229 = vmatpush.msra.mxu2 %v2172_v6  ;;  %2249 = vmatpush.msra.mxu3 %v2173_v7  ;;  %v2109_v6 = vld [vmem:[#allocation9 + $0x1a0] sm:$0xff]  ;;  %v2110_v7 = vld [vmem:[#allocation9 + $0x1a8] sm:$0xff] }
 0x270   :  { %2190 = vmatpush.msra.mxu0 %v2166_v5  ;;  %2210 = vmatpush.msra.mxu1 %v2167_v8  ;;  %v2111_v5 = vld [vmem:[#allocation9 + $0x1b0] sm:$0xff] }
 0x271   :  { %2230 = vmatpush.msra.mxu2 %v2168_v9  ;;  %2250 = vmatpush.msra.mxu3 %v2169_v10  ;;  %v2112_v10 = vld [vmem:[#allocation9 + $0x1b8] sm:$0xff] }
 0x272   :  { %2191 = vmatpush.msra.mxu0 %v2162_v11  ;;  %2211 = vmatpush.msra.mxu1 %v2163_v54  ;;  %v2105_v11 = vld [vmem:[#allocation9 + $0x180] sm:$0xff]  ;;  %v2106_v54 = vld [vmem:[#allocation9 + $0x188] sm:$0xff] }
 0x273   :  { %2231 = vmatpush.msra.mxu2 %v2164_v12  ;;  %2251 = vmatpush.msra.mxu3 %v2165_v1  ;;  %v2107_v12 = vld [vmem:[#allocation9 + $0x190] sm:$0xff]  ;;  %v2108_v1 = vld [vmem:[#allocation9 + $0x198] sm:$0xff] }
 0x274   :  { %2192 = vmatpush.msra.mxu0 %v2158_v13  ;;  %2212 = vmatpush.msra.mxu1 %v2159_v14  ;;  %v2101_v13 = vld [vmem:[#allocation9 + $0x160] sm:$0xff]  ;;  %v2102_v14 = vld [vmem:[#allocation9 + $0x168] sm:$0xff] }
 0x275   :  { %2232 = vmatpush.msra.mxu2 %v2160_v15  ;;  %2252 = vmatpush.msra.mxu3 %v2161_v16  ;;  %v2103_v15 = vld [vmem:[#allocation9 + $0x170] sm:$0xff]  ;;  %v2104_v16 = vld [vmem:[#allocation9 + $0x178] sm:$0xff] }
 0x276   :  { %2193 = vmatpush.msra.mxu0 %v2154_v3  ;;  %2213 = vmatpush.msra.mxu1 %v2155_v17  ;;  %v2097_v3 = vld [vmem:[#allocation9 + $0x140] sm:$0xff]  ;;  %v2098_v17 = vld [vmem:[#allocation9 + $0x148] sm:$0xff] }
 0x277   :  { %2233 = vmatpush.msra.mxu2 %v2156_v18  ;;  %2253 = vmatpush.msra.mxu3 %v2157_v19  ;;  %v2099_v18 = vld [vmem:[#allocation9 + $0x150] sm:$0xff]  ;;  %v2100_v19 = vld [vmem:[#allocation9 + $0x158] sm:$0xff] }
 0x278   :  { %2194 = vmatpush.msra.mxu0 %v2150_v20  ;;  %2214 = vmatpush.msra.mxu1 %v2151_v21  ;;  %v2093_v21 = vld [vmem:[#allocation9 + $0x120] sm:$0xff] }
 0x279   :  { %2234 = vmatpush.msra.mxu2 %v2152_v22  ;;  %2254 = vmatpush.msra.mxu3 %v2153_v23  ;;  %v2094_v22 = vld [vmem:[#allocation9 + $0x128] sm:$0xff]  ;;  %v2095_v23 = vld [vmem:[#allocation9 + $0x130] sm:$0xff] }
 0x27a   :  { %2195 = vmatpush.msra.mxu0 %v2146_v25  ;;  %2215 = vmatpush.msra.mxu1 %v2147_v26 }
 0x27b   :  { %2235 = vmatpush.msra.mxu2 %v2148_v28  ;;  %2255 = vmatpush.msra.mxu3 %v2149_v29  ;;  %v2096_v28 = vld [vmem:[#allocation9 + $0x138] sm:$0xff] }
 0x27c   :  { %2196 = vmatpush.msra.mxu0 %v2142_v33  ;;  %2216 = vmatpush.msra.mxu1 %v2143_v34  ;;  %v2089_v34 = vld [vmem:[#allocation9 + $0x100] sm:$0xff] }
 0x27d   :  { %2236 = vmatpush.msra.mxu2 %v2144_v27  ;;  %2256 = vmatpush.msra.mxu3 %v2145_v35  ;;  %v2090_v27 = vld [vmem:[#allocation9 + $0x108] sm:$0xff]  ;;  %v2091_v35 = vld [vmem:[#allocation9 + $0x110] sm:$0xff] }
 0x27e   :  { %2197 = vmatpush.msra.mxu0 %v2138_v36  ;;  %2217 = vmatpush.msra.mxu1 %v2139_v37  ;;  %v2092_v36 = vld [vmem:[#allocation9 + $0x118] sm:$0xff] }
 0x27f   :  { %2237 = vmatpush.msra.mxu2 %v2140_v41  ;;  %2257 = vmatpush.msra.mxu3 %v2141_v43  ;;  %v2085_v43 = vld [vmem:[#allocation9 + $0xe0] sm:$0xff] }
 0x280   :  { %2198 = vmatpush.msra.mxu0 %v2134_v47  ;;  %2218 = vmatpush.msra.mxu1 %v2135_v51  ;;  %v2086_v47 = vld [vmem:[#allocation9 + $0xe8] sm:$0xff]  ;;  %v2087_v51 = vld [vmem:[#allocation9 + $0xf0] sm:$0xff] }
 0x281   :  { %2238 = vmatpush.msra.mxu2 %v2136_v30  ;;  %2258 = vmatpush.msra.mxu3 %v2137_v38  ;;  %v2088_v30 = vld [vmem:[#allocation9 + $0xf8] sm:$0xff] }
 0x282   :  { %2199 = vmatpush.msra.mxu0 %v2130_v55  ;;  %2219 = vmatpush.msra.mxu1 %v2131_v59  ;;  %v2081_v59 = vld [vmem:[#allocation9 + $0xc0] sm:$0xff] }
 0x283   :  { %2239 = vmatpush.msra.mxu2 %v2132_v56  ;;  %2259 = vmatpush.msra.mxu3 %v2133_v57  ;;  %v2082_v56 = vld [vmem:[#allocation9 + $0xc8] sm:$0xff] }
 0x284   :  { %2200 = vmatpush.msra.mxu0 %v2126_v45  ;;  %2220 = vmatpush.msra.mxu1 %v2127_v24  ;;  %v2083_v45 = vld [vmem:[#allocation9 + $0xd0] sm:$0xff]  ;;  %v2084_v24 = vld [vmem:[#allocation9 + $0xd8] sm:$0xff] }
 0x285   :  { %2240 = vmatpush.msra.mxu2 %v2128_v58  ;;  %2260 = vmatpush.msra.mxu3 %v2129_v44  ;;  %v2077_v44 = vld [vmem:[#allocation9 + $0xa0] sm:$0xff] }
 0x286   :  { %2201 = vmatpush.msra.mxu0 %v2122_v46  ;;  %2221 = vmatpush.msra.mxu1 %v2123_v42  ;;  %v2078_v46 = vld [vmem:[#allocation9 + $0xa8] sm:$0xff]  ;;  %v2079_v42 = vld [vmem:[#allocation9 + $0xb0] sm:$0xff] }
 0x287   :  { %2241 = vmatpush.msra.mxu2 %v2124_v52  ;;  %2261 = vmatpush.msra.mxu3 %v2125_v49  ;;  %v2080_v49 = vld [vmem:[#allocation9 + $0xb8] sm:$0xff] }
 0x288   :  { %2266 = vmatpush.msrb.mxu0 %v2117_v39  ;;  %2286 = vmatpush.msrb.mxu1 %v2118_v61  ;;  %v2073_v39 = vld [vmem:[#allocation9 + $0x80] sm:$0xff]  ;;  %v2074_v61 = vld [vmem:[#allocation9 + $0x88] sm:$0xff] }
 0x289   :  { %2306 = vmatpush.msrb.mxu2 %v2119_v53  ;;  %2326 = vmatpush.msrb.mxu3 %v2120_v62  ;;  %v2075_v53 = vld [vmem:[#allocation9 + $0x90] sm:$0xff] }
 0x28a   :  { %2267 = vmatpush.msrb.mxu0 %v2113_v48  ;;  %2287 = vmatpush.msrb.mxu1 %v2114_v0  ;;  %v1907_v48 = vld [vmem:[#allocation4 + $0x60] sm:$0xff]  ;;  %v1908_v0 = vld [vmem:[#allocation4 + $0x68] sm:$0xff] }
 0x28b   :  { %2307 = vmatpush.msrb.mxu2 %v2115_v2  ;;  %2327 = vmatpush.msrb.mxu3 %v2116_v4  ;;  %v2076_v2 = vld [vmem:[#allocation9 + $0x98] sm:$0xff]  ;;  %v2069_v4 = vld [vmem:[#allocation9 + $0x60] sm:$0xff] }
 0x28c   :  { %2268 = vmatpush.msrb.mxu0 %v2109_v6  ;;  %2288 = vmatpush.msrb.mxu1 %v2110_v7  ;;  %v2070_v6 = vld [vmem:[#allocation9 + $0x68] sm:$0xff]  ;;  %v2071_v7 = vld [vmem:[#allocation9 + $0x70] sm:$0xff] }
 0x28d   :  { %2308 = vmatpush.msrb.mxu2 %v2111_v5  ;;  %2328 = vmatpush.msrb.mxu3 %v2112_v10  ;;  %v2072_v10 = vld [vmem:[#allocation9 + $0x78] sm:$0xff] }
 0x28e   :  { %2269 = vmatpush.msrb.mxu0 %v2105_v11  ;;  %2289 = vmatpush.msrb.mxu1 %v2106_v54 }
 0x28f   :  { %2309 = vmatpush.msrb.mxu2 %v2107_v12  ;;  %2329 = vmatpush.msrb.mxu3 %v2108_v1  ;;  %v2065_v1 = vld [vmem:[#allocation9 + $0x40] sm:$0xff] }
 0x290   :  { %2270 = vmatpush.msrb.mxu0 %v2101_v13  ;;  %2290 = vmatpush.msrb.mxu1 %v2102_v14  ;;  %v2066_v13 = vld [vmem:[#allocation9 + $0x48] sm:$0xff]  ;;  %v2067_v14 = vld [vmem:[#allocation9 + $0x50] sm:$0xff] }
 0x291   :  { %2310 = vmatpush.msrb.mxu2 %v2103_v15  ;;  %2330 = vmatpush.msrb.mxu3 %v2104_v16 }
 0x292   :  { %2271 = vmatpush.msrb.mxu0 %v2097_v3  ;;  %2291 = vmatpush.msrb.mxu1 %v2098_v17  ;;  %v2068_v17 = vld [vmem:[#allocation9 + $0x58] sm:$0xff] }
 0x293   :  { %2311 = vmatpush.msrb.mxu2 %v2099_v18  ;;  %2331 = vmatpush.msrb.mxu3 %v2100_v19 }
 0x294   :  { %2272 = vmatpush.msrb.mxu0 %v2093_v21  ;;  %2292 = vmatpush.msrb.mxu1 %v2094_v22  ;;  %v1910_v21 = vld [vmem:[#allocation4 + $0x78] sm:$0xff]  ;;  %v2061_v22 = vld [vmem:[#allocation9 + $0x20] sm:$0xff] }
 0x295   :  { %2312 = vmatpush.msrb.mxu2 %v2095_v23  ;;  %2332 = vmatpush.msrb.mxu3 %v2096_v28  ;;  %v2062_v23 = vld [vmem:[#allocation9 + $0x28] sm:$0xff] }
 0x296   :  { %2273 = vmatpush.msrb.mxu0 %v2089_v34  ;;  %2293 = vmatpush.msrb.mxu1 %v2090_v27  ;;  %v2059_v34 = vld [vmem:[#allocation9 + $0x10] sm:$0xff]  ;;  %v2060_v27 = vld [vmem:[#allocation9 + $0x18] sm:$0xff] }
 0x297   :  { %2313 = vmatpush.msrb.mxu2 %v2091_v35  ;;  %2333 = vmatpush.msrb.mxu3 %v2092_v36 }
 0x298   :  { %2274 = vmatpush.msrb.mxu0 %v2085_v43  ;;  %2294 = vmatpush.msrb.mxu1 %v2086_v47 }
 0x299   :  { %2314 = vmatpush.msrb.mxu2 %v2087_v51  ;;  %2334 = vmatpush.msrb.mxu3 %v2088_v30 }
 0x29a   :  { %2275 = vmatpush.msrb.mxu0 %v2081_v59  ;;  %2295 = vmatpush.msrb.mxu1 %v2082_v56 }
 0x29b   :  { %2315 = vmatpush.msrb.mxu2 %v2083_v45  ;;  %2335 = vmatpush.msrb.mxu3 %v2084_v24 }
 0x29c   :  { %2276 = vmatpush.msrb.mxu0 %v2077_v44  ;;  %2296 = vmatpush.msrb.mxu1 %v2078_v46 }
 0x29d   :  { %2316 = vmatpush.msrb.mxu2 %v2079_v42  ;;  %2336 = vmatpush.msrb.mxu3 %v2080_v49 }
 0x29e   :  { %2277 = vmatpush.msrb.mxu0 %v2073_v39  ;;  %2297 = vmatpush.msrb.mxu1 %v2074_v61  ;;  %v1909_v61 = vld [vmem:[#allocation4 + $0x70] sm:$0xff] }
 0x29f   :  { %2317 = vmatpush.msrb.mxu2 %v2075_v53  ;;  %2337 = vmatpush.msrb.mxu3 %v2076_v2 }
 0x2a0   :  { %2278 = vmatpush.msrb.mxu0 %v2069_v4  ;;  %2298 = vmatpush.msrb.mxu1 %v2070_v6 }
 0x2a1   :  { %2318 = vmatpush.msrb.mxu2 %v2071_v7  ;;  %2338 = vmatpush.msrb.mxu3 %v2072_v10 }
 0x2a2   :  { %2279 = vmatpush.msrb.mxu0 %v2065_v1  ;;  %2299 = vmatpush.msrb.mxu1 %v2066_v13 }
 0x2a3   :  { %2319 = vmatpush.msrb.mxu2 %v2067_v14  ;;  %2339 = vmatpush.msrb.mxu3 %v2068_v17 }
 0x2a4   :  { %2280 = vmatpush.msrb.mxu0 %v2061_v22  ;;  %2300 = vmatpush.msrb.mxu1 %v2062_v23 }
 0x2bf   :  { %v1628_v8 = vpop.f32.mrf.mxu0  ;;  %v1648_v9 = vpop.f32.mrf.mxu1 }
 0x2c6   :  { %v1688_v20 = vpop.f32.mrf.mxu3  ;;  %v6010_v57 = vpop.f32.mrf.mxu2 }
 0x2d7   :  { %v1708_v25 = vpop.f32.mrf.mxu0  ;;  %v1728_v26 = vpop.f32.mrf.mxu1 }
 0x2d8   :  { %v1709_v29 = vadd.f32 %v1708_v25, %v1628_v8  ;;  %v1729_v33 = vadd.f32 %v1728_v26, %v1648_v9  ;;  %v2063_v25 = vld [vmem:[#allocation9 + $0x30] sm:$0xff]  ;;  %v2064_v26 = vld [vmem:[#allocation9 + $0x38] sm:$0xff] }
 0x2d9   :  { %2320 = vmatpush.msrb.mxu2 %v2063_v25  ;;  %2340 = vmatpush.msrb.mxu3 %v2064_v26 }
 0x2da   :  { %v1771_v37 = vadd.f32 %v1709_v29, %v5785_v31  ;;  %v1772_v41 = vadd.f32 %v1729_v33, %v5788_v32  ;;  %v2057_v29 = vld [vmem:[#allocation9] sm:$0xff]  ;;  %v2058_v33 = vld [vmem:[#allocation9 + $0x8] sm:$0xff] }
 0x2db   :  { %2281 = vmatpush.msrb.mxu0 %v2057_v29  ;;  %2301 = vmatpush.msrb.mxu1 %v2058_v33 }
 0x2dc   :  { %v4755_v38 = vmul.f32 -1.442695, %v1771_v37  ;;  %v4756_v55 = vmul.f32 -1.442695, %v1772_v41  ;;  %2321 = vmatpush.msrb.mxu2 %v2059_v34  ;;  %2341 = vmatpush.msrb.mxu3 %v2060_v27 }
 0x2de   :  { %4877 = vpow2.f32 %v4755_v38  ;;  %v1768_v58 = vpop.f32.mrf.mxu3  ;;  %v1748_v3 = vpop.f32.mrf.mxu2 }
 0x2df   :  { %4879 = vpow2.f32 %v4756_v55  ;;  %v1769_v52 = vadd.f32 %v1768_v58, %v1688_v20  ;;  %v1749_v28 = vadd.f32 %v1748_v3, %v6010_v57 }
 0x2e1   :  { %v1774_v62 = vadd.f32 %v1769_v52, %v5795_v50  ;;  %v1773_v41 = vadd.f32 %v1749_v28, %v5806_v40 }
 0x2e3   :  { %v4757_v5 = vmul.f32 -1.442695, %v1774_v62  ;;  %v1928_v8 = vpop.f32.mrf.mxu0  ;;  %v1948_v9 = vpop.f32.mrf.mxu1 }
 0x2e4   :  { %v4878_v11 = vpop.eup %4877  ;;  %v1929_v54 = vadd.f32 %v1928_v8, %v1907_v48  ;;  %v1949_v12 = vadd.f32 %v1948_v9, %v1908_v0 }
 0x2e5   :  { %v4880_v15 = vpop.eup %4879  ;;  %v6013_v16 = vadd.f32 1.0, %v4878_v11  ;;  %4881 = vpow2.f32 %v4757_v5 }
 0x2e6   :  { %v6015_v18 = vadd.f32 1.0, %v4880_v15  ;;  %v4758_v19 = vmul.f32 -1.442695, %v1929_v54  ;;  %v4759_v20 = vmul.f32 -1.442695, %v1949_v12 }
 0x2e7   :  { %4883 = vrcp.f32 %v6013_v16  ;;  %v1789_v58 = vand.u32 2147483647, %v6013_v16  ;;  %v1791_v44 = vand.u32 2147483648, %v6013_v16  ;;  %vm1785_vm15 = vweird.f32 %v6013_v16 }
 0x2e8   :  { %4885 = vrcp.f32 %v6015_v18  ;;  %v1810_v42 = vand.u32 2147483648, %v6015_v18  ;;  %v1808_v39 = vand.u32 2147483647, %v6015_v18  ;;  %vm1804_vm14 = vweird.f32 %v6015_v18 }
 0x2e9   :  { %4887 = vpow2.f32 %v4758_v19  ;;  %vm1790_vm1 = vcmp.eq.f32.partialorder %v1789_v58, 8.507059e+37  ;;  %v1792_v2 = vor.u32 1.1754944e-38, %v1791_v44 }
 0x2ea   :  { %4889 = vpow2.f32 %v4759_v20  ;;  %v1988_v35 = vpop.f32.mrf.mxu3  ;;  %v1968_v53 = vpop.f32.mrf.mxu2  ;;  %v1811_v5 = vor.u32 1.1754944e-38, %v1810_v42  ;;  %vm1809_vm3 = vcmp.eq.f32.partialorder %v1808_v39, 8.507059e+37  ;;  %v2478_v39 = vld [vmem:[#allocation7 + $0x1e8] sm:$0xff] }
 0x2eb   :  { %v4882_v36 = vpop.eup %4881  ;;  %v1989_v37 = vadd.f32 %v1988_v35, %v1910_v21  ;;  %v1969_v9 = vadd.f32 %v1968_v53, %v1909_v61  ;;  %v2479_v53 = vld [vmem:[#allocation7 + $0x1f0] sm:$0xff] }
 0x2ec   :  { %v6021_v43 = vadd.f32 1.0, %v4882_v36 }
 0x2ed   :  { %v4884_v47 = vpop.eup %4883  ;;  %v4760_v51 = vmul.f32 -1.442695, %v1989_v37  ;;  %v2452_v37 = vld [vmem:[#allocation7 + $0x118] sm:$0xff] }
 0x2ee   :  { %v4886_v30 = vpop.eup %4885  ;;  %v1781_v38 = vmul.f32 %v4884_v47, %v6013_v16  ;;  %4891 = vrcp.f32 %v6021_v43  ;;  %vm1786_vm12 = vweird.f32 %v4884_v47  ;;  %vm1824_vm4 = vweird.f32 %v6021_v43 }
 0x2ef   :  { %v4888_v55 = vpop.eup %4887  ;;  %v1800_v59 = vmul.f32 %v4886_v30, %v6015_v18  ;;  %4893 = vpow2.f32 %v4760_v51  ;;  %vm1805_vm13 = vweird.f32 %v4886_v30  ;;  %vm1787_vm0 = vmor %vm1785_vm15, %vm1786_vm12  ;;  %v1830_v22 = vand.u32 2147483648, %v6021_v43 }
 0x2f0   :  { %v4890_v56 = vpop.eup %4889  ;;  %v1782_v57 = vsub.f32 1.0, %v1781_v38  ;;  %4895 = vtanh.f32 %v1773_v41  ;;  %v6026_v45 = vadd.f32 1.0, %v4888_v55  ;;  %vm1806_vm2 = vmor %vm1804_vm14, %vm1805_vm13  ;;  %v1828_v27 = vand.u32 2147483647, %v6021_v43 }
 0x2f1   :  { %v1801_v24 = vsub.f32 1.0, %v1800_v59  ;;  %v6030_v46 = vadd.f32 1.0, %v4890_v56  ;;  %v1831_v56 = vor.u32 1.1754944e-38, %v1830_v22  ;;  %v2464_v22 = vld [vmem:[#allocation7 + $0x178] sm:$0xff] }
 0x2f2   :  { %v1783_v52 = vmul.f32 %v4884_v47, %v1782_v57  ;;  %4897 = vrcp.f32 %v6026_v45  ;;  %v2005_v21 = vand.u32 2147483647, %v6026_v45  ;;  %v2007_v25 = vand.u32 2147483648, %v6026_v45 }
 0x2f3   :  { %v1802_v49 = vmul.f32 %v4886_v30, %v1801_v24  ;;  %4899 = vrcp.f32 %v6030_v46  ;;  %v2026_v26 = vand.u32 2147483648, %v6030_v46  ;;  %v2024_v34 = vand.u32 2147483647, %v6030_v46 }
 0x2f4   :  { %v6036_v62 = vpop.eup %4891  ;;  %v1784_v48 = vadd.f32 %v4884_v47, %v1783_v52  ;;  %vm2020_vm8 = vweird.f32 %v6030_v46  ;;  %vm2001_vm9 = vweird.f32 %v6026_v45  ;;  %vm2006_vm12 = vcmp.eq.f32.partialorder %v2005_v21, 8.507059e+37  ;;  %v2463_v21 = vld [vmem:[#allocation7 + $0x170] sm:$0xff] }
 0x2f5   :  { %v4894_v0 = vpop.eup %4893  ;;  %v1803_v4 = vadd.f32 %v4886_v30, %v1802_v49  ;;  %v1820_v6 = vmul.f32 %v6036_v62, %v6021_v43  ;;  %vm1825_vm5 = vweird.f32 %v6036_v62  ;;  %v2027_v38 = vor.u32 1.1754944e-38, %v2026_v26  ;;  %v2477_v49 = vld [vmem:[#allocation7 + $0x1e0] sm:$0xff]  ;;  %v2460_v26 = vld [vmem:[#allocation7 + $0x158] sm:$0xff] }
 0x2f6   :  { %v4896_v7 = vpop.eup %4895  ;;  %v1788_v8 = vsel %vm1787_vm0, %v4884_v47, %v1784_v48  ;;  %v6043_v10 = vadd.f32 1.0, %v4894_v0  ;;  %vm6070_vm10 = vmor %vm1824_vm4, %vm1825_vm5  ;;  %v2008_v47 = vor.u32 1.1754944e-38, %v2007_v25  ;;  %vm2025_vm14 = vcmp.eq.f32.partialorder %v2024_v34, 8.507059e+37  ;;  %v2473_v0 = vld [vmem:[#allocation7 + $0x1c0] sm:$0xff]  ;;  %v2458_v25 = vld [vmem:[#allocation7 + $0x148] sm:$0xff] }
 0x2f7   :  { %v1793_v11 = vsel %vm1790_vm1, %v1792_v2, %v1788_v8  ;;  %v1807_v54 = vsel %vm1806_vm2, %v4886_v30, %v1803_v4  ;;  %v1821_v12 = vsub.f32 1.0, %v1820_v6  ;;  %vm1829_vm15 = vcmp.eq.f32.partialorder %v1828_v27, 8.507059e+37  ;;  %v2474_v2 = vld [vmem:[#allocation7 + $0x1c8] sm:$0xff]  ;;  %v2475_v4 = vld [vmem:[#allocation7 + $0x1d0] sm:$0xff]  ;;  %v2476_v6 = vld [vmem:[#allocation7 + $0x1d8] sm:$0xff] }
 0x2f8   :  { %v4898_v1 = vpop.eup %4897  ;;  %v1812_v13 = vsel %vm1809_vm3, %v1811_v5, %v1807_v54  ;;  %v1835_v14 = vmul.f32 %v4896_v7, %v1793_v11  ;;  %4901 = vrcp.f32 %v6043_v10  ;;  %vm2040_vm1 = vweird.f32 %v6043_v10  ;;  %v2469_v5 = vld [vmem:[#allocation7 + $0x1a0] sm:$0xff]  ;;  %v2470_v8 = vld [vmem:[#allocation7 + $0x1a8] sm:$0xff]  ;;  %v2471_v11 = vld [vmem:[#allocation7 + $0x1b0] sm:$0xff] }
 0x2f9   :  { %v4900_v15 = vpop.eup %4899  ;;  %v1834_v16 = vmul.f32 %v1812_v13, %v5932_v63  ;;  %v1997_v3 = vmul.f32 %v4898_v1, %v6026_v45  ;;  %4903 = vtanh.f32 %v1969_v9  ;;  %v1822_v18 = vmul.f32 %v6036_v62, %v1821_v12  ;;  %v2472_v54 = vld [vmem:[#allocation7 + $0x1b8] sm:$0xff]  ;;  %v2449_v27 = vld [vmem:[#allocation7 + $0x100] sm:$0xff]  ;;  %v2419_v9 = vld [vmem:[#allocation7 + $0x10] sm:$0xff] }
 0x2fa   :  { %v2016_v17 = vmul.f32 %v4900_v15, %v6030_v46  ;;  %vm2002_vm6 = vweird.f32 %v4898_v1  ;;  %vm2021_vm7 = vweird.f32 %v4900_v15  ;;  %v2044_v7 = vand.u32 2147483647, %v6043_v10  ;;  %v2456_v34 = vld [vmem:[#allocation7 + $0x138] sm:$0xff] }
 0x2fb   :  { %v6051_v19 = vadd.f32 %v1835_v14, %v1834_v16  ;;  %v1998_v20 = vsub.f32 1.0, %v1997_v3  ;;  %v1823_v63 = vadd.f32 %v6036_v62, %v1822_v18  ;;  %vm2003_vm11 = vmor %vm2001_vm9, %vm2002_vm6  ;;  %v2467_v14 = vld [vmem:[#allocation7 + $0x190] sm:$0xff]  ;;  %v2461_v16 = vld [vmem:[#allocation7 + $0x160] sm:$0xff] }
 0x2fc   :  { %v2017_v23 = vsub.f32 1.0, %v2016_v17  ;;  %vm2022_vm13 = vmor %vm2020_vm8, %vm2021_vm7  ;;  %vm2045_vm3 = vcmp.eq.f32.partialorder %v2044_v7, 8.507059e+37  ;;  %v2462_v3 = vld [vmem:[#allocation7 + $0x168] sm:$0xff]  ;;  %v2424_v7 = vld [vmem:[#allocation7 + $0x38] sm:$0xff] }
 0x2fd   :  { %4905 = vtanh.f32 %v6051_v19  ;;  %v1999_v28 = vmul.f32 %v4898_v1, %v1998_v20  ;;  %v1827_v30 = vsel %vm6070_vm10, %v6036_v62, %v1823_v63  ;;  %v2480_v62 = vld [vmem:[#allocation7 + $0x1f8] sm:$0xff]  ;;  %v2459_v63 = vld [vmem:[#allocation7 + $0x150] sm:$0xff] }
 0x2fe   :  { %v6060_v29 = vpop.eup %4901  ;;  %v2018_v33 = vmul.f32 %v4900_v15, %v2017_v23  ;;  %v1832_v46 = vsel %vm1829_vm15, %v1831_v56, %v1827_v30  ;;  %v2457_v23 = vld [vmem:[#allocation7 + $0x140] sm:$0xff]  ;;  %v2448_v30 = vld [vmem:[#allocation7 + $0xf8] sm:$0xff] }
 0x2ff   :  { %v2000_v35 = vadd.f32 %v4898_v1, %v1999_v28  ;;  %v2036_v36 = vmul.f32 %v6060_v29, %v6043_v10  ;;  %v4904_v41 = vpop.eup %4903  ;;  %vm2041_vm0 = vweird.f32 %v6060_v29  ;;  %v2453_v28 = vld [vmem:[#allocation7 + $0x120] sm:$0xff]  ;;  %v2444_v56 = vld [vmem:[#allocation7 + $0xd8] sm:$0xff] }
 0x300   :  { %v2019_v51 = vadd.f32 %v4900_v15, %v2018_v33  ;;  %vm6089_vm2 = vmor %vm2040_vm1, %vm2041_vm0  ;;  %v2455_v33 = vld [vmem:[#allocation7 + $0x130] sm:$0xff] }
 0x301   :  { %v2004_v55 = vsel %vm2003_vm11, %v4898_v1, %v2000_v35  ;;  %v2037_v59 = vsub.f32 1.0, %v2036_v36  ;;  %v2466_v1 = vld [vmem:[#allocation7 + $0x188] sm:$0xff]  ;;  %v2451_v36 = vld [vmem:[#allocation7 + $0x110] sm:$0xff] }
 0x302   :  { %v2009_v57 = vsel %vm2006_vm12, %v2008_v47, %v2004_v55  ;;  %v2023_v43 = vsel %vm2022_vm13, %v4900_v15, %v2019_v51  ;;  %v2468_v15 = vld [vmem:[#allocation7 + $0x198] sm:$0xff]  ;;  %v2450_v35 = vld [vmem:[#allocation7 + $0x108] sm:$0xff]  ;;  %v2447_v51 = vld [vmem:[#allocation7 + $0xf0] sm:$0xff] }
 0x303   :  { %v4906_v45 = vpop.eup %4905  ;;  %v2028_v24 = vsel %vm2025_vm14, %v2027_v38, %v2023_v43  ;;  %v2051_v58 = vmul.f32 %v4904_v41, %v2009_v57  ;;  %v2038_v44 = vmul.f32 %v6060_v29, %v2037_v59  ;;  %v2445_v41 = vld [vmem:[#allocation7 + $0xe0] sm:$0xff]  ;;  %v2446_v47 = vld [vmem:[#allocation7 + $0xe8] sm:$0xff]  ;;  %v2443_v59 = vld [vmem:[#allocation7 + $0xd0] sm:$0xff] }
 0x304   :  { %v2050_v42 = vmul.f32 %v2028_v24, %v5991_v60  ;;  %v1838_v52 = vmul.f32 %v4906_v45, %v1832_v46  ;;  %v2046_v60 = vand.u32 2147483648, %v6043_v10  ;;  %v2465_v10 = vld [vmem:[#allocation7 + $0x180] sm:$0xff]  ;;  %v2442_v55 = vld [vmem:[#allocation7 + $0xc8] sm:$0xff]  ;;  %v2439_v45 = vld [vmem:[#allocation7 + $0xb0] sm:$0xff] }
 0x305   :  { %v2039_v48 = vadd.f32 %v6060_v29, %v2038_v44  ;;  %v2441_v38 = vld [vmem:[#allocation7 + $0xc0] sm:$0xff]  ;;  %v2438_v43 = vld [vmem:[#allocation7 + $0xa8] sm:$0xff]  ;;  %v2440_v24 = vld [vmem:[#allocation7 + $0xb8] sm:$0xff] }
 0x306   :  { %v6079_v61 = vadd.f32 %v2051_v58, %v2050_v42  ;;  %2202 = vmatmul.f32.vlgmr.msra.gmra.mxu0 %v1838_v52  ;;  %2222 = vmatmul.f32.vlgmr.msra.gmra.mxu1 %v1838_v52  ;;  %v2047_v13 = vor.u32 1.1754944e-38, %v2046_v60  ;;  %v2437_v57 = vld [vmem:[#allocation7 + $0xa0] sm:$0xff]  ;;  %v2434_v44 = vld [vmem:[#allocation7 + $0x88] sm:$0xff]  ;;  %v2435_v46 = vld [vmem:[#allocation7 + $0x90] sm:$0xff] }
 0x307   :  { %2242 = vmatmul.f32.vlgmr.msra.gmra.mxu2 %v1838_v52  ;;  %2262 = vmatmul.f32.vlgmr.msra.gmra.mxu3 %v1838_v52  ;;  %v2043_v12 = vsel %vm6089_vm2, %v6060_v29, %v2039_v48  ;;  %v2454_v29 = vld [vmem:[#allocation7 + $0x128] sm:$0xff]  ;;  %v2433_v58 = vld [vmem:[#allocation7 + $0x80] sm:$0xff]  ;;  %v2436_v42 = vld [vmem:[#allocation7 + $0x98] sm:$0xff] }
 0x308   :  { %4907 = vtanh.f32 %v6079_v61  ;;  %2486 = vmatpush.msra.mxu0 %v2477_v49  ;;  %2506 = vmatpush.msra.mxu1 %v2478_v39  ;;  %v2048_v18 = vsel %vm2045_vm3, %v2047_v13, %v2043_v12  ;;  %v2429_v52 = vld [vmem:[#allocation7 + $0x60] sm:$0xff]  ;;  %v2430_v49 = vld [vmem:[#allocation7 + $0x68] sm:$0xff]  ;;  %v2431_v39 = vld [vmem:[#allocation7 + $0x70] sm:$0xff] }
 0x309   :  { %2526 = vmatpush.msra.mxu2 %v2479_v53  ;;  %2546 = vmatpush.msra.mxu3 %v2480_v62  ;;  %v2432_v53 = vld [vmem:[#allocation7 + $0x78] sm:$0xff]  ;;  %v2425_v62 = vld [vmem:[#allocation7 + $0x40] sm:$0xff]  ;;  %v2426_v48 = vld [vmem:[#allocation7 + $0x48] sm:$0xff] }
 0x30a   :  { %2487 = vmatpush.msra.mxu0 %v2473_v0  ;;  %2507 = vmatpush.msra.mxu1 %v2474_v2  ;;  %v2427_v0 = vld [vmem:[#allocation7 + $0x50] sm:$0xff]  ;;  %v2428_v2 = vld [vmem:[#allocation7 + $0x58] sm:$0xff]  ;;  %v2421_v60 = vld [vmem:[#allocation7 + $0x20] sm:$0xff] }
 0x30b   :  { %2527 = vmatpush.msra.mxu2 %v2475_v4  ;;  %2547 = vmatpush.msra.mxu3 %v2476_v6  ;;  %v2422_v4 = vld [vmem:[#allocation7 + $0x28] sm:$0xff]  ;;  %v2423_v6 = vld [vmem:[#allocation7 + $0x30] sm:$0xff]  ;;  %v2753_v13 = vld [vmem:[#allocation10 + $0x1c0] sm:$0xff] }
 0x30c   :  { %2488 = vmatpush.msra.mxu0 %v2469_v5  ;;  %2508 = vmatpush.msra.mxu1 %v2470_v8  ;;  %v2417_v5 = vld [vmem:[#allocation7] sm:$0xff]  ;;  %v2418_v8 = vld [vmem:[#allocation7 + $0x8] sm:$0xff] }
 0x30d   :  { %2528 = vmatpush.msra.mxu2 %v2471_v11  ;;  %2548 = vmatpush.msra.mxu3 %v2472_v54  ;;  %v2420_v11 = vld [vmem:[#allocation7 + $0x18] sm:$0xff]  ;;  %v2757_v54 = vld [vmem:[#allocation10 + $0x1e0] sm:$0xff]  ;;  %v2758_v12 = vld [vmem:[#allocation10 + $0x1e8] sm:$0xff] }
 0x30e   :  { %v4908_v17 = vpop.eup %4907  ;;  %2489 = vmatpush.msra.mxu0 %v2465_v10  ;;  %2509 = vmatpush.msra.mxu1 %v2466_v1  ;;  %v2759_v10 = vld [vmem:[#allocation10 + $0x1f0] sm:$0xff]  ;;  %v2760_v1 = vld [vmem:[#allocation10 + $0x1f8] sm:$0xff] }
 0x30f   :  { %v6096_v20 = vmul.f32 %v4908_v17, %v2048_v18  ;;  %2529 = vmatpush.msra.mxu2 %v2467_v14  ;;  %2549 = vmatpush.msra.mxu3 %v2468_v15  ;;  %v2754_v14 = vld [vmem:[#allocation10 + $0x1c8] sm:$0xff]  ;;  %v2755_v15 = vld [vmem:[#allocation10 + $0x1d0] sm:$0xff] }
 0x310   :  { %2490 = vmatpush.msra.mxu0 %v2461_v16  ;;  %2510 = vmatpush.msra.mxu1 %v2462_v3  ;;  %v2756_v16 = vld [vmem:[#allocation10 + $0x1d8] sm:$0xff]  ;;  %v2749_v3 = vld [vmem:[#allocation10 + $0x1a0] sm:$0xff]  ;;  %v2750_v17 = vld [vmem:[#allocation10 + $0x1a8] sm:$0xff] }
 0x311   :  { %2282 = vmatmul.f32.vlgmr.msrb.gmra.mxu0 %v6096_v20  ;;  %2302 = vmatmul.f32.vlgmr.msrb.gmra.mxu1 %v6096_v20  ;;  %v2751_v18 = vld [vmem:[#allocation10 + $0x1b0] sm:$0xff] }
 0x312   :  { %2322 = vmatmul.f32.vlgmr.msrb.gmra.mxu2 %v6096_v20  ;;  %2342 = vmatmul.f32.vlgmr.msrb.gmra.mxu3 %v6096_v20 }
 0x313   :  { %2530 = vmatpush.msra.mxu2 %v2463_v21  ;;  %2550 = vmatpush.msra.mxu3 %v2464_v22  ;;  %v2752_v21 = vld [vmem:[#allocation10 + $0x1b8] sm:$0xff]  ;;  %v2745_v22 = vld [vmem:[#allocation10 + $0x180] sm:$0xff] }
 0x314   :  { %2491 = vmatpush.msra.mxu0 %v2457_v23  ;;  %2511 = vmatpush.msra.mxu1 %v2458_v25  ;;  %v2746_v23 = vld [vmem:[#allocation10 + $0x188] sm:$0xff]  ;;  %v2748_v25 = vld [vmem:[#allocation10 + $0x198] sm:$0xff] }
 0x315   :  { %2531 = vmatpush.msra.mxu2 %v2459_v63  ;;  %2551 = vmatpush.msra.mxu3 %v2460_v26  ;;  %v2741_v63 = vld [vmem:[#allocation10 + $0x160] sm:$0xff]  ;;  %v2742_v26 = vld [vmem:[#allocation10 + $0x168] sm:$0xff] }
 0x316   :  { %2492 = vmatpush.msra.mxu0 %v2453_v28  ;;  %2512 = vmatpush.msra.mxu1 %v2454_v29  ;;  %v2743_v28 = vld [vmem:[#allocation10 + $0x170] sm:$0xff]  ;;  %v2744_v29 = vld [vmem:[#allocation10 + $0x178] sm:$0xff] }
 0x317   :  { %2532 = vmatpush.msra.mxu2 %v2455_v33  ;;  %2552 = vmatpush.msra.mxu3 %v2456_v34  ;;  %v2737_v33 = vld [vmem:[#allocation10 + $0x140] sm:$0xff]  ;;  %v2738_v34 = vld [vmem:[#allocation10 + $0x148] sm:$0xff] }
 0x318   :  { %2493 = vmatpush.msra.mxu0 %v2449_v27  ;;  %2513 = vmatpush.msra.mxu1 %v2450_v35  ;;  %v2739_v27 = vld [vmem:[#allocation10 + $0x150] sm:$0xff]  ;;  %v2740_v35 = vld [vmem:[#allocation10 + $0x158] sm:$0xff] }
 0x319   :  { %2533 = vmatpush.msra.mxu2 %v2451_v36  ;;  %2553 = vmatpush.msra.mxu3 %v2452_v37  ;;  %v2733_v36 = vld [vmem:[#allocation10 + $0x120] sm:$0xff]  ;;  %v2734_v37 = vld [vmem:[#allocation10 + $0x128] sm:$0xff] }
 0x31a   :  { %2494 = vmatpush.msra.mxu0 %v2445_v41  ;;  %2514 = vmatpush.msra.mxu1 %v2446_v47  ;;  %v2735_v41 = vld [vmem:[#allocation10 + $0x130] sm:$0xff]  ;;  %v2736_v47 = vld [vmem:[#allocation10 + $0x138] sm:$0xff] }
 0x31b   :  { %2534 = vmatpush.msra.mxu2 %v2447_v51  ;;  %2554 = vmatpush.msra.mxu3 %v2448_v30  ;;  %v2729_v51 = vld [vmem:[#allocation10 + $0x100] sm:$0xff]  ;;  %v2730_v30 = vld [vmem:[#allocation10 + $0x108] sm:$0xff] }
 0x31c   :  { %2495 = vmatpush.msra.mxu0 %v2441_v38  ;;  %2515 = vmatpush.msra.mxu1 %v2442_v55  ;;  %v2731_v38 = vld [vmem:[#allocation10 + $0x110] sm:$0xff]  ;;  %v2732_v55 = vld [vmem:[#allocation10 + $0x118] sm:$0xff] }
 0x31d   :  { %2535 = vmatpush.msra.mxu2 %v2443_v59  ;;  %2555 = vmatpush.msra.mxu3 %v2444_v56  ;;  %v2725_v59 = vld [vmem:[#allocation10 + $0xe0] sm:$0xff]  ;;  %v2726_v56 = vld [vmem:[#allocation10 + $0xe8] sm:$0xff] }
 0x31e   :  { %2496 = vmatpush.msra.mxu0 %v2437_v57  ;;  %2516 = vmatpush.msra.mxu1 %v2438_v43  ;;  %v2727_v57 = vld [vmem:[#allocation10 + $0xf0] sm:$0xff]  ;;  %v2728_v43 = vld [vmem:[#allocation10 + $0xf8] sm:$0xff] }
 0x31f   :  { %2536 = vmatpush.msra.mxu2 %v2439_v45  ;;  %2556 = vmatpush.msra.mxu3 %v2440_v24  ;;  %v2721_v45 = vld [vmem:[#allocation10 + $0xc0] sm:$0xff]  ;;  %v2722_v24 = vld [vmem:[#allocation10 + $0xc8] sm:$0xff] }
 0x320   :  { %2497 = vmatpush.msra.mxu0 %v2433_v58  ;;  %2517 = vmatpush.msra.mxu1 %v2434_v44  ;;  %v2723_v58 = vld [vmem:[#allocation10 + $0xd0] sm:$0xff]  ;;  %v2724_v44 = vld [vmem:[#allocation10 + $0xd8] sm:$0xff] }
 0x321   :  { %2537 = vmatpush.msra.mxu2 %v2435_v46  ;;  %2557 = vmatpush.msra.mxu3 %v2436_v42  ;;  %v2717_v46 = vld [vmem:[#allocation10 + $0xa0] sm:$0xff]  ;;  %v2718_v42 = vld [vmem:[#allocation10 + $0xa8] sm:$0xff] }
 0x322   :  { %2498 = vmatpush.msra.mxu0 %v2429_v52  ;;  %2518 = vmatpush.msra.mxu1 %v2430_v49  ;;  %v2719_v52 = vld [vmem:[#allocation10 + $0xb0] sm:$0xff]  ;;  %v2720_v49 = vld [vmem:[#allocation10 + $0xb8] sm:$0xff] }
 0x323   :  { %2538 = vmatpush.msra.mxu2 %v2431_v39  ;;  %2558 = vmatpush.msra.mxu3 %v2432_v53  ;;  %v2713_v39 = vld [vmem:[#allocation10 + $0x80] sm:$0xff]  ;;  %v2714_v53 = vld [vmem:[#allocation10 + $0x88] sm:$0xff] }
 0x324   :  { %2499 = vmatpush.msra.mxu0 %v2425_v62  ;;  %2519 = vmatpush.msra.mxu1 %v2426_v48  ;;  %v2715_v62 = vld [vmem:[#allocation10 + $0x90] sm:$0xff]  ;;  %v2716_v48 = vld [vmem:[#allocation10 + $0x98] sm:$0xff] }
 0x325   :  { %2539 = vmatpush.msra.mxu2 %v2427_v0  ;;  %2559 = vmatpush.msra.mxu3 %v2428_v2  ;;  %v2709_v0 = vld [vmem:[#allocation10 + $0x60] sm:$0xff]  ;;  %v2710_v2 = vld [vmem:[#allocation10 + $0x68] sm:$0xff] }
 0x326   :  { %2500 = vmatpush.msra.mxu0 %v2421_v60  ;;  %2520 = vmatpush.msra.mxu1 %v2422_v4  ;;  %v2711_v60 = vld [vmem:[#allocation10 + $0x70] sm:$0xff]  ;;  %v2712_v4 = vld [vmem:[#allocation10 + $0x78] sm:$0xff] }
 0x327   :  { %2540 = vmatpush.msra.mxu2 %v2423_v6  ;;  %2560 = vmatpush.msra.mxu3 %v2424_v7  ;;  %v2705_v6 = vld [vmem:[#allocation10 + $0x40] sm:$0xff]  ;;  %v2706_v7 = vld [vmem:[#allocation10 + $0x48] sm:$0xff] }
 0x328   :  { %2501 = vmatpush.msra.mxu0 %v2417_v5  ;;  %2521 = vmatpush.msra.mxu1 %v2418_v8  ;;  %v2707_v5 = vld [vmem:[#allocation10 + $0x50] sm:$0xff]  ;;  %v2708_v8 = vld [vmem:[#allocation10 + $0x58] sm:$0xff] }
 0x329   :  { %2541 = vmatpush.msra.mxu2 %v2419_v9  ;;  %2561 = vmatpush.msra.mxu3 %v2420_v11  ;;  %v2701_v9 = vld [vmem:[#allocation10 + $0x20] sm:$0xff]  ;;  %v2702_v11 = vld [vmem:[#allocation10 + $0x28] sm:$0xff] }
 0x32a   :  { %2502 = vmatmul.f32.vlgmr.msra.gmra.mxu0 %v6096_v20  ;;  %2522 = vmatmul.f32.vlgmr.msra.gmra.mxu1 %v6096_v20 }
 0x32b   :  { %2542 = vmatmul.f32.vlgmr.msra.gmra.mxu2 %v6096_v20  ;;  %2562 = vmatmul.f32.vlgmr.msra.gmra.mxu3 %v6096_v20  ;;  %v2747_v20 = vld [vmem:[#allocation10 + $0x190] sm:$0xff] }
 0x32c   :  { %2761 = vmatpush.msrb.mxu0 %v2757_v54  ;;  %2781 = vmatpush.msrb.mxu1 %v2758_v12  ;;  %v2703_v54 = vld [vmem:[#allocation10 + $0x30] sm:$0xff]  ;;  %v2704_v12 = vld [vmem:[#allocation10 + $0x38] sm:$0xff] }
 0x32d   :  { %2801 = vmatpush.msrb.mxu2 %v2759_v10  ;;  %2821 = vmatpush.msrb.mxu3 %v2760_v1  ;;  %v2697_v10 = vld [vmem:[#allocation10] sm:$0xff]  ;;  %v2698_v1 = vld [vmem:[#allocation10 + $0x8] sm:$0xff] }
 0x32e   :  { %2762 = vmatpush.msrb.mxu0 %v2753_v13  ;;  %2782 = vmatpush.msrb.mxu1 %v2754_v14  ;;  %v2699_v13 = vld [vmem:[#allocation10 + $0x10] sm:$0xff]  ;;  %v2700_v14 = vld [vmem:[#allocation10 + $0x18] sm:$0xff] }
 0x32f   :  { %2802 = vmatpush.msrb.mxu2 %v2755_v15  ;;  %2822 = vmatpush.msrb.mxu3 %v2756_v16  ;;  %v2692_v15 = vld [vmem:[#allocation9 + $0x1e0] sm:$0xff]  ;;  %v2693_v16 = vld [vmem:[#allocation9 + $0x1e8] sm:$0xff] }
 0x330   :  { %2763 = vmatpush.msrb.mxu0 %v2749_v3  ;;  %2783 = vmatpush.msrb.mxu1 %v2750_v17  ;;  %v2694_v3 = vld [vmem:[#allocation9 + $0x1f0] sm:$0xff]  ;;  %v2695_v17 = vld [vmem:[#allocation9 + $0x1f8] sm:$0xff] }
 0x331   :  { %2803 = vmatpush.msrb.mxu2 %v2751_v18  ;;  %2823 = vmatpush.msrb.mxu3 %v2752_v21 }
 0x332   :  { %2764 = vmatpush.msrb.mxu0 %v2745_v22  ;;  %2784 = vmatpush.msrb.mxu1 %v2746_v23  ;;  %v5085_v22 = vld [vmem:[#allocation9 + $0x1c0] sm:$0xff]  ;;  %v5086_v23 = vld [vmem:[#allocation9 + $0x1c8] sm:$0xff] }
 0x333   :  { %2804 = vmatpush.msrb.mxu2 %v2747_v20  ;;  %2824 = vmatpush.msrb.mxu3 %v2748_v25  ;;  %v5087_v20 = vld [vmem:[#allocation9 + $0x1d0] sm:$0xff]  ;;  %v5088_v25 = vld [vmem:[#allocation9 + $0x1d8] sm:$0xff] }
 0x334   :  { %2765 = vmatpush.msrb.mxu0 %v2741_v63  ;;  %2785 = vmatpush.msrb.mxu1 %v2742_v26  ;;  %v5089_v63 = vld [vmem:[#allocation9 + $0x1a0] sm:$0xff]  ;;  %v5090_v26 = vld [vmem:[#allocation9 + $0x1a8] sm:$0xff] }
 0x335   :  { %2805 = vmatpush.msrb.mxu2 %v2743_v28  ;;  %2825 = vmatpush.msrb.mxu3 %v2744_v29  ;;  %v5091_v28 = vld [vmem:[#allocation9 + $0x1b0] sm:$0xff]  ;;  %v5092_v29 = vld [vmem:[#allocation9 + $0x1b8] sm:$0xff] }
 0x336   :  { %2766 = vmatpush.msrb.mxu0 %v2737_v33  ;;  %2786 = vmatpush.msrb.mxu1 %v2738_v34  ;;  %v5093_v33 = vld [vmem:[#allocation9 + $0x180] sm:$0xff]  ;;  %v5094_v34 = vld [vmem:[#allocation9 + $0x188] sm:$0xff] }
 0x337   :  { %2806 = vmatpush.msrb.mxu2 %v2739_v27  ;;  %2826 = vmatpush.msrb.mxu3 %v2740_v35  ;;  %v5095_v27 = vld [vmem:[#allocation9 + $0x190] sm:$0xff]  ;;  %v5096_v35 = vld [vmem:[#allocation9 + $0x198] sm:$0xff] }
 0x338   :  { %2767 = vmatpush.msrb.mxu0 %v2733_v36  ;;  %2787 = vmatpush.msrb.mxu1 %v2734_v37  ;;  %v5097_v36 = vld [vmem:[#allocation9 + $0x160] sm:$0xff]  ;;  %v5098_v37 = vld [vmem:[#allocation9 + $0x168] sm:$0xff] }
 0x339   :  { %2807 = vmatpush.msrb.mxu2 %v2735_v41  ;;  %2827 = vmatpush.msrb.mxu3 %v2736_v47  ;;  %v5099_v47 = vld [vmem:[#allocation9 + $0x170] sm:$0xff] }
 0x33a   :  { %2768 = vmatpush.msrb.mxu0 %v2729_v51  ;;  %2788 = vmatpush.msrb.mxu1 %v2730_v30  ;;  %v5100_v51 = vld [vmem:[#allocation9 + $0x178] sm:$0xff]  ;;  %v5101_v30 = vld [vmem:[#allocation9 + $0x140] sm:$0xff] }
 0x33b   :  { %2808 = vmatpush.msrb.mxu2 %v2731_v38  ;;  %2828 = vmatpush.msrb.mxu3 %v2732_v55  ;;  %v5102_v38 = vld [vmem:[#allocation9 + $0x148] sm:$0xff]  ;;  %v5103_v55 = vld [vmem:[#allocation9 + $0x150] sm:$0xff] }
 0x33c   :  { %2769 = vmatpush.msrb.mxu0 %v2725_v59  ;;  %2789 = vmatpush.msrb.mxu1 %v2726_v56  ;;  %v5104_v59 = vld [vmem:[#allocation9 + $0x158] sm:$0xff] }
 0x33d   :  { %2809 = vmatpush.msrb.mxu2 %v2727_v57  ;;  %2829 = vmatpush.msrb.mxu3 %v2728_v43  ;;  %v5105_v43 = vld [vmem:[#allocation9 + $0x120] sm:$0xff] }
 0x33e   :  { %2770 = vmatpush.msrb.mxu0 %v2721_v45  ;;  %2790 = vmatpush.msrb.mxu1 %v2722_v24  ;;  %v5106_v45 = vld [vmem:[#allocation9 + $0x128] sm:$0xff]  ;;  %v2664_v24 = vld [vmem:[#allocation9 + $0x100] sm:$0xff] }
 0x33f   :  { %2810 = vmatpush.msrb.mxu2 %v2723_v58  ;;  %2830 = vmatpush.msrb.mxu3 %v2724_v44  ;;  %v2665_v58 = vld [vmem:[#allocation9 + $0x108] sm:$0xff]  ;;  %v2666_v44 = vld [vmem:[#allocation9 + $0x110] sm:$0xff] }
 0x340   :  { %2771 = vmatpush.msrb.mxu0 %v2717_v46  ;;  %2791 = vmatpush.msrb.mxu1 %v2718_v42 }
 0x341   :  { %2811 = vmatpush.msrb.mxu2 %v2719_v52  ;;  %2831 = vmatpush.msrb.mxu3 %v2720_v49  ;;  %v5107_v52 = vld [vmem:[#allocation9 + $0x130] sm:$0xff]  ;;  %v5108_v49 = vld [vmem:[#allocation9 + $0x138] sm:$0xff] }
 0x342   :  { %2772 = vmatpush.msrb.mxu0 %v2713_v39  ;;  %2792 = vmatpush.msrb.mxu1 %v2714_v53  ;;  %v2667_v39 = vld [vmem:[#allocation9 + $0x118] sm:$0xff]  ;;  %v2660_v53 = vld [vmem:[#allocation9 + $0xe0] sm:$0xff] }
 0x343   :  { %2812 = vmatpush.msrb.mxu2 %v2715_v62  ;;  %2832 = vmatpush.msrb.mxu3 %v2716_v48  ;;  %v2661_v62 = vld [vmem:[#allocation9 + $0xe8] sm:$0xff]  ;;  %v2662_v48 = vld [vmem:[#allocation9 + $0xf0] sm:$0xff] }
 0x344   :  { %2773 = vmatpush.msrb.mxu0 %v2709_v0  ;;  %2793 = vmatpush.msrb.mxu1 %v2710_v2 }
 0x345   :  { %2813 = vmatpush.msrb.mxu2 %v2711_v60  ;;  %2833 = vmatpush.msrb.mxu3 %v2712_v4  ;;  %v2663_v60 = vld [vmem:[#allocation9 + $0xf8] sm:$0xff] }
 0x346   :  { %2774 = vmatpush.msrb.mxu0 %v2705_v6  ;;  %2794 = vmatpush.msrb.mxu1 %v2706_v7  ;;  %v2656_v6 = vld [vmem:[#allocation9 + $0xc0] sm:$0xff]  ;;  %v2657_v7 = vld [vmem:[#allocation9 + $0xc8] sm:$0xff] }
 0x347   :  { %2814 = vmatpush.msrb.mxu2 %v2707_v5  ;;  %2834 = vmatpush.msrb.mxu3 %v2708_v8  ;;  %v2658_v5 = vld [vmem:[#allocation9 + $0xd0] sm:$0xff] }
 0x348   :  { %2775 = vmatpush.msrb.mxu0 %v2701_v9  ;;  %2795 = vmatpush.msrb.mxu1 %v2702_v11  ;;  %v2659_v11 = vld [vmem:[#allocation9 + $0xd8] sm:$0xff] }
 0x349   :  { %2815 = vmatpush.msrb.mxu2 %v2703_v54  ;;  %2835 = vmatpush.msrb.mxu3 %v2704_v12  ;;  %v2652_v54 = vld [vmem:[#allocation9 + $0xa0] sm:$0xff]  ;;  %v2653_v12 = vld [vmem:[#allocation9 + $0xa8] sm:$0xff] }
 0x34a   :  { %2776 = vmatpush.msrb.mxu0 %v2697_v10  ;;  %2796 = vmatpush.msrb.mxu1 %v2698_v1  ;;  %v2654_v10 = vld [vmem:[#allocation9 + $0xb0] sm:$0xff] }
 0x34b   :  { %2816 = vmatpush.msrb.mxu2 %v2699_v13  ;;  %2836 = vmatpush.msrb.mxu3 %v2700_v14  ;;  %v2655_v13 = vld [vmem:[#allocation9 + $0xb8] sm:$0xff] }
 0x34c   :  { %2841 = vmatpush.msra.mxu0 %v2692_v15  ;;  %2861 = vmatpush.msra.mxu1 %v2693_v16  ;;  %v2648_v15 = vld [vmem:[#allocation9 + $0x80] sm:$0xff]  ;;  %v2649_v16 = vld [vmem:[#allocation9 + $0x88] sm:$0xff] }
 0x34d   :  { %2881 = vmatpush.msra.mxu2 %v2694_v3  ;;  %2901 = vmatpush.msra.mxu3 %v2695_v17  ;;  %v2650_v3 = vld [vmem:[#allocation9 + $0x90] sm:$0xff]  ;;  %v2651_v17 = vld [vmem:[#allocation9 + $0x98] sm:$0xff] }
 0x34e   :  { %2842 = vmatpush.msra.mxu0 %v5085_v22  ;;  %2862 = vmatpush.msra.mxu1 %v5086_v23  ;;  %v2645_v22 = vld [vmem:[#allocation9 + $0x68] sm:$0xff]  ;;  %v2646_v23 = vld [vmem:[#allocation9 + $0x70] sm:$0xff] }
 0x34f   :  { %2882 = vmatpush.msra.mxu2 %v5087_v20  ;;  %2902 = vmatpush.msra.mxu3 %v5088_v25  ;;  %v2647_v20 = vld [vmem:[#allocation9 + $0x78] sm:$0xff] }
 0x350   :  { %2843 = vmatpush.msra.mxu0 %v5089_v63  ;;  %2863 = vmatpush.msra.mxu1 %v5090_v26  ;;  %v2640_v63 = vld [vmem:[#allocation9 + $0x40] sm:$0xff]  ;;  %v2641_v26 = vld [vmem:[#allocation9 + $0x48] sm:$0xff] }
 0x351   :  { %2883 = vmatpush.msra.mxu2 %v5091_v28  ;;  %2903 = vmatpush.msra.mxu3 %v5092_v29  ;;  %v2642_v28 = vld [vmem:[#allocation9 + $0x50] sm:$0xff] }
 0x352   :  { %2844 = vmatpush.msra.mxu0 %v5093_v33  ;;  %2864 = vmatpush.msra.mxu1 %v5094_v34  ;;  %v2643_v33 = vld [vmem:[#allocation9 + $0x58] sm:$0xff] }
 0x353   :  { %2884 = vmatpush.msra.mxu2 %v5095_v27  ;;  %2904 = vmatpush.msra.mxu3 %v5096_v35 }
 0x354   :  { %2845 = vmatpush.msra.mxu0 %v5097_v36  ;;  %2865 = vmatpush.msra.mxu1 %v5098_v37  ;;  %v2636_v36 = vld [vmem:[#allocation9 + $0x20] sm:$0xff]  ;;  %v2637_v37 = vld [vmem:[#allocation9 + $0x28] sm:$0xff] }
 0x355   :  { %2885 = vmatpush.msra.mxu2 %v5099_v47  ;;  %2905 = vmatpush.msra.mxu3 %v5100_v51  ;;  %v2639_v51 = vld [vmem:[#allocation9 + $0x38] sm:$0xff] }
 0x356   :  { %2846 = vmatpush.msra.mxu0 %v5101_v30  ;;  %2866 = vmatpush.msra.mxu1 %v5102_v38  ;;  %v2632_v30 = vld [vmem:[#allocation9] sm:$0xff]  ;;  %v2633_v38 = vld [vmem:[#allocation9 + $0x8] sm:$0xff] }
 0x357   :  { %2886 = vmatpush.msra.mxu2 %v5103_v55  ;;  %2906 = vmatpush.msra.mxu3 %v5104_v59  ;;  %v2634_v55 = vld [vmem:[#allocation9 + $0x10] sm:$0xff] }
 0x358   :  { %2847 = vmatpush.msra.mxu0 %v5105_v43  ;;  %2867 = vmatpush.msra.mxu1 %v5106_v45 }
 0x359   :  { %2887 = vmatpush.msra.mxu2 %v5107_v52  ;;  %2907 = vmatpush.msra.mxu3 %v5108_v49 }
 0x35a   :  { %2848 = vmatpush.msra.mxu0 %v2664_v24  ;;  %2868 = vmatpush.msra.mxu1 %v2665_v58 }
 0x35b   :  { %2888 = vmatpush.msra.mxu2 %v2666_v44  ;;  %2908 = vmatpush.msra.mxu3 %v2667_v39 }
 0x35c   :  { %2849 = vmatpush.msra.mxu0 %v2660_v53  ;;  %2869 = vmatpush.msra.mxu1 %v2661_v62 }
 0x35d   :  { %2889 = vmatpush.msra.mxu2 %v2662_v48  ;;  %2909 = vmatpush.msra.mxu3 %v2663_v60 }
 0x35e   :  { %2850 = vmatpush.msra.mxu0 %v2656_v6  ;;  %2870 = vmatpush.msra.mxu1 %v2657_v7 }
 0x35f   :  { %2890 = vmatpush.msra.mxu2 %v2658_v5  ;;  %2910 = vmatpush.msra.mxu3 %v2659_v11 }
 0x360   :  { %2851 = vmatpush.msra.mxu0 %v2652_v54  ;;  %2871 = vmatpush.msra.mxu1 %v2653_v12 }
 0x361   :  { %2891 = vmatpush.msra.mxu2 %v2654_v10  ;;  %2911 = vmatpush.msra.mxu3 %v2655_v13  ;;  %v2485_v13 = vld [vmem:[#allocation4 + $0x98] sm:$0xff] }
 0x362   :  { %2852 = vmatpush.msra.mxu0 %v2648_v15  ;;  %2872 = vmatpush.msra.mxu1 %v2649_v16 }
 0x363   :  { %2892 = vmatpush.msra.mxu2 %v2650_v3  ;;  %2912 = vmatpush.msra.mxu3 %v2651_v17 }
 0x364   :  { %2873 = vmatpush.msra.mxu1 %v2645_v22 }
 0x365   :  { %2893 = vmatpush.msra.mxu2 %v2646_v23  ;;  %2913 = vmatpush.msra.mxu3 %v2647_v20 }
 0x366   :  { %2874 = vmatpush.msra.mxu1 %v2641_v26 }
 0x367   :  { %2894 = vmatpush.msra.mxu2 %v2642_v28  ;;  %2914 = vmatpush.msra.mxu3 %v2643_v33 }
 0x368   :  { %2875 = vmatpush.msra.mxu1 %v2637_v37 }
 0x369   :  { %2915 = vmatpush.msra.mxu3 %v2639_v51 }
 0x36a   :  { %2876 = vmatpush.msra.mxu1 %v2633_v38 }
 0x383   :  { %v2203_v18 = vpop.f32.mrf.mxu0  ;;  %v2223_v21 = vpop.f32.mrf.mxu1 }
 0x38a   :  { %v2263_v41 = vpop.f32.mrf.mxu3  ;;  %v6108_v4 = vpop.f32.mrf.mxu2 }
 0x38e   :  { %v2283_v56 = vpop.f32.mrf.mxu0  ;;  %v2303_v57 = vpop.f32.mrf.mxu1 }
 0x38f   :  { %v2284_v46 = vadd.f32 %v2283_v56, %v2203_v18  ;;  %v2304_v42 = vadd.f32 %v2303_v57, %v2223_v21  ;;  %v2644_v21 = vld [vmem:[#allocation9 + $0x60] sm:$0xff]  ;;  %v2635_v56 = vld [vmem:[#allocation9 + $0x18] sm:$0xff] }
 0x390   :  { %2853 = vmatpush.msra.mxu0 %v2644_v21  ;;  %2916 = vmatpush.msra.mxu3 %v2635_v56 }
 0x391   :  { %v2346_v0 = vadd.f32 %v2284_v46, %v5785_v31  ;;  %v2347_v2 = vadd.f32 %v2304_v42, %v5788_v32  ;;  %v2482_v46 = vld [vmem:[#allocation4 + $0x80] sm:$0xff]  ;;  %v2483_v42 = vld [vmem:[#allocation4 + $0x88] sm:$0xff] }
 0x392   :  { %2854 = vmatpush.msra.mxu0 %v2640_v63 }
 0x393   :  { %v4761_v8 = vmul.f32 -1.442695, %v2346_v0  ;;  %v4762_v9 = vmul.f32 -1.442695, %v2347_v2 }
 0x394   :  { %2855 = vmatpush.msra.mxu0 %v2636_v36 }
 0x395   :  { %4909 = vpow2.f32 %v4761_v8  ;;  %v2343_v1 = vpop.f32.mrf.mxu3  ;;  %v2323_v35 = vpop.f32.mrf.mxu2 }
 0x396   :  { %4911 = vpow2.f32 %v4762_v9  ;;  %v2344_v14 = vadd.f32 %v2343_v1, %v2263_v41  ;;  %v2638_v41 = vld [vmem:[#allocation9 + $0x30] sm:$0xff]  ;;  %v2324_v59 = vadd.f32 %v2323_v35, %v6108_v4  ;;  %2856 = vmatpush.msra.mxu0 %v2632_v30 }
 0x397   :  { %2895 = vmatpush.msra.mxu2 %v2638_v41  ;;  %v2484_v41 = vld [vmem:[#allocation4 + $0x90] sm:$0xff] }
 0x398   :  { %v2349_v18 = vadd.f32 %v2344_v14, %v5795_v50  ;;  %v2348_v43 = vadd.f32 %v2324_v59, %v5806_v40 }
 0x399   :  { %2896 = vmatpush.msra.mxu2 %v2634_v55 }
 0x39a   :  { %v4763_v25 = vmul.f32 -1.442695, %v2349_v18 }
 0x39b   :  { %v4910_v29 = vpop.eup %4909 }
 0x39c   :  { %v4912_v34 = vpop.eup %4911  ;;  %v6111_v27 = vadd.f32 1.0, %v4910_v29  ;;  %4913 = vpow2.f32 %v4763_v25 }
 0x39d   :  { %v6113_v47 = vadd.f32 1.0, %v4912_v34 }
 0x39e   :  { %4915 = vrcp.f32 %v6111_v27  ;;  %v2364_v39 = vand.u32 2147483647, %v6111_v27  ;;  %v2366_v0 = vand.u32 2147483648, %v6111_v27  ;;  %vm2360_vm7 = vweird.f32 %v6111_v27 }
 0x39f   :  { %4917 = vrcp.f32 %v6113_v47  ;;  %v2385_v4 = vand.u32 2147483648, %v6113_v47  ;;  %v2383_v7 = vand.u32 2147483647, %v6113_v47  ;;  %vm2379_vm6 = vweird.f32 %v6113_v47 }
 0x3a0   :  { %v2367_v12 = vor.u32 1.1754944e-38, %v2366_v0  ;;  %vm2365_vm10 = vcmp.eq.f32.partialorder %v2364_v39, 8.507059e+37  ;;  %v3048_v39 = vld [vmem:[#allocation7 + $0x1c0] sm:$0xff]  ;;  %v3050_v0 = vld [vmem:[#allocation7 + $0x1d0] sm:$0xff] }
 0x3a1   :  { %v2386_v15 = vor.u32 1.1754944e-38, %v2385_v4  ;;  %vm2384_vm11 = vcmp.eq.f32.partialorder %v2383_v7, 8.507059e+37  ;;  %v3044_v7 = vld [vmem:[#allocation7 + $0x1a0] sm:$0xff] }
 0x3a2   :  { %v4914_v57 = vpop.eup %4913 }
 0x3a3   :  { %v6119_v45 = vadd.f32 1.0, %v4914_v57 }
 0x3a4   :  { %v4916_v24 = vpop.eup %4915 }
 0x3a5   :  { %v4918_v58 = vpop.eup %4917  ;;  %v2356_v44 = vmul.f32 %v4916_v24, %v6111_v27  ;;  %4919 = vrcp.f32 %v6119_v45  ;;  %vm2361_vm4 = vweird.f32 %v4916_v24  ;;  %v2405_v36 = vand.u32 2147483648, %v6119_v45 }
 0x3a6   :  { %v2375_v52 = vmul.f32 %v4918_v58, %v6113_v47  ;;  %4921 = vtanh.f32 %v2348_v43  ;;  %vm2380_vm5 = vweird.f32 %v4918_v58  ;;  %vm2362_vm8 = vmor %vm2360_vm7, %vm2361_vm4  ;;  %vm2399_vm13 = vweird.f32 %v6119_v45 }
 0x3a7   :  { %v2357_v49 = vsub.f32 1.0, %v2356_v44  ;;  %v2503_v53 = vpop.f32.mrf.mxu0  ;;  %v2523_v62 = vpop.f32.mrf.mxu1  ;;  %vm2381_vm9 = vmor %vm2379_vm6, %vm2380_vm5  ;;  %v2406_v51 = vor.u32 1.1754944e-38, %v2405_v36  ;;  %v3053_v44 = vld [vmem:[#allocation7 + $0x1e8] sm:$0xff] }
 0x3a8   :  { %v2376_v48 = vsub.f32 1.0, %v2375_v52  ;;  %v2504_v2 = vadd.f32 %v2503_v53, %v2482_v46  ;;  %v2524_v60 = vadd.f32 %v2523_v62, %v2483_v42  ;;  %v3054_v42 = vld [vmem:[#allocation7 + $0x1f0] sm:$0xff]  ;;  %v3055_v52 = vld [vmem:[#allocation7 + $0x1f8] sm:$0xff]  ;;  %v3049_v53 = vld [vmem:[#allocation7 + $0x1c8] sm:$0xff] }
 0x3a9   :  { %v2358_v6 = vmul.f32 %v4916_v24, %v2357_v49 }
 0x3aa   :  { %v2377_v5 = vmul.f32 %v4918_v58, %v2376_v48  ;;  %v4764_v8 = vmul.f32 -1.442695, %v2504_v2  ;;  %v4765_v9 = vmul.f32 -1.442695, %v2524_v60  ;;  %v3051_v2 = vld [vmem:[#allocation7 + $0x1d8] sm:$0xff] }
 0x3ab   :  { %v4920_v11 = vpop.eup %4919  ;;  %v2359_v54 = vadd.f32 %v4916_v24, %v2358_v6 }
 0x3ac   :  { %v2378_v10 = vadd.f32 %v4918_v58, %v2377_v5  ;;  %v2395_v1 = vmul.f32 %v4920_v11, %v6119_v45  ;;  %4923 = vpow2.f32 %v4764_v8  ;;  %v4922_v14 = vpop.eup %4921  ;;  %vm2400_vm12 = vweird.f32 %v4920_v11  ;;  %v3045_v5 = vld [vmem:[#allocation7 + $0x1a8] sm:$0xff] }
 0x3ad   :  { %v2363_v16 = vsel %vm2362_vm8, %v4916_v24, %v2359_v54  ;;  %4925 = vpow2.f32 %v4765_v9  ;;  %vm2401_vm14 = vmor %vm2399_vm13, %vm2400_vm12  ;;  %v3047_v54 = vld [vmem:[#allocation7 + $0x1b8] sm:$0xff] }
 0x3ae   :  { %v2368_v3 = vsel %vm2365_vm10, %v2367_v12, %v2363_v16  ;;  %v2382_v17 = vsel %vm2381_vm9, %v4918_v58, %v2378_v10  ;;  %v2396_v18 = vsub.f32 1.0, %v2395_v1  ;;  %v2563_v21 = vpop.f32.mrf.mxu3  ;;  %v2543_v47 = vpop.f32.mrf.mxu2  ;;  %v3052_v58 = vld [vmem:[#allocation7 + $0x1e0] sm:$0xff] }
 0x3af   :  { %v2387_v22 = vsel %vm2384_vm11, %v2386_v15, %v2382_v17  ;;  %v2410_v23 = vmul.f32 %v4922_v14, %v2368_v3  ;;  %v2564_v20 = vadd.f32 %v2563_v21, %v2485_v13  ;;  %v2544_v57 = vadd.f32 %v2543_v47, %v2484_v41  ;;  %v3040_v1 = vld [vmem:[#allocation7 + $0x180] sm:$0xff]  ;;  %v3041_v13 = vld [vmem:[#allocation7 + $0x188] sm:$0xff]  ;;  %v3042_v17 = vld [vmem:[#allocation7 + $0x190] sm:$0xff] }
 0x3b0   :  { %v2409_v25 = vmul.f32 %v2387_v22, %v6051_v19  ;;  %v2397_v63 = vmul.f32 %v4920_v11, %v2396_v18  ;;  %v2403_v19 = vand.u32 2147483647, %v6119_v45  ;;  %v3043_v18 = vld [vmem:[#allocation7 + $0x198] sm:$0xff]  ;;  %v3004_v14 = vld [vmem:[#allocation7 + $0x60] sm:$0xff]  ;;  %v3002_v21 = vld [vmem:[#allocation7 + $0x50] sm:$0xff] }
 0x3b1   :  { %v4766_v26 = vmul.f32 -1.442695, %v2564_v20  ;;  %v3036_v20 = vld [vmem:[#allocation7 + $0x160] sm:$0xff] }
 0x3b2   :  { %v4924_v28 = vpop.eup %4923  ;;  %v6132_v29 = vadd.f32 %v2410_v23, %v2409_v25  ;;  %v2398_v27 = vadd.f32 %v4920_v11, %v2397_v63  ;;  %vm2404_vm15 = vcmp.eq.f32.partialorder %v2403_v19, 8.507059e+37  ;;  %v3037_v25 = vld [vmem:[#allocation7 + $0x168] sm:$0xff]  ;;  %v3032_v19 = vld [vmem:[#allocation7 + $0x140] sm:$0xff] }
 0x3b3   :  { %v4926_v33 = vpop.eup %4925  ;;  %v6134_v34 = vadd.f32 1.0, %v4924_v28  ;;  %4927 = vpow2.f32 %v4766_v26 }
 0x3b4   :  { %4929 = vtanh.f32 %v6132_v29  ;;  %v6137_v35 = vadd.f32 1.0, %v4926_v33  ;;  %v2402_v37 = vsel %vm2401_vm14, %v4920_v11, %v2398_v27  ;;  %v3046_v11 = vld [vmem:[#allocation7 + $0x1b0] sm:$0xff]  ;;  %v3039_v27 = vld [vmem:[#allocation7 + $0x178] sm:$0xff] }
 0x3b5   :  { %4931 = vrcp.f32 %v6134_v34  ;;  %v2407_v59 = vsel %vm2404_vm15, %v2406_v51, %v2402_v37  ;;  %v2582_v48 = vand.u32 2147483648, %v6134_v34  ;;  %v2580_v6 = vand.u32 2147483647, %v6134_v34  ;;  %v3033_v37 = vld [vmem:[#allocation7 + $0x148] sm:$0xff]  ;;  %v3034_v51 = vld [vmem:[#allocation7 + $0x150] sm:$0xff] }
 0x3b6   :  { %4933 = vrcp.f32 %v6137_v35  ;;  %v2601_v60 = vand.u32 2147483648, %v6137_v35  ;;  %v2599_v9 = vand.u32 2147483647, %v6137_v35  ;;  %vm2576_vm2 = vweird.f32 %v6134_v34 }
 0x3b7   :  { %vm2595_vm3 = vweird.f32 %v6137_v35  ;;  %v2583_v15 = vor.u32 1.1754944e-38, %v2582_v48  ;;  %vm2581_vm6 = vcmp.eq.f32.partialorder %v2580_v6, 8.507059e+37  ;;  %v3012_v6 = vld [vmem:[#allocation7 + $0xa0] sm:$0xff] }
 0x3b8   :  { %v2602_v22 = vor.u32 1.1754944e-38, %v2601_v60  ;;  %vm2600_vm7 = vcmp.eq.f32.partialorder %v2599_v9, 8.507059e+37  ;;  %v3018_v60 = vld [vmem:[#allocation7 + $0xd0] sm:$0xff] }
 0x3b9   :  { %v4928_v30 = vpop.eup %4927  ;;  %v3014_v9 = vld [vmem:[#allocation7 + $0xb0] sm:$0xff] }
 0x3ba   :  { %v4930_v38 = vpop.eup %4929  ;;  %v6144_v55 = vadd.f32 1.0, %v4928_v30  ;;  %v3035_v30 = vld [vmem:[#allocation7 + $0x158] sm:$0xff] }
 0x3bb   :  { %v6146_v56 = vpop.eup %4931  ;;  %v2413_v43 = vmul.f32 %v4930_v38, %v2407_v59  ;;  %v3028_v38 = vld [vmem:[#allocation7 + $0x120] sm:$0xff]  ;;  %v3029_v59 = vld [vmem:[#allocation7 + $0x128] sm:$0xff] }
 0x3bc   :  { %v6148_v24 = vpop.eup %4933  ;;  %v2572_v45 = vmul.f32 %v6146_v56, %v6134_v34  ;;  %4935 = vrcp.f32 %v6144_v55  ;;  %vm2577_vm0 = vweird.f32 %v6146_v56  ;;  %v3038_v34 = vld [vmem:[#allocation7 + $0x170] sm:$0xff]  ;;  %vm2615_vm9 = vweird.f32 %v6144_v55 }
 0x3bd   :  { %v2591_v46 = vmul.f32 %v6148_v24, %v6137_v35  ;;  %2777 = vmatmul.f32.vlgmr.msrb.gmra.mxu0 %v2413_v43  ;;  %2797 = vmatmul.f32.vlgmr.msrb.gmra.mxu1 %v2413_v43  ;;  %4937 = vtanh.f32 %v2544_v57  ;;  %vm2596_vm1 = vweird.f32 %v6148_v24  ;;  %vm6170_vm4 = vmor %vm2576_vm2, %vm2577_vm0  ;;  %v3030_v57 = vld [vmem:[#allocation7 + $0x130] sm:$0xff] }
 0x3be   :  { %v2573_v49 = vsub.f32 1.0, %v2572_v45  ;;  %2817 = vmatmul.f32.vlgmr.msrb.gmra.mxu2 %v2413_v43  ;;  %2837 = vmatmul.f32.vlgmr.msrb.gmra.mxu3 %v2413_v43  ;;  %vm6179_vm5 = vmor %vm2595_vm3, %vm2596_vm1  ;;  %v3031_v43 = vld [vmem:[#allocation7 + $0x138] sm:$0xff]  ;;  %v3025_v45 = vld [vmem:[#allocation7 + $0x108] sm:$0xff] }
 0x3bf   :  { %v2592_v62 = vsub.f32 1.0, %v2591_v46  ;;  %3061 = vmatpush.msrb.mxu0 %v3052_v58  ;;  %3081 = vmatpush.msrb.mxu1 %v3053_v44  ;;  %v2621_v58 = vand.u32 2147483648, %v6144_v55  ;;  %v3026_v44 = vld [vmem:[#allocation7 + $0x110] sm:$0xff]  ;;  %v3027_v46 = vld [vmem:[#allocation7 + $0x118] sm:$0xff] }
 0x3c0   :  { %v2574_v4 = vmul.f32 %v6146_v56, %v2573_v49  ;;  %3101 = vmatpush.msrb.mxu2 %v3054_v42  ;;  %3121 = vmatpush.msrb.mxu3 %v3055_v52  ;;  %v2619_v42 = vand.u32 2147483647, %v6144_v55  ;;  %v3020_v52 = vld [vmem:[#allocation7 + $0xe0] sm:$0xff]  ;;  %v3021_v49 = vld [vmem:[#allocation7 + $0xe8] sm:$0xff] }
 0x3c1   :  { %v2593_v8 = vmul.f32 %v6148_v24, %v2592_v62  ;;  %3062 = vmatpush.msrb.mxu0 %v3048_v39  ;;  %3082 = vmatpush.msrb.mxu1 %v3049_v53  ;;  %v3022_v53 = vld [vmem:[#allocation7 + $0xf0] sm:$0xff]  ;;  %v3023_v62 = vld [vmem:[#allocation7 + $0xf8] sm:$0xff] }
 0x3c2   :  { %v6163_v12 = vpop.eup %4935  ;;  %v2575_v10 = vadd.f32 %v6146_v56, %v2574_v4  ;;  %3102 = vmatpush.msrb.mxu2 %v3050_v0  ;;  %3122 = vmatpush.msrb.mxu3 %v3051_v2  ;;  %v3017_v0 = vld [vmem:[#allocation7 + $0xc8] sm:$0xff]  ;;  %v2622_v2 = vor.u32 1.1754944e-38, %v2621_v58  ;;  %v3019_v4 = vld [vmem:[#allocation7 + $0xd8] sm:$0xff]  ;;  %vm2620_vm11 = vcmp.eq.f32.partialorder %v2619_v42, 8.507059e+37  ;;  %v3316_v58 = vld [vmem:[#allocation10 + $0x160] sm:$0xff] }
 0x3c3   :  { %v2594_v16 = vadd.f32 %v6148_v24, %v2593_v8  ;;  %v2611_v3 = vmul.f32 %v6163_v12, %v6144_v55  ;;  %3063 = vmatpush.msrb.mxu0 %v3044_v7  ;;  %3083 = vmatpush.msrb.mxu1 %v3045_v5  ;;  %v4938_v63 = vpop.eup %4937  ;;  %vm2616_vm8 = vweird.f32 %v6163_v12  ;;  %v3016_v55 = vld [vmem:[#allocation7 + $0xc0] sm:$0xff]  ;;  %v3013_v7 = vld [vmem:[#allocation7 + $0xa8] sm:$0xff]  ;;  %v3319_v42 = vld [vmem:[#allocation10 + $0x178] sm:$0xff] }
 0x3c4   :  { %v2579_v23 = vsel %vm6170_vm4, %v6146_v56, %v2575_v10  ;;  %3103 = vmatpush.msrb.mxu2 %v3046_v11  ;;  %3123 = vmatpush.msrb.mxu3 %v3047_v54  ;;  %vm6201_vm10 = vmor %vm2615_vm9, %vm2616_vm8  ;;  %v3015_v11 = vld [vmem:[#allocation7 + $0xb8] sm:$0xff]  ;;  %v3009_v10 = vld [vmem:[#allocation7 + $0x88] sm:$0xff] }
 0x3c5   :  { %v2584_v26 = vsel %vm2581_vm6, %v2583_v15, %v2579_v23  ;;  %v2598_v28 = vsel %vm6179_vm5, %v6148_v24, %v2594_v16  ;;  %v2612_v33 = vsub.f32 1.0, %v2611_v3  ;;  %3064 = vmatpush.msrb.mxu0 %v3040_v1  ;;  %3084 = vmatpush.msrb.mxu1 %v3041_v13  ;;  %v3010_v1 = vld [vmem:[#allocation7 + $0x90] sm:$0xff]  ;;  %v3011_v13 = vld [vmem:[#allocation7 + $0x98] sm:$0xff]  ;;  %v3005_v15 = vld [vmem:[#allocation7 + $0x68] sm:$0xff] }
 0x3c6   :  { %v2603_v35 = vsel %vm2600_vm7, %v2602_v22, %v2598_v28  ;;  %v2626_v36 = vmul.f32 %v4938_v63, %v2584_v26  ;;  %3104 = vmatpush.msrb.mxu2 %v3042_v17  ;;  %3124 = vmatpush.msrb.mxu3 %v3043_v18  ;;  %v3006_v16 = vld [vmem:[#allocation7 + $0x70] sm:$0xff]  ;;  %v3007_v3 = vld [vmem:[#allocation7 + $0x78] sm:$0xff]  ;;  %v3000_v17 = vld [vmem:[#allocation7 + $0x40] sm:$0xff] }
 0x3c7   :  { %v2625_v41 = vmul.f32 %v2603_v35, %v6079_v61  ;;  %v2613_v47 = vmul.f32 %v6163_v12, %v2612_v33  ;;  %3065 = vmatpush.msrb.mxu0 %v3036_v20  ;;  %3085 = vmatpush.msrb.mxu1 %v3037_v25  ;;  %v3024_v61 = vld [vmem:[#allocation7 + $0x100] sm:$0xff]  ;;  %v3001_v18 = vld [vmem:[#allocation7 + $0x48] sm:$0xff]  ;;  %v3003_v22 = vld [vmem:[#allocation7 + $0x58] sm:$0xff] }
 0x3c8   :  { %3105 = vmatpush.msrb.mxu2 %v3038_v34  ;;  %3125 = vmatpush.msrb.mxu3 %v3039_v27  ;;  %v2996_v23 = vld [vmem:[#allocation7 + $0x20] sm:$0xff]  ;;  %v2997_v20 = vld [vmem:[#allocation7 + $0x28] sm:$0xff]  ;;  %v2998_v25 = vld [vmem:[#allocation7 + $0x30] sm:$0xff] }
 0x3c9   :  { %v6191_v56 = vadd.f32 %v2626_v36, %v2625_v41  ;;  %3066 = vmatpush.msrb.mxu0 %v3032_v19  ;;  %3086 = vmatpush.msrb.mxu1 %v3033_v37  ;;  %v2614_v24 = vadd.f32 %v6163_v12, %v2613_v47  ;;  %v2999_v63 = vld [vmem:[#allocation7 + $0x38] sm:$0xff]  ;;  %v2992_v26 = vld [vmem:[#allocation7] sm:$0xff]  ;;  %v2993_v28 = vld [vmem:[#allocation7 + $0x8] sm:$0xff] }
 0x3ca   :  { %3106 = vmatpush.msrb.mxu2 %v3034_v51  ;;  %3126 = vmatpush.msrb.mxu3 %v3035_v30  ;;  %v2994_v33 = vld [vmem:[#allocation7 + $0x10] sm:$0xff]  ;;  %v2995_v34 = vld [vmem:[#allocation7 + $0x18] sm:$0xff]  ;;  %v3332_v27 = vld [vmem:[#allocation10 + $0x1e0] sm:$0xff] }
 0x3cb   :  { %4939 = vtanh.f32 %v6191_v56  ;;  %3067 = vmatpush.msrb.mxu0 %v3028_v38  ;;  %3087 = vmatpush.msrb.mxu1 %v3029_v59  ;;  %v2618_v48 = vsel %vm6201_vm10, %v6163_v12, %v2614_v24  ;;  %v3008_v12 = vld [vmem:[#allocation7 + $0x80] sm:$0xff]  ;;  %v3333_v35 = vld [vmem:[#allocation10 + $0x1e8] sm:$0xff]  ;;  %v3334_v36 = vld [vmem:[#allocation10 + $0x1f0] sm:$0xff] }
 0x3cc   :  { %3107 = vmatpush.msrb.mxu2 %v3030_v57  ;;  %3127 = vmatpush.msrb.mxu3 %v3031_v43  ;;  %v2623_v8 = vsel %vm2620_vm11, %v2622_v2, %v2618_v48  ;;  %v3335_v19 = vld [vmem:[#allocation10 + $0x1f8] sm:$0xff]  ;;  %v3328_v37 = vld [vmem:[#allocation10 + $0x1c0] sm:$0xff]  ;;  %v3329_v41 = vld [vmem:[#allocation10 + $0x1c8] sm:$0xff] }
 0x3cd   :  { %3068 = vmatpush.msrb.mxu0 %v3024_v61  ;;  %3088 = vmatpush.msrb.mxu1 %v3025_v45  ;;  %v3330_v47 = vld [vmem:[#allocation10 + $0x1d0] sm:$0xff]  ;;  %v3331_v51 = vld [vmem:[#allocation10 + $0x1d8] sm:$0xff]  ;;  %v3324_v30 = vld [vmem:[#allocation10 + $0x1a0] sm:$0xff] }
 0x3ce   :  { %3108 = vmatpush.msrb.mxu2 %v3026_v44  ;;  %3128 = vmatpush.msrb.mxu3 %v3027_v46  ;;  %v3325_v38 = vld [vmem:[#allocation10 + $0x1a8] sm:$0xff]  ;;  %v3326_v59 = vld [vmem:[#allocation10 + $0x1b0] sm:$0xff]  ;;  %v3327_v57 = vld [vmem:[#allocation10 + $0x1b8] sm:$0xff] }
 0x3cf   :  { %3069 = vmatpush.msrb.mxu0 %v3020_v52  ;;  %3089 = vmatpush.msrb.mxu1 %v3021_v49  ;;  %v3320_v43 = vld [vmem:[#allocation10 + $0x180] sm:$0xff]  ;;  %v3321_v24 = vld [vmem:[#allocation10 + $0x188] sm:$0xff]  ;;  %v3322_v61 = vld [vmem:[#allocation10 + $0x190] sm:$0xff] }
 0x3d0   :  { %3109 = vmatpush.msrb.mxu2 %v3022_v53  ;;  %3129 = vmatpush.msrb.mxu3 %v3023_v62  ;;  %v3323_v45 = vld [vmem:[#allocation10 + $0x198] sm:$0xff]  ;;  %v3317_v44 = vld [vmem:[#allocation10 + $0x168] sm:$0xff]  ;;  %v3318_v46 = vld [vmem:[#allocation10 + $0x170] sm:$0xff] }
 0x3d1   :  { %v4940_v5 = vpop.eup %4939  ;;  %3070 = vmatpush.msrb.mxu0 %v3016_v55  ;;  %3090 = vmatpush.msrb.mxu1 %v3017_v0  ;;  %v3312_v52 = vld [vmem:[#allocation10 + $0x140] sm:$0xff]  ;;  %v3313_v49 = vld [vmem:[#allocation10 + $0x148] sm:$0xff]  ;;  %v3314_v39 = vld [vmem:[#allocation10 + $0x150] sm:$0xff] }
 0x3d2   :  { %v2629_v54 = vmul.f32 %v4940_v5, %v2623_v8  ;;  %3110 = vmatpush.msrb.mxu2 %v3018_v60  ;;  %3130 = vmatpush.msrb.mxu3 %v3019_v4  ;;  %v3315_v53 = vld [vmem:[#allocation10 + $0x158] sm:$0xff]  ;;  %v3308_v62 = vld [vmem:[#allocation10 + $0x120] sm:$0xff]  ;;  %v3309_v48 = vld [vmem:[#allocation10 + $0x128] sm:$0xff] }
 0x3d3   :  { %3071 = vmatpush.msrb.mxu0 %v3012_v6  ;;  %3091 = vmatpush.msrb.mxu1 %v3013_v7  ;;  %v3310_v55 = vld [vmem:[#allocation10 + $0x130] sm:$0xff]  ;;  %v3311_v0 = vld [vmem:[#allocation10 + $0x138] sm:$0xff]  ;;  %v3304_v2 = vld [vmem:[#allocation10 + $0x100] sm:$0xff] }
 0x3d4   :  { %3111 = vmatpush.msrb.mxu2 %v3014_v9  ;;  %3131 = vmatpush.msrb.mxu3 %v3015_v11  ;;  %v3305_v60 = vld [vmem:[#allocation10 + $0x108] sm:$0xff]  ;;  %v3306_v4 = vld [vmem:[#allocation10 + $0x110] sm:$0xff]  ;;  %v3307_v6 = vld [vmem:[#allocation10 + $0x118] sm:$0xff] }
 0x3d5   :  { %2857 = vmatmul.f32.vlgmr.msra.gmra.mxu0 %v2629_v54  ;;  %2877 = vmatmul.f32.vlgmr.msra.gmra.mxu1 %v2629_v54  ;;  %v3300_v7 = vld [vmem:[#allocation10 + $0xe0] sm:$0xff]  ;;  %v3301_v5 = vld [vmem:[#allocation10 + $0xe8] sm:$0xff]  ;;  %v3302_v8 = vld [vmem:[#allocation10 + $0xf0] sm:$0xff] }
 0x3d6   :  { %2897 = vmatmul.f32.vlgmr.msra.gmra.mxu2 %v2629_v54  ;;  %2917 = vmatmul.f32.vlgmr.msra.gmra.mxu3 %v2629_v54  ;;  %v3303_v9 = vld [vmem:[#allocation10 + $0xf8] sm:$0xff]  ;;  %v3296_v11 = vld [vmem:[#allocation10 + $0xc0] sm:$0xff] }
 0x3d7   :  { %3072 = vmatpush.msrb.mxu0 %v3008_v12  ;;  %3092 = vmatpush.msrb.mxu1 %v3009_v10  ;;  %v3298_v12 = vld [vmem:[#allocation10 + $0xd0] sm:$0xff]  ;;  %v3299_v10 = vld [vmem:[#allocation10 + $0xd8] sm:$0xff] }
 0x3d8   :  { %3112 = vmatpush.msrb.mxu2 %v3010_v1  ;;  %3132 = vmatpush.msrb.mxu3 %v3011_v13  ;;  %v3292_v1 = vld [vmem:[#allocation10 + $0xa0] sm:$0xff]  ;;  %v3293_v13 = vld [vmem:[#allocation10 + $0xa8] sm:$0xff] }
 0x3d9   :  { %3073 = vmatpush.msrb.mxu0 %v3004_v14  ;;  %3093 = vmatpush.msrb.mxu1 %v3005_v15  ;;  %v3294_v14 = vld [vmem:[#allocation10 + $0xb0] sm:$0xff]  ;;  %v3295_v15 = vld [vmem:[#allocation10 + $0xb8] sm:$0xff] }
 0x3da   :  { %3113 = vmatpush.msrb.mxu2 %v3006_v16  ;;  %3133 = vmatpush.msrb.mxu3 %v3007_v3  ;;  %v3288_v16 = vld [vmem:[#allocation10 + $0x80] sm:$0xff]  ;;  %v3289_v3 = vld [vmem:[#allocation10 + $0x88] sm:$0xff] }
 0x3db   :  { %3074 = vmatpush.msrb.mxu0 %v3000_v17  ;;  %3094 = vmatpush.msrb.mxu1 %v3001_v18  ;;  %v3290_v17 = vld [vmem:[#allocation10 + $0x90] sm:$0xff]  ;;  %v3291_v18 = vld [vmem:[#allocation10 + $0x98] sm:$0xff] }
 0x3dc   :  { %3114 = vmatpush.msrb.mxu2 %v3002_v21  ;;  %3134 = vmatpush.msrb.mxu3 %v3003_v22  ;;  %v3284_v21 = vld [vmem:[#allocation10 + $0x60] sm:$0xff]  ;;  %v3285_v22 = vld [vmem:[#allocation10 + $0x68] sm:$0xff] }
 0x3dd   :  { %3075 = vmatpush.msrb.mxu0 %v2996_v23  ;;  %3095 = vmatpush.msrb.mxu1 %v2997_v20  ;;  %v3286_v23 = vld [vmem:[#allocation10 + $0x70] sm:$0xff]  ;;  %v3287_v20 = vld [vmem:[#allocation10 + $0x78] sm:$0xff] }
 0x3de   :  { %3115 = vmatpush.msrb.mxu2 %v2998_v25  ;;  %3135 = vmatpush.msrb.mxu3 %v2999_v63  ;;  %v3280_v25 = vld [vmem:[#allocation10 + $0x40] sm:$0xff]  ;;  %v3281_v63 = vld [vmem:[#allocation10 + $0x48] sm:$0xff] }
 0x3df   :  { %3076 = vmatpush.msrb.mxu0 %v2992_v26  ;;  %3096 = vmatpush.msrb.mxu1 %v2993_v28  ;;  %v3282_v26 = vld [vmem:[#allocation10 + $0x50] sm:$0xff]  ;;  %v3283_v28 = vld [vmem:[#allocation10 + $0x58] sm:$0xff] }
 0x3e0   :  { %3116 = vmatpush.msrb.mxu2 %v2994_v33  ;;  %3136 = vmatpush.msrb.mxu3 %v2995_v34  ;;  %v3276_v33 = vld [vmem:[#allocation10 + $0x20] sm:$0xff]  ;;  %v3277_v34 = vld [vmem:[#allocation10 + $0x28] sm:$0xff] }
 0x3e1   :  { %3077 = vmatmul.f32.vlgmr.msrb.gmra.mxu0 %v2629_v54  ;;  %3097 = vmatmul.f32.vlgmr.msrb.gmra.mxu1 %v2629_v54 }
 0x3e2   :  { %3117 = vmatmul.f32.vlgmr.msrb.gmra.mxu2 %v2629_v54  ;;  %3137 = vmatmul.f32.vlgmr.msrb.gmra.mxu3 %v2629_v54  ;;  %v3297_v54 = vld [vmem:[#allocation10 + $0xc8] sm:$0xff] }
 0x3e3   :  { %3336 = vmatpush.msra.mxu0 %v3332_v27  ;;  %3356 = vmatpush.msra.mxu1 %v3333_v35  ;;  %v3278_v27 = vld [vmem:[#allocation10 + $0x30] sm:$0xff]  ;;  %v3279_v35 = vld [vmem:[#allocation10 + $0x38] sm:$0xff] }
 0x3e4   :  { %3376 = vmatpush.msra.mxu2 %v3334_v36  ;;  %3396 = vmatpush.msra.mxu3 %v3335_v19  ;;  %v3272_v36 = vld [vmem:[#allocation10] sm:$0xff]  ;;  %v3273_v19 = vld [vmem:[#allocation10 + $0x8] sm:$0xff] }
 0x3e5   :  { %3337 = vmatpush.msra.mxu0 %v3328_v37  ;;  %3357 = vmatpush.msra.mxu1 %v3329_v41  ;;  %v3274_v37 = vld [vmem:[#allocation10 + $0x10] sm:$0xff]  ;;  %v3275_v41 = vld [vmem:[#allocation10 + $0x18] sm:$0xff] }
 0x3e6   :  { %3377 = vmatpush.msra.mxu2 %v3330_v47  ;;  %3397 = vmatpush.msra.mxu3 %v3331_v51  ;;  %v3267_v47 = vld [vmem:[#allocation9 + $0x1e0] sm:$0xff]  ;;  %v3268_v51 = vld [vmem:[#allocation9 + $0x1e8] sm:$0xff] }
 0x3e7   :  { %3338 = vmatpush.msra.mxu0 %v3324_v30  ;;  %3358 = vmatpush.msra.mxu1 %v3325_v38  ;;  %v3269_v30 = vld [vmem:[#allocation9 + $0x1f0] sm:$0xff]  ;;  %v3270_v38 = vld [vmem:[#allocation9 + $0x1f8] sm:$0xff] }
 0x3e8   :  { %3378 = vmatpush.msra.mxu2 %v3326_v59  ;;  %3398 = vmatpush.msra.mxu3 %v3327_v57  ;;  %v3263_v59 = vld [vmem:[#allocation9 + $0x1c0] sm:$0xff]  ;;  %v3264_v57 = vld [vmem:[#allocation9 + $0x1c8] sm:$0xff] }
 0x3e9   :  { %3339 = vmatpush.msra.mxu0 %v3320_v43  ;;  %3359 = vmatpush.msra.mxu1 %v3321_v24  ;;  %v3265_v43 = vld [vmem:[#allocation9 + $0x1d0] sm:$0xff]  ;;  %v3266_v24 = vld [vmem:[#allocation9 + $0x1d8] sm:$0xff] }
 0x3ea   :  { %3379 = vmatpush.msra.mxu2 %v3322_v61  ;;  %3399 = vmatpush.msra.mxu3 %v3323_v45  ;;  %v3259_v61 = vld [vmem:[#allocation9 + $0x1a0] sm:$0xff]  ;;  %v3260_v45 = vld [vmem:[#allocation9 + $0x1a8] sm:$0xff] }
 0x3eb   :  { %3340 = vmatpush.msra.mxu0 %v3316_v58  ;;  %3360 = vmatpush.msra.mxu1 %v3317_v44  ;;  %v3261_v58 = vld [vmem:[#allocation9 + $0x1b0] sm:$0xff] }
 0x3ec   :  { %3380 = vmatpush.msra.mxu2 %v3318_v46  ;;  %3400 = vmatpush.msra.mxu3 %v3319_v42  ;;  %v3262_v42 = vld [vmem:[#allocation9 + $0x1b8] sm:$0xff] }
 0x3ed   :  { %3341 = vmatpush.msra.mxu0 %v3312_v52  ;;  %3361 = vmatpush.msra.mxu1 %v3313_v49  ;;  %v3255_v52 = vld [vmem:[#allocation9 + $0x180] sm:$0xff]  ;;  %v3256_v49 = vld [vmem:[#allocation9 + $0x188] sm:$0xff] }
 0x3ee   :  { %3381 = vmatpush.msra.mxu2 %v3314_v39  ;;  %3401 = vmatpush.msra.mxu3 %v3315_v53  ;;  %v3257_v39 = vld [vmem:[#allocation9 + $0x190] sm:$0xff]  ;;  %v3258_v53 = vld [vmem:[#allocation9 + $0x198] sm:$0xff] }
 0x3ef   :  { %3342 = vmatpush.msra.mxu0 %v3308_v62  ;;  %3362 = vmatpush.msra.mxu1 %v3309_v48  ;;  %v3251_v62 = vld [vmem:[#allocation9 + $0x160] sm:$0xff]  ;;  %v3252_v48 = vld [vmem:[#allocation9 + $0x168] sm:$0xff] }
 0x3f0   :  { %3382 = vmatpush.msra.mxu2 %v3310_v55  ;;  %3402 = vmatpush.msra.mxu3 %v3311_v0  ;;  %v3253_v55 = vld [vmem:[#allocation9 + $0x170] sm:$0xff]  ;;  %v3254_v0 = vld [vmem:[#allocation9 + $0x178] sm:$0xff] }
 0x3f1   :  { %3343 = vmatpush.msra.mxu0 %v3304_v2  ;;  %3363 = vmatpush.msra.mxu1 %v3305_v60  ;;  %v3247_v2 = vld [vmem:[#allocation9 + $0x140] sm:$0xff]  ;;  %v3248_v60 = vld [vmem:[#allocation9 + $0x148] sm:$0xff] }
 0x3f2   :  { %3383 = vmatpush.msra.mxu2 %v3306_v4  ;;  %3403 = vmatpush.msra.mxu3 %v3307_v6  ;;  %v3249_v4 = vld [vmem:[#allocation9 + $0x150] sm:$0xff]  ;;  %v3250_v6 = vld [vmem:[#allocation9 + $0x158] sm:$0xff] }
 0x3f3   :  { %3344 = vmatpush.msra.mxu0 %v3300_v7  ;;  %3364 = vmatpush.msra.mxu1 %v3301_v5  ;;  %v3243_v5 = vld [vmem:[#allocation9 + $0x120] sm:$0xff] }
 0x3f4   :  { %3384 = vmatpush.msra.mxu2 %v3302_v8  ;;  %3404 = vmatpush.msra.mxu3 %v3303_v9  ;;  %v3244_v8 = vld [vmem:[#allocation9 + $0x128] sm:$0xff]  ;;  %v3245_v9 = vld [vmem:[#allocation9 + $0x130] sm:$0xff] }
 0x3f5   :  { %3345 = vmatpush.msra.mxu0 %v3296_v11  ;;  %3365 = vmatpush.msra.mxu1 %v3297_v54 }
 0x3f6   :  { %3385 = vmatpush.msra.mxu2 %v3298_v12  ;;  %3405 = vmatpush.msra.mxu3 %v3299_v10  ;;  %v3246_v12 = vld [vmem:[#allocation9 + $0x138] sm:$0xff] }
 0x3f7   :  { %3346 = vmatpush.msra.mxu0 %v3292_v1  ;;  %3366 = vmatpush.msra.mxu1 %v3293_v13  ;;  %v3239_v13 = vld [vmem:[#allocation9 + $0x100] sm:$0xff] }
 0x3f8   :  { %3386 = vmatpush.msra.mxu2 %v3294_v14  ;;  %3406 = vmatpush.msra.mxu3 %v3295_v15  ;;  %v3240_v14 = vld [vmem:[#allocation9 + $0x108] sm:$0xff]  ;;  %v3241_v15 = vld [vmem:[#allocation9 + $0x110] sm:$0xff] }
 0x3f9   :  { %3347 = vmatpush.msra.mxu0 %v3288_v16  ;;  %3367 = vmatpush.msra.mxu1 %v3289_v3  ;;  %v3242_v16 = vld [vmem:[#allocation9 + $0x118] sm:$0xff] }
 0x3fa   :  { %3387 = vmatpush.msra.mxu2 %v3290_v17  ;;  %3407 = vmatpush.msra.mxu3 %v3291_v18  ;;  %v3235_v18 = vld [vmem:[#allocation9 + $0xe0] sm:$0xff] }
 0x3fb   :  { %3348 = vmatpush.msra.mxu0 %v3284_v21  ;;  %3368 = vmatpush.msra.mxu1 %v3285_v22  ;;  %v3236_v21 = vld [vmem:[#allocation9 + $0xe8] sm:$0xff]  ;;  %v3237_v22 = vld [vmem:[#allocation9 + $0xf0] sm:$0xff] }
 0x3fc   :  { %3388 = vmatpush.msra.mxu2 %v3286_v23  ;;  %3408 = vmatpush.msra.mxu3 %v3287_v20  ;;  %v3238_v23 = vld [vmem:[#allocation9 + $0xf8] sm:$0xff] }
 0x3fd   :  { %3349 = vmatpush.msra.mxu0 %v3280_v25  ;;  %3369 = vmatpush.msra.mxu1 %v3281_v63  ;;  %v3231_v63 = vld [vmem:[#allocation9 + $0xc0] sm:$0xff] }
 0x3fe   :  { %3389 = vmatpush.msra.mxu2 %v3282_v26  ;;  %3409 = vmatpush.msra.mxu3 %v3283_v28  ;;  %v3232_v26 = vld [vmem:[#allocation9 + $0xc8] sm:$0xff] }
 0x3ff   :  { %3350 = vmatpush.msra.mxu0 %v3276_v33  ;;  %3370 = vmatpush.msra.mxu1 %v3277_v34  ;;  %v3233_v33 = vld [vmem:[#allocation9 + $0xd0] sm:$0xff]  ;;  %v3234_v34 = vld [vmem:[#allocation9 + $0xd8] sm:$0xff] }
 0x400   :  { %3390 = vmatpush.msra.mxu2 %v3278_v27  ;;  %3410 = vmatpush.msra.mxu3 %v3279_v35  ;;  %v3227_v35 = vld [vmem:[#allocation9 + $0xa0] sm:$0xff] }
 0x401   :  { %3351 = vmatpush.msra.mxu0 %v3272_v36  ;;  %3371 = vmatpush.msra.mxu1 %v3273_v19  ;;  %v3228_v36 = vld [vmem:[#allocation9 + $0xa8] sm:$0xff]  ;;  %v3229_v19 = vld [vmem:[#allocation9 + $0xb0] sm:$0xff] }
 0x402   :  { %3391 = vmatpush.msra.mxu2 %v3274_v37  ;;  %3411 = vmatpush.msra.mxu3 %v3275_v41  ;;  %v3230_v41 = vld [vmem:[#allocation9 + $0xb8] sm:$0xff] }
 0x403   :  { %3416 = vmatpush.msrb.mxu0 %v3267_v47  ;;  %3436 = vmatpush.msrb.mxu1 %v3268_v51  ;;  %v3223_v47 = vld [vmem:[#allocation9 + $0x80] sm:$0xff]  ;;  %v3224_v51 = vld [vmem:[#allocation9 + $0x88] sm:$0xff] }
 0x404   :  { %3456 = vmatpush.msrb.mxu2 %v3269_v30  ;;  %3476 = vmatpush.msrb.mxu3 %v3270_v38  ;;  %v3225_v30 = vld [vmem:[#allocation9 + $0x90] sm:$0xff] }
 0x405   :  { %3417 = vmatpush.msrb.mxu0 %v3263_v59  ;;  %3437 = vmatpush.msrb.mxu1 %v3264_v57  ;;  %v3057_v59 = vld [vmem:[#allocation4 + $0xa0] sm:$0xff]  ;;  %v3058_v57 = vld [vmem:[#allocation4 + $0xa8] sm:$0xff] }
 0x406   :  { %3457 = vmatpush.msrb.mxu2 %v3265_v43  ;;  %3477 = vmatpush.msrb.mxu3 %v3266_v24  ;;  %v3226_v43 = vld [vmem:[#allocation9 + $0x98] sm:$0xff]  ;;  %v3219_v24 = vld [vmem:[#allocation9 + $0x60] sm:$0xff] }
 0x407   :  { %3418 = vmatpush.msrb.mxu0 %v3259_v61  ;;  %3438 = vmatpush.msrb.mxu1 %v3260_v45  ;;  %v3220_v61 = vld [vmem:[#allocation9 + $0x68] sm:$0xff]  ;;  %v3221_v45 = vld [vmem:[#allocation9 + $0x70] sm:$0xff] }
 0x408   :  { %3458 = vmatpush.msrb.mxu2 %v3261_v58  ;;  %3478 = vmatpush.msrb.mxu3 %v3262_v42  ;;  %v3222_v42 = vld [vmem:[#allocation9 + $0x78] sm:$0xff] }
 0x409   :  { %3419 = vmatpush.msrb.mxu0 %v3255_v52  ;;  %3439 = vmatpush.msrb.mxu1 %v3256_v49 }
 0x40a   :  { %3459 = vmatpush.msrb.mxu2 %v3257_v39  ;;  %3479 = vmatpush.msrb.mxu3 %v3258_v53  ;;  %v3215_v53 = vld [vmem:[#allocation9 + $0x40] sm:$0xff] }
 0x40b   :  { %3420 = vmatpush.msrb.mxu0 %v3251_v62  ;;  %3440 = vmatpush.msrb.mxu1 %v3252_v48  ;;  %v3216_v62 = vld [vmem:[#allocation9 + $0x48] sm:$0xff]  ;;  %v3217_v48 = vld [vmem:[#allocation9 + $0x50] sm:$0xff] }
 0x40c   :  { %3460 = vmatpush.msrb.mxu2 %v3253_v55  ;;  %3480 = vmatpush.msrb.mxu3 %v3254_v0 }
 0x40d   :  { %3421 = vmatpush.msrb.mxu0 %v3247_v2  ;;  %3441 = vmatpush.msrb.mxu1 %v3248_v60  ;;  %v3218_v60 = vld [vmem:[#allocation9 + $0x58] sm:$0xff] }
 0x40e   :  { %3461 = vmatpush.msrb.mxu2 %v3249_v4  ;;  %3481 = vmatpush.msrb.mxu3 %v3250_v6 }
 0x40f   :  { %3422 = vmatpush.msrb.mxu0 %v3243_v5  ;;  %3442 = vmatpush.msrb.mxu1 %v3244_v8  ;;  %v3060_v5 = vld [vmem:[#allocation4 + $0xb8] sm:$0xff]  ;;  %v3211_v8 = vld [vmem:[#allocation9 + $0x20] sm:$0xff] }
 0x410   :  { %3462 = vmatpush.msrb.mxu2 %v3245_v9  ;;  %3482 = vmatpush.msrb.mxu3 %v3246_v12  ;;  %v3212_v9 = vld [vmem:[#allocation9 + $0x28] sm:$0xff] }
 0x411   :  { %3423 = vmatpush.msrb.mxu0 %v3239_v13  ;;  %3443 = vmatpush.msrb.mxu1 %v3240_v14  ;;  %v3209_v13 = vld [vmem:[#allocation9 + $0x10] sm:$0xff]  ;;  %v3210_v14 = vld [vmem:[#allocation9 + $0x18] sm:$0xff] }
 0x412   :  { %3463 = vmatpush.msrb.mxu2 %v3241_v15  ;;  %3483 = vmatpush.msrb.mxu3 %v3242_v16 }
 0x413   :  { %3424 = vmatpush.msrb.mxu0 %v3235_v18  ;;  %3444 = vmatpush.msrb.mxu1 %v3236_v21 }
 0x414   :  { %3464 = vmatpush.msrb.mxu2 %v3237_v22  ;;  %3484 = vmatpush.msrb.mxu3 %v3238_v23 }
 0x415   :  { %3425 = vmatpush.msrb.mxu0 %v3231_v63  ;;  %3445 = vmatpush.msrb.mxu1 %v3232_v26 }
 0x416   :  { %3465 = vmatpush.msrb.mxu2 %v3233_v33  ;;  %3485 = vmatpush.msrb.mxu3 %v3234_v34 }
 0x417   :  { %3426 = vmatpush.msrb.mxu0 %v3227_v35  ;;  %3446 = vmatpush.msrb.mxu1 %v3228_v36 }
 0x418   :  { %3466 = vmatpush.msrb.mxu2 %v3229_v19  ;;  %3486 = vmatpush.msrb.mxu3 %v3230_v41 }
 0x419   :  { %3427 = vmatpush.msrb.mxu0 %v3223_v47  ;;  %3447 = vmatpush.msrb.mxu1 %v3224_v51  ;;  %v3059_v51 = vld [vmem:[#allocation4 + $0xb0] sm:$0xff] }
 0x41a   :  { %3467 = vmatpush.msrb.mxu2 %v3225_v30  ;;  %3487 = vmatpush.msrb.mxu3 %v3226_v43 }
 0x41b   :  { %3428 = vmatpush.msrb.mxu0 %v3219_v24  ;;  %3448 = vmatpush.msrb.mxu1 %v3220_v61 }
 0x41c   :  { %3468 = vmatpush.msrb.mxu2 %v3221_v45  ;;  %3488 = vmatpush.msrb.mxu3 %v3222_v42 }
 0x41d   :  { %3429 = vmatpush.msrb.mxu0 %v3215_v53  ;;  %3449 = vmatpush.msrb.mxu1 %v3216_v62 }
 0x41e   :  { %3469 = vmatpush.msrb.mxu2 %v3217_v48  ;;  %3489 = vmatpush.msrb.mxu3 %v3218_v60 }
 0x41f   :  { %3430 = vmatpush.msrb.mxu0 %v3211_v8  ;;  %3450 = vmatpush.msrb.mxu1 %v3212_v9 }
 0x43a   :  { %v2778_v44 = vpop.f32.mrf.mxu0  ;;  %v2798_v46 = vpop.f32.mrf.mxu1 }
 0x441   :  { %v2838_v7 = vpop.f32.mrf.mxu3  ;;  %v6210_v28 = vpop.f32.mrf.mxu2 }
 0x452   :  { %v2858_v11 = vpop.f32.mrf.mxu0  ;;  %v2878_v54 = vpop.f32.mrf.mxu1 }
 0x453   :  { %v2859_v10 = vadd.f32 %v2858_v11, %v2778_v44  ;;  %v2879_v1 = vadd.f32 %v2878_v54, %v2798_v46  ;;  %v3213_v11 = vld [vmem:[#allocation9 + $0x30] sm:$0xff]  ;;  %v3214_v54 = vld [vmem:[#allocation9 + $0x38] sm:$0xff] }
 0x454   :  { %3470 = vmatpush.msrb.mxu2 %v3213_v11  ;;  %3490 = vmatpush.msrb.mxu3 %v3214_v54 }
 0x455   :  { %v2921_v3 = vadd.f32 %v2859_v10, %v5785_v31  ;;  %v2922_v17 = vadd.f32 %v2879_v1, %v5788_v32  ;;  %v3207_v10 = vld [vmem:[#allocation9] sm:$0xff]  ;;  %v3208_v1 = vld [vmem:[#allocation9 + $0x8] sm:$0xff] }
 0x456   :  { %3431 = vmatpush.msrb.mxu0 %v3207_v10  ;;  %3451 = vmatpush.msrb.mxu1 %v3208_v1 }
 0x457   :  { %v4767_v20 = vmul.f32 -1.442695, %v2921_v3  ;;  %v4768_v25 = vmul.f32 -1.442695, %v2922_v17  ;;  %3471 = vmatpush.msrb.mxu2 %v3209_v13  ;;  %3491 = vmatpush.msrb.mxu3 %v3210_v14 }
 0x459   :  { %4941 = vpow2.f32 %v4767_v20  ;;  %v2918_v27 = vpop.f32.mrf.mxu3  ;;  %v2898_v2 = vpop.f32.mrf.mxu2 }
 0x45a   :  { %4943 = vpow2.f32 %v4768_v25  ;;  %v2919_v37 = vadd.f32 %v2918_v27, %v2838_v7  ;;  %v2899_v12 = vadd.f32 %v2898_v2, %v6210_v28 }
 0x45c   :  { %v2924_v38 = vadd.f32 %v2919_v37, %v5795_v50  ;;  %v2923_v17 = vadd.f32 %v2899_v12, %v5806_v40 }
 0x45e   :  { %v4769_v58 = vmul.f32 -1.442695, %v2924_v38  ;;  %v3078_v44 = vpop.f32.mrf.mxu0  ;;  %v3098_v46 = vpop.f32.mrf.mxu1 }
 0x45f   :  { %v4942_v52 = vpop.eup %4941  ;;  %v3079_v49 = vadd.f32 %v3078_v44, %v3057_v59  ;;  %v3099_v39 = vadd.f32 %v3098_v46, %v3058_v57 }
 0x460   :  { %v4944_v55 = vpop.eup %4943  ;;  %v6213_v0 = vadd.f32 1.0, %v4942_v52  ;;  %4945 = vpow2.f32 %v4769_v58 }
 0x461   :  { %v6215_v4 = vadd.f32 1.0, %v4944_v55  ;;  %v4770_v6 = vmul.f32 -1.442695, %v3079_v49  ;;  %v4771_v7 = vmul.f32 -1.442695, %v3099_v39 }
 0x462   :  { %4947 = vrcp.f32 %v6213_v0  ;;  %v2939_v27 = vand.u32 2147483647, %v6213_v0  ;;  %v2941_v35 = vand.u32 2147483648, %v6213_v0  ;;  %vm2935_vm15 = vweird.f32 %v6213_v0 }
 0x463   :  { %4949 = vrcp.f32 %v6215_v4  ;;  %v2960_v19 = vand.u32 2147483648, %v6215_v4  ;;  %v2958_v47 = vand.u32 2147483647, %v6215_v4  ;;  %vm2954_vm14 = vweird.f32 %v6215_v4 }
 0x464   :  { %4951 = vpow2.f32 %v4770_v6  ;;  %vm2940_vm1 = vcmp.eq.f32.partialorder %v2939_v27, 8.507059e+37  ;;  %v2942_v43 = vor.u32 1.1754944e-38, %v2941_v35 }
 0x465   :  { %4953 = vpow2.f32 %v4771_v7  ;;  %v3138_v15 = vpop.f32.mrf.mxu3  ;;  %v3118_v30 = vpop.f32.mrf.mxu2  ;;  %v2961_v58 = vor.u32 1.1754944e-38, %v2960_v19  ;;  %vm2959_vm3 = vcmp.eq.f32.partialorder %v2958_v47, 8.507059e+37  ;;  %v3628_v47 = vld [vmem:[#allocation7 + $0x1e8] sm:$0xff] }
 0x466   :  { %v4946_v16 = vpop.eup %4945  ;;  %v3139_v3 = vadd.f32 %v3138_v15, %v3060_v5  ;;  %v3119_v46 = vadd.f32 %v3118_v30, %v3059_v51  ;;  %v3629_v30 = vld [vmem:[#allocation7 + $0x1f0] sm:$0xff] }
 0x467   :  { %v6221_v18 = vadd.f32 1.0, %v4946_v16 }
 0x468   :  { %v4948_v21 = vpop.eup %4947  ;;  %v4772_v22 = vmul.f32 -1.442695, %v3139_v3  ;;  %v3602_v3 = vld [vmem:[#allocation7 + $0x118] sm:$0xff] }
 0x469   :  { %v4950_v23 = vpop.eup %4949  ;;  %v2931_v20 = vmul.f32 %v4948_v21, %v6213_v0  ;;  %4955 = vrcp.f32 %v6221_v18  ;;  %vm2936_vm12 = vweird.f32 %v4948_v21  ;;  %vm2974_vm4 = vweird.f32 %v6221_v18 }
 0x46a   :  { %v4952_v25 = vpop.eup %4951  ;;  %v2950_v63 = vmul.f32 %v4950_v23, %v6215_v4  ;;  %4957 = vpow2.f32 %v4772_v22  ;;  %vm2955_vm13 = vweird.f32 %v4950_v23  ;;  %vm2937_vm0 = vmor %vm2935_vm15, %vm2936_vm12  ;;  %v2980_v8 = vand.u32 2147483648, %v6221_v18 }
 0x46b   :  { %v4954_v26 = vpop.eup %4953  ;;  %v2932_v28 = vsub.f32 1.0, %v2931_v20  ;;  %4959 = vtanh.f32 %v2923_v17  ;;  %v6226_v33 = vadd.f32 1.0, %v4952_v25  ;;  %vm2956_vm2 = vmor %vm2954_vm14, %vm2955_vm13  ;;  %v2978_v14 = vand.u32 2147483647, %v6221_v18 }
 0x46c   :  { %v2951_v34 = vsub.f32 1.0, %v2950_v63  ;;  %v6230_v36 = vadd.f32 1.0, %v4954_v26  ;;  %v2981_v26 = vor.u32 1.1754944e-38, %v2980_v8  ;;  %v3614_v8 = vld [vmem:[#allocation7 + $0x178] sm:$0xff] }
 0x46d   :  { %v2933_v37 = vmul.f32 %v4948_v21, %v2932_v28  ;;  %4961 = vrcp.f32 %v6226_v33  ;;  %v3155_v5 = vand.u32 2147483647, %v6226_v33  ;;  %v3157_v11 = vand.u32 2147483648, %v6226_v33 }
 0x46e   :  { %v2952_v41 = vmul.f32 %v4950_v23, %v2951_v34  ;;  %4963 = vrcp.f32 %v6230_v36  ;;  %v3176_v54 = vand.u32 2147483648, %v6230_v36  ;;  %v3174_v13 = vand.u32 2147483647, %v6230_v36 }
 0x46f   :  { %v6236_v38 = vpop.eup %4955  ;;  %v2934_v59 = vadd.f32 %v4948_v21, %v2933_v37  ;;  %vm3170_vm8 = vweird.f32 %v6230_v36  ;;  %vm3151_vm9 = vweird.f32 %v6226_v33  ;;  %vm3156_vm12 = vcmp.eq.f32.partialorder %v3155_v5, 8.507059e+37  ;;  %v3613_v5 = vld [vmem:[#allocation7 + $0x170] sm:$0xff] }
 0x470   :  { %v4958_v57 = vpop.eup %4957  ;;  %v2953_v24 = vadd.f32 %v4950_v23, %v2952_v41  ;;  %v2970_v61 = vmul.f32 %v6236_v38, %v6221_v18  ;;  %vm2975_vm5 = vweird.f32 %v6236_v38  ;;  %v3177_v20 = vor.u32 1.1754944e-38, %v3176_v54  ;;  %v3627_v41 = vld [vmem:[#allocation7 + $0x1e0] sm:$0xff]  ;;  %v3610_v54 = vld [vmem:[#allocation7 + $0x158] sm:$0xff] }
 0x471   :  { %v4960_v45 = vpop.eup %4959  ;;  %v2938_v44 = vsel %vm2937_vm0, %v4948_v21, %v2934_v59  ;;  %v6243_v42 = vadd.f32 1.0, %v4958_v57  ;;  %vm6270_vm10 = vmor %vm2974_vm4, %vm2975_vm5  ;;  %v3158_v21 = vor.u32 1.1754944e-38, %v3157_v11  ;;  %vm3175_vm14 = vcmp.eq.f32.partialorder %v3174_v13, 8.507059e+37  ;;  %v3623_v57 = vld [vmem:[#allocation7 + $0x1c0] sm:$0xff]  ;;  %v3608_v11 = vld [vmem:[#allocation7 + $0x148] sm:$0xff] }
 0x472   :  { %v2943_v52 = vsel %vm2940_vm1, %v2942_v43, %v2938_v44  ;;  %v2957_v49 = vsel %vm2956_vm2, %v4950_v23, %v2953_v24  ;;  %v2971_v39 = vsub.f32 1.0, %v2970_v61  ;;  %vm2979_vm15 = vcmp.eq.f32.partialorder %v2978_v14, 8.507059e+37  ;;  %v3624_v43 = vld [vmem:[#allocation7 + $0x1c8] sm:$0xff]  ;;  %v3625_v24 = vld [vmem:[#allocation7 + $0x1d0] sm:$0xff]  ;;  %v3626_v61 = vld [vmem:[#allocation7 + $0x1d8] sm:$0xff] }
 0x473   :  { %v4962_v53 = vpop.eup %4961  ;;  %v2962_v62 = vsel %vm2959_vm3, %v2961_v58, %v2957_v49  ;;  %v2985_v48 = vmul.f32 %v4960_v45, %v2943_v52  ;;  %4965 = vrcp.f32 %v6243_v42  ;;  %vm3190_vm1 = vweird.f32 %v6243_v42  ;;  %v3619_v58 = vld [vmem:[#allocation7 + $0x1a0] sm:$0xff]  ;;  %v3620_v44 = vld [vmem:[#allocation7 + $0x1a8] sm:$0xff]  ;;  %v3621_v52 = vld [vmem:[#allocation7 + $0x1b0] sm:$0xff] }
 0x474   :  { %v4964_v55 = vpop.eup %4963  ;;  %v2984_v0 = vmul.f32 %v2962_v62, %v6132_v29  ;;  %v3147_v2 = vmul.f32 %v4962_v53, %v6226_v33  ;;  %4967 = vtanh.f32 %v3119_v46  ;;  %v2972_v4 = vmul.f32 %v6236_v38, %v2971_v39  ;;  %v3622_v49 = vld [vmem:[#allocation7 + $0x1b8] sm:$0xff]  ;;  %v3599_v14 = vld [vmem:[#allocation7 + $0x100] sm:$0xff]  ;;  %v3569_v46 = vld [vmem:[#allocation7 + $0x10] sm:$0xff] }
 0x475   :  { %v3166_v60 = vmul.f32 %v4964_v55, %v6230_v36  ;;  %vm3152_vm6 = vweird.f32 %v4962_v53  ;;  %vm3171_vm7 = vweird.f32 %v4964_v55  ;;  %v3194_v45 = vand.u32 2147483647, %v6243_v42  ;;  %v3606_v13 = vld [vmem:[#allocation7 + $0x138] sm:$0xff] }
 0x476   :  { %v6251_v6 = vadd.f32 %v2985_v48, %v2984_v0  ;;  %v3148_v7 = vsub.f32 1.0, %v3147_v2  ;;  %v2973_v29 = vadd.f32 %v6236_v38, %v2972_v4  ;;  %vm3153_vm11 = vmor %vm3151_vm9, %vm3152_vm6  ;;  %v3617_v48 = vld [vmem:[#allocation7 + $0x190] sm:$0xff]  ;;  %v3611_v0 = vld [vmem:[#allocation7 + $0x160] sm:$0xff] }
 0x477   :  { %v3167_v9 = vsub.f32 1.0, %v3166_v60  ;;  %vm3172_vm13 = vmor %vm3170_vm8, %vm3171_vm7  ;;  %vm3195_vm3 = vcmp.eq.f32.partialorder %v3194_v45, 8.507059e+37  ;;  %v3612_v2 = vld [vmem:[#allocation7 + $0x168] sm:$0xff]  ;;  %v3574_v45 = vld [vmem:[#allocation7 + $0x38] sm:$0xff] }
 0x478   :  { %4969 = vtanh.f32 %v6251_v6  ;;  %v3149_v12 = vmul.f32 %v4962_v53, %v3148_v7  ;;  %v2977_v23 = vsel %vm6270_vm10, %v6236_v38, %v2973_v29  ;;  %v3630_v38 = vld [vmem:[#allocation7 + $0x1f8] sm:$0xff]  ;;  %v3609_v29 = vld [vmem:[#allocation7 + $0x150] sm:$0xff] }
 0x479   :  { %v6260_v10 = vpop.eup %4965  ;;  %v3168_v1 = vmul.f32 %v4964_v55, %v3167_v9  ;;  %v2982_v36 = vsel %vm2979_vm15, %v2981_v26, %v2977_v23  ;;  %v3607_v9 = vld [vmem:[#allocation7 + $0x140] sm:$0xff]  ;;  %v3598_v23 = vld [vmem:[#allocation7 + $0xf8] sm:$0xff] }
 0x47a   :  { %v3150_v15 = vadd.f32 %v4962_v53, %v3149_v12  ;;  %v3186_v16 = vmul.f32 %v6260_v10, %v6243_v42  ;;  %v4968_v17 = vpop.eup %4967  ;;  %vm3191_vm0 = vweird.f32 %v6260_v10  ;;  %v3603_v12 = vld [vmem:[#allocation7 + $0x120] sm:$0xff]  ;;  %v3594_v26 = vld [vmem:[#allocation7 + $0xd8] sm:$0xff] }
 0x47b   :  { %v3169_v22 = vadd.f32 %v4964_v55, %v3168_v1  ;;  %vm6289_vm2 = vmor %vm3190_vm1, %vm3191_vm0  ;;  %v3605_v1 = vld [vmem:[#allocation7 + $0x130] sm:$0xff] }
 0x47c   :  { %v3154_v25 = vsel %vm3153_vm11, %v4962_v53, %v3150_v15  ;;  %v3187_v63 = vsub.f32 1.0, %v3186_v16  ;;  %v3616_v53 = vld [vmem:[#allocation7 + $0x188] sm:$0xff]  ;;  %v3601_v16 = vld [vmem:[#allocation7 + $0x110] sm:$0xff] }
 0x47d   :  { %v3159_v28 = vsel %vm3156_vm12, %v3158_v21, %v3154_v25  ;;  %v3173_v18 = vsel %vm3172_vm13, %v4964_v55, %v3169_v22  ;;  %v3618_v55 = vld [vmem:[#allocation7 + $0x198] sm:$0xff]  ;;  %v3600_v15 = vld [vmem:[#allocation7 + $0x108] sm:$0xff]  ;;  %v3597_v22 = vld [vmem:[#allocation7 + $0xf0] sm:$0xff] }
 0x47e   :  { %v4970_v33 = vpop.eup %4969  ;;  %v3178_v34 = vsel %vm3175_vm14, %v3177_v20, %v3173_v18  ;;  %v3201_v27 = vmul.f32 %v4968_v17, %v3159_v28  ;;  %v3188_v35 = vmul.f32 %v6260_v10, %v3187_v63  ;;  %v3595_v17 = vld [vmem:[#allocation7 + $0xe0] sm:$0xff]  ;;  %v3596_v21 = vld [vmem:[#allocation7 + $0xe8] sm:$0xff]  ;;  %v3593_v63 = vld [vmem:[#allocation7 + $0xd0] sm:$0xff] }
 0x47f   :  { %v3200_v19 = vmul.f32 %v3178_v34, %v6191_v56  ;;  %v2988_v37 = vmul.f32 %v4970_v33, %v2982_v36  ;;  %v3196_v56 = vand.u32 2147483648, %v6243_v42  ;;  %v3615_v42 = vld [vmem:[#allocation7 + $0x180] sm:$0xff]  ;;  %v3592_v25 = vld [vmem:[#allocation7 + $0xc8] sm:$0xff]  ;;  %v3589_v33 = vld [vmem:[#allocation7 + $0xb0] sm:$0xff] }
 0x480   :  { %v3189_v59 = vadd.f32 %v6260_v10, %v3188_v35  ;;  %v3591_v20 = vld [vmem:[#allocation7 + $0xc0] sm:$0xff]  ;;  %v3588_v18 = vld [vmem:[#allocation7 + $0xa8] sm:$0xff]  ;;  %v3590_v34 = vld [vmem:[#allocation7 + $0xb8] sm:$0xff] }
 0x481   :  { %v6279_v51 = vadd.f32 %v3201_v27, %v3200_v19  ;;  %3352 = vmatmul.f32.vlgmr.msra.gmra.mxu0 %v2988_v37  ;;  %3372 = vmatmul.f32.vlgmr.msra.gmra.mxu1 %v2988_v37  ;;  %v3197_v62 = vor.u32 1.1754944e-38, %v3196_v56  ;;  %v3587_v28 = vld [vmem:[#allocation7 + $0xa0] sm:$0xff]  ;;  %v3584_v35 = vld [vmem:[#allocation7 + $0x88] sm:$0xff]  ;;  %v3585_v36 = vld [vmem:[#allocation7 + $0x90] sm:$0xff] }
 0x482   :  { %3392 = vmatmul.f32.vlgmr.msra.gmra.mxu2 %v2988_v37  ;;  %3412 = vmatmul.f32.vlgmr.msra.gmra.mxu3 %v2988_v37  ;;  %v3193_v39 = vsel %vm6289_vm2, %v6260_v10, %v3189_v59  ;;  %v3604_v10 = vld [vmem:[#allocation7 + $0x128] sm:$0xff]  ;;  %v3583_v27 = vld [vmem:[#allocation7 + $0x80] sm:$0xff]  ;;  %v3586_v19 = vld [vmem:[#allocation7 + $0x98] sm:$0xff] }
 0x483   :  { %4971 = vtanh.f32 %v6279_v51  ;;  %3636 = vmatpush.msra.mxu0 %v3627_v41  ;;  %3656 = vmatpush.msra.mxu1 %v3628_v47  ;;  %v3198_v4 = vsel %vm3195_vm3, %v3197_v62, %v3193_v39  ;;  %v3579_v37 = vld [vmem:[#allocation7 + $0x60] sm:$0xff]  ;;  %v3580_v41 = vld [vmem:[#allocation7 + $0x68] sm:$0xff]  ;;  %v3581_v47 = vld [vmem:[#allocation7 + $0x70] sm:$0xff] }
 0x484   :  { %3676 = vmatpush.msra.mxu2 %v3629_v30  ;;  %3696 = vmatpush.msra.mxu3 %v3630_v38  ;;  %v3582_v30 = vld [vmem:[#allocation7 + $0x78] sm:$0xff]  ;;  %v3575_v38 = vld [vmem:[#allocation7 + $0x40] sm:$0xff]  ;;  %v3576_v59 = vld [vmem:[#allocation7 + $0x48] sm:$0xff] }
 0x485   :  { %3637 = vmatpush.msra.mxu0 %v3623_v57  ;;  %3657 = vmatpush.msra.mxu1 %v3624_v43  ;;  %v3577_v57 = vld [vmem:[#allocation7 + $0x50] sm:$0xff]  ;;  %v3578_v43 = vld [vmem:[#allocation7 + $0x58] sm:$0xff]  ;;  %v3571_v56 = vld [vmem:[#allocation7 + $0x20] sm:$0xff] }
 0x486   :  { %3677 = vmatpush.msra.mxu2 %v3625_v24  ;;  %3697 = vmatpush.msra.mxu3 %v3626_v61  ;;  %v3572_v24 = vld [vmem:[#allocation7 + $0x28] sm:$0xff]  ;;  %v3573_v61 = vld [vmem:[#allocation7 + $0x30] sm:$0xff]  ;;  %v3903_v62 = vld [vmem:[#allocation10 + $0x1c0] sm:$0xff] }
 0x487   :  { %3638 = vmatpush.msra.mxu0 %v3619_v58  ;;  %3658 = vmatpush.msra.mxu1 %v3620_v44  ;;  %v3567_v58 = vld [vmem:[#allocation7] sm:$0xff]  ;;  %v3568_v44 = vld [vmem:[#allocation7 + $0x8] sm:$0xff] }
 0x488   :  { %3678 = vmatpush.msra.mxu2 %v3621_v52  ;;  %3698 = vmatpush.msra.mxu3 %v3622_v49  ;;  %v3570_v52 = vld [vmem:[#allocation7 + $0x18] sm:$0xff]  ;;  %v3907_v49 = vld [vmem:[#allocation10 + $0x1e0] sm:$0xff]  ;;  %v3908_v39 = vld [vmem:[#allocation10 + $0x1e8] sm:$0xff] }
 0x489   :  { %v4972_v60 = vpop.eup %4971  ;;  %3639 = vmatpush.msra.mxu0 %v3615_v42  ;;  %3659 = vmatpush.msra.mxu1 %v3616_v53  ;;  %v3909_v42 = vld [vmem:[#allocation10 + $0x1f0] sm:$0xff]  ;;  %v3910_v53 = vld [vmem:[#allocation10 + $0x1f8] sm:$0xff] }
 0x48a   :  { %v6296_v7 = vmul.f32 %v4972_v60, %v3198_v4  ;;  %3679 = vmatpush.msra.mxu2 %v3617_v48  ;;  %3699 = vmatpush.msra.mxu3 %v3618_v55  ;;  %v3904_v48 = vld [vmem:[#allocation10 + $0x1c8] sm:$0xff]  ;;  %v3905_v55 = vld [vmem:[#allocation10 + $0x1d0] sm:$0xff] }
 0x48b   :  { %3640 = vmatpush.msra.mxu0 %v3611_v0  ;;  %3660 = vmatpush.msra.mxu1 %v3612_v2  ;;  %v3906_v0 = vld [vmem:[#allocation10 + $0x1d8] sm:$0xff]  ;;  %v3899_v2 = vld [vmem:[#allocation10 + $0x1a0] sm:$0xff]  ;;  %v3900_v60 = vld [vmem:[#allocation10 + $0x1a8] sm:$0xff] }
 0x48c   :  { %3432 = vmatmul.f32.vlgmr.msrb.gmra.mxu0 %v6296_v7  ;;  %3452 = vmatmul.f32.vlgmr.msrb.gmra.mxu1 %v6296_v7  ;;  %v3901_v4 = vld [vmem:[#allocation10 + $0x1b0] sm:$0xff] }
 0x48d   :  { %3472 = vmatmul.f32.vlgmr.msrb.gmra.mxu2 %v6296_v7  ;;  %3492 = vmatmul.f32.vlgmr.msrb.gmra.mxu3 %v6296_v7 }
 0x48e   :  { %3680 = vmatpush.msra.mxu2 %v3613_v5  ;;  %3700 = vmatpush.msra.mxu3 %v3614_v8  ;;  %v3902_v5 = vld [vmem:[#allocation10 + $0x1b8] sm:$0xff]  ;;  %v3895_v8 = vld [vmem:[#allocation10 + $0x180] sm:$0xff] }
 0x48f   :  { %3641 = vmatpush.msra.mxu0 %v3607_v9  ;;  %3661 = vmatpush.msra.mxu1 %v3608_v11  ;;  %v3896_v9 = vld [vmem:[#allocation10 + $0x188] sm:$0xff]  ;;  %v3898_v11 = vld [vmem:[#allocation10 + $0x198] sm:$0xff] }
 0x490   :  { %3681 = vmatpush.msra.mxu2 %v3609_v29  ;;  %3701 = vmatpush.msra.mxu3 %v3610_v54  ;;  %v3891_v29 = vld [vmem:[#allocation10 + $0x160] sm:$0xff]  ;;  %v3892_v54 = vld [vmem:[#allocation10 + $0x168] sm:$0xff] }
 0x491   :  { %3642 = vmatpush.msra.mxu0 %v3603_v12  ;;  %3662 = vmatpush.msra.mxu1 %v3604_v10  ;;  %v3893_v12 = vld [vmem:[#allocation10 + $0x170] sm:$0xff]  ;;  %v3894_v10 = vld [vmem:[#allocation10 + $0x178] sm:$0xff] }
 0x492   :  { %3682 = vmatpush.msra.mxu2 %v3605_v1  ;;  %3702 = vmatpush.msra.mxu3 %v3606_v13  ;;  %v3887_v1 = vld [vmem:[#allocation10 + $0x140] sm:$0xff]  ;;  %v3888_v13 = vld [vmem:[#allocation10 + $0x148] sm:$0xff] }
 0x493   :  { %3643 = vmatpush.msra.mxu0 %v3599_v14  ;;  %3663 = vmatpush.msra.mxu1 %v3600_v15  ;;  %v3889_v14 = vld [vmem:[#allocation10 + $0x150] sm:$0xff]  ;;  %v3890_v15 = vld [vmem:[#allocation10 + $0x158] sm:$0xff] }
 0x494   :  { %3683 = vmatpush.msra.mxu2 %v3601_v16  ;;  %3703 = vmatpush.msra.mxu3 %v3602_v3  ;;  %v3883_v16 = vld [vmem:[#allocation10 + $0x120] sm:$0xff]  ;;  %v3884_v3 = vld [vmem:[#allocation10 + $0x128] sm:$0xff] }
 0x495   :  { %3644 = vmatpush.msra.mxu0 %v3595_v17  ;;  %3664 = vmatpush.msra.mxu1 %v3596_v21  ;;  %v3885_v17 = vld [vmem:[#allocation10 + $0x130] sm:$0xff]  ;;  %v3886_v21 = vld [vmem:[#allocation10 + $0x138] sm:$0xff] }
 0x496   :  { %3684 = vmatpush.msra.mxu2 %v3597_v22  ;;  %3704 = vmatpush.msra.mxu3 %v3598_v23  ;;  %v3879_v22 = vld [vmem:[#allocation10 + $0x100] sm:$0xff]  ;;  %v3880_v23 = vld [vmem:[#allocation10 + $0x108] sm:$0xff] }
 0x497   :  { %3645 = vmatpush.msra.mxu0 %v3591_v20  ;;  %3665 = vmatpush.msra.mxu1 %v3592_v25  ;;  %v3881_v20 = vld [vmem:[#allocation10 + $0x110] sm:$0xff]  ;;  %v3882_v25 = vld [vmem:[#allocation10 + $0x118] sm:$0xff] }
 0x498   :  { %3685 = vmatpush.msra.mxu2 %v3593_v63  ;;  %3705 = vmatpush.msra.mxu3 %v3594_v26  ;;  %v3875_v63 = vld [vmem:[#allocation10 + $0xe0] sm:$0xff]  ;;  %v3876_v26 = vld [vmem:[#allocation10 + $0xe8] sm:$0xff] }
 0x499   :  { %3646 = vmatpush.msra.mxu0 %v3587_v28  ;;  %3666 = vmatpush.msra.mxu1 %v3588_v18  ;;  %v3877_v28 = vld [vmem:[#allocation10 + $0xf0] sm:$0xff]  ;;  %v3878_v18 = vld [vmem:[#allocation10 + $0xf8] sm:$0xff] }
 0x49a   :  { %3686 = vmatpush.msra.mxu2 %v3589_v33  ;;  %3706 = vmatpush.msra.mxu3 %v3590_v34  ;;  %v3871_v33 = vld [vmem:[#allocation10 + $0xc0] sm:$0xff]  ;;  %v3872_v34 = vld [vmem:[#allocation10 + $0xc8] sm:$0xff] }
 0x49b   :  { %3647 = vmatpush.msra.mxu0 %v3583_v27  ;;  %3667 = vmatpush.msra.mxu1 %v3584_v35  ;;  %v3873_v27 = vld [vmem:[#allocation10 + $0xd0] sm:$0xff]  ;;  %v3874_v35 = vld [vmem:[#allocation10 + $0xd8] sm:$0xff] }
 0x49c   :  { %3687 = vmatpush.msra.mxu2 %v3585_v36  ;;  %3707 = vmatpush.msra.mxu3 %v3586_v19  ;;  %v3867_v36 = vld [vmem:[#allocation10 + $0xa0] sm:$0xff]  ;;  %v3868_v19 = vld [vmem:[#allocation10 + $0xa8] sm:$0xff] }
 0x49d   :  { %3648 = vmatpush.msra.mxu0 %v3579_v37  ;;  %3668 = vmatpush.msra.mxu1 %v3580_v41  ;;  %v3869_v37 = vld [vmem:[#allocation10 + $0xb0] sm:$0xff]  ;;  %v3870_v41 = vld [vmem:[#allocation10 + $0xb8] sm:$0xff] }
 0x49e   :  { %3688 = vmatpush.msra.mxu2 %v3581_v47  ;;  %3708 = vmatpush.msra.mxu3 %v3582_v30  ;;  %v3863_v47 = vld [vmem:[#allocation10 + $0x80] sm:$0xff]  ;;  %v3864_v30 = vld [vmem:[#allocation10 + $0x88] sm:$0xff] }
 0x49f   :  { %3649 = vmatpush.msra.mxu0 %v3575_v38  ;;  %3669 = vmatpush.msra.mxu1 %v3576_v59  ;;  %v3865_v38 = vld [vmem:[#allocation10 + $0x90] sm:$0xff]  ;;  %v3866_v59 = vld [vmem:[#allocation10 + $0x98] sm:$0xff] }
 0x4a0   :  { %3689 = vmatpush.msra.mxu2 %v3577_v57  ;;  %3709 = vmatpush.msra.mxu3 %v3578_v43  ;;  %v3859_v57 = vld [vmem:[#allocation10 + $0x60] sm:$0xff]  ;;  %v3860_v43 = vld [vmem:[#allocation10 + $0x68] sm:$0xff] }
 0x4a1   :  { %3650 = vmatpush.msra.mxu0 %v3571_v56  ;;  %3670 = vmatpush.msra.mxu1 %v3572_v24  ;;  %v3861_v56 = vld [vmem:[#allocation10 + $0x70] sm:$0xff]  ;;  %v3862_v24 = vld [vmem:[#allocation10 + $0x78] sm:$0xff] }
 0x4a2   :  { %3690 = vmatpush.msra.mxu2 %v3573_v61  ;;  %3710 = vmatpush.msra.mxu3 %v3574_v45  ;;  %v3855_v61 = vld [vmem:[#allocation10 + $0x40] sm:$0xff]  ;;  %v3856_v45 = vld [vmem:[#allocation10 + $0x48] sm:$0xff] }
 0x4a3   :  { %3651 = vmatpush.msra.mxu0 %v3567_v58  ;;  %3671 = vmatpush.msra.mxu1 %v3568_v44  ;;  %v3857_v58 = vld [vmem:[#allocation10 + $0x50] sm:$0xff]  ;;  %v3858_v44 = vld [vmem:[#allocation10 + $0x58] sm:$0xff] }
 0x4a4   :  { %3691 = vmatpush.msra.mxu2 %v3569_v46  ;;  %3711 = vmatpush.msra.mxu3 %v3570_v52  ;;  %v3851_v46 = vld [vmem:[#allocation10 + $0x20] sm:$0xff]  ;;  %v3852_v52 = vld [vmem:[#allocation10 + $0x28] sm:$0xff] }
 0x4a5   :  { %3652 = vmatmul.f32.vlgmr.msra.gmra.mxu0 %v6296_v7  ;;  %3672 = vmatmul.f32.vlgmr.msra.gmra.mxu1 %v6296_v7 }
 0x4a6   :  { %3692 = vmatmul.f32.vlgmr.msra.gmra.mxu2 %v6296_v7  ;;  %3712 = vmatmul.f32.vlgmr.msra.gmra.mxu3 %v6296_v7  ;;  %v3897_v7 = vld [vmem:[#allocation10 + $0x190] sm:$0xff] }
 0x4a7   :  { %3911 = vmatpush.msrb.mxu0 %v3907_v49  ;;  %3931 = vmatpush.msrb.mxu1 %v3908_v39  ;;  %v3853_v49 = vld [vmem:[#allocation10 + $0x30] sm:$0xff]  ;;  %v3854_v39 = vld [vmem:[#allocation10 + $0x38] sm:$0xff] }
 0x4a8   :  { %3951 = vmatpush.msrb.mxu2 %v3909_v42  ;;  %3971 = vmatpush.msrb.mxu3 %v3910_v53  ;;  %v3847_v42 = vld [vmem:[#allocation10] sm:$0xff]  ;;  %v3848_v53 = vld [vmem:[#allocation10 + $0x8] sm:$0xff] }
 0x4a9   :  { %3912 = vmatpush.msrb.mxu0 %v3903_v62  ;;  %3932 = vmatpush.msrb.mxu1 %v3904_v48  ;;  %v3849_v62 = vld [vmem:[#allocation10 + $0x10] sm:$0xff]  ;;  %v3850_v48 = vld [vmem:[#allocation10 + $0x18] sm:$0xff] }
 0x4aa   :  { %3952 = vmatpush.msrb.mxu2 %v3905_v55  ;;  %3972 = vmatpush.msrb.mxu3 %v3906_v0  ;;  %v3842_v55 = vld [vmem:[#allocation9 + $0x1e0] sm:$0xff]  ;;  %v3843_v0 = vld [vmem:[#allocation9 + $0x1e8] sm:$0xff] }
 0x4ab   :  { %3913 = vmatpush.msrb.mxu0 %v3899_v2  ;;  %3933 = vmatpush.msrb.mxu1 %v3900_v60  ;;  %v3844_v2 = vld [vmem:[#allocation9 + $0x1f0] sm:$0xff]  ;;  %v3845_v60 = vld [vmem:[#allocation9 + $0x1f8] sm:$0xff] }
 0x4ac   :  { %3953 = vmatpush.msrb.mxu2 %v3901_v4  ;;  %3973 = vmatpush.msrb.mxu3 %v3902_v5 }
 0x4ad   :  { %3914 = vmatpush.msrb.mxu0 %v3895_v8  ;;  %3934 = vmatpush.msrb.mxu1 %v3896_v9  ;;  %v5109_v8 = vld [vmem:[#allocation9 + $0x1c0] sm:$0xff]  ;;  %v5110_v9 = vld [vmem:[#allocation9 + $0x1c8] sm:$0xff] }
 0x4ae   :  { %3954 = vmatpush.msrb.mxu2 %v3897_v7  ;;  %3974 = vmatpush.msrb.mxu3 %v3898_v11  ;;  %v5111_v7 = vld [vmem:[#allocation9 + $0x1d0] sm:$0xff]  ;;  %v5112_v11 = vld [vmem:[#allocation9 + $0x1d8] sm:$0xff] }
 0x4af   :  { %3915 = vmatpush.msrb.mxu0 %v3891_v29  ;;  %3935 = vmatpush.msrb.mxu1 %v3892_v54  ;;  %v5113_v29 = vld [vmem:[#allocation9 + $0x1a0] sm:$0xff]  ;;  %v5114_v54 = vld [vmem:[#allocation9 + $0x1a8] sm:$0xff] }
 0x4b0   :  { %3955 = vmatpush.msrb.mxu2 %v3893_v12  ;;  %3975 = vmatpush.msrb.mxu3 %v3894_v10  ;;  %v5115_v12 = vld [vmem:[#allocation9 + $0x1b0] sm:$0xff]  ;;  %v5116_v10 = vld [vmem:[#allocation9 + $0x1b8] sm:$0xff] }
 0x4b1   :  { %3916 = vmatpush.msrb.mxu0 %v3887_v1  ;;  %3936 = vmatpush.msrb.mxu1 %v3888_v13  ;;  %v5117_v1 = vld [vmem:[#allocation9 + $0x180] sm:$0xff]  ;;  %v5118_v13 = vld [vmem:[#allocation9 + $0x188] sm:$0xff] }
 0x4b2   :  { %3956 = vmatpush.msrb.mxu2 %v3889_v14  ;;  %3976 = vmatpush.msrb.mxu3 %v3890_v15  ;;  %v5119_v14 = vld [vmem:[#allocation9 + $0x190] sm:$0xff]  ;;  %v5120_v15 = vld [vmem:[#allocation9 + $0x198] sm:$0xff] }
 0x4b3   :  { %3917 = vmatpush.msrb.mxu0 %v3883_v16  ;;  %3937 = vmatpush.msrb.mxu1 %v3884_v3  ;;  %v5121_v16 = vld [vmem:[#allocation9 + $0x160] sm:$0xff]  ;;  %v5122_v3 = vld [vmem:[#allocation9 + $0x168] sm:$0xff] }
 0x4b4   :  { %3957 = vmatpush.msrb.mxu2 %v3885_v17  ;;  %3977 = vmatpush.msrb.mxu3 %v3886_v21  ;;  %v5123_v21 = vld [vmem:[#allocation9 + $0x170] sm:$0xff] }
 0x4b5   :  { %3918 = vmatpush.msrb.mxu0 %v3879_v22  ;;  %3938 = vmatpush.msrb.mxu1 %v3880_v23  ;;  %v5124_v22 = vld [vmem:[#allocation9 + $0x178] sm:$0xff]  ;;  %v5125_v23 = vld [vmem:[#allocation9 + $0x140] sm:$0xff] }
 0x4b6   :  { %3958 = vmatpush.msrb.mxu2 %v3881_v20  ;;  %3978 = vmatpush.msrb.mxu3 %v3882_v25  ;;  %v5126_v20 = vld [vmem:[#allocation9 + $0x148] sm:$0xff]  ;;  %v5127_v25 = vld [vmem:[#allocation9 + $0x150] sm:$0xff] }
 0x4b7   :  { %3919 = vmatpush.msrb.mxu0 %v3875_v63  ;;  %3939 = vmatpush.msrb.mxu1 %v3876_v26  ;;  %v5128_v63 = vld [vmem:[#allocation9 + $0x158] sm:$0xff] }
 0x4b8   :  { %3959 = vmatpush.msrb.mxu2 %v3877_v28  ;;  %3979 = vmatpush.msrb.mxu3 %v3878_v18  ;;  %v5129_v18 = vld [vmem:[#allocation9 + $0x120] sm:$0xff] }
 0x4b9   :  { %3920 = vmatpush.msrb.mxu0 %v3871_v33  ;;  %3940 = vmatpush.msrb.mxu1 %v3872_v34  ;;  %v5130_v33 = vld [vmem:[#allocation9 + $0x128] sm:$0xff]  ;;  %v3814_v34 = vld [vmem:[#allocation9 + $0x100] sm:$0xff] }
 0x4ba   :  { %3960 = vmatpush.msrb.mxu2 %v3873_v27  ;;  %3980 = vmatpush.msrb.mxu3 %v3874_v35  ;;  %v3815_v27 = vld [vmem:[#allocation9 + $0x108] sm:$0xff]  ;;  %v3816_v35 = vld [vmem:[#allocation9 + $0x110] sm:$0xff] }
 0x4bb   :  { %3921 = vmatpush.msrb.mxu0 %v3867_v36  ;;  %3941 = vmatpush.msrb.mxu1 %v3868_v19 }
 0x4bc   :  { %3961 = vmatpush.msrb.mxu2 %v3869_v37  ;;  %3981 = vmatpush.msrb.mxu3 %v3870_v41  ;;  %v5131_v37 = vld [vmem:[#allocation9 + $0x130] sm:$0xff]  ;;  %v5132_v41 = vld [vmem:[#allocation9 + $0x138] sm:$0xff] }
 0x4bd   :  { %3922 = vmatpush.msrb.mxu0 %v3863_v47  ;;  %3942 = vmatpush.msrb.mxu1 %v3864_v30  ;;  %v3817_v47 = vld [vmem:[#allocation9 + $0x118] sm:$0xff]  ;;  %v3810_v30 = vld [vmem:[#allocation9 + $0xe0] sm:$0xff] }
 0x4be   :  { %3962 = vmatpush.msrb.mxu2 %v3865_v38  ;;  %3982 = vmatpush.msrb.mxu3 %v3866_v59  ;;  %v3811_v38 = vld [vmem:[#allocation9 + $0xe8] sm:$0xff]  ;;  %v3812_v59 = vld [vmem:[#allocation9 + $0xf0] sm:$0xff] }
 0x4bf   :  { %3923 = vmatpush.msrb.mxu0 %v3859_v57  ;;  %3943 = vmatpush.msrb.mxu1 %v3860_v43 }
 0x4c0   :  { %3963 = vmatpush.msrb.mxu2 %v3861_v56  ;;  %3983 = vmatpush.msrb.mxu3 %v3862_v24  ;;  %v3813_v56 = vld [vmem:[#allocation9 + $0xf8] sm:$0xff] }
 0x4c1   :  { %3924 = vmatpush.msrb.mxu0 %v3855_v61  ;;  %3944 = vmatpush.msrb.mxu1 %v3856_v45  ;;  %v3806_v61 = vld [vmem:[#allocation9 + $0xc0] sm:$0xff]  ;;  %v3807_v45 = vld [vmem:[#allocation9 + $0xc8] sm:$0xff] }
 0x4c2   :  { %3964 = vmatpush.msrb.mxu2 %v3857_v58  ;;  %3984 = vmatpush.msrb.mxu3 %v3858_v44  ;;  %v3808_v58 = vld [vmem:[#allocation9 + $0xd0] sm:$0xff] }
 0x4c3   :  { %3925 = vmatpush.msrb.mxu0 %v3851_v46  ;;  %3945 = vmatpush.msrb.mxu1 %v3852_v52  ;;  %v3809_v52 = vld [vmem:[#allocation9 + $0xd8] sm:$0xff] }
 0x4c4   :  { %3965 = vmatpush.msrb.mxu2 %v3853_v49  ;;  %3985 = vmatpush.msrb.mxu3 %v3854_v39  ;;  %v3802_v49 = vld [vmem:[#allocation9 + $0xa0] sm:$0xff]  ;;  %v3803_v39 = vld [vmem:[#allocation9 + $0xa8] sm:$0xff] }
 0x4c5   :  { %3926 = vmatpush.msrb.mxu0 %v3847_v42  ;;  %3946 = vmatpush.msrb.mxu1 %v3848_v53  ;;  %v3804_v42 = vld [vmem:[#allocation9 + $0xb0] sm:$0xff] }
 0x4c6   :  { %3966 = vmatpush.msrb.mxu2 %v3849_v62  ;;  %3986 = vmatpush.msrb.mxu3 %v3850_v48  ;;  %v3805_v62 = vld [vmem:[#allocation9 + $0xb8] sm:$0xff] }
 0x4c7   :  { %3991 = vmatpush.msra.mxu0 %v3842_v55  ;;  %4011 = vmatpush.msra.mxu1 %v3843_v0  ;;  %v3798_v55 = vld [vmem:[#allocation9 + $0x80] sm:$0xff]  ;;  %v3799_v0 = vld [vmem:[#allocation9 + $0x88] sm:$0xff] }
 0x4c8   :  { %4031 = vmatpush.msra.mxu2 %v3844_v2  ;;  %4051 = vmatpush.msra.mxu3 %v3845_v60  ;;  %v3800_v2 = vld [vmem:[#allocation9 + $0x90] sm:$0xff]  ;;  %v3801_v60 = vld [vmem:[#allocation9 + $0x98] sm:$0xff] }
 0x4c9   :  { %3992 = vmatpush.msra.mxu0 %v5109_v8  ;;  %4012 = vmatpush.msra.mxu1 %v5110_v9  ;;  %v3795_v8 = vld [vmem:[#allocation9 + $0x68] sm:$0xff]  ;;  %v3796_v9 = vld [vmem:[#allocation9 + $0x70] sm:$0xff] }
 0x4ca   :  { %4032 = vmatpush.msra.mxu2 %v5111_v7  ;;  %4052 = vmatpush.msra.mxu3 %v5112_v11  ;;  %v3797_v7 = vld [vmem:[#allocation9 + $0x78] sm:$0xff] }
 0x4cb   :  { %3993 = vmatpush.msra.mxu0 %v5113_v29  ;;  %4013 = vmatpush.msra.mxu1 %v5114_v54  ;;  %v3790_v29 = vld [vmem:[#allocation9 + $0x40] sm:$0xff]  ;;  %v3791_v54 = vld [vmem:[#allocation9 + $0x48] sm:$0xff] }
 0x4cc   :  { %4033 = vmatpush.msra.mxu2 %v5115_v12  ;;  %4053 = vmatpush.msra.mxu3 %v5116_v10  ;;  %v3792_v12 = vld [vmem:[#allocation9 + $0x50] sm:$0xff] }
 0x4cd   :  { %3994 = vmatpush.msra.mxu0 %v5117_v1  ;;  %4014 = vmatpush.msra.mxu1 %v5118_v13  ;;  %v3793_v1 = vld [vmem:[#allocation9 + $0x58] sm:$0xff] }
 0x4ce   :  { %4034 = vmatpush.msra.mxu2 %v5119_v14  ;;  %4054 = vmatpush.msra.mxu3 %v5120_v15 }
 0x4cf   :  { %3995 = vmatpush.msra.mxu0 %v5121_v16  ;;  %4015 = vmatpush.msra.mxu1 %v5122_v3  ;;  %v3786_v16 = vld [vmem:[#allocation9 + $0x20] sm:$0xff]  ;;  %v3787_v3 = vld [vmem:[#allocation9 + $0x28] sm:$0xff] }
 0x4d0   :  { %4035 = vmatpush.msra.mxu2 %v5123_v21  ;;  %4055 = vmatpush.msra.mxu3 %v5124_v22  ;;  %v3789_v22 = vld [vmem:[#allocation9 + $0x38] sm:$0xff] }
 0x4d1   :  { %3996 = vmatpush.msra.mxu0 %v5125_v23  ;;  %4016 = vmatpush.msra.mxu1 %v5126_v20  ;;  %v3782_v23 = vld [vmem:[#allocation9] sm:$0xff]  ;;  %v3783_v20 = vld [vmem:[#allocation9 + $0x8] sm:$0xff] }
 0x4d2   :  { %4036 = vmatpush.msra.mxu2 %v5127_v25  ;;  %4056 = vmatpush.msra.mxu3 %v5128_v63  ;;  %v3784_v25 = vld [vmem:[#allocation9 + $0x10] sm:$0xff] }
 0x4d3   :  { %3997 = vmatpush.msra.mxu0 %v5129_v18  ;;  %4017 = vmatpush.msra.mxu1 %v5130_v33 }
 0x4d4   :  { %4037 = vmatpush.msra.mxu2 %v5131_v37  ;;  %4057 = vmatpush.msra.mxu3 %v5132_v41 }
 0x4d5   :  { %3998 = vmatpush.msra.mxu0 %v3814_v34  ;;  %4018 = vmatpush.msra.mxu1 %v3815_v27 }
 0x4d6   :  { %4038 = vmatpush.msra.mxu2 %v3816_v35  ;;  %4058 = vmatpush.msra.mxu3 %v3817_v47 }
 0x4d7   :  { %3999 = vmatpush.msra.mxu0 %v3810_v30  ;;  %4019 = vmatpush.msra.mxu1 %v3811_v38 }
 0x4d8   :  { %4039 = vmatpush.msra.mxu2 %v3812_v59  ;;  %4059 = vmatpush.msra.mxu3 %v3813_v56 }
 0x4d9   :  { %4000 = vmatpush.msra.mxu0 %v3806_v61  ;;  %4020 = vmatpush.msra.mxu1 %v3807_v45 }
 0x4da   :  { %4040 = vmatpush.msra.mxu2 %v3808_v58  ;;  %4060 = vmatpush.msra.mxu3 %v3809_v52 }
 0x4db   :  { %4001 = vmatpush.msra.mxu0 %v3802_v49  ;;  %4021 = vmatpush.msra.mxu1 %v3803_v39 }
 0x4dc   :  { %4041 = vmatpush.msra.mxu2 %v3804_v42  ;;  %4061 = vmatpush.msra.mxu3 %v3805_v62  ;;  %v3635_v62 = vld [vmem:[#allocation4 + $0xd8] sm:$0xff] }
 0x4dd   :  { %4002 = vmatpush.msra.mxu0 %v3798_v55  ;;  %4022 = vmatpush.msra.mxu1 %v3799_v0 }
 0x4de   :  { %4042 = vmatpush.msra.mxu2 %v3800_v2  ;;  %4062 = vmatpush.msra.mxu3 %v3801_v60 }
 0x4df   :  { %4023 = vmatpush.msra.mxu1 %v3795_v8 }
 0x4e0   :  { %4043 = vmatpush.msra.mxu2 %v3796_v9  ;;  %4063 = vmatpush.msra.mxu3 %v3797_v7 }
 0x4e1   :  { %4024 = vmatpush.msra.mxu1 %v3791_v54 }
 0x4e2   :  { %4044 = vmatpush.msra.mxu2 %v3792_v12  ;;  %4064 = vmatpush.msra.mxu3 %v3793_v1 }
 0x4e3   :  { %4025 = vmatpush.msra.mxu1 %v3787_v3 }
 0x4e4   :  { %4065 = vmatpush.msra.mxu3 %v3789_v22 }
 0x4e5   :  { %4026 = vmatpush.msra.mxu1 %v3783_v20 }
 0x4fe   :  { %v3353_v4 = vpop.f32.mrf.mxu0  ;;  %v3373_v5 = vpop.f32.mrf.mxu1 }
 0x505   :  { %v3413_v17 = vpop.f32.mrf.mxu3  ;;  %v6308_v24 = vpop.f32.mrf.mxu2 }
 0x509   :  { %v3433_v26 = vpop.f32.mrf.mxu0  ;;  %v3453_v28 = vpop.f32.mrf.mxu1 }
 0x50a   :  { %v3434_v36 = vadd.f32 %v3433_v26, %v3353_v4  ;;  %v3454_v19 = vadd.f32 %v3453_v28, %v3373_v5  ;;  %v3794_v5 = vld [vmem:[#allocation9 + $0x60] sm:$0xff]  ;;  %v3785_v26 = vld [vmem:[#allocation9 + $0x18] sm:$0xff] }
 0x50b   :  { %4003 = vmatpush.msra.mxu0 %v3794_v5  ;;  %4066 = vmatpush.msra.mxu3 %v3785_v26 }
 0x50c   :  { %v3496_v57 = vadd.f32 %v3434_v36, %v5785_v31  ;;  %v3497_v43 = vadd.f32 %v3454_v19, %v5788_v32  ;;  %v3632_v36 = vld [vmem:[#allocation4 + $0xc0] sm:$0xff]  ;;  %v3633_v19 = vld [vmem:[#allocation4 + $0xc8] sm:$0xff] }
 0x50d   :  { %4004 = vmatpush.msra.mxu0 %v3790_v29 }
 0x50e   :  { %v4773_v44 = vmul.f32 -1.442695, %v3496_v57  ;;  %v4774_v46 = vmul.f32 -1.442695, %v3497_v43 }
 0x50f   :  { %4005 = vmatpush.msra.mxu0 %v3786_v16 }
 0x510   :  { %4973 = vpow2.f32 %v4773_v44  ;;  %v3493_v53 = vpop.f32.mrf.mxu3  ;;  %v3473_v15 = vpop.f32.mrf.mxu2 }
 0x511   :  { %4975 = vpow2.f32 %v4774_v46  ;;  %v3494_v48 = vadd.f32 %v3493_v53, %v3413_v17  ;;  %v3788_v17 = vld [vmem:[#allocation9 + $0x30] sm:$0xff]  ;;  %v3474_v63 = vadd.f32 %v3473_v15, %v6308_v24  ;;  %4006 = vmatpush.msra.mxu0 %v3782_v23 }
 0x512   :  { %4045 = vmatpush.msra.mxu2 %v3788_v17  ;;  %v3634_v17 = vld [vmem:[#allocation4 + $0xd0] sm:$0xff] }
 0x513   :  { %v3499_v4 = vadd.f32 %v3494_v48, %v5795_v50  ;;  %v3498_v18 = vadd.f32 %v3474_v63, %v5806_v40 }
 0x514   :  { %4046 = vmatpush.msra.mxu2 %v3784_v25 }
 0x515   :  { %v4775_v11 = vmul.f32 -1.442695, %v3499_v4 }
 0x516   :  { %v4974_v10 = vpop.eup %4973 }
 0x517   :  { %v4976_v13 = vpop.eup %4975  ;;  %v6311_v14 = vadd.f32 1.0, %v4974_v10  ;;  %4977 = vpow2.f32 %v4775_v11 }
 0x518   :  { %v6313_v21 = vadd.f32 1.0, %v4976_v13 }
 0x519   :  { %4979 = vrcp.f32 %v6311_v14  ;;  %v3514_v47 = vand.u32 2147483647, %v6311_v14  ;;  %v3516_v57 = vand.u32 2147483648, %v6311_v14  ;;  %vm3510_vm7 = vweird.f32 %v6311_v14 }
 0x51a   :  { %4981 = vrcp.f32 %v6313_v21  ;;  %v3535_v24 = vand.u32 2147483648, %v6313_v21  ;;  %v3533_v45 = vand.u32 2147483647, %v6313_v21  ;;  %vm3529_vm6 = vweird.f32 %v6313_v21 }
 0x51b   :  { %v3517_v39 = vor.u32 1.1754944e-38, %v3516_v57  ;;  %vm3515_vm10 = vcmp.eq.f32.partialorder %v3514_v47, 8.507059e+37  ;;  %v4198_v47 = vld [vmem:[#allocation7 + $0x1c0] sm:$0xff]  ;;  %v4200_v57 = vld [vmem:[#allocation7 + $0x1d0] sm:$0xff] }
 0x51c   :  { %v3536_v55 = vor.u32 1.1754944e-38, %v3535_v24  ;;  %vm3534_vm11 = vcmp.eq.f32.partialorder %v3533_v45, 8.507059e+37  ;;  %v4194_v45 = vld [vmem:[#allocation7 + $0x1a0] sm:$0xff] }
 0x51d   :  { %v4978_v28 = vpop.eup %4977 }
 0x51e   :  { %v6319_v33 = vadd.f32 1.0, %v4978_v28 }
 0x51f   :  { %v4980_v34 = vpop.eup %4979 }
 0x520   :  { %v4982_v27 = vpop.eup %4981  ;;  %v3506_v35 = vmul.f32 %v4980_v34, %v6311_v14  ;;  %4983 = vrcp.f32 %v6319_v33  ;;  %vm3511_vm4 = vweird.f32 %v4980_v34  ;;  %v3555_v16 = vand.u32 2147483648, %v6319_v33 }
 0x521   :  { %v3525_v37 = vmul.f32 %v4982_v27, %v6313_v21  ;;  %4985 = vtanh.f32 %v3498_v18  ;;  %vm3530_vm5 = vweird.f32 %v4982_v27  ;;  %vm3512_vm8 = vmor %vm3510_vm7, %vm3511_vm4  ;;  %vm3549_vm13 = vweird.f32 %v6319_v33 }
 0x522   :  { %v3507_v41 = vsub.f32 1.0, %v3506_v35  ;;  %v3653_v30 = vpop.f32.mrf.mxu0  ;;  %v3673_v38 = vpop.f32.mrf.mxu1  ;;  %vm3531_vm9 = vmor %vm3529_vm6, %vm3530_vm5  ;;  %v3556_v22 = vor.u32 1.1754944e-38, %v3555_v16  ;;  %v4203_v35 = vld [vmem:[#allocation7 + $0x1e8] sm:$0xff] }
 0x523   :  { %v3526_v59 = vsub.f32 1.0, %v3525_v37  ;;  %v3654_v43 = vadd.f32 %v3653_v30, %v3632_v36  ;;  %v3674_v56 = vadd.f32 %v3673_v38, %v3633_v19  ;;  %v4204_v19 = vld [vmem:[#allocation7 + $0x1f0] sm:$0xff]  ;;  %v4205_v37 = vld [vmem:[#allocation7 + $0x1f8] sm:$0xff]  ;;  %v4199_v30 = vld [vmem:[#allocation7 + $0x1c8] sm:$0xff] }
 0x524   :  { %v3508_v61 = vmul.f32 %v4980_v34, %v3507_v41 }
 0x525   :  { %v3527_v58 = vmul.f32 %v4982_v27, %v3526_v59  ;;  %v4776_v44 = vmul.f32 -1.442695, %v3654_v43  ;;  %v4777_v46 = vmul.f32 -1.442695, %v3674_v56  ;;  %v4201_v43 = vld [vmem:[#allocation7 + $0x1d8] sm:$0xff] }
 0x526   :  { %v4984_v52 = vpop.eup %4983  ;;  %v3509_v49 = vadd.f32 %v4980_v34, %v3508_v61 }
 0x527   :  { %v3528_v42 = vadd.f32 %v4982_v27, %v3527_v58  ;;  %v3545_v53 = vmul.f32 %v4984_v52, %v6319_v33  ;;  %4987 = vpow2.f32 %v4776_v44  ;;  %v4986_v48 = vpop.eup %4985  ;;  %vm3550_vm12 = vweird.f32 %v4984_v52  ;;  %v4195_v58 = vld [vmem:[#allocation7 + $0x1a8] sm:$0xff] }
 0x528   :  { %v3513_v0 = vsel %vm3512_vm8, %v4980_v34, %v3509_v49  ;;  %4989 = vpow2.f32 %v4777_v46  ;;  %vm3551_vm14 = vmor %vm3549_vm13, %vm3550_vm12  ;;  %v4197_v49 = vld [vmem:[#allocation7 + $0x1b8] sm:$0xff] }
 0x529   :  { %v3518_v2 = vsel %vm3515_vm10, %v3517_v39, %v3513_v0  ;;  %v3532_v60 = vsel %vm3531_vm9, %v4982_v27, %v3528_v42  ;;  %v3546_v4 = vsub.f32 1.0, %v3545_v53  ;;  %v3713_v5 = vpop.f32.mrf.mxu3  ;;  %v3693_v21 = vpop.f32.mrf.mxu2  ;;  %v4202_v27 = vld [vmem:[#allocation7 + $0x1e0] sm:$0xff] }
 0x52a   :  { %v3537_v8 = vsel %vm3534_vm11, %v3536_v55, %v3532_v60  ;;  %v3560_v9 = vmul.f32 %v4986_v48, %v3518_v2  ;;  %v3714_v7 = vadd.f32 %v3713_v5, %v3635_v62  ;;  %v3694_v28 = vadd.f32 %v3693_v21, %v3634_v17  ;;  %v4190_v53 = vld [vmem:[#allocation7 + $0x180] sm:$0xff]  ;;  %v4191_v62 = vld [vmem:[#allocation7 + $0x188] sm:$0xff]  ;;  %v4192_v60 = vld [vmem:[#allocation7 + $0x190] sm:$0xff] }
 0x52b   :  { %v3559_v11 = vmul.f32 %v3537_v8, %v6251_v6  ;;  %v3547_v29 = vmul.f32 %v4984_v52, %v3546_v4  ;;  %v3553_v6 = vand.u32 2147483647, %v6319_v33  ;;  %v4193_v4 = vld [vmem:[#allocation7 + $0x198] sm:$0xff]  ;;  %v4154_v48 = vld [vmem:[#allocation7 + $0x60] sm:$0xff]  ;;  %v4152_v5 = vld [vmem:[#allocation7 + $0x50] sm:$0xff] }
 0x52c   :  { %v4778_v54 = vmul.f32 -1.442695, %v3714_v7  ;;  %v4186_v7 = vld [vmem:[#allocation7 + $0x160] sm:$0xff] }
 0x52d   :  { %v4988_v12 = vpop.eup %4987  ;;  %v6332_v10 = vadd.f32 %v3560_v9, %v3559_v11  ;;  %v3548_v14 = vadd.f32 %v4984_v52, %v3547_v29  ;;  %vm3554_vm15 = vcmp.eq.f32.partialorder %v3553_v6, 8.507059e+37  ;;  %v4187_v11 = vld [vmem:[#allocation7 + $0x168] sm:$0xff]  ;;  %v4182_v6 = vld [vmem:[#allocation7 + $0x140] sm:$0xff] }
 0x52e   :  { %v4990_v1 = vpop.eup %4989  ;;  %v6334_v13 = vadd.f32 1.0, %v4988_v12  ;;  %4991 = vpow2.f32 %v4778_v54 }
 0x52f   :  { %4993 = vtanh.f32 %v6332_v10  ;;  %v6337_v15 = vadd.f32 1.0, %v4990_v1  ;;  %v3552_v3 = vsel %vm3551_vm14, %v4984_v52, %v3548_v14  ;;  %v4196_v52 = vld [vmem:[#allocation7 + $0x1b0] sm:$0xff]  ;;  %v4189_v14 = vld [vmem:[#allocation7 + $0x178] sm:$0xff] }
 0x530   :  { %4995 = vrcp.f32 %v6334_v13  ;;  %v3557_v63 = vsel %vm3554_vm15, %v3556_v22, %v3552_v3  ;;  %v3732_v59 = vand.u32 2147483648, %v6334_v13  ;;  %v3730_v61 = vand.u32 2147483647, %v6334_v13  ;;  %v4183_v3 = vld [vmem:[#allocation7 + $0x148] sm:$0xff]  ;;  %v4184_v22 = vld [vmem:[#allocation7 + $0x150] sm:$0xff] }
 0x531   :  { %4997 = vrcp.f32 %v6337_v15  ;;  %v3751_v56 = vand.u32 2147483648, %v6337_v15  ;;  %v3749_v46 = vand.u32 2147483647, %v6337_v15  ;;  %vm3726_vm2 = vweird.f32 %v6334_v13 }
 0x532   :  { %vm3745_vm3 = vweird.f32 %v6337_v15  ;;  %v3733_v55 = vor.u32 1.1754944e-38, %v3732_v59  ;;  %vm3731_vm6 = vcmp.eq.f32.partialorder %v3730_v61, 8.507059e+37  ;;  %v4162_v61 = vld [vmem:[#allocation7 + $0xa0] sm:$0xff] }
 0x533   :  { %v3752_v8 = vor.u32 1.1754944e-38, %v3751_v56  ;;  %vm3750_vm7 = vcmp.eq.f32.partialorder %v3749_v46, 8.507059e+37  ;;  %v4168_v56 = vld [vmem:[#allocation7 + $0xd0] sm:$0xff] }
 0x534   :  { %v4992_v23 = vpop.eup %4991  ;;  %v4164_v46 = vld [vmem:[#allocation7 + $0xb0] sm:$0xff] }
 0x535   :  { %v4994_v20 = vpop.eup %4993  ;;  %v6344_v25 = vadd.f32 1.0, %v4992_v23  ;;  %v4185_v23 = vld [vmem:[#allocation7 + $0x158] sm:$0xff] }
 0x536   :  { %v6346_v26 = vpop.eup %4995  ;;  %v3563_v18 = vmul.f32 %v4994_v20, %v3557_v63  ;;  %v4178_v20 = vld [vmem:[#allocation7 + $0x120] sm:$0xff]  ;;  %v4179_v63 = vld [vmem:[#allocation7 + $0x128] sm:$0xff] }
 0x537   :  { %v6348_v34 = vpop.eup %4997  ;;  %v3722_v33 = vmul.f32 %v6346_v26, %v6334_v13  ;;  %4999 = vrcp.f32 %v6344_v25  ;;  %vm3727_vm0 = vweird.f32 %v6346_v26  ;;  %v4188_v13 = vld [vmem:[#allocation7 + $0x170] sm:$0xff]  ;;  %vm3765_vm9 = vweird.f32 %v6344_v25 }
 0x538   :  { %v3741_v36 = vmul.f32 %v6348_v34, %v6337_v15  ;;  %3927 = vmatmul.f32.vlgmr.msrb.gmra.mxu0 %v3563_v18  ;;  %3947 = vmatmul.f32.vlgmr.msrb.gmra.mxu1 %v3563_v18  ;;  %5001 = vtanh.f32 %v3694_v28  ;;  %vm3746_vm1 = vweird.f32 %v6348_v34  ;;  %vm6370_vm4 = vmor %vm3726_vm2, %vm3727_vm0  ;;  %v4180_v28 = vld [vmem:[#allocation7 + $0x130] sm:$0xff] }
 0x539   :  { %v3723_v41 = vsub.f32 1.0, %v3722_v33  ;;  %3967 = vmatmul.f32.vlgmr.msrb.gmra.mxu2 %v3563_v18  ;;  %3987 = vmatmul.f32.vlgmr.msrb.gmra.mxu3 %v3563_v18  ;;  %vm6379_vm5 = vmor %vm3745_vm3, %vm3746_vm1  ;;  %v4181_v18 = vld [vmem:[#allocation7 + $0x138] sm:$0xff]  ;;  %v4175_v33 = vld [vmem:[#allocation7 + $0x108] sm:$0xff] }
 0x53a   :  { %v3742_v38 = vsub.f32 1.0, %v3741_v36  ;;  %4211 = vmatpush.msrb.mxu0 %v4202_v27  ;;  %4231 = vmatpush.msrb.mxu1 %v4203_v35  ;;  %v3771_v27 = vand.u32 2147483648, %v6344_v25  ;;  %v4176_v35 = vld [vmem:[#allocation7 + $0x110] sm:$0xff]  ;;  %v4177_v36 = vld [vmem:[#allocation7 + $0x118] sm:$0xff] }
 0x53b   :  { %v3724_v24 = vmul.f32 %v6346_v26, %v3723_v41  ;;  %4251 = vmatpush.msrb.mxu2 %v4204_v19  ;;  %4271 = vmatpush.msrb.mxu3 %v4205_v37  ;;  %v3769_v19 = vand.u32 2147483647, %v6344_v25  ;;  %v4170_v37 = vld [vmem:[#allocation7 + $0xe0] sm:$0xff]  ;;  %v4171_v41 = vld [vmem:[#allocation7 + $0xe8] sm:$0xff] }
 0x53c   :  { %v3743_v44 = vmul.f32 %v6348_v34, %v3742_v38  ;;  %4212 = vmatpush.msrb.mxu0 %v4198_v47  ;;  %4232 = vmatpush.msrb.mxu1 %v4199_v30  ;;  %v4172_v30 = vld [vmem:[#allocation7 + $0xf0] sm:$0xff]  ;;  %v4173_v38 = vld [vmem:[#allocation7 + $0xf8] sm:$0xff] }
 0x53d   :  { %v6363_v39 = vpop.eup %4999  ;;  %v3725_v42 = vadd.f32 %v6346_v26, %v3724_v24  ;;  %4252 = vmatpush.msrb.mxu2 %v4200_v57  ;;  %4272 = vmatpush.msrb.mxu3 %v4201_v43  ;;  %v4167_v57 = vld [vmem:[#allocation7 + $0xc8] sm:$0xff]  ;;  %v3772_v43 = vor.u32 1.1754944e-38, %v3771_v27  ;;  %v4169_v24 = vld [vmem:[#allocation7 + $0xd8] sm:$0xff]  ;;  %vm3770_vm11 = vcmp.eq.f32.partialorder %v3769_v19, 8.507059e+37  ;;  %v4466_v27 = vld [vmem:[#allocation10 + $0x160] sm:$0xff] }
 0x53e   :  { %v3744_v0 = vadd.f32 %v6348_v34, %v3743_v44  ;;  %v3761_v2 = vmul.f32 %v6363_v39, %v6344_v25  ;;  %4213 = vmatpush.msrb.mxu0 %v4194_v45  ;;  %4233 = vmatpush.msrb.mxu1 %v4195_v58  ;;  %v5002_v29 = vpop.eup %5001  ;;  %vm3766_vm8 = vweird.f32 %v6363_v39  ;;  %v4166_v25 = vld [vmem:[#allocation7 + $0xc0] sm:$0xff]  ;;  %v4163_v45 = vld [vmem:[#allocation7 + $0xa8] sm:$0xff]  ;;  %v4469_v19 = vld [vmem:[#allocation10 + $0x178] sm:$0xff] }
 0x53f   :  { %v3729_v9 = vsel %vm6370_vm4, %v6346_v26, %v3725_v42  ;;  %4253 = vmatpush.msrb.mxu2 %v4196_v52  ;;  %4273 = vmatpush.msrb.mxu3 %v4197_v49  ;;  %vm6401_vm10 = vmor %vm3765_vm9, %vm3766_vm8  ;;  %v4165_v52 = vld [vmem:[#allocation7 + $0xb8] sm:$0xff]  ;;  %v4159_v42 = vld [vmem:[#allocation7 + $0x88] sm:$0xff] }
 0x540   :  { %v3734_v54 = vsel %vm3731_vm6, %v3733_v55, %v3729_v9  ;;  %v3748_v12 = vsel %vm6379_vm5, %v6348_v34, %v3744_v0  ;;  %v3762_v1 = vsub.f32 1.0, %v3761_v2  ;;  %4214 = vmatpush.msrb.mxu0 %v4190_v53  ;;  %4234 = vmatpush.msrb.mxu1 %v4191_v62  ;;  %v4160_v53 = vld [vmem:[#allocation7 + $0x90] sm:$0xff]  ;;  %v4161_v62 = vld [vmem:[#allocation7 + $0x98] sm:$0xff]  ;;  %v4155_v55 = vld [vmem:[#allocation7 + $0x68] sm:$0xff] }
 0x541   :  { %v3753_v15 = vsel %vm3750_vm7, %v3752_v8, %v3748_v12  ;;  %v3776_v16 = vmul.f32 %v5002_v29, %v3734_v54  ;;  %4254 = vmatpush.msrb.mxu2 %v4192_v60  ;;  %4274 = vmatpush.msrb.mxu3 %v4193_v4  ;;  %v4156_v0 = vld [vmem:[#allocation7 + $0x70] sm:$0xff]  ;;  %v4157_v2 = vld [vmem:[#allocation7 + $0x78] sm:$0xff]  ;;  %v4150_v60 = vld [vmem:[#allocation7 + $0x40] sm:$0xff] }
 0x542   :  { %v3775_v17 = vmul.f32 %v3753_v15, %v6279_v51  ;;  %v3763_v21 = vmul.f32 %v6363_v39, %v3762_v1  ;;  %4215 = vmatpush.msrb.mxu0 %v4186_v7  ;;  %4235 = vmatpush.msrb.mxu1 %v4187_v11  ;;  %v4174_v51 = vld [vmem:[#allocation7 + $0x100] sm:$0xff]  ;;  %v4151_v4 = vld [vmem:[#allocation7 + $0x48] sm:$0xff]  ;;  %v4153_v8 = vld [vmem:[#allocation7 + $0x58] sm:$0xff] }
 0x543   :  { %4255 = vmatpush.msrb.mxu2 %v4188_v13  ;;  %4275 = vmatpush.msrb.mxu3 %v4189_v14  ;;  %v4146_v9 = vld [vmem:[#allocation7 + $0x20] sm:$0xff]  ;;  %v4147_v7 = vld [vmem:[#allocation7 + $0x28] sm:$0xff]  ;;  %v4148_v11 = vld [vmem:[#allocation7 + $0x30] sm:$0xff] }
 0x544   :  { %v6391_v26 = vadd.f32 %v3776_v16, %v3775_v17  ;;  %4216 = vmatpush.msrb.mxu0 %v4182_v6  ;;  %4236 = vmatpush.msrb.mxu1 %v4183_v3  ;;  %v3764_v34 = vadd.f32 %v6363_v39, %v3763_v21  ;;  %v4149_v29 = vld [vmem:[#allocation7 + $0x38] sm:$0xff]  ;;  %v4142_v54 = vld [vmem:[#allocation7] sm:$0xff]  ;;  %v4143_v12 = vld [vmem:[#allocation7 + $0x8] sm:$0xff] }
 0x545   :  { %4256 = vmatpush.msrb.mxu2 %v4184_v22  ;;  %4276 = vmatpush.msrb.mxu3 %v4185_v23  ;;  %v4144_v1 = vld [vmem:[#allocation7 + $0x10] sm:$0xff]  ;;  %v4145_v13 = vld [vmem:[#allocation7 + $0x18] sm:$0xff]  ;;  %v4482_v14 = vld [vmem:[#allocation10 + $0x1e0] sm:$0xff] }
 0x546   :  { %5003 = vtanh.f32 %v6391_v26  ;;  %4217 = vmatpush.msrb.mxu0 %v4178_v20  ;;  %4237 = vmatpush.msrb.mxu1 %v4179_v63  ;;  %v3768_v59 = vsel %vm6401_vm10, %v6363_v39, %v3764_v34  ;;  %v4158_v39 = vld [vmem:[#allocation7 + $0x80] sm:$0xff]  ;;  %v4483_v15 = vld [vmem:[#allocation10 + $0x1e8] sm:$0xff]  ;;  %v4484_v16 = vld [vmem:[#allocation10 + $0x1f0] sm:$0xff] }
 0x547   :  { %4257 = vmatpush.msrb.mxu2 %v4180_v28  ;;  %4277 = vmatpush.msrb.mxu3 %v4181_v18  ;;  %v3773_v44 = vsel %vm3770_vm11, %v3772_v43, %v3768_v59  ;;  %v4485_v6 = vld [vmem:[#allocation10 + $0x1f8] sm:$0xff]  ;;  %v4478_v3 = vld [vmem:[#allocation10 + $0x1c0] sm:$0xff]  ;;  %v4479_v17 = vld [vmem:[#allocation10 + $0x1c8] sm:$0xff] }
 0x548   :  { %4218 = vmatpush.msrb.mxu0 %v4174_v51  ;;  %4238 = vmatpush.msrb.mxu1 %v4175_v33  ;;  %v4480_v21 = vld [vmem:[#allocation10 + $0x1d0] sm:$0xff]  ;;  %v4481_v22 = vld [vmem:[#allocation10 + $0x1d8] sm:$0xff]  ;;  %v4474_v23 = vld [vmem:[#allocation10 + $0x1a0] sm:$0xff] }
 0x549   :  { %4258 = vmatpush.msrb.mxu2 %v4176_v35  ;;  %4278 = vmatpush.msrb.mxu3 %v4177_v36  ;;  %v4475_v20 = vld [vmem:[#allocation10 + $0x1a8] sm:$0xff]  ;;  %v4476_v63 = vld [vmem:[#allocation10 + $0x1b0] sm:$0xff]  ;;  %v4477_v28 = vld [vmem:[#allocation10 + $0x1b8] sm:$0xff] }
 0x54a   :  { %4219 = vmatpush.msrb.mxu0 %v4170_v37  ;;  %4239 = vmatpush.msrb.mxu1 %v4171_v41  ;;  %v4470_v18 = vld [vmem:[#allocation10 + $0x180] sm:$0xff]  ;;  %v4471_v34 = vld [vmem:[#allocation10 + $0x188] sm:$0xff]  ;;  %v4472_v51 = vld [vmem:[#allocation10 + $0x190] sm:$0xff] }
 0x54b   :  { %4259 = vmatpush.msrb.mxu2 %v4172_v30  ;;  %4279 = vmatpush.msrb.mxu3 %v4173_v38  ;;  %v4473_v33 = vld [vmem:[#allocation10 + $0x198] sm:$0xff]  ;;  %v4467_v35 = vld [vmem:[#allocation10 + $0x168] sm:$0xff]  ;;  %v4468_v36 = vld [vmem:[#allocation10 + $0x170] sm:$0xff] }
 0x54c   :  { %v5004_v58 = vpop.eup %5003  ;;  %4220 = vmatpush.msrb.mxu0 %v4166_v25  ;;  %4240 = vmatpush.msrb.mxu1 %v4167_v57  ;;  %v4462_v37 = vld [vmem:[#allocation10 + $0x140] sm:$0xff]  ;;  %v4463_v41 = vld [vmem:[#allocation10 + $0x148] sm:$0xff]  ;;  %v4464_v47 = vld [vmem:[#allocation10 + $0x150] sm:$0xff] }
 0x54d   :  { %v3779_v49 = vmul.f32 %v5004_v58, %v3773_v44  ;;  %4260 = vmatpush.msrb.mxu2 %v4168_v56  ;;  %4280 = vmatpush.msrb.mxu3 %v4169_v24  ;;  %v4465_v30 = vld [vmem:[#allocation10 + $0x158] sm:$0xff]  ;;  %v4458_v38 = vld [vmem:[#allocation10 + $0x120] sm:$0xff]  ;;  %v4459_v59 = vld [vmem:[#allocation10 + $0x128] sm:$0xff] }
 0x54e   :  { %4221 = vmatpush.msrb.mxu0 %v4162_v61  ;;  %4241 = vmatpush.msrb.mxu1 %v4163_v45  ;;  %v4460_v25 = vld [vmem:[#allocation10 + $0x130] sm:$0xff]  ;;  %v4461_v57 = vld [vmem:[#allocation10 + $0x138] sm:$0xff]  ;;  %v4454_v43 = vld [vmem:[#allocation10 + $0x100] sm:$0xff] }
 0x54f   :  { %4261 = vmatpush.msrb.mxu2 %v4164_v46  ;;  %4281 = vmatpush.msrb.mxu3 %v4165_v52  ;;  %v4455_v56 = vld [vmem:[#allocation10 + $0x108] sm:$0xff]  ;;  %v4456_v24 = vld [vmem:[#allocation10 + $0x110] sm:$0xff]  ;;  %v4457_v61 = vld [vmem:[#allocation10 + $0x118] sm:$0xff] }
 0x550   :  { %4007 = vmatmul.f32.vlgmr.msra.gmra.mxu0 %v3779_v49  ;;  %4027 = vmatmul.f32.vlgmr.msra.gmra.mxu1 %v3779_v49  ;;  %v4450_v45 = vld [vmem:[#allocation10 + $0xe0] sm:$0xff]  ;;  %v4451_v58 = vld [vmem:[#allocation10 + $0xe8] sm:$0xff]  ;;  %v4452_v44 = vld [vmem:[#allocation10 + $0xf0] sm:$0xff] }
 0x551   :  { %4047 = vmatmul.f32.vlgmr.msra.gmra.mxu2 %v3779_v49  ;;  %4067 = vmatmul.f32.vlgmr.msra.gmra.mxu3 %v3779_v49  ;;  %v4453_v46 = vld [vmem:[#allocation10 + $0xf8] sm:$0xff]  ;;  %v4446_v52 = vld [vmem:[#allocation10 + $0xc0] sm:$0xff] }
 0x552   :  { %4222 = vmatpush.msrb.mxu0 %v4158_v39  ;;  %4242 = vmatpush.msrb.mxu1 %v4159_v42  ;;  %v4448_v39 = vld [vmem:[#allocation10 + $0xd0] sm:$0xff]  ;;  %v4449_v42 = vld [vmem:[#allocation10 + $0xd8] sm:$0xff] }
 0x553   :  { %4262 = vmatpush.msrb.mxu2 %v4160_v53  ;;  %4282 = vmatpush.msrb.mxu3 %v4161_v62  ;;  %v4442_v53 = vld [vmem:[#allocation10 + $0xa0] sm:$0xff]  ;;  %v4443_v62 = vld [vmem:[#allocation10 + $0xa8] sm:$0xff] }
 0x554   :  { %4223 = vmatpush.msrb.mxu0 %v4154_v48  ;;  %4243 = vmatpush.msrb.mxu1 %v4155_v55  ;;  %v4444_v48 = vld [vmem:[#allocation10 + $0xb0] sm:$0xff]  ;;  %v4445_v55 = vld [vmem:[#allocation10 + $0xb8] sm:$0xff] }
 0x555   :  { %4263 = vmatpush.msrb.mxu2 %v4156_v0  ;;  %4283 = vmatpush.msrb.mxu3 %v4157_v2  ;;  %v4438_v0 = vld [vmem:[#allocation10 + $0x80] sm:$0xff]  ;;  %v4439_v2 = vld [vmem:[#allocation10 + $0x88] sm:$0xff] }
 0x556   :  { %4224 = vmatpush.msrb.mxu0 %v4150_v60  ;;  %4244 = vmatpush.msrb.mxu1 %v4151_v4  ;;  %v4440_v60 = vld [vmem:[#allocation10 + $0x90] sm:$0xff]  ;;  %v4441_v4 = vld [vmem:[#allocation10 + $0x98] sm:$0xff] }
 0x557   :  { %4264 = vmatpush.msrb.mxu2 %v4152_v5  ;;  %4284 = vmatpush.msrb.mxu3 %v4153_v8  ;;  %v4434_v5 = vld [vmem:[#allocation10 + $0x60] sm:$0xff]  ;;  %v4435_v8 = vld [vmem:[#allocation10 + $0x68] sm:$0xff] }
 0x558   :  { %4225 = vmatpush.msrb.mxu0 %v4146_v9  ;;  %4245 = vmatpush.msrb.mxu1 %v4147_v7  ;;  %v4436_v9 = vld [vmem:[#allocation10 + $0x70] sm:$0xff]  ;;  %v4437_v7 = vld [vmem:[#allocation10 + $0x78] sm:$0xff] }
 0x559   :  { %4265 = vmatpush.msrb.mxu2 %v4148_v11  ;;  %4285 = vmatpush.msrb.mxu3 %v4149_v29  ;;  %v4430_v11 = vld [vmem:[#allocation10 + $0x40] sm:$0xff]  ;;  %v4431_v29 = vld [vmem:[#allocation10 + $0x48] sm:$0xff] }
 0x55a   :  { %4226 = vmatpush.msrb.mxu0 %v4142_v54  ;;  %4246 = vmatpush.msrb.mxu1 %v4143_v12  ;;  %v4432_v54 = vld [vmem:[#allocation10 + $0x50] sm:$0xff]  ;;  %v4433_v12 = vld [vmem:[#allocation10 + $0x58] sm:$0xff] }
 0x55b   :  { %4266 = vmatpush.msrb.mxu2 %v4144_v1  ;;  %4286 = vmatpush.msrb.mxu3 %v4145_v13 }
 0x55c   :  { %4227 = vmatmul.f32.vlgmr.msrb.gmra.mxu0 %v3779_v49  ;;  %4247 = vmatmul.f32.vlgmr.msrb.gmra.mxu1 %v3779_v49 }
 0x55d   :  { %4267 = vmatmul.f32.vlgmr.msrb.gmra.mxu2 %v3779_v49  ;;  %4287 = vmatmul.f32.vlgmr.msrb.gmra.mxu3 %v3779_v49  ;;  %v4447_v49 = vld [vmem:[#allocation10 + $0xc8] sm:$0xff] }
 0x55e   :  { %4486 = vmatpush.msra.mxu0 %v4482_v14  ;;  %4506 = vmatpush.msra.mxu1 %v4483_v15  ;;  %v4426_v14 = vld [vmem:[#allocation10 + $0x20] sm:$0xff]  ;;  %v4427_v15 = vld [vmem:[#allocation10 + $0x28] sm:$0xff] }
 0x55f   :  { %4526 = vmatpush.msra.mxu2 %v4484_v16  ;;  %4546 = vmatpush.msra.mxu3 %v4485_v6  ;;  %v4428_v16 = vld [vmem:[#allocation10 + $0x30] sm:$0xff]  ;;  %v4429_v6 = vld [vmem:[#allocation10 + $0x38] sm:$0xff] }
 0x560   :  { %4487 = vmatpush.msra.mxu0 %v4478_v3  ;;  %4507 = vmatpush.msra.mxu1 %v4479_v17  ;;  %v4422_v3 = vld [vmem:[#allocation10] sm:$0xff]  ;;  %v4423_v17 = vld [vmem:[#allocation10 + $0x8] sm:$0xff] }
 0x561   :  { %4527 = vmatpush.msra.mxu2 %v4480_v21  ;;  %4547 = vmatpush.msra.mxu3 %v4481_v22  ;;  %v4424_v21 = vld [vmem:[#allocation10 + $0x10] sm:$0xff]  ;;  %v4425_v22 = vld [vmem:[#allocation10 + $0x18] sm:$0xff] }
 0x562   :  { %4488 = vmatpush.msra.mxu0 %v4474_v23  ;;  %4508 = vmatpush.msra.mxu1 %v4475_v20  ;;  %v4417_v23 = vld [vmem:[#allocation9 + $0x1e0] sm:$0xff]  ;;  %v4418_v20 = vld [vmem:[#allocation9 + $0x1e8] sm:$0xff] }
 0x563   :  { %4528 = vmatpush.msra.mxu2 %v4476_v63  ;;  %4548 = vmatpush.msra.mxu3 %v4477_v28  ;;  %v4419_v63 = vld [vmem:[#allocation9 + $0x1f0] sm:$0xff]  ;;  %v4420_v28 = vld [vmem:[#allocation9 + $0x1f8] sm:$0xff] }
 0x564   :  { %4489 = vmatpush.msra.mxu0 %v4470_v18  ;;  %4509 = vmatpush.msra.mxu1 %v4471_v34  ;;  %v4413_v18 = vld [vmem:[#allocation9 + $0x1c0] sm:$0xff]  ;;  %v4414_v34 = vld [vmem:[#allocation9 + $0x1c8] sm:$0xff] }
 0x565   :  { %4529 = vmatpush.msra.mxu2 %v4472_v51  ;;  %4549 = vmatpush.msra.mxu3 %v4473_v33  ;;  %v4415_v51 = vld [vmem:[#allocation9 + $0x1d0] sm:$0xff]  ;;  %v4416_v33 = vld [vmem:[#allocation9 + $0x1d8] sm:$0xff] }
 0x566   :  { %4490 = vmatpush.msra.mxu0 %v4466_v27  ;;  %4510 = vmatpush.msra.mxu1 %v4467_v35  ;;  %v4409_v35 = vld [vmem:[#allocation9 + $0x1a0] sm:$0xff] }
 0x567   :  { %4530 = vmatpush.msra.mxu2 %v4468_v36  ;;  %4550 = vmatpush.msra.mxu3 %v4469_v19  ;;  %v4410_v36 = vld [vmem:[#allocation9 + $0x1a8] sm:$0xff]  ;;  %v4411_v19 = vld [vmem:[#allocation9 + $0x1b0] sm:$0xff] }
 0x568   :  { %4491 = vmatpush.msra.mxu0 %v4462_v37  ;;  %4511 = vmatpush.msra.mxu1 %v4463_v41 }
 0x569   :  { %4531 = vmatpush.msra.mxu2 %v4464_v47  ;;  %4551 = vmatpush.msra.mxu3 %v4465_v30  ;;  %v4412_v47 = vld [vmem:[#allocation9 + $0x1b8] sm:$0xff] }
 0x56a   :  { %4492 = vmatpush.msra.mxu0 %v4458_v38  ;;  %4512 = vmatpush.msra.mxu1 %v4459_v59  ;;  %v4405_v59 = vld [vmem:[#allocation9 + $0x180] sm:$0xff] }
 0x56b   :  { %4532 = vmatpush.msra.mxu2 %v4460_v25  ;;  %4552 = vmatpush.msra.mxu3 %v4461_v57  ;;  %v4406_v25 = vld [vmem:[#allocation9 + $0x188] sm:$0xff]  ;;  %v4407_v57 = vld [vmem:[#allocation9 + $0x190] sm:$0xff] }
 0x56c   :  { %4493 = vmatpush.msra.mxu0 %v4454_v43  ;;  %4513 = vmatpush.msra.mxu1 %v4455_v56  ;;  %v4408_v43 = vld [vmem:[#allocation9 + $0x198] sm:$0xff] }
 0x56d   :  { %4533 = vmatpush.msra.mxu2 %v4456_v24  ;;  %4553 = vmatpush.msra.mxu3 %v4457_v61  ;;  %v4401_v61 = vld [vmem:[#allocation9 + $0x160] sm:$0xff] }
 0x56e   :  { %4494 = vmatpush.msra.mxu0 %v4450_v45  ;;  %4514 = vmatpush.msra.mxu1 %v4451_v58  ;;  %v4402_v45 = vld [vmem:[#allocation9 + $0x168] sm:$0xff]  ;;  %v4403_v58 = vld [vmem:[#allocation9 + $0x170] sm:$0xff] }
 0x56f   :  { %4534 = vmatpush.msra.mxu2 %v4452_v44  ;;  %4554 = vmatpush.msra.mxu3 %v4453_v46  ;;  %v4404_v44 = vld [vmem:[#allocation9 + $0x178] sm:$0xff] }
 0x570   :  { %4495 = vmatpush.msra.mxu0 %v4446_v52  ;;  %4515 = vmatpush.msra.mxu1 %v4447_v49  ;;  %v4397_v49 = vld [vmem:[#allocation9 + $0x140] sm:$0xff] }
 0x571   :  { %4535 = vmatpush.msra.mxu2 %v4448_v39  ;;  %4555 = vmatpush.msra.mxu3 %v4449_v42  ;;  %v4398_v39 = vld [vmem:[#allocation9 + $0x148] sm:$0xff] }
 0x572   :  { %4496 = vmatpush.msra.mxu0 %v4442_v53  ;;  %4516 = vmatpush.msra.mxu1 %v4443_v62  ;;  %v4399_v53 = vld [vmem:[#allocation9 + $0x150] sm:$0xff]  ;;  %v4400_v62 = vld [vmem:[#allocation9 + $0x158] sm:$0xff] }
 0x573   :  { %4536 = vmatpush.msra.mxu2 %v4444_v48  ;;  %4556 = vmatpush.msra.mxu3 %v4445_v55  ;;  %v4393_v55 = vld [vmem:[#allocation9 + $0x120] sm:$0xff] }
 0x574   :  { %4497 = vmatpush.msra.mxu0 %v4438_v0  ;;  %4517 = vmatpush.msra.mxu1 %v4439_v2  ;;  %v4394_v0 = vld [vmem:[#allocation9 + $0x128] sm:$0xff]  ;;  %v4395_v2 = vld [vmem:[#allocation9 + $0x130] sm:$0xff] }
 0x575   :  { %4537 = vmatpush.msra.mxu2 %v4440_v60  ;;  %4557 = vmatpush.msra.mxu3 %v4441_v4  ;;  %v4396_v4 = vld [vmem:[#allocation9 + $0x138] sm:$0xff] }
 0x576   :  { %4498 = vmatpush.msra.mxu0 %v4434_v5  ;;  %4518 = vmatpush.msra.mxu1 %v4435_v8  ;;  %v4389_v5 = vld [vmem:[#allocation9 + $0x100] sm:$0xff]  ;;  %v4390_v8 = vld [vmem:[#allocation9 + $0x108] sm:$0xff] }
 0x577   :  { %4538 = vmatpush.msra.mxu2 %v4436_v9  ;;  %4558 = vmatpush.msra.mxu3 %v4437_v7  ;;  %v4391_v9 = vld [vmem:[#allocation9 + $0x110] sm:$0xff] }
 0x578   :  { %4499 = vmatpush.msra.mxu0 %v4430_v11  ;;  %4519 = vmatpush.msra.mxu1 %v4431_v29  ;;  %v4207_v11 = vld [vmem:[#allocation4 + $0xe0] sm:$0xff]  ;;  %v4208_v29 = vld [vmem:[#allocation4 + $0xe8] sm:$0xff] }
 0x579   :  { %4539 = vmatpush.msra.mxu2 %v4432_v54  ;;  %4559 = vmatpush.msra.mxu3 %v4433_v12  ;;  %v4392_v54 = vld [vmem:[#allocation9 + $0x118] sm:$0xff]  ;;  %v4385_v12 = vld [vmem:[#allocation9 + $0xe0] sm:$0xff] }
 0x57a   :  { %4500 = vmatpush.msra.mxu0 %v4426_v14  ;;  %4520 = vmatpush.msra.mxu1 %v4427_v15 }
 0x57b   :  { %4540 = vmatpush.msra.mxu2 %v4428_v16  ;;  %4560 = vmatpush.msra.mxu3 %v4429_v6  ;;  %v4388_v6 = vld [vmem:[#allocation9 + $0xf8] sm:$0xff] }
 0x57c   :  { %4501 = vmatpush.msra.mxu0 %v4422_v3  ;;  %4521 = vmatpush.msra.mxu1 %v4423_v17 }
 0x57d   :  { %4541 = vmatpush.msra.mxu2 %v4424_v21  ;;  %4561 = vmatpush.msra.mxu3 %v4425_v22  ;;  %v4381_v22 = vld [vmem:[#allocation9 + $0xc0] sm:$0xff] }
 0x57e   :  { %4566 = vmatpush.msrb.mxu0 %v4417_v23  ;;  %4586 = vmatpush.msrb.mxu1 %v4418_v20  ;;  %v4382_v23 = vld [vmem:[#allocation9 + $0xc8] sm:$0xff]  ;;  %v4383_v20 = vld [vmem:[#allocation9 + $0xd0] sm:$0xff] }
 0x57f   :  { %4606 = vmatpush.msrb.mxu2 %v4419_v63  ;;  %4626 = vmatpush.msrb.mxu3 %v4420_v28 }
 0x580   :  { %4567 = vmatpush.msrb.mxu0 %v4413_v18  ;;  %4587 = vmatpush.msrb.mxu1 %v4414_v34  ;;  %v4384_v34 = vld [vmem:[#allocation9 + $0xd8] sm:$0xff] }
 0x581   :  { %4607 = vmatpush.msrb.mxu2 %v4415_v51  ;;  %4627 = vmatpush.msrb.mxu3 %v4416_v33 }
 0x582   :  { %4568 = vmatpush.msrb.mxu0 %v4409_v35  ;;  %4588 = vmatpush.msrb.mxu1 %v4410_v36  ;;  %v4210_v35 = vld [vmem:[#allocation4 + $0xf8] sm:$0xff]  ;;  %v4377_v36 = vld [vmem:[#allocation9 + $0xa0] sm:$0xff] }
 0x583   :  { %4608 = vmatpush.msrb.mxu2 %v4411_v19  ;;  %4628 = vmatpush.msrb.mxu3 %v4412_v47  ;;  %v4378_v19 = vld [vmem:[#allocation9 + $0xa8] sm:$0xff] }
 0x584   :  { %4569 = vmatpush.msrb.mxu0 %v4405_v59  ;;  %4589 = vmatpush.msrb.mxu1 %v4406_v25  ;;  %v4375_v59 = vld [vmem:[#allocation9 + $0x90] sm:$0xff]  ;;  %v4376_v25 = vld [vmem:[#allocation9 + $0x98] sm:$0xff] }
 0x585   :  { %4609 = vmatpush.msrb.mxu2 %v4407_v57  ;;  %4629 = vmatpush.msrb.mxu3 %v4408_v43  ;;  %v4369_v57 = vld [vmem:[#allocation9 + $0x60] sm:$0xff]  ;;  %v4370_v43 = vld [vmem:[#allocation9 + $0x68] sm:$0xff] }
 0x586   :  { %4570 = vmatpush.msrb.mxu0 %v4401_v61  ;;  %4590 = vmatpush.msrb.mxu1 %v4402_v45  ;;  %v4372_v61 = vld [vmem:[#allocation9 + $0x78] sm:$0xff] }
 0x587   :  { %4610 = vmatpush.msrb.mxu2 %v4403_v58  ;;  %4630 = vmatpush.msrb.mxu3 %v4404_v44  ;;  %v4365_v44 = vld [vmem:[#allocation9 + $0x40] sm:$0xff] }
 0x588   :  { %4571 = vmatpush.msrb.mxu0 %v4397_v49  ;;  %4591 = vmatpush.msrb.mxu1 %v4398_v39  ;;  %v4367_v39 = vld [vmem:[#allocation9 + $0x50] sm:$0xff] }
 0x589   :  { %4611 = vmatpush.msrb.mxu2 %v4399_v53  ;;  %4631 = vmatpush.msrb.mxu3 %v4400_v62 }
 0x58a   :  { %4572 = vmatpush.msrb.mxu0 %v4393_v55  ;;  %4592 = vmatpush.msrb.mxu1 %v4394_v0  ;;  %v4362_v55 = vld [vmem:[#allocation9 + $0x28] sm:$0xff] }
 0x58b   :  { %4612 = vmatpush.msrb.mxu2 %v4395_v2  ;;  %4632 = vmatpush.msrb.mxu3 %v4396_v4  ;;  %v4364_v4 = vld [vmem:[#allocation9 + $0x38] sm:$0xff] }
 0x58c   :  { %4573 = vmatpush.msrb.mxu0 %v4389_v5  ;;  %4593 = vmatpush.msrb.mxu1 %v4390_v8 }
 0x58d   :  { %4613 = vmatpush.msrb.mxu2 %v4391_v9  ;;  %4633 = vmatpush.msrb.mxu3 %v4392_v54  ;;  %v4357_v9 = vld [vmem:[#allocation9] sm:$0xff] }
 0x58e   :  { %4574 = vmatpush.msrb.mxu0 %v4385_v12  ;;  %v4359_v12 = vld [vmem:[#allocation9 + $0x10] sm:$0xff] }
 0x58f   :  { %4634 = vmatpush.msrb.mxu3 %v4388_v6 }
 0x590   :  { %4575 = vmatpush.msrb.mxu0 %v4381_v22  ;;  %v4209_v22 = vld [vmem:[#allocation4 + $0xf0] sm:$0xff] }
 0x591   :  { %4635 = vmatpush.msrb.mxu3 %v4384_v34 }
 0x592   :  { %4576 = vmatpush.msrb.mxu0 %v4377_v36 }
 0x5b5   :  { %v3928_v1 = vpop.f32.mrf.mxu0  ;;  %v3948_v13 = vpop.f32.mrf.mxu1 }
 0x5bc   :  { %v3988_v27 = vpop.f32.mrf.mxu3  ;;  %v6410_v42 = vpop.f32.mrf.mxu2 }
 0x5cd   :  { %v4008_v37 = vpop.f32.mrf.mxu0  ;;  %v4028_v41 = vpop.f32.mrf.mxu1 }
 0x5ce   :  { %v4009_v30 = vadd.f32 %v4008_v37, %v3928_v1  ;;  %v4029_v38 = vadd.f32 %v4028_v41, %v3948_v13  ;;  %v4386_v1 = vld [vmem:[#allocation9 + $0xe8] sm:$0xff]  ;;  %v4387_v13 = vld [vmem:[#allocation9 + $0xf0] sm:$0xff]  ;;  %v4380_v41 = vld [vmem:[#allocation9 + $0xb8] sm:$0xff] }
 0x5cf   :  { %4594 = vmatpush.msrb.mxu1 %v4386_v1  ;;  %4614 = vmatpush.msrb.mxu2 %v4387_v13  ;;  %v4379_v37 = vld [vmem:[#allocation9 + $0xb0] sm:$0xff]  ;;  %v4360_v1 = vld [vmem:[#allocation9 + $0x18] sm:$0xff] }
 0x5d0   :  { %v4071_v56 = vadd.f32 %v4009_v30, %v5785_v31  ;;  %v4072_v24 = vadd.f32 %v4029_v38, %v5788_v32  ;;  %v4373_v30 = vld [vmem:[#allocation9 + $0x80] sm:$0xff]  ;;  %v4374_v38 = vld [vmem:[#allocation9 + $0x88] sm:$0xff]  ;;  %4636 = vmatpush.msrb.mxu3 %v4380_v41 }
 0x5d1   :  { %4595 = vmatpush.msrb.mxu1 %v4382_v23  ;;  %4615 = vmatpush.msrb.mxu2 %v4383_v20 }
 0x5d2   :  { %v4779_v46 = vmul.f32 -1.442695, %v4071_v56  ;;  %v4780_v52 = vmul.f32 -1.442695, %v4072_v24  ;;  %4577 = vmatpush.msrb.mxu0 %v4373_v30  ;;  %v4371_v24 = vld [vmem:[#allocation9 + $0x70] sm:$0xff]  ;;  %4637 = vmatpush.msrb.mxu3 %v4376_v25 }
 0x5d3   :  { %4596 = vmatpush.msrb.mxu1 %v4378_v19  ;;  %4616 = vmatpush.msrb.mxu2 %v4379_v37 }
 0x5d4   :  { %5005 = vpow2.f32 %v4779_v46  ;;  %v4068_v48 = vpop.f32.mrf.mxu3  ;;  %v4048_v18 = vpop.f32.mrf.mxu2  ;;  %v4366_v46 = vld [vmem:[#allocation9 + $0x48] sm:$0xff]  ;;  %4578 = vmatpush.msrb.mxu0 %v4369_v57  ;;  %4638 = vmatpush.msrb.mxu3 %v4372_v61 }
 0x5d5   :  { %5007 = vpow2.f32 %v4780_v52  ;;  %v4069_v60 = vadd.f32 %v4068_v48, %v3988_v27  ;;  %v4049_v47 = vadd.f32 %v4048_v18, %v6410_v42  ;;  %4597 = vmatpush.msrb.mxu1 %v4374_v38  ;;  %4617 = vmatpush.msrb.mxu2 %v4375_v59  ;;  %v4368_v42 = vld [vmem:[#allocation9 + $0x58] sm:$0xff]  ;;  %v4361_v48 = vld [vmem:[#allocation9 + $0x20] sm:$0xff] }
 0x5d6   :  { %4579 = vmatpush.msrb.mxu0 %v4365_v44  ;;  %4639 = vmatpush.msrb.mxu3 %v4368_v42 }
 0x5d7   :  { %v4074_v7 = vadd.f32 %v4069_v60, %v5795_v50  ;;  %v4073_v52 = vadd.f32 %v4049_v47, %v5806_v40  ;;  %4598 = vmatpush.msrb.mxu1 %v4370_v43  ;;  %4618 = vmatpush.msrb.mxu2 %v4371_v24  ;;  %v4363_v60 = vld [vmem:[#allocation9 + $0x30] sm:$0xff] }
 0x5d8   :  { %4580 = vmatpush.msrb.mxu0 %v4361_v48  ;;  %4640 = vmatpush.msrb.mxu3 %v4364_v4 }
 0x5d9   :  { %v4781_v14 = vmul.f32 -1.442695, %v4074_v7  ;;  %v4228_v15 = vpop.f32.mrf.mxu0  ;;  %v4248_v16 = vpop.f32.mrf.mxu1  ;;  %4599 = vmatpush.msrb.mxu1 %v4366_v46  ;;  %4619 = vmatpush.msrb.mxu2 %v4367_v39  ;;  %v4358_v7 = vld [vmem:[#allocation9 + $0x8] sm:$0xff] }
 0x5da   :  { %v5006_v3 = vpop.eup %5005  ;;  %v4229_v17 = vadd.f32 %v4228_v15, %v4207_v11  ;;  %v4249_v21 = vadd.f32 %v4248_v16, %v4208_v29  ;;  %4581 = vmatpush.msrb.mxu0 %v4357_v9  ;;  %4641 = vmatpush.msrb.mxu3 %v4360_v1 }
 0x5db   :  { %v5008_v63 = vpop.eup %5007  ;;  %v6413_v28 = vadd.f32 1.0, %v5006_v3  ;;  %5009 = vpow2.f32 %v4781_v14  ;;  %4600 = vmatpush.msrb.mxu1 %v4362_v55  ;;  %4620 = vmatpush.msrb.mxu2 %v4363_v60 }
 0x5dc   :  { %v6415_v51 = vadd.f32 1.0, %v5008_v63  ;;  %v4782_v33 = vmul.f32 -1.442695, %v4229_v17  ;;  %v4783_v27 = vmul.f32 -1.442695, %v4249_v21 }
 0x5dd   :  { %5011 = vrcp.f32 %v6413_v28  ;;  %v4089_v14 = vand.u32 2147483647, %v6413_v28  ;;  %v4091_v15 = vand.u32 2147483648, %v6413_v28  ;;  %4601 = vmatpush.msrb.mxu1 %v4358_v7  ;;  %4621 = vmatpush.msrb.mxu2 %v4359_v12  ;;  %vm4085_vm15 = vweird.f32 %v6413_v28 }
 0x5de   :  { %5013 = vrcp.f32 %v6415_v51  ;;  %v4110_v6 = vand.u32 2147483648, %v6415_v51  ;;  %v4108_v21 = vand.u32 2147483647, %v6415_v51  ;;  %vm4104_vm14 = vweird.f32 %v6415_v51 }
 0x5df   :  { %5015 = vpow2.f32 %v4782_v33  ;;  %vm4090_vm1 = vcmp.eq.f32.partialorder %v4089_v14, 8.507059e+37  ;;  %v4092_v34 = vor.u32 1.1754944e-38, %v4091_v15 }
 0x5e0   :  { %5017 = vpow2.f32 %v4783_v27  ;;  %v4288_v56 = vpop.f32.mrf.mxu3  ;;  %v4268_v23 = vpop.f32.mrf.mxu2  ;;  %vm4109_vm3 = vcmp.eq.f32.partialorder %v4108_v21, 8.507059e+37 }
 0x5e1   :  { %v5010_v45 = vpop.eup %5009  ;;  %v4289_v58 = vadd.f32 %v4288_v56, %v4210_v35  ;;  %v4269_v19 = vadd.f32 %v4268_v23, %v4209_v22 }
 0x5e2   :  { %v6421_v49 = vadd.f32 1.0, %v5010_v45 }
 0x5e3   :  { %v6423_v53 = vpop.eup %5011  ;;  %v4784_v62 = vmul.f32 -1.442695, %v4289_v58 }
 0x5e4   :  { %v6425_v0 = vpop.eup %5013  ;;  %v4081_v2 = vmul.f32 %v6423_v53, %v6413_v28  ;;  %5019 = vrcp.f32 %v6421_v49  ;;  %vm4086_vm12 = vweird.f32 %v6423_v53  ;;  %vm4124_vm4 = vweird.f32 %v6421_v49 }
 0x5e5   :  { %v5016_v5 = vpop.eup %5015  ;;  %v4100_v8 = vmul.f32 %v6425_v0, %v6415_v51  ;;  %5021 = vpow2.f32 %v4784_v62  ;;  %vm4105_vm13 = vweird.f32 %v6425_v0  ;;  %vm4087_vm0 = vmor %vm4085_vm15, %vm4086_vm12  ;;  %v4111_v51 = vor.u32 1.1754944e-38, %v4110_v6 }
 0x5e6   :  { %v5018_v11 = vpop.eup %5017  ;;  %v4082_v29 = vsub.f32 1.0, %v4081_v2  ;;  %5023 = vtanh.f32 %v4073_v52  ;;  %v6432_v54 = vadd.f32 1.0, %v5016_v5  ;;  %vm4106_vm2 = vmor %vm4104_vm14, %vm4105_vm13  ;;  %v4130_v44 = vand.u32 2147483648, %v6421_v49 }
 0x5e7   :  { %v4101_v13 = vsub.f32 1.0, %v4100_v8  ;;  %v6436_v16 = vadd.f32 1.0, %v5018_v11  ;;  %v4128_v55 = vand.u32 2147483647, %v6421_v49 }
 0x5e8   :  { %v4083_v3 = vmul.f32 %v6423_v53, %v4082_v29  ;;  %5025 = vrcp.f32 %v6432_v54  ;;  %v4305_v58 = vand.u32 2147483647, %v6432_v54  ;;  %v4307_v52 = vand.u32 2147483648, %v6432_v54 }
 0x5e9   :  { %v4102_v17 = vmul.f32 %v6425_v0, %v4101_v13  ;;  %5027 = vrcp.f32 %v6436_v16  ;;  %v4326_v39 = vand.u32 2147483648, %v6436_v16  ;;  %v4324_v48 = vand.u32 2147483647, %v6436_v16 }
 0x5ea   :  { %v6446_v20 = vpop.eup %5019  ;;  %v4084_v63 = vadd.f32 %v6423_v53, %v4083_v3  ;;  %vm4320_vm8 = vweird.f32 %v6436_v16  ;;  %vm4301_vm9 = vweird.f32 %v6432_v54  ;;  %vm4306_vm12 = vcmp.eq.f32.partialorder %v4305_v58, 8.507059e+37 }
 0x5eb   :  { %v5022_v18 = vpop.eup %5021  ;;  %v4103_v33 = vadd.f32 %v6425_v0, %v4102_v17  ;;  %v4120_v27 = vmul.f32 %v6446_v20, %v6421_v49  ;;  %vm4125_vm5 = vweird.f32 %v6446_v20  ;;  %v4308_v5 = vor.u32 1.1754944e-38, %v4307_v52 }
 0x5ec   :  { %v5024_v35 = vpop.eup %5023  ;;  %v4088_v36 = vsel %vm4087_vm0, %v6423_v53, %v4084_v63  ;;  %v6459_v28 = vadd.f32 1.0, %v5022_v18  ;;  %vm6484_vm10 = vmor %vm4124_vm4, %vm4125_vm5  ;;  %v4327_v7 = vor.u32 1.1754944e-38, %v4326_v39  ;;  %vm4325_vm14 = vcmp.eq.f32.partialorder %v4324_v48, 8.507059e+37 }
 0x5ed   :  { %v4093_v37 = vsel %vm4090_vm1, %v4092_v34, %v4088_v36  ;;  %v4107_v41 = vsel %vm4106_vm2, %v6425_v0, %v4103_v33  ;;  %v4121_v47 = vsub.f32 1.0, %v4120_v27  ;;  %vm4129_vm15 = vcmp.eq.f32.partialorder %v4128_v55, 8.507059e+37 }
 0x5ee   :  { %v5026_v30 = vpop.eup %5025  ;;  %v4112_v38 = vsel %vm4109_vm3, %v4111_v51, %v4107_v41  ;;  %v4135_v59 = vmul.f32 %v5024_v35, %v4093_v37  ;;  %5029 = vrcp.f32 %v6459_v28  ;;  %v4346_v22 = vand.u32 2147483648, %v6459_v28 }
 0x5ef   :  { %v5028_v25 = vpop.eup %5027  ;;  %v4134_v57 = vmul.f32 %v4112_v38, %v6332_v10  ;;  %v4297_v43 = vmul.f32 %v5026_v30, %v6432_v54  ;;  %v4122_v56 = vmul.f32 %v6446_v20, %v4121_v47  ;;  %5031 = vtanh.f32 %v4269_v19 }
 0x5f0   :  { %v4316_v24 = vmul.f32 %v5028_v25, %v6436_v16  ;;  %vm4302_vm6 = vweird.f32 %v5026_v30  ;;  %vm4321_vm7 = vweird.f32 %v5028_v25  ;;  %v4131_v54 = vor.u32 1.1754944e-38, %v4130_v44 }
 0x5f1   :  { %v6468_v61 = vadd.f32 %v4135_v59, %v4134_v57  ;;  %v4298_v45 = vsub.f32 1.0, %v4297_v43  ;;  %v4123_v10 = vadd.f32 %v6446_v20, %v4122_v56  ;;  %vm4303_vm11 = vmor %vm4301_vm9, %vm4302_vm6  ;;  %vm4340_vm1 = vweird.f32 %v6459_v28 }
 0x5f2   :  { %v4317_v46 = vsub.f32 1.0, %v4316_v24  ;;  %vm4322_vm13 = vmor %vm4320_vm8, %vm4321_vm7  ;;  %v4344_v23 = vand.u32 2147483647, %v6459_v28  ;;  %v4347_v63 = vor.u32 1.1754944e-38, %v4346_v22 }
 0x5f3   :  { %5033 = vtanh.f32 %v6468_v61  ;;  %v4299_v42 = vmul.f32 %v5026_v30, %v4298_v45  ;;  %v4127_v9 = vsel %vm6484_vm10, %v6446_v20, %v4123_v10 }
 0x5f4   :  { %v5030_v53 = vpop.eup %5029  ;;  %v4318_v62 = vmul.f32 %v5028_v25, %v4317_v46  ;;  %v4132_v15 = vsel %vm4129_vm15, %v4131_v54, %v4127_v9  ;;  %vm4345_vm3 = vcmp.eq.f32.partialorder %v4344_v23, 8.507059e+37 }
 0x5f5   :  { %v4300_v0 = vadd.f32 %v5026_v30, %v4299_v42  ;;  %v4336_v2 = vmul.f32 %v5030_v53, %v6459_v28  ;;  %v5032_v4 = vpop.eup %5031  ;;  %vm4341_vm0 = vweird.f32 %v5030_v53 }
 0x5f6   :  { %v4319_v8 = vadd.f32 %v5028_v25, %v4318_v62  ;;  %vm4342_vm2 = vmor %vm4340_vm1, %vm4341_vm0 }
 0x5f7   :  { %v4304_v11 = vsel %vm4303_vm11, %v5026_v30, %v4300_v0  ;;  %v4337_v29 = vsub.f32 1.0, %v4336_v2 }
 0x5f8   :  { %v4309_v12 = vsel %vm4306_vm12, %v4308_v5, %v4304_v11  ;;  %v4323_v49 = vsel %vm4322_vm13, %v5028_v25, %v4319_v8 }
 0x5f9   :  { %v5034_v1 = vpop.eup %5033  ;;  %v4328_v13 = vsel %vm4325_vm14, %v4327_v7, %v4323_v49  ;;  %v4351_v14 = vmul.f32 %v5032_v4, %v4309_v12  ;;  %v4338_v16 = vmul.f32 %v5030_v53, %v4337_v29 }
 0x5fa   :  { %v4350_v6 = vmul.f32 %v4328_v13, %v6391_v26  ;;  %v4138_v3 = vmul.f32 %v5034_v1, %v4132_v15 }
 0x5fb   :  { %v4339_v21 = vadd.f32 %v5030_v53, %v4338_v16 }
 0x5fc   :  { %v4352_v17 = vadd.f32 %v4351_v14, %v4350_v6  ;;  %4502 = vmatmul.f32.vlgmr.msra.gmra.mxu0 %v4138_v3  ;;  %4522 = vmatmul.f32.vlgmr.msra.gmra.mxu1 %v4138_v3 }
 0x5fd   :  { %4542 = vmatmul.f32.vlgmr.msra.gmra.mxu2 %v4138_v3  ;;  %4562 = vmatmul.f32.vlgmr.msra.gmra.mxu3 %v4138_v3  ;;  %v4343_v20 = vsel %vm4342_vm2, %v5030_v53, %v4339_v21 }
 0x5fe   :  { %5035 = vtanh.f32 %v4352_v17  ;;  %v4348_v18 = vsel %vm4345_vm3, %v4347_v63, %v4343_v20 }
 0x604   :  { %v5036_v26 = vpop.eup %5035 }
 0x605   :  { %v4354_v34 = vmul.f32 %v5036_v26, %v4348_v18 }
 0x607   :  { %4582 = vmatmul.f32.vlgmr.msrb.gmra.mxu0 %v4354_v34  ;;  %4602 = vmatmul.f32.vlgmr.msrb.gmra.mxu1 %v4354_v34 }
 0x608   :  { %4622 = vmatmul.f32.vlgmr.msrb.gmra.mxu2 %v4354_v34  ;;  %4642 = vmatmul.f32.vlgmr.msrb.gmra.mxu3 %v4354_v34 }
 0x679   :  { %v4503_v33 = vpop.f32.mrf.mxu0  ;;  %v4523_v27 = vpop.f32.mrf.mxu1 }
 0x680   :  { %v4563_v35 = vpop.f32.mrf.mxu3  ;;  %v4543_v47 = vpop.f32.mrf.mxu2 }
 0x684   :  { %v4583_v51 = vpop.f32.mrf.mxu0  ;;  %v4603_v36 = vpop.f32.mrf.mxu1 }
 0x685   :  { %v4584_v19 = vadd.f32 %v4583_v51, %v4503_v33  ;;  %v4604_v37 = vadd.f32 %v4603_v36, %v4523_v27 }
 0x687   :  { %v4646_v28 = vadd.f32 %v4584_v19, %v5785_v31  ;;  %v4647_v41 = vadd.f32 %v4604_v37, %v5788_v32 }
 0x689   :  { %v4785_v30 = vmul.f32 -1.442695, %v4646_v28  ;;  %v4786_v38 = vmul.f32 -1.442695, %v4647_v41 }
 0x68b   :  { %5037 = vpow2.f32 %v4785_v30  ;;  %v4643_v59 = vpop.f32.mrf.mxu3  ;;  %v4623_v44 = vpop.f32.mrf.mxu2 }
 0x68c   :  { %5039 = vpow2.f32 %v4786_v38  ;;  %v4644_v25 = vadd.f32 %v4643_v59, %v4563_v35  ;;  %v4624_v31 = vadd.f32 %v4623_v44, %v4543_v47 }
 0x68e   :  { %v4649_v57 = vadd.f32 %v4644_v25, %v5795_v50  ;;  %v4648_v10 = vadd.f32 %v4624_v31, %v5806_v40 }
 0x690   :  { %v4787_v43 = vmul.f32 -1.442695, %v4649_v57 }
 0x691   :  { %v5038_v56 = vpop.eup %5037 }
 0x692   :  { %v5040_v24 = vpop.eup %5039  ;;  %v4654_v45 = vadd.f32 1.0, %v5038_v56  ;;  %5041 = vpow2.f32 %v4787_v43 }
 0x693   :  { %v4673_v58 = vadd.f32 1.0, %v5040_v24 }
 0x694   :  { %5043 = vrcp.f32 %v4654_v45  ;;  %v4666_v48 = vand.u32 2147483648, %v4654_v45  ;;  %v4664_v2 = vand.u32 2147483647, %v4654_v45  ;;  %vm4660_vm6 = vweird.f32 %v4654_v45 }
 0x695   :  { %5045 = vrcp.f32 %v4673_v58  ;;  %v4685_v55 = vand.u32 2147483648, %v4673_v58  ;;  %v4683_v4 = vand.u32 2147483647, %v4673_v58  ;;  %vm4679_vm7 = vweird.f32 %v4673_v58 }
 0x696   :  { %v4667_v40 = vor.u32 1.1754944e-38, %v4666_v48  ;;  %vm4665_vm10 = vcmp.eq.f32.partialorder %v4664_v2, 8.507059e+37 }
 0x697   :  { %v4686_v11 = vor.u32 1.1754944e-38, %v4685_v55  ;;  %vm4684_vm11 = vcmp.eq.f32.partialorder %v4683_v4, 8.507059e+37 }
 0x698   :  { %v5042_v32 = vpop.eup %5041 }
 0x699   :  { %v4693_v46 = vadd.f32 1.0, %v5042_v32 }
 0x69a   :  { %v5044_v52 = vpop.eup %5043 }
 0x69b   :  { %v5046_v39 = vpop.eup %5045  ;;  %v4656_v42 = vmul.f32 %v5044_v52, %v4654_v45  ;;  %5047 = vrcp.f32 %v4693_v46  ;;  %vm4661_vm4 = vweird.f32 %v5044_v52  ;;  %v4705_v17 = vand.u32 2147483648, %v4693_v46 }
 0x69c   :  { %v4675_v53 = vmul.f32 %v5046_v39, %v4673_v58  ;;  %5049 = vtanh.f32 %v4648_v10  ;;  %vm4680_vm5 = vweird.f32 %v5046_v39  ;;  %vm4662_vm8 = vmor %vm4660_vm6, %vm4661_vm4  ;;  %vm4699_vm13 = vweird.f32 %v4693_v46 }
 0x69d   :  { %v4657_v50 = vsub.f32 1.0, %v4656_v42  ;;  %vm4681_vm9 = vmor %vm4679_vm7, %vm4680_vm5  ;;  %v4703_v21 = vand.u32 2147483647, %v4693_v46  ;;  %v4706_v23 = vor.u32 1.1754944e-38, %v4705_v17 }
 0x69e   :  { %v4676_v62 = vsub.f32 1.0, %v4675_v53 }
 0x69f   :  { %v4658_v0 = vmul.f32 %v5044_v52, %v4657_v50  ;;  %vm4704_vm15 = vcmp.eq.f32.partialorder %v4703_v21, 8.507059e+37 }
 0x6a0   :  { %v4677_v60 = vmul.f32 %v5046_v39, %v4676_v62 }
 0x6a1   :  { %v5048_v5 = vpop.eup %5047  ;;  %v4659_v8 = vadd.f32 %v5044_v52, %v4658_v0 }
 0x6a2   :  { %v4678_v9 = vadd.f32 %v5046_v39, %v4677_v60  ;;  %v4695_v7 = vmul.f32 %v5048_v5, %v4693_v46  ;;  %v5050_v54 = vpop.eup %5049  ;;  %vm4700_vm12 = vweird.f32 %v5048_v5 }
 0x6a3   :  { %v4663_v29 = vsel %vm4662_vm8, %v5044_v52, %v4659_v8  ;;  %vm4701_vm14 = vmor %vm4699_vm13, %vm4700_vm12 }
 0x6a4   :  { %v4668_v12 = vsel %vm4665_vm10, %v4667_v40, %v4663_v29  ;;  %v4682_v49 = vsel %vm4681_vm9, %v5046_v39, %v4678_v9  ;;  %v4696_v1 = vsub.f32 1.0, %v4695_v7 }
 0x6a5   :  { %v4687_v13 = vsel %vm4684_vm11, %v4686_v11, %v4682_v49  ;;  %v4710_v14 = vmul.f32 %v5050_v54, %v4668_v12 }
 0x6a6   :  { %v4709_v15 = vmul.f32 %v4687_v13, %v6468_v61  ;;  %v4697_v16 = vmul.f32 %v5048_v5, %v4696_v1 }
 0x6a8   :  { %v4711_v6 = vadd.f32 %v4710_v14, %v4709_v15  ;;  %v4698_v3 = vadd.f32 %v5048_v5, %v4697_v16 }
 0x6aa   :  { %5051 = vtanh.f32 %v4711_v6  ;;  %v4702_v22 = vsel %vm4701_vm14, %v5048_v5, %v4698_v3 }
 0x6ab   :  { %v4707_v61 = vsel %vm4704_vm15, %v4706_v23, %v4702_v22 }
 0x6b0   :  { %v5052_v20 = vpop.eup %5051 }
 0x6b1   :  { %v4713_v63 = vmul.f32 %v5052_v20, %v4707_v61 }
 0x6b3   :  { %4720 = vst [vmem:[#allocation13] sm:$0xff] %v4713_v63 }
 0x6b4   :  { %4731 = dma.vmem_to_hbm [thread:$0]  %s4727_s4, 128, %s4729_s19, [#allocation6]  }
 0x6b5   :  { %5283 = dma.done.wait [#allocation6], 128  }
 0x6b6   :  { %5284 = vsyncadd [#allocation6], 4294967168 }
 0x6b7   :  { %4736 = vsyncpa [#allocation5], 1 }
 0x6b8   :  { %4737 = vsyncpa [#allocation8], 1 }
 0x6b9   :  { %4738 = vsyncpa [#allocation11], 1 }
 0x6ba   :  { %4739 = vsyncpa [#allocation6], 1 }

</bundles_post_ra>
